<compile_context>
chip_gen: v6e
topology: v6e:2x2x1
jax: 0.10.0
libtpu: 0.0.40
codegen_flags: <defaults>
</compile_context>

<pallas_src>
import jax
import jax.numpy as jnp
from jax.experimental import pallas as pl
from jax.experimental.pallas import tpu as pltpu


def _largest_divisor_at_most(total, target):
    t = max(1, min(total, target))
    while total % t:
        t -= 1
    return t


def _row_tile(total, target):
    # Largest divisor of `total` that is <= target and a multiple of 8
    # (sublane-legal block); falls back to the full extent (always legal).
    t = max(1, min(total, target))
    while t > 0:
        if total % t == 0 and t % 8 == 0:
            return t
        t -= 1
    return total


# ---------------------------------------------------------------- kernel A ---
def _upconv_kernel(x_ref, w0_ref, w1_ref, b_ref, o_ref):
    # x_ref : (1, TH, W, Cin)
    # w0/w1 : (Cin, 2*Cout)   weights for output-row parity 0 / 1, cols (kx, c)
    # b_ref : (1, 2*Cout)
    # o_ref : (1, TH, 2, W, 2*Cout)  dims = (b, i, ky, j, (kx, c))
    th, w, cin = x_ref.shape[1], x_ref.shape[2], x_ref.shape[3]
    c2 = w0_ref.shape[1]
    x2d = x_ref[0].reshape(th * w, cin)                    # contiguous view
    t0 = jnp.dot(x2d, w0_ref[...], preferred_element_type=jnp.float32) + b_ref[...]
    t1 = jnp.dot(x2d, w1_ref[...], preferred_element_type=jnp.float32) + b_ref[...]
    o_ref[0, :, 0, :, :] = t0.reshape(th, w, c2)
    o_ref[0, :, 1, :, :] = t1.reshape(th, w, c2)


# ---------------------------------------------------------------- kernel B ---
def _fused_conv_kernel(up_ref, skip_ref, wu_ref, wsk_ref, b_ref,
                       y_ref, s_ref, m2_ref, acc_ref):
    # up_ref/skip_ref : (1, H, W, C)         (concat is implicit: split weights)
    # wu_ref/wsk_ref  : (3, 3, C, C)
    # b_ref           : (1, C)
    # y_ref           : (1, H, W, C)         conv output (pre-BN)
    # s_ref, m2_ref   : (1, 1, C)            per-image sum / centered M2
    # acc_ref         : VMEM (H+2, W+2, C)   zero-padded accumulator
    h, w, c = y_ref.shape[1], y_ref.shape[2], y_ref.shape[3]
    up2d = up_ref[0].reshape(h * w, c)      # one contiguous reshape: no per-tap
    sk2d = skip_ref[0].reshape(h * w, c)    # strided-slice copies of the image
    acc_ref[...] = jnp.zeros_like(acc_ref)
    for ky in range(3):                     # statically unrolled 3x3 taps
        for kx in range(3):
            t = (jnp.dot(up2d, wu_ref[ky, kx], preferred_element_type=jnp.float32)
                 + jnp.dot(sk2d, wsk_ref[ky, kx], preferred_element_type=jnp.float32)
                 ).reshape(h, w, c)
            # tap (ky,kx): contribution of input pixel (i,j) lands at padded
            # output coordinate (i + 2-ky, j + 2-kx); out-of-range taps fall
            # into the 1-pixel border of the accumulator and are discarded.
            r0, c0 = 2 - ky, 2 - kx
            acc_ref[r0:r0 + h, c0:c0 + w, :] = acc_ref[r0:r0 + h, c0:c0 + w, :] + t
    acc = acc_ref[1:h + 1, 1:w + 1, :] + b_ref[...].reshape(1, 1, c)
    y_ref[...] = acc.reshape(1, h, w, c)
    # per-image partial stats (mean-centered M2) -> stable parallel-variance
    # combine in the wrapper instead of catastrophic E[x^2] - E[x]^2.
    acc2 = acc.reshape(h * w, c)
    s = jnp.sum(acc2, axis=0, keepdims=True)               # (1, C)
    d = acc2 - s * (1.0 / (h * w))
    m2 = jnp.sum(d * d, axis=0, keepdims=True)             # (1, C)
    s_ref[...] = s.reshape(1, 1, c)
    m2_ref[...] = m2.reshape(1, 1, c)


# ---------------------------------------------------------------- kernel C ---
def _bn_relu_kernel(y_ref, scale_ref, shift_ref, o_ref):
    # y_ref/o_ref : (TR, W*C) lane-dense slab; scale/shift : (1, W*C)
    o_ref[...] = jnp.maximum(y_ref[...] * scale_ref[...] + shift_ref[...], 0.0)


# ----------------------------------------------------------------- wrapper ---
def decoder_block_forward(x_nchw, skip_nchw, params):
    x = jnp.transpose(x_nchw, (0, 2, 3, 1)).astype(jnp.float32)       # NHWC
    skip = jnp.transpose(skip_nchw, (0, 2, 3, 1)).astype(jnp.float32)
    n, h, w, cin = x.shape
    hs, ws = skip.shape[1], skip.shape[2]
    cout = params["bt"].shape[0]

    # ---- 1) ConvTranspose2d(k=2, s=2) --------------------------------------
    # torch weight (Cin, Cout, 2, 2) -> per-output-row-parity matmul weights.
    wt_t = jnp.transpose(params["wt"], (0, 2, 3, 1))                  # (Cin,2,2,Cout)
    w0 = wt_t[:, 0].reshape(cin, 2 * cout)
    w1 = wt_t[:, 1].reshape(cin, 2 * cout)
    bt2 = jnp.tile(params["bt"], 2).reshape(1, 2 * cout)

    th = _largest_divisor_at_most(h, max(1, 2048 // max(w, 1)))       # row tile
    up_packed = pl.pallas_call(
        _upconv_kernel,
        out_shape=jax.ShapeDtypeStruct((n, h, 2, w, 2 * cout), jnp.float32),
        grid=(n, h // th),
        in_specs=[pl.BlockSpec((1, th, w, cin), lambda b, r: (b, r, 0, 0)),
                  pl.BlockSpec((cin, 2 * cout), lambda b, r: (0, 0)),
                  pl.BlockSpec((cin, 2 * cout), lambda b, r: (0, 0)),
                  pl.BlockSpec((1, 2 * cout), lambda b, r: (0, 0))],
        out_specs=pl.BlockSpec((1, th, 2, w, 2 * cout),
                               lambda b, r: (b, r, 0, 0, 0)),
        compiler_params=pltpu.CompilerParams(
            dimension_semantics=("parallel", "parallel"),
            vmem_limit_bytes=32 * 1024 * 1024),
    )(x, w0, w1, bt2)
    # (N, H, 2, W, 2*Cout) row-major == (N, 2H, 2W, Cout): free reshape, no permute.
    up = up_packed.reshape(n, 2 * h, 2 * w, cout)

    if up.shape[1] != hs or up.shape[2] != ws:
        # TODO(synk): rare odd-size path (skip larger than 2x) handled via XLA
        # pad instead of being folded into kernel B.
        up = jnp.pad(up, ((0, 0), (0, hs - up.shape[1]),
                          (0, ws - up.shape[2]), (0, 0)))

    # ---- 2+3) fused concat + zero-pad + 3x3 conv + BN partial stats --------
    wc_t = jnp.transpose(params["wc"], (2, 3, 1, 0))                  # (3,3,2C,C)
    wu = wc_t[:, :, :cout, :]                                          # up half
    wsk = wc_t[:, :, cout:, :]                                         # skip half
    bc = params["bc"].reshape(1, cout)

    # TODO(synk): for large images add an H row-tiling grid axis (1-row halo)
    # so per-step VMEM stays within v5e/v7x budgets; at these sizes one image
    # per grid step is far below the 32 MiB scoped limit.
    y, s, m2 = pl.pallas_call(
        _fused_conv_kernel,
        out_shape=(jax.ShapeDtypeStruct((n, hs, ws, cout), jnp.float32),
                   jax.ShapeDtypeStruct((n, 1, cout), jnp.float32),
                   jax.ShapeDtypeStruct((n, 1, cout), jnp.float32)),
        grid=(n,),
        in_specs=[pl.BlockSpec((1, hs, ws, cout), lambda b: (b, 0, 0, 0)),
                  pl.BlockSpec((1, hs, ws, cout), lambda b: (b, 0, 0, 0)),
                  pl.BlockSpec((3, 3, cout, cout), lambda b: (0, 0, 0, 0)),
                  pl.BlockSpec((3, 3, cout, cout), lambda b: (0, 0, 0, 0)),
                  pl.BlockSpec((1, cout), lambda b: (0, 0))],
        out_specs=(pl.BlockSpec((1, hs, ws, cout), lambda b: (b, 0, 0, 0)),
                   pl.BlockSpec((1, 1, cout), lambda b: (b, 0, 0)),
                   pl.BlockSpec((1, 1, cout), lambda b: (b, 0, 0))),
        scratch_shapes=[pltpu.VMEM((hs + 2, ws + 2, cout), jnp.float32)],
        compiler_params=pltpu.CompilerParams(
            dimension_semantics=("parallel",),
            vmem_limit_bytes=32 * 1024 * 1024),
    )(up, skip, wu, wsk, bc)

    # ---- 4) BatchNorm batch statistics (training-mode, biased var, eps=1e-5)
    # Parallel-variance combine (Chan et al.) of per-image (sum, centered M2).
    # TODO(synk): running_mean/running_var buffer updates of nn.BatchNorm2d are
    # not reproduced; only the forward math is.
    cnt = hs * ws
    total = n * cnt
    s2 = s.reshape(n, cout)
    m2v = m2.reshape(n, cout)
    mean_b = s2 / cnt
    mean = jnp.sum(s2, axis=0) / total
    var = (jnp.sum(m2v, axis=0)
           + cnt * jnp.sum((mean_b - mean[None, :]) ** 2, axis=0)) / total
    eps = 1e-5
    scale = params["gamma"] / jnp.sqrt(var + eps)
    shift = params["beta"] - mean * scale

    # ---- 5) fused BN + ReLU: lane-dense slab, in place on y ----------------
    rows = n * hs
    lanes = ws * cout
    y_flat = y.reshape(rows, lanes)                        # free reshape
    scale_row = jnp.tile(scale, ws).reshape(1, lanes)
    shift_row = jnp.tile(shift, ws).reshape(1, lanes)
    tr = _row_tile(rows, 1024)
    out_flat = pl.pallas_call(
        _bn_relu_kernel,
        out_shape=jax.ShapeDtypeStruct((rows, lanes), jnp.float32),
        grid=(rows // tr,),
        in_specs=[pl.BlockSpec((tr, lanes), lambda i: (i, 0)),
                  pl.BlockSpec((1, lanes), lambda i: (0, 0)),
                  pl.BlockSpec((1, lanes), lambda i: (0, 0))],
        out_specs=pl.BlockSpec((tr, lanes), lambda i: (i, 0)),
        input_output_aliases={0: 0},
        compiler_params=pltpu.CompilerParams(
            dimension_semantics=("parallel",),
            vmem_limit_bytes=32 * 1024 * 1024),
    )(y_flat, scale_row, shift_row)

    out = out_flat.reshape(n, hs, ws, cout)
    return jnp.transpose(out, (0, 3, 1, 2))                # back to NCHW


# ------------------------------------------------------------------------
# Pure-JAX reference (XLA convs) used only for a numerical sanity check.
# ------------------------------------------------------------------------
def _reference_forward(x_nchw, skip_nchw, params):
    x = jnp.transpose(x_nchw, (0, 2, 3, 1))
    skip = jnp.transpose(skip_nchw, (0, 2, 3, 1))
    # ConvTranspose2d(k=2, s=2) == conv of 2x-dilated input with flipped kernel.
    kt = jnp.flip(jnp.transpose(params["wt"], (2, 3, 0, 1)), axis=(0, 1))  # HWIO
    up = jax.lax.conv_general_dilated(
        x, kt, window_strides=(1, 1), padding=((1, 1), (1, 1)),
        lhs_dilation=(2, 2),
        dimension_numbers=("NHWC", "HWIO", "NHWC")) + params["bt"]
    hs, ws = skip.shape[1], skip.shape[2]
    if up.shape[1] != hs or up.shape[2] != ws:
        up = jnp.pad(up, ((0, 0), (0, hs - up.shape[1]),
                          (0, ws - up.shape[2]), (0, 0)))
    cat = jnp.concatenate([up, skip], axis=-1)
    kc = jnp.transpose(params["wc"], (2, 3, 1, 0))         # HWIO
    y = jax.lax.conv_general_dilated(
        cat, kc, window_strides=(1, 1), padding=((1, 1), (1, 1)),
        dimension_numbers=("NHWC", "HWIO", "NHWC")) + params["bc"]
    mean = jnp.mean(y, axis=(0, 1, 2))
    var = jnp.mean(y * y, axis=(0, 1, 2)) - mean * mean
    out = jnp.maximum((y - mean) / jnp.sqrt(var + 1e-5)
                      * params["gamma"] + params["beta"], 0.0)
    return jnp.transpose(out, (0, 3, 1, 2))


if __name__ == "__main__":
    in_channels, out_channels = 8, 4
    key = jax.random.PRNGKey(0)
    ks = jax.random.split(key, 8)
    params = {
        "wt": 0.1 * jax.random.normal(ks[0], (in_channels, out_channels, 2, 2), jnp.float32),
        "bt": 0.1 * jax.random.normal(ks[1], (out_channels,), jnp.float32),
        "wc": 0.1 * jax.random.normal(ks[2], (out_channels, 2 * out_channels, 3, 3), jnp.float32),
        "bc": 0.1 * jax.random.normal(ks[3], (out_channels,), jnp.float32),
        "gamma": 1.0 + 0.1 * jax.random.normal(ks[4], (out_channels,), jnp.float32),
        "beta": 0.1 * jax.random.normal(ks[5], (out_channels,), jnp.float32),
    }
    x = jax.random.normal(ks[6], (2, in_channels, 8, 8), jnp.float32)        # NCHW
    skip = jax.random.normal(ks[7], (2, out_channels, 16, 16), jnp.float32)  # NCHW

    fwd = jax.jit(decoder_block_forward)
    out = jax.block_until_ready(fwd(x, skip, params))

    ref = jax.block_until_ready(_reference_forward(x, skip, params))
    assert out.shape == (2, out_channels, 16, 16), out.shape
    assert jnp.allclose(out, ref, rtol=1e-4, atol=1e-4), \
        float(jnp.max(jnp.abs(out - ref)))
    print("KERNEL_OK")
</pallas_src>

<mosaic_0001>
module attributes {stable_mosaic.version = 11 : i64} {
  func.func @_upconv_kernel(%arg0: i32, %arg1: i32, %arg2: memref<1x8x8x8xf32, #tpu.memory_space<vmem>>, %arg3: memref<8x8xf32, #tpu.memory_space<vmem>>, %arg4: memref<8x8xf32, #tpu.memory_space<vmem>>, %arg5: memref<1x8xf32, #tpu.memory_space<vmem>>, %arg6: memref<1x8x2x8x8xf32, #tpu.memory_space<vmem>>) attributes {dimension_semantics = [#tpu.dimension_semantics<parallel>, #tpu.dimension_semantics<parallel>], iteration_bounds = array<i64: 2, 1>, scalar_prefetch = 0 : i64, scratch_operands = 0 : i64, tpu.core_type = #tpu.core_type<tc>, window_params = [{transform_indices = @transform_0, window_bounds = array<i64: 1, 8, 8, 8>}, {pipeline_mode = #tpu.pipeline_mode<synchronous>, transform_indices = @transform_1, window_bounds = array<i64: 8, 8>}, {pipeline_mode = #tpu.pipeline_mode<synchronous>, transform_indices = @transform_2, window_bounds = array<i64: 8, 8>}, {pipeline_mode = #tpu.pipeline_mode<synchronous>, transform_indices = @transform_3, window_bounds = array<i64: 1, 8>}, {transform_indices = @transform_4, window_bounds = array<i64: 1, 8, 2, 8, 8>}]} {
    %c0 = arith.constant 0 : index
    %c0_0 = arith.constant 0 : index
    %c0_1 = arith.constant 0 : index
    %c0_2 = arith.constant 0 : index
    %0 = vector.load %arg2[%c0, %c0_0, %c0_1, %c0_2] : memref<1x8x8x8xf32, #tpu.memory_space<vmem>>, vector<1x8x8x8xf32>
    %1 = vector.shape_cast %0 : vector<1x8x8x8xf32> to vector<8x8x8xf32>
    %2 = vector.shape_cast %1 : vector<8x8x8xf32> to vector<64x8xf32>
    %c0_3 = arith.constant 0 : index
    %c0_4 = arith.constant 0 : index
    %3 = vector.load %arg3[%c0_3, %c0_4] : memref<8x8xf32, #tpu.memory_space<vmem>>, vector<8x8xf32>
    %cst = arith.constant dense<0.000000e+00> : vector<64x8xf32>
    %4 = tpu.matmul %2, %3, %cst {dimension_numbers = #tpu.dot_dimension_numbers<[1], [0], [0], [1], [0, 0, 1, 1], [], []>} : vector<64x8xf32>, vector<8x8xf32>, vector<64x8xf32> -> vector<64x8xf32>
    %c0_5 = arith.constant 0 : index
    %c0_6 = arith.constant 0 : index
    %5 = vector.load %arg5[%c0_5, %c0_6] : memref<1x8xf32, #tpu.memory_space<vmem>>, vector<1x8xf32>
    %6 = vector.broadcast %5 : vector<1x8xf32> to vector<64x8xf32>
    %7 = arith.addf %4, %6 : vector<64x8xf32>
    %c0_7 = arith.constant 0 : index
    %c0_8 = arith.constant 0 : index
    %8 = vector.load %arg4[%c0_7, %c0_8] : memref<8x8xf32, #tpu.memory_space<vmem>>, vector<8x8xf32>
    %cst_9 = arith.constant dense<0.000000e+00> : vector<64x8xf32>
    %9 = tpu.matmul %2, %8, %cst_9 {dimension_numbers = #tpu.dot_dimension_numbers<[1], [0], [0], [1], [0, 0, 1, 1], [], []>} : vector<64x8xf32>, vector<8x8xf32>, vector<64x8xf32> -> vector<64x8xf32>
    %c0_10 = arith.constant 0 : index
    %c0_11 = arith.constant 0 : index
    %10 = vector.load %arg5[%c0_10, %c0_11] : memref<1x8xf32, #tpu.memory_space<vmem>>, vector<1x8xf32>
    %11 = vector.broadcast %10 : vector<1x8xf32> to vector<64x8xf32>
    %12 = arith.addf %9, %11 : vector<64x8xf32>
    %13 = vector.shape_cast %7 : vector<64x8xf32> to vector<8x8x8xf32>
    %c0_12 = arith.constant 0 : index
    %c0_13 = arith.constant 0 : index
    %c0_14 = arith.constant 0 : index
    %c0_15 = arith.constant 0 : index
    %c0_16 = arith.constant 0 : index
    %14 = vector.load %arg6[%c0_12, %c0_13, %c0_14, %c0_15, %c0_16] : memref<1x8x2x8x8xf32, #tpu.memory_space<vmem>>, vector<1x8x1x8x8xf32>
    %15 = vector.shape_cast %14 : vector<1x8x1x8x8xf32> to vector<8x8x8xf32>
    %16 = vector.shape_cast %13 : vector<8x8x8xf32> to vector<1x8x1x8x8xf32>
    tpu.vector_store %arg6[%c0_12, %c0_13, %c0_14, %c0_15, %c0_16], %16 {strides = array<i32>} : memref<1x8x2x8x8xf32, #tpu.memory_space<vmem>>, vector<1x8x1x8x8xf32>,
    %17 = vector.shape_cast %12 : vector<64x8xf32> to vector<8x8x8xf32>
    %c0_17 = arith.constant 0 : index
    %c0_18 = arith.constant 0 : index
    %c1 = arith.constant 1 : index
    %c0_19 = arith.constant 0 : index
    %c0_20 = arith.constant 0 : index
    %18 = vector.load %arg6[%c0_17, %c0_18, %c1, %c0_19, %c0_20] : memref<1x8x2x8x8xf32, #tpu.memory_space<vmem>>, vector<1x8x1x8x8xf32>
    %19 = vector.shape_cast %18 : vector<1x8x1x8x8xf32> to vector<8x8x8xf32>
    %20 = vector.shape_cast %17 : vector<8x8x8xf32> to vector<1x8x1x8x8xf32>
    tpu.vector_store %arg6[%c0_17, %c0_18, %c1, %c0_19, %c0_20], %20 {strides = array<i32>} : memref<1x8x2x8x8xf32, #tpu.memory_space<vmem>>, vector<1x8x1x8x8xf32>,
    return
  }
  func.func @transform_0(%arg0: i32, %arg1: i32) -> (i32, i32, i32, i32) {
    %c0_i32 = arith.constant 0 : i32
    %c0_i32_0 = arith.constant 0 : i32
    %c0_i32_1 = arith.constant 0 : i32
    return %arg0, %arg1, %c0_i32, %c0_i32_0 : i32, i32, i32, i32
  }
  func.func @transform_1(%arg0: i32, %arg1: i32) -> (i32, i32) {
    %c0_i32 = arith.constant 0 : i32
    %c0_i32_0 = arith.constant 0 : i32
    %c0_i32_1 = arith.constant 0 : i32
    return %c0_i32, %c0_i32_0 : i32, i32
  }
  func.func @transform_2(%arg0: i32, %arg1: i32) -> (i32, i32) {
    %c0_i32 = arith.constant 0 : i32
    %c0_i32_0 = arith.constant 0 : i32
    %c0_i32_1 = arith.constant 0 : i32
    return %c0_i32, %c0_i32_0 : i32, i32
  }
  func.func @transform_3(%arg0: i32, %arg1: i32) -> (i32, i32) {
    %c0_i32 = arith.constant 0 : i32
    %c0_i32_0 = arith.constant 0 : i32
    %c0_i32_1 = arith.constant 0 : i32
    return %c0_i32, %c0_i32_0 : i32, i32
  }
  func.func @transform_4(%arg0: i32, %arg1: i32) -> (i32, i32, i32, i32, i32) {
    %c0_i32 = arith.constant 0 : i32
    %c0_i32_0 = arith.constant 0 : i32
    %c0_i32_1 = arith.constant 0 : i32
    %c0_i32_2 = arith.constant 0 : i32
    return %arg0, %arg1, %c0_i32, %c0_i32_0, %c0_i32_1 : i32, i32, i32, i32, i32
  }
}

module attributes {stable_mosaic.version = 11 : i64} {
  func.func @_fused_conv_kernel(%arg0: i32, %arg1: memref<1x16x16x4xf32, #tpu.memory_space<vmem>>, %arg2: memref<1x16x16x4xf32, #tpu.memory_space<vmem>>, %arg3: memref<3x3x4x4xf32, #tpu.memory_space<vmem>>, %arg4: memref<3x3x4x4xf32, #tpu.memory_space<vmem>>, %arg5: memref<1x4xf32, #tpu.memory_space<vmem>>, %arg6: memref<1x16x16x4xf32, #tpu.memory_space<vmem>>, %arg7: memref<1x1x4xf32, #tpu.memory_space<vmem>>, %arg8: memref<1x1x4xf32, #tpu.memory_space<vmem>>, %arg9: memref<18x18x4xf32, #tpu.memory_space<vmem>>) attributes {dimension_semantics = [#tpu.dimension_semantics<parallel>], iteration_bounds = array<i64: 2>, scalar_prefetch = 0 : i64, scratch_operands = 1 : i64, tpu.core_type = #tpu.core_type<tc>, window_params = [{transform_indices = @transform_0, window_bounds = array<i64: 1, 16, 16, 4>}, {transform_indices = @transform_1, window_bounds = array<i64: 1, 16, 16, 4>}, {pipeline_mode = #tpu.pipeline_mode<synchronous>, transform_indices = @transform_2, window_bounds = array<i64: 3, 3, 4, 4>}, {pipeline_mode = #tpu.pipeline_mode<synchronous>, transform_indices = @transform_3, window_bounds = array<i64: 3, 3, 4, 4>}, {pipeline_mode = #tpu.pipeline_mode<synchronous>, transform_indices = @transform_4, window_bounds = array<i64: 1, 4>}, {transform_indices = @transform_5, window_bounds = array<i64: 1, 16, 16, 4>}, {transform_indices = @transform_6, window_bounds = array<i64: 1, 1, 4>}, {transform_indices = @transform_7, window_bounds = array<i64: 1, 1, 4>}]} {
    %c0 = arith.constant 0 : index
    %c0_0 = arith.constant 0 : index
    %c0_1 = arith.constant 0 : index
    %c0_2 = arith.constant 0 : index
    %0 = vector.load %arg1[%c0, %c0_0, %c0_1, %c0_2] : memref<1x16x16x4xf32, #tpu.memory_space<vmem>>, vector<1x16x16x4xf32>
    %1 = vector.shape_cast %0 : vector<1x16x16x4xf32> to vector<16x16x4xf32>
    %2 = vector.shape_cast %1 : vector<16x16x4xf32> to vector<256x4xf32>
    %c0_3 = arith.constant 0 : index
    %c0_4 = arith.constant 0 : index
    %c0_5 = arith.constant 0 : index
    %c0_6 = arith.constant 0 : index
    %3 = vector.load %arg2[%c0_3, %c0_4, %c0_5, %c0_6] : memref<1x16x16x4xf32, #tpu.memory_space<vmem>>, vector<1x16x16x4xf32>
    %4 = vector.shape_cast %3 : vector<1x16x16x4xf32> to vector<16x16x4xf32>
    %5 = vector.shape_cast %4 : vector<16x16x4xf32> to vector<256x4xf32>
    %cst = arith.constant 0.000000e+00 : f32
    %6 = vector.broadcast %cst : f32 to vector<18x18x4xf32>
    %c0_7 = arith.constant 0 : index
    %c0_8 = arith.constant 0 : index
    %c0_9 = arith.constant 0 : index
    %7 = vector.load %arg9[%c0_7, %c0_8, %c0_9] : memref<18x18x4xf32, #tpu.memory_space<vmem>>, vector<18x18x4xf32>
    tpu.vector_store %arg9[%c0_7, %c0_8, %c0_9], %6 {strides = array<i32>} : memref<18x18x4xf32, #tpu.memory_space<vmem>>, vector<18x18x4xf32>,
    %c0_10 = arith.constant 0 : index
    %c0_11 = arith.constant 0 : index
    %c0_12 = arith.constant 0 : index
    %c0_13 = arith.constant 0 : index
    %8 = vector.load %arg3[%c0_10, %c0_11, %c0_12, %c0_13] : memref<3x3x4x4xf32, #tpu.memory_space<vmem>>, vector<1x1x4x4xf32>
    %9 = vector.shape_cast %8 : vector<1x1x4x4xf32> to vector<4x4xf32>
    %cst_14 = arith.constant dense<0.000000e+00> : vector<256x4xf32>
    %10 = tpu.matmul %2, %9, %cst_14 {dimension_numbers = #tpu.dot_dimension_numbers<[1], [0], [0], [1], [0, 0, 1, 1], [], []>} : vector<256x4xf32>, vector<4x4xf32>, vector<256x4xf32> -> vector<256x4xf32>
    %c0_15 = arith.constant 0 : index
    %c0_16 = arith.constant 0 : index
    %c0_17 = arith.constant 0 : index
    %c0_18 = arith.constant 0 : index
    %11 = vector.load %arg4[%c0_15, %c0_16, %c0_17, %c0_18] : memref<3x3x4x4xf32, #tpu.memory_space<vmem>>, vector<1x1x4x4xf32>
    %12 = vector.shape_cast %11 : vector<1x1x4x4xf32> to vector<4x4xf32>
    %cst_19 = arith.constant dense<0.000000e+00> : vector<256x4xf32>
    %13 = tpu.matmul %5, %12, %cst_19 {dimension_numbers = #tpu.dot_dimension_numbers<[1], [0], [0], [1], [0, 0, 1, 1], [], []>} : vector<256x4xf32>, vector<4x4xf32>, vector<256x4xf32> -> vector<256x4xf32>
    %14 = arith.addf %10, %13 : vector<256x4xf32>
    %15 = vector.shape_cast %14 : vector<256x4xf32> to vector<16x16x4xf32>
    %c2 = arith.constant 2 : index
    %c2_20 = arith.constant 2 : index
    %c0_21 = arith.constant 0 : index
    %16 = vector.load %arg9[%c2, %c2_20, %c0_21] : memref<18x18x4xf32, #tpu.memory_space<vmem>>, vector<16x16x4xf32>
    %17 = arith.addf %16, %15 : vector<16x16x4xf32>
    %c2_22 = arith.constant 2 : index
    %c2_23 = arith.constant 2 : index
    %c0_24 = arith.constant 0 : index
    %18 = vector.load %arg9[%c2_22, %c2_23, %c0_24] : memref<18x18x4xf32, #tpu.memory_space<vmem>>, vector<16x16x4xf32>
    tpu.vector_store %arg9[%c2_22, %c2_23, %c0_24], %17 {strides = array<i32>} : memref<18x18x4xf32, #tpu.memory_space<vmem>>, vector<16x16x4xf32>,
    %c0_25 = arith.constant 0 : index
    %c1 = arith.constant 1 : index
    %c0_26 = arith.constant 0 : index
    %c0_27 = arith.constant 0 : index
    %19 = vector.load %arg3[%c0_25, %c1, %c0_26, %c0_27] : memref<3x3x4x4xf32, #tpu.memory_space<vmem>>, vector<1x1x4x4xf32>
    %20 = vector.shape_cast %19 : vector<1x1x4x4xf32> to vector<4x4xf32>
    %cst_28 = arith.constant dense<0.000000e+00> : vector<256x4xf32>
    %21 = tpu.matmul %2, %20, %cst_28 {dimension_numbers = #tpu.dot_dimension_numbers<[1], [0], [0], [1], [0, 0, 1, 1], [], []>} : vector<256x4xf32>, vector<4x4xf32>, vector<256x4xf32> -> vector<256x4xf32>
    %c0_29 = arith.constant 0 : index
    %c1_30 = arith.constant 1 : index
    %c0_31 = arith.constant 0 : index
    %c0_32 = arith.constant 0 : index
    %22 = vector.load %arg4[%c0_29, %c1_30, %c0_31, %c0_32] : memref<3x3x4x4xf32, #tpu.memory_space<vmem>>, vector<1x1x4x4xf32>
    %23 = vector.shape_cast %22 : vector<1x1x4x4xf32> to vector<4x4xf32>
    %cst_33 = arith.constant dense<0.000000e+00> : vector<256x4xf32>
    %24 = tpu.matmul %5, %23, %cst_33 {dimension_numbers = #tpu.dot_dimension_numbers<[1], [0], [0], [1], [0, 0, 1, 1], [], []>} : vector<256x4xf32>, vector<4x4xf32>, vector<256x4xf32> -> vector<256x4xf32>
    %25 = arith.addf %21, %24 : vector<256x4xf32>
    %26 = vector.shape_cast %25 : vector<256x4xf32> to vector<16x16x4xf32>
    %c2_34 = arith.constant 2 : index
    %c1_35 = arith.constant 1 : index
    %c0_36 = arith.constant 0 : index
    %27 = vector.load %arg9[%c2_34, %c1_35, %c0_36] : memref<18x18x4xf32, #tpu.memory_space<vmem>>, vector<16x16x4xf32>
    %28 = arith.addf %27, %26 : vector<16x16x4xf32>
    %c2_37 = arith.constant 2 : index
    %c1_38 = arith.constant 1 : index
    %c0_39 = arith.constant 0 : index
    %29 = vector.load %arg9[%c2_37, %c1_38, %c0_39] : memref<18x18x4xf32, #tpu.memory_space<vmem>>, vector<16x16x4xf32>
    tpu.vector_store %arg9[%c2_37, %c1_38, %c0_39], %28 {strides = array<i32>} : memref<18x18x4xf32, #tpu.memory_space<vmem>>, vector<16x16x4xf32>,
    %c0_40 = arith.constant 0 : index
    %c2_41 = arith.constant 2 : index
    %c0_42 = arith.constant 0 : index
    %c0_43 = arith.constant 0 : index
    %30 = vector.load %arg3[%c0_40, %c2_41, %c0_42, %c0_43] : memref<3x3x4x4xf32, #tpu.memory_space<vmem>>, vector<1x1x4x4xf32>
    %31 = vector.shape_cast %30 : vector<1x1x4x4xf32> to vector<4x4xf32>
    %cst_44 = arith.constant dense<0.000000e+00> : vector<256x4xf32>
    %32 = tpu.matmul %2, %31, %cst_44 {dimension_numbers = #tpu.dot_dimension_numbers<[1], [0], [0], [1], [0, 0, 1, 1], [], []>} : vector<256x4xf32>, vector<4x4xf32>, vector<256x4xf32> -> vector<256x4xf32>
    %c0_45 = arith.constant 0 : index
    %c2_46 = arith.constant 2 : index
    %c0_47 = arith.constant 0 : index
    %c0_48 = arith.constant 0 : index
    %33 = vector.load %arg4[%c0_45, %c2_46, %c0_47, %c0_48] : memref<3x3x4x4xf32, #tpu.memory_space<vmem>>, vector<1x1x4x4xf32>
    %34 = vector.shape_cast %33 : vector<1x1x4x4xf32> to vector<4x4xf32>
    %cst_49 = arith.constant dense<0.000000e+00> : vector<256x4xf32>
    %35 = tpu.matmul %5, %34, %cst_49 {dimension_numbers = #tpu.dot_dimension_numbers<[1], [0], [0], [1], [0, 0, 1, 1], [], []>} : vector<256x4xf32>, vector<4x4xf32>, vector<256x4xf32> -> vector<256x4xf32>
    %36 = arith.addf %32, %35 : vector<256x4xf32>
    %37 = vector.shape_cast %36 : vector<256x4xf32> to vector<16x16x4xf32>
    %c2_50 = arith.constant 2 : index
    %c0_51 = arith.constant 0 : index
    %c0_52 = arith.constant 0 : index
    %38 = vector.load %arg9[%c2_50, %c0_51, %c0_52] : memref<18x18x4xf32, #tpu.memory_space<vmem>>, vector<16x16x4xf32>
    %39 = arith.addf %38, %37 : vector<16x16x4xf32>
    %c2_53 = arith.constant 2 : index
    %c0_54 = arith.constant 0 : index
    %c0_55 = arith.constant 0 : index
    %40 = vector.load %arg9[%c2_53, %c0_54, %c0_55] : memref<18x18x4xf32, #tpu.memory_space<vmem>>, vector<16x16x4xf32>
    tpu.vector_store %arg9[%c2_53, %c0_54, %c0_55], %39 {strides = array<i32>} : memref<18x18x4xf32, #tpu.memory_space<vmem>>, vector<16x16x4xf32>,
    %c1_56 = arith.constant 1 : index
    %c0_57 = arith.constant 0 : index
    %c0_58 = arith.constant 0 : index
    %c0_59 = arith.constant 0 : index
    %41 = vector.load %arg3[%c1_56, %c0_57, %c0_58, %c0_59] : memref<3x3x4x4xf32, #tpu.memory_space<vmem>>, vector<1x1x4x4xf32>
    %42 = vector.shape_cast %41 : vector<1x1x4x4xf32> to vector<4x4xf32>
    %cst_60 = arith.constant dense<0.000000e+00> : vector<256x4xf32>
    %43 = tpu.matmul %2, %42, %cst_60 {dimension_numbers = #tpu.dot_dimension_numbers<[1], [0], [0], [1], [0, 0, 1, 1], [], []>} : vector<256x4xf32>, vector<4x4xf32>, vector<256x4xf32> -> vector<256x4xf32>
    %c1_61 = arith.constant 1 : index
    %c0_62 = arith.constant 0 : index
    %c0_63 = arith.constant 0 : index
    %c0_64 = arith.constant 0 : index
    %44 = vector.load %arg4[%c1_61, %c0_62, %c0_63, %c0_64] : memref<3x3x4x4xf32, #tpu.memory_space<vmem>>, vector<1x1x4x4xf32>
    %45 = vector.shape_cast %44 : vector<1x1x4x4xf32> to vector<4x4xf32>
    %cst_65 = arith.constant dense<0.000000e+00> : vector<256x4xf32>
    %46 = tpu.matmul %5, %45, %cst_65 {dimension_numbers = #tpu.dot_dimension_numbers<[1], [0], [0], [1], [0, 0, 1, 1], [], []>} : vector<256x4xf32>, vector<4x4xf32>, vector<256x4xf32> -> vector<256x4xf32>
    %47 = arith.addf %43, %46 : vector<256x4xf32>
    %48 = vector.shape_cast %47 : vector<256x4xf32> to vector<16x16x4xf32>
    %c1_66 = arith.constant 1 : index
    %c2_67 = arith.constant 2 : index
    %c0_68 = arith.constant 0 : index
    %49 = vector.load %arg9[%c1_66, %c2_67, %c0_68] : memref<18x18x4xf32, #tpu.memory_space<vmem>>, vector<16x16x4xf32>
    %50 = arith.addf %49, %48 : vector<16x16x4xf32>
    %c1_69 = arith.constant 1 : index
    %c2_70 = arith.constant 2 : index
    %c0_71 = arith.constant 0 : index
    %51 = vector.load %arg9[%c1_69, %c2_70, %c0_71] : memref<18x18x4xf32, #tpu.memory_space<vmem>>, vector<16x16x4xf32>
    tpu.vector_store %arg9[%c1_69, %c2_70, %c0_71], %50 {strides = array<i32>} : memref<18x18x4xf32, #tpu.memory_space<vmem>>, vector<16x16x4xf32>,
    %c1_72 = arith.constant 1 : index
    %c1_73 = arith.constant 1 : index
    %c0_74 = arith.constant 0 : index
    %c0_75 = arith.constant 0 : index
    %52 = vector.load %arg3[%c1_72, %c1_73, %c0_74, %c0_75] : memref<3x3x4x4xf32, #tpu.memory_space<vmem>>, vector<1x1x4x4xf32>
    %53 = vector.shape_cast %52 : vector<1x1x4x4xf32> to vector<4x4xf32>
    %cst_76 = arith.constant dense<0.000000e+00> : vector<256x4xf32>
    %54 = tpu.matmul %2, %53, %cst_76 {dimension_numbers = #tpu.dot_dimension_numbers<[1], [0], [0], [1], [0, 0, 1, 1], [], []>} : vector<256x4xf32>, vector<4x4xf32>, vector<256x4xf32> -> vector<256x4xf32>
    %c1_77 = arith.constant 1 : index
    %c1_78 = arith.constant 1 : index
    %c0_79 = arith.constant 0 : index
    %c0_80 = arith.constant 0 : index
    %55 = vector.load %arg4[%c1_77, %c1_78, %c0_79, %c0_80] : memref<3x3x4x4xf32, #tpu.memory_space<vmem>>, vector<1x1x4x4xf32>
    %56 = vector.shape_cast %55 : vector<1x1x4x4xf32> to vector<4x4xf32>
    %cst_81 = arith.constant dense<0.000000e+00> : vector<256x4xf32>
    %57 = tpu.matmul %5, %56, %cst_81 {dimension_numbers = #tpu.dot_dimension_numbers<[1], [0], [0], [1], [0, 0, 1, 1], [], []>} : vector<256x4xf32>, vector<4x4xf32>, vector<256x4xf32> -> vector<256x4xf32>
    %58 = arith.addf %54, %57 : vector<256x4xf32>
    %59 = vector.shape_cast %58 : vector<256x4xf32> to vector<16x16x4xf32>
    %c1_82 = arith.constant 1 : index
    %c1_83 = arith.constant 1 : index
    %c0_84 = arith.constant 0 : index
    %60 = vector.load %arg9[%c1_82, %c1_83, %c0_84] : memref<18x18x4xf32, #tpu.memory_space<vmem>>, vector<16x16x4xf32>
    %61 = arith.addf %60, %59 : vector<16x16x4xf32>
    %c1_85 = arith.constant 1 : index
    %c1_86 = arith.constant 1 : index
    %c0_87 = arith.constant 0 : index
    %62 = vector.load %arg9[%c1_85, %c1_86, %c0_87] : memref<18x18x4xf32, #tpu.memory_space<vmem>>, vector<16x16x4xf32>
    tpu.vector_store %arg9[%c1_85, %c1_86, %c0_87], %61 {strides = array<i32>} : memref<18x18x4xf32, #tpu.memory_space<vmem>>, vector<16x16x4xf32>,
    %c1_88 = arith.constant 1 : index
    %c2_89 = arith.constant 2 : index
    %c0_90 = arith.constant 0 : index
    %c0_91 = arith.constant 0 : index
    %63 = vector.load %arg3[%c1_88, %c2_89, %c0_90, %c0_91] : memref<3x3x4x4xf32, #tpu.memory_space<vmem>>, vector<1x1x4x4xf32>
    %64 = vector.shape_cast %63 : vector<1x1x4x4xf32> to vector<4x4xf32>
    %cst_92 = arith.constant dense<0.000000e+00> : vector<256x4xf32>
    %65 = tpu.matmul %2, %64, %cst_92 {dimension_numbers = #tpu.dot_dimension_numbers<[1], [0], [0], [1], [0, 0, 1, 1], [], []>} : vector<256x4xf32>, vector<4x4xf32>, vector<256x4xf32> -> vector<256x4xf32>
    %c1_93 = arith.constant 1 : index
    %c2_94 = arith.constant 2 : index
    %c0_95 = arith.constant 0 : index
    %c0_96 = arith.constant 0 : index
    %66 = vector.load %arg4[%c1_93, %c2_94, %c0_95, %c0_96] : memref<3x3x4x4xf32, #tpu.memory_space<vmem>>, vector<1x1x4x4xf32>
    %67 = vector.shape_cast %66 : vector<1x1x4x4xf32> to vector<4x4xf32>
    %cst_97 = arith.constant dense<0.000000e+00> : vector<256x4xf32>
    %68 = tpu.matmul %5, %67, %cst_97 {dimension_numbers = #tpu.dot_dimension_numbers<[1], [0], [0], [1], [0, 0, 1, 1], [], []>} : vector<256x4xf32>, vector<4x4xf32>, vector<256x4xf32> -> vector<256x4xf32>
    %69 = arith.addf %65, %68 : vector<256x4xf32>
    %70 = vector.shape_cast %69 : vector<256x4xf32> to vector<16x16x4xf32>
    %c1_98 = arith.constant 1 : index
    %c0_99 = arith.constant 0 : index
    %c0_100 = arith.constant 0 : index
    %71 = vector.load %arg9[%c1_98, %c0_99, %c0_100] : memref<18x18x4xf32, #tpu.memory_space<vmem>>, vector<16x16x4xf32>
    %72 = arith.addf %71, %70 : vector<16x16x4xf32>
    %c1_101 = arith.constant 1 : index
    %c0_102 = arith.constant 0 : index
    %c0_103 = arith.constant 0 : index
    %73 = vector.load %arg9[%c1_101, %c0_102, %c0_103] : memref<18x18x4xf32, #tpu.memory_space<vmem>>, vector<16x16x4xf32>
    tpu.vector_store %arg9[%c1_101, %c0_102, %c0_103], %72 {strides = array<i32>} : memref<18x18x4xf32, #tpu.memory_space<vmem>>, vector<16x16x4xf32>,
    %c2_104 = arith.constant 2 : index
    %c0_105 = arith.constant 0 : index
    %c0_106 = arith.constant 0 : index
    %c0_107 = arith.constant 0 : index
    %74 = vector.load %arg3[%c2_104, %c0_105, %c0_106, %c0_107] : memref<3x3x4x4xf32, #tpu.memory_space<vmem>>, vector<1x1x4x4xf32>
    %75 = vector.shape_cast %74 : vector<1x1x4x4xf32> to vector<4x4xf32>
    %cst_108 = arith.constant dense<0.000000e+00> : vector<256x4xf32>
    %76 = tpu.matmul %2, %75, %cst_108 {dimension_numbers = #tpu.dot_dimension_numbers<[1], [0], [0], [1], [0, 0, 1, 1], [], []>} : vector<256x4xf32>, vector<4x4xf32>, vector<256x4xf32> -> vector<256x4xf32>
    %c2_109 = arith.constant 2 : index
    %c0_110 = arith.constant 0 : index
    %c0_111 = arith.constant 0 : index
    %c0_112 = arith.constant 0 : index
    %77 = vector.load %arg4[%c2_109, %c0_110, %c0_111, %c0_112] : memref<3x3x4x4xf32, #tpu.memory_space<vmem>>, vector<1x1x4x4xf32>
    %78 = vector.shape_cast %77 : vector<1x1x4x4xf32> to vector<4x4xf32>
    %cst_113 = arith.constant dense<0.000000e+00> : vector<256x4xf32>
    %79 = tpu.matmul %5, %78, %cst_113 {dimension_numbers = #tpu.dot_dimension_numbers<[1], [0], [0], [1], [0, 0, 1, 1], [], []>} : vector<256x4xf32>, vector<4x4xf32>, vector<256x4xf32> -> vector<256x4xf32>
    %80 = arith.addf %76, %79 : vector<256x4xf32>
    %81 = vector.shape_cast %80 : vector<256x4xf32> to vector<16x16x4xf32>
    %c0_114 = arith.constant 0 : index
    %c2_115 = arith.constant 2 : index
    %c0_116 = arith.constant 0 : index
    %82 = vector.load %arg9[%c0_114, %c2_115, %c0_116] : memref<18x18x4xf32, #tpu.memory_space<vmem>>, vector<16x16x4xf32>
    %83 = arith.addf %82, %81 : vector<16x16x4xf32>
    %c0_117 = arith.constant 0 : index
    %c2_118 = arith.constant 2 : index
    %c0_119 = arith.constant 0 : index
    %84 = vector.load %arg9[%c0_117, %c2_118, %c0_119] : memref<18x18x4xf32, #tpu.memory_space<vmem>>, vector<16x16x4xf32>
    tpu.vector_store %arg9[%c0_117, %c2_118, %c0_119], %83 {strides = array<i32>} : memref<18x18x4xf32, #tpu.memory_space<vmem>>, vector<16x16x4xf32>,
    %c2_120 = arith.constant 2 : index
    %c1_121 = arith.constant 1 : index
    %c0_122 = arith.constant 0 : index
    %c0_123 = arith.constant 0 : index
    %85 = vector.load %arg3[%c2_120, %c1_121, %c0_122, %c0_123] : memref<3x3x4x4xf32, #tpu.memory_space<vmem>>, vector<1x1x4x4xf32>
    %86 = vector.shape_cast %85 : vector<1x1x4x4xf32> to vector<4x4xf32>
    %cst_124 = arith.constant dense<0.000000e+00> : vector<256x4xf32>
    %87 = tpu.matmul %2, %86, %cst_124 {dimension_numbers = #tpu.dot_dimension_numbers<[1], [0], [0], [1], [0, 0, 1, 1], [], []>} : vector<256x4xf32>, vector<4x4xf32>, vector<256x4xf32> -> vector<256x4xf32>
    %c2_125 = arith.constant 2 : index
    %c1_126 = arith.constant 1 : index
    %c0_127 = arith.constant 0 : index
    %c0_128 = arith.constant 0 : index
    %88 = vector.load %arg4[%c2_125, %c1_126, %c0_127, %c0_128] : memref<3x3x4x4xf32, #tpu.memory_space<vmem>>, vector<1x1x4x4xf32>
    %89 = vector.shape_cast %88 : vector<1x1x4x4xf32> to vector<4x4xf32>
    %cst_129 = arith.constant dense<0.000000e+00> : vector<256x4xf32>
    %90 = tpu.matmul %5, %89, %cst_129 {dimension_numbers = #tpu.dot_dimension_numbers<[1], [0], [0], [1], [0, 0, 1, 1], [], []>} : vector<256x4xf32>, vector<4x4xf32>, vector<256x4xf32> -> vector<256x4xf32>
    %91 = arith.addf %87, %90 : vector<256x4xf32>
    %92 = vector.shape_cast %91 : vector<256x4xf32> to vector<16x16x4xf32>
    %c0_130 = arith.constant 0 : index
    %c1_131 = arith.constant 1 : index
    %c0_132 = arith.constant 0 : index
    %93 = vector.load %arg9[%c0_130, %c1_131, %c0_132] : memref<18x18x4xf32, #tpu.memory_space<vmem>>, vector<16x16x4xf32>
    %94 = arith.addf %93, %92 : vector<16x16x4xf32>
    %c0_133 = arith.constant 0 : index
    %c1_134 = arith.constant 1 : index
    %c0_135 = arith.constant 0 : index
    %95 = vector.load %arg9[%c0_133, %c1_134, %c0_135] : memref<18x18x4xf32, #tpu.memory_space<vmem>>, vector<16x16x4xf32>
    tpu.vector_store %arg9[%c0_133, %c1_134, %c0_135], %94 {strides = array<i32>} : memref<18x18x4xf32, #tpu.memory_space<vmem>>, vector<16x16x4xf32>,
    %c2_136 = arith.constant 2 : index
    %c2_137 = arith.constant 2 : index
    %c0_138 = arith.constant 0 : index
    %c0_139 = arith.constant 0 : index
    %96 = vector.load %arg3[%c2_136, %c2_137, %c0_138, %c0_139] : memref<3x3x4x4xf32, #tpu.memory_space<vmem>>, vector<1x1x4x4xf32>
    %97 = vector.shape_cast %96 : vector<1x1x4x4xf32> to vector<4x4xf32>
    %cst_140 = arith.constant dense<0.000000e+00> : vector<256x4xf32>
    %98 = tpu.matmul %2, %97, %cst_140 {dimension_numbers = #tpu.dot_dimension_numbers<[1], [0], [0], [1], [0, 0, 1, 1], [], []>} : vector<256x4xf32>, vector<4x4xf32>, vector<256x4xf32> -> vector<256x4xf32>
    %c2_141 = arith.constant 2 : index
    %c2_142 = arith.constant 2 : index
    %c0_143 = arith.constant 0 : index
    %c0_144 = arith.constant 0 : index
    %99 = vector.load %arg4[%c2_141, %c2_142, %c0_143, %c0_144] : memref<3x3x4x4xf32, #tpu.memory_space<vmem>>, vector<1x1x4x4xf32>
    %100 = vector.shape_cast %99 : vector<1x1x4x4xf32> to vector<4x4xf32>
    %cst_145 = arith.constant dense<0.000000e+00> : vector<256x4xf32>
    %101 = tpu.matmul %5, %100, %cst_145 {dimension_numbers = #tpu.dot_dimension_numbers<[1], [0], [0], [1], [0, 0, 1, 1], [], []>} : vector<256x4xf32>, vector<4x4xf32>, vector<256x4xf32> -> vector<256x4xf32>
    %102 = arith.addf %98, %101 : vector<256x4xf32>
    %103 = vector.shape_cast %102 : vector<256x4xf32> to vector<16x16x4xf32>
    %c0_146 = arith.constant 0 : index
    %c0_147 = arith.constant 0 : index
    %c0_148 = arith.constant 0 : index
    %104 = vector.load %arg9[%c0_146, %c0_147, %c0_148] : memref<18x18x4xf32, #tpu.memory_space<vmem>>, vector<16x16x4xf32>
    %105 = arith.addf %104, %103 : vector<16x16x4xf32>
    %c0_149 = arith.constant 0 : index
    %c0_150 = arith.constant 0 : index
    %c0_151 = arith.constant 0 : index
    %106 = vector.load %arg9[%c0_149, %c0_150, %c0_151] : memref<18x18x4xf32, #tpu.memory_space<vmem>>, vector<16x16x4xf32>
    tpu.vector_store %arg9[%c0_149, %c0_150, %c0_151], %105 {strides = array<i32>} : memref<18x18x4xf32, #tpu.memory_space<vmem>>, vector<16x16x4xf32>,
    %c1_152 = arith.constant 1 : index
    %c1_153 = arith.constant 1 : index
    %c0_154 = arith.constant 0 : index
    %107 = vector.load %arg9[%c1_152, %c1_153, %c0_154] : memref<18x18x4xf32, #tpu.memory_space<vmem>>, vector<16x16x4xf32>
    %c0_155 = arith.constant 0 : index
    %c0_156 = arith.constant 0 : index
    %108 = vector.load %arg5[%c0_155, %c0_156] : memref<1x4xf32, #tpu.memory_space<vmem>>, vector<1x4xf32>
    %109 = vector.shape_cast %108 : vector<1x4xf32> to vector<1x1x4xf32>
    %110 = vector.broadcast %109 : vector<1x1x4xf32> to vector<16x16x4xf32>
    %111 = arith.addf %107, %110 : vector<16x16x4xf32>
    %112 = vector.shape_cast %111 : vector<16x16x4xf32> to vector<1x16x16x4xf32>
    %c0_157 = arith.constant 0 : index
    %c0_158 = arith.constant 0 : index
    %c0_159 = arith.constant 0 : index
    %c0_160 = arith.constant 0 : index
    %113 = vector.load %arg6[%c0_157, %c0_158, %c0_159, %c0_160] : memref<1x16x16x4xf32, #tpu.memory_space<vmem>>, vector<1x16x16x4xf32>
    tpu.vector_store %arg6[%c0_157, %c0_158, %c0_159, %c0_160], %112 {strides = array<i32>} : memref<1x16x16x4xf32, #tpu.memory_space<vmem>>, vector<1x16x16x4xf32>,
    %114 = vector.shape_cast %111 : vector<16x16x4xf32> to vector<256x4xf32>
    %cst_161 = arith.constant dense<0.000000e+00> : vector<4xf32>
    %115 = vector.multi_reduction <add>, %114, %cst_161 [0] : vector<256x4xf32> to vector<4xf32>
    %116 = vector.shape_cast %115 : vector<4xf32> to vector<1x4xf32>
    %cst_162 = arith.constant 3.906250e-03 : f32
    %117 = vector.broadcast %cst_162 : f32 to vector<1x4xf32>
    %118 = arith.mulf %116, %117 : vector<1x4xf32>
    %119 = vector.broadcast %118 : vector<1x4xf32> to vector<256x4xf32>
    %120 = arith.subf %114, %119 : vector<256x4xf32>
    %121 = arith.mulf %120, %120 : vector<256x4xf32>
    %cst_163 = arith.constant dense<0.000000e+00> : vector<4xf32>
    %122 = vector.multi_reduction <add>, %121, %cst_163 [0] : vector<256x4xf32> to vector<4xf32>
    %123 = vector.shape_cast %122 : vector<4xf32> to vector<1x4xf32>
    %124 = vector.shape_cast %116 : vector<1x4xf32> to vector<1x1x4xf32>
    %c0_164 = arith.constant 0 : index
    %c0_165 = arith.constant 0 : index
    %c0_166 = arith.constant 0 : index
    %125 = vector.load %arg7[%c0_164, %c0_165, %c0_166] : memref<1x1x4xf32, #tpu.memory_space<vmem>>, vector<1x1x4xf32>
    tpu.vector_store %arg7[%c0_164, %c0_165, %c0_166], %124 {strides = array<i32>} : memref<1x1x4xf32, #tpu.memory_space<vmem>>, vector<1x1x4xf32>,
    %126 = vector.shape_cast %123 : vector<1x4xf32> to vector<1x1x4xf32>
    %c0_167 = arith.constant 0 : index
    %c0_168 = arith.constant 0 : index
    %c0_169 = arith.constant 0 : index
    %127 = vector.load %arg8[%c0_167, %c0_168, %c0_169] : memref<1x1x4xf32, #tpu.memory_space<vmem>>, vector<1x1x4xf32>
    tpu.vector_store %arg8[%c0_167, %c0_168, %c0_169], %126 {strides = array<i32>} : memref<1x1x4xf32, #tpu.memory_space<vmem>>, vector<1x1x4xf32>,
    return
  }
  func.func @transform_0(%arg0: i32) -> (i32, i32, i32, i32) {
    %c0_i32 = arith.constant 0 : i32
    %c0_i32_0 = arith.constant 0 : i32
    %c0_i32_1 = arith.constant 0 : i32
    %c0_i32_2 = arith.constant 0 : i32
    return %arg0, %c0_i32, %c0_i32_0, %c0_i32_1 : i32, i32, i32, i32
  }
  func.func @transform_1(%arg0: i32) -> (i32, i32, i32, i32) {
    %c0_i32 = arith.constant 0 : i32
    %c0_i32_0 = arith.constant 0 : i32
    %c0_i32_1 = arith.constant 0 : i32
    %c0_i32_2 = arith.constant 0 : i32
    return %arg0, %c0_i32, %c0_i32_0, %c0_i32_1 : i32, i32, i32, i32
  }
  func.func @transform_2(%arg0: i32) -> (i32, i32, i32, i32) {
    %c0_i32 = arith.constant 0 : i32
    %c0_i32_0 = arith.constant 0 : i32
    %c0_i32_1 = arith.constant 0 : i32
    %c0_i32_2 = arith.constant 0 : i32
    %c0_i32_3 = arith.constant 0 : i32
    return %c0_i32, %c0_i32_0, %c0_i32_1, %c0_i32_2 : i32, i32, i32, i32
  }
  func.func @transform_3(%arg0: i32) -> (i32, i32, i32, i32) {
    %c0_i32 = arith.constant 0 : i32
    %c0_i32_0 = arith.constant 0 : i32
    %c0_i32_1 = arith.constant 0 : i32
    %c0_i32_2 = arith.constant 0 : i32
    %c0_i32_3 = arith.constant 0 : i32
    return %c0_i32, %c0_i32_0, %c0_i32_1, %c0_i32_2 : i32, i32, i32, i32
  }
  func.func @transform_4(%arg0: i32) -> (i32, i32) {
    %c0_i32 = arith.constant 0 : i32
    %c0_i32_0 = arith.constant 0 : i32
    %c0_i32_1 = arith.constant 0 : i32
    return %c0_i32, %c0_i32_0 : i32, i32
  }
  func.func @transform_5(%arg0: i32) -> (i32, i32, i32, i32) {
    %c0_i32 = arith.constant 0 : i32
    %c0_i32_0 = arith.constant 0 : i32
    %c0_i32_1 = arith.constant 0 : i32
    %c0_i32_2 = arith.constant 0 : i32
    return %arg0, %c0_i32, %c0_i32_0, %c0_i32_1 : i32, i32, i32, i32
  }
  func.func @transform_6(%arg0: i32) -> (i32, i32, i32) {
    %c0_i32 = arith.constant 0 : i32
    %c0_i32_0 = arith.constant 0 : i32
    %c0_i32_1 = arith.constant 0 : i32
    return %arg0, %c0_i32, %c0_i32_0 : i32, i32, i32
  }
  func.func @transform_7(%arg0: i32) -> (i32, i32, i32) {
    %c0_i32 = arith.constant 0 : i32
    %c0_i32_0 = arith.constant 0 : i32
    %c0_i32_1 = arith.constant 0 : i32
    return %arg0, %c0_i32, %c0_i32_0 : i32, i32, i32
  }
}

module attributes {stable_mosaic.version = 11 : i64} {
  func.func @_bn_relu_kernel(%arg0: i32, %arg1: memref<32x64xf32, #tpu.memory_space<vmem>>, %arg2: memref<1x64xf32, #tpu.memory_space<vmem>>, %arg3: memref<1x64xf32, #tpu.memory_space<vmem>>, %arg4: memref<32x64xf32, #tpu.memory_space<vmem>>) attributes {dimension_semantics = [#tpu.dimension_semantics<parallel>], iteration_bounds = array<i64: 1>, scalar_prefetch = 0 : i64, scratch_operands = 0 : i64, tpu.core_type = #tpu.core_type<tc>, window_params = [{transform_indices = @transform_0, window_bounds = array<i64: 32, 64>}, {pipeline_mode = #tpu.pipeline_mode<synchronous>, transform_indices = @transform_1, window_bounds = array<i64: 1, 64>}, {pipeline_mode = #tpu.pipeline_mode<synchronous>, transform_indices = @transform_2, window_bounds = array<i64: 1, 64>}, {transform_indices = @transform_3, window_bounds = array<i64: 32, 64>}]} {
    %c0 = arith.constant 0 : index
    %c0_0 = arith.constant 0 : index
    %0 = vector.load %arg1[%c0, %c0_0] : memref<32x64xf32, #tpu.memory_space<vmem>>, vector<32x64xf32>
    %c0_1 = arith.constant 0 : index
    %c0_2 = arith.constant 0 : index
    %1 = vector.load %arg2[%c0_1, %c0_2] : memref<1x64xf32, #tpu.memory_space<vmem>>, vector<1x64xf32>
    %2 = vector.broadcast %1 : vector<1x64xf32> to vector<32x64xf32>
    %3 = arith.mulf %0, %2 : vector<32x64xf32>
    %c0_3 = arith.constant 0 : index
    %c0_4 = arith.constant 0 : index
    %4 = vector.load %arg3[%c0_3, %c0_4] : memref<1x64xf32, #tpu.memory_space<vmem>>, vector<1x64xf32>
    %5 = vector.broadcast %4 : vector<1x64xf32> to vector<32x64xf32>
    %6 = arith.addf %3, %5 : vector<32x64xf32>
    %cst = arith.constant 0.000000e+00 : f32
    %7 = vector.broadcast %cst : f32 to vector<32x64xf32>
    %8 = arith.maximumf %6, %7 : vector<32x64xf32>
    %c0_5 = arith.constant 0 : index
    %c0_6 = arith.constant 0 : index
    %9 = vector.load %arg4[%c0_5, %c0_6] : memref<32x64xf32, #tpu.memory_space<vmem>>, vector<32x64xf32>
    tpu.vector_store %arg4[%c0_5, %c0_6], %8 {strides = array<i32>} : memref<32x64xf32, #tpu.memory_space<vmem>>, vector<32x64xf32>,
    return
  }
  func.func @transform_0(%arg0: i32) -> (i32, i32) {
    %c0_i32 = arith.constant 0 : i32
    %c0_i32_0 = arith.constant 0 : i32
    return %arg0, %c0_i32 : i32, i32
  }
  func.func @transform_1(%arg0: i32) -> (i32, i32) {
    %c0_i32 = arith.constant 0 : i32
    %c0_i32_0 = arith.constant 0 : i32
    %c0_i32_1 = arith.constant 0 : i32
    return %c0_i32, %c0_i32_0 : i32, i32
  }
  func.func @transform_2(%arg0: i32) -> (i32, i32) {
    %c0_i32 = arith.constant 0 : i32
    %c0_i32_0 = arith.constant 0 : i32
    %c0_i32_1 = arith.constant 0 : i32
    return %c0_i32, %c0_i32_0 : i32, i32
  }
  func.func @transform_3(%arg0: i32) -> (i32, i32) {
    %c0_i32 = arith.constant 0 : i32
    %c0_i32_0 = arith.constant 0 : i32
    return %arg0, %c0_i32 : i32, i32
  }
}

</mosaic_0001>

<bundles_post_ra>
// kernel: tile.19
= control target key start
LH: loop header
LB: loop body
LE: loop exit
PB: predicated region body
PF: predicated region fallthrough
CT: control target
= control target key end

     0   :  { %vm8_vm0 = vcmask 31744   ;;  %vm14_vm1 = vcmask 64544   ;;  %s42_s0 = inlined_call_operand.vmem [shape: f32[2,4], index: 0, kind: input, shape index: {}]   ;;  %s43_s1 = inlined_call_operand.vmem [shape: f32[1,8], index: 1, kind: output, shape index: {}]  }
   0x1   :  { %v5_v0 = vld [vmem:[%s42_s0] sm:$0x3]  ;;  %s25_s0 = smov 4  }
   0x2   :  { %6 = vst [vmem:[#allocation1] sm:$0x3] %v5_v0 }
   0x9   :  { %v11_v1 = vld [vmem:[#allocation1 + $0x1] sm:$0x1]   ;;  %v7_v2 = vld [vmem:[#allocation1] sm:$0x1]  }
   0xa   :  { %12 = vrot.lane.b32.xlu0 %v11_v1, %s25_s0  ;;  %9 = vst.msk [vmem:[#allocation0] sm:$0x1] %vm8_vm0, %v7_v2  }
  0x7c   :  { %v13_v3 = vpop.permute.xlu0 %12  }
  0x7d   :  { %15 = vst.msk [vmem:[#allocation0] sm:$0x1] %vm14_vm1, %v13_v3  }
  0x84   :  { %v20_v4 = vld [vmem:[#allocation0] sm:$0x1] }
  0x85   :  { %23 = vst [vmem:[%s43_s1] sm:$0x1] %v20_v4 }

// kernel: tile.18
= control target key start
LH: loop header
LB: loop body
LE: loop exit
PB: predicated region body
PF: predicated region fallthrough
CT: control target
= control target key end

     0   :  { %2 = vsyncpa [#allocation1], 0  ;;  %s42_s6 = smov [#allocation0]   ;;  %s59_s0 = inlined_call_operand.hbm [shape: f32[4], index: 0, kind: input, shape index: {}]   ;;  %s60_s1 = inlined_call_operand.vmem [shape: f32[2,4], index: 1, kind: output, shape index: {}]  }
   0x1   :  { %s9_s7 = sshll.u32 %s42_s6, 4  ;;  %s10_s7 = int_to_ptr.vmem [resolvable:$true] %s9_s7 }
   0x2   :  { %s28_s8 = scalar_lea.vmem %s10_s7, 16  ;;  %s32_s9 = scalar_lea.vmem %s10_s7, 32 }
   0x3   :  { %p29_p0 = scmp.ne.s32.totalorder %s10_s7, %s28_s8  ;;  %p33_p1 = scmp.lt.s32.totalorder %s10_s7, %s10_s7 }
   0x4   :  { %p34_p2 = scmp.lt.s32.totalorder %s32_s9, %s28_s8 }
   0x6   :  { %p35_p3 = por %p34_p2, %p33_p1 }
   0x8   :  { %p36_p4 = pnand %p35_p3, %p29_p0 }
   0xa   :  { %39 = shalt.err (!%p36_p4)
}
   0xb   :  { %12 = dma.hbm_to_vmem [thread:$0]  %s59_s0, 16, %s10_s7, [#allocation1]  }
   0xc   :  { %40 = dma.done.wait [#allocation1], 16  }
   0xd   :  { %41 = vsyncadd [#allocation1], 4294967280  ;;  %v16_v0 = vld [vmem:[#allocation0] ss:$0 sm:$0xff] }
   0xe   :  { %17 = vst [vmem:[%s60_s1] sm:$0x3] %v16_v0 }
   0xf   :  { %18 = vsyncpa [#allocation1], 1 }

// kernel: tile.28
= control target key start
LH: loop header
LB: loop body
LE: loop exit
PB: predicated region body
PF: predicated region fallthrough
CT: control target
= control target key end

     0   :  { %s28_s0 = inlined_call_operand.vmem [shape: f32[4], index: 0, kind: input, shape index: {}]   ;;  %s29_s1 = inlined_call_operand.vmem [shape: f32[16,4], index: 1, kind: output, shape index: {}]  }
   0x1   :  { %v4_v0 = vld [vmem:[%s28_s0] ss:$0 sm:$0xff] }
   0x2   :  { %5 = vst [vmem:[%s29_s1] sm:$0xff] %v4_v0  ;;  %8 = vst [vmem:[%s29_s1 + $0x8] sm:$0xff] %v4_v0 }

// kernel: tile.29
= control target key start
LH: loop header
LB: loop body
LE: loop exit
PB: predicated region body
PF: predicated region fallthrough
CT: control target
= control target key end

     0   :  { %s133_s10 = smov 60   ;;  %s134_s11 = smov 52   ;;  %vm3_vm0 = vcmask 31744   ;;  %vm9_vm1 = vcmask 523744   ;;  %vm15_vm2 = vcmask 490944   ;;  %vm21_vm3 = vcmask 458144   ;;  %s209_s0 = inlined_call_operand.vmem [shape: f32[16,4], index: 0, kind: input, shape index: {}]   ;;  %s210_s1 = inlined_call_operand.vmem [shape: f32[1,64], index: 1, kind: output, shape index: {}]  }
   0x1   :  { %v103_v0 = vld [vmem:[%s209_s0 + $0xf] sm:$0x1]   ;;  %v105_v1 = vld [vmem:[%s209_s0 + $0xd] sm:$0x1]   ;;  %v104_v2 = vld [vmem:[%s209_s0 + $0xe] sm:$0x1]  }
   0x2   :  { %7 = vrot.lane.b32.xlu0 %v103_v0, %s133_s10  ;;  %19 = vrot.lane.b32.xlu1 %v105_v1, %s134_s11  ;;  %v106_v3 = vld [vmem:[%s209_s0 + $0xc] sm:$0x1]   ;;  %s135_s16 = smov 56   ;;  %s136_s17 = smov 48   ;;  %v107_v4 = vld [vmem:[%s209_s0 + $0xb] sm:$0x1]  }
   0x3   :  { %v108_v5 = vld [vmem:[%s209_s0 + $0xa] sm:$0x1]   ;;  %v2_v6 = vld [vmem:[%s209_s0] sm:$0x1]   ;;  %s137_s24 = smov 44   ;;  %s138_s25 = smov 40  }
   0x4   :  { %4 = vst.msk [vmem:[#allocation0] sm:$0x1] %vm3_vm0, %v2_v6   ;;  %v109_v7 = vld [vmem:[%s209_s0 + $0x9] sm:$0x1]   ;;  %v110_v8 = vld [vmem:[%s209_s0 + $0x8] sm:$0x1]  }
   0x5   :  { %s139_s30 = smov 36   ;;  %s140_s2 = smov 32   ;;  %v111_v9 = vld [vmem:[%s209_s0 + $0x7] sm:$0x1]   ;;  %v112_v10 = vld [vmem:[%s209_s0 + $0x6] sm:$0x1]  }
   0x6   :  { %13 = vrot.lane.b32.xlu0 %v104_v2, %s135_s16  ;;  %25 = vrot.lane.b32.xlu1 %v106_v3, %s136_s17  ;;  %s141_s7 = smov 28   ;;  %s142_s8 = smov 24   ;;  %v113_v11 = vld [vmem:[%s209_s0 + $0x5] sm:$0x1]   ;;  %v114_v12 = vld [vmem:[%s209_s0 + $0x4] sm:$0x1]  }
   0x7   :  { %s143_s13 = smov 20   ;;  %s144_s14 = smov 16   ;;  %v115_v13 = vld [vmem:[%s209_s0 + $0x3] sm:$0x1]   ;;  %v116_v14 = vld [vmem:[%s209_s0 + $0x2] sm:$0x1]  }
   0x8   :  { %s145_s19 = smov 12   ;;  %s146_s20 = smov 8   ;;  %v117_v15 = vld [vmem:[%s209_s0 + $0x1] sm:$0x1]   ;;  %vm27_vm4 = vcmask 425344   ;;  %vm33_vm5 = vcmask 392544  }
   0x9   :  { %s147_s0 = smov 4   ;;  %vm39_vm6 = vcmask 359744   ;;  %vm45_vm7 = vcmask 326944   ;;  %vm51_vm8 = vcmask 294144   ;;  %vm57_vm9 = vcmask 261344  }
   0xa   :  { %31 = vrot.lane.b32.xlu0 %v107_v4, %s137_s24  ;;  %37 = vrot.lane.b32.xlu1 %v108_v5, %s138_s25  ;;  %vm63_vm10 = vcmask 228544   ;;  %vm69_vm11 = vcmask 195744   ;;  %vm75_vm12 = vcmask 162944   ;;  %vm81_vm13 = vcmask 130144  }
   0xb   :  { %vm87_vm14 = vcmask 97344   ;;  %vm93_vm15 = vcmask 64544  }
   0xe   :  { %43 = vrot.lane.b32.xlu0 %v109_v7, %s139_s30  ;;  %49 = vrot.lane.b32.xlu1 %v110_v8, %s140_s2 }
  0x12   :  { %55 = vrot.lane.b32.xlu0 %v111_v9, %s141_s7  ;;  %61 = vrot.lane.b32.xlu1 %v112_v10, %s142_s8 }
  0x16   :  { %67 = vrot.lane.b32.xlu0 %v113_v11, %s143_s13  ;;  %73 = vrot.lane.b32.xlu1 %v114_v12, %s144_s14 }
  0x1a   :  { %79 = vrot.lane.b32.xlu0 %v115_v13, %s145_s19  ;;  %85 = vrot.lane.b32.xlu1 %v116_v14, %s146_s20 }
  0x1e   :  { %91 = vrot.lane.b32.xlu0 %v117_v15, %s147_s0 }
  0x74   :  { %v8_v16 = vpop.permute.xlu0 %7   ;;  %v20_v17 = vpop.permute.xlu1 %19  }
  0x75   :  { %10 = vst.msk [vmem:[#allocation0] sm:$0x1] %vm9_vm1, %v8_v16  }
  0x78   :  { %v14_v18 = vpop.permute.xlu0 %13   ;;  %v26_v19 = vpop.permute.xlu1 %25  }
  0x79   :  { %16 = vst.msk [vmem:[#allocation0] sm:$0x1] %vm15_vm2, %v14_v18  }
  0x7a   :  { %22 = vst.msk [vmem:[#allocation0] sm:$0x1] %vm21_vm3, %v20_v17  }
  0x7b   :  { %28 = vst.msk [vmem:[#allocation0] sm:$0x1] %vm27_vm4, %v26_v19  }
  0x7c   :  { %v32_v20 = vpop.permute.xlu0 %31   ;;  %v38_v21 = vpop.permute.xlu1 %37  }
  0x7d   :  { %34 = vst.msk [vmem:[#allocation0] sm:$0x1] %vm33_vm5, %v32_v20  }
  0x7e   :  { %40 = vst.msk [vmem:[#allocation0] sm:$0x1] %vm39_vm6, %v38_v21  }
  0x80   :  { %v44_v22 = vpop.permute.xlu0 %43   ;;  %v50_v23 = vpop.permute.xlu1 %49  }
  0x81   :  { %46 = vst.msk [vmem:[#allocation0] sm:$0x1] %vm45_vm7, %v44_v22  }
  0x82   :  { %52 = vst.msk [vmem:[#allocation0] sm:$0x1] %vm51_vm8, %v50_v23  }
  0x84   :  { %v56_v24 = vpop.permute.xlu0 %55   ;;  %v62_v25 = vpop.permute.xlu1 %61  }
  0x85   :  { %58 = vst.msk [vmem:[#allocation0] sm:$0x1] %vm57_vm9, %v56_v24  }
  0x86   :  { %64 = vst.msk [vmem:[#allocation0] sm:$0x1] %vm63_vm10, %v62_v25  }
  0x88   :  { %v68_v26 = vpop.permute.xlu0 %67   ;;  %v74_v27 = vpop.permute.xlu1 %73  }
  0x89   :  { %70 = vst.msk [vmem:[#allocation0] sm:$0x1] %vm69_vm11, %v68_v26  }
  0x8a   :  { %76 = vst.msk [vmem:[#allocation0] sm:$0x1] %vm75_vm12, %v74_v27  }
  0x8c   :  { %v80_v28 = vpop.permute.xlu0 %79   ;;  %v86_v29 = vpop.permute.xlu1 %85  }
  0x8d   :  { %82 = vst.msk [vmem:[#allocation0] sm:$0x1] %vm81_vm13, %v80_v28  }
  0x8e   :  { %88 = vst.msk [vmem:[#allocation0] sm:$0x1] %vm87_vm14, %v86_v29  }
  0x90   :  { %v92_v30 = vpop.permute.xlu0 %91  }
  0x91   :  { %94 = vst.msk [vmem:[#allocation0] sm:$0x1] %vm93_vm15, %v92_v30  }
  0x98   :  { %v99_v31 = vld [vmem:[#allocation0] sm:$0x1] }
  0x99   :  { %102 = vst [vmem:[%s210_s1] sm:$0x1] %v99_v31 }

// kernel: decoder_block_forward.5
= control target key start
LH: loop header
LB: loop body
LE: loop exit
PB: predicated region body
PF: predicated region fallthrough
CT: control target
= control target key end

     0   :  { %vm44_vm0 = vcmask 523264   ;;  %s105_s0 = inlined_call_operand.vmem [shape: f32[32,64], index: 0, kind: input, shape index: {}, may-alias: {0,3}]   ;;  %s106_s1 = inlined_call_operand.vmem [shape: f32[1,64], index: 1, kind: input, shape index: {}]   ;;  %s107_s2 = inlined_call_operand.vmem [shape: f32[1,64], index: 2, kind: input, shape index: {}]   ;;  %s108_s3 = inlined_call_operand.vmem [shape: f32[32,64], index: 3, kind: output, shape index: {}, may-alias: {0,3}]  }
   0x1   :  { %v14_v0 = vld [vmem:[%s105_s0] sm:$0xff]  ;;  %v15_v4 = vld [vmem:[%s105_s0 + $0x8] sm:$0xff]  ;;  %v16_v5 = vld [vmem:[%s105_s0 + $0x10] sm:$0xff] }
   0x2   :  { %v53_v1 = vld [vmem:[%s106_s1] ss:$0 sm:$0xff]  ;;  %v17_v6 = vld [vmem:[%s105_s0 + $0x18] sm:$0xff] }
   0x3   :  { %v54_v2 = vld [vmem:[%s107_s2] ss:$0 sm:$0xff]  ;;  %v25_v3 = vmul.f32 %v53_v1, %v14_v0  ;;  %v26_v7 = vmul.f32 %v53_v1, %v15_v4  ;;  %v27_v8 = vmul.f32 %v53_v1, %v16_v5  ;;  %v28_v9 = vmul.f32 %v53_v1, %v17_v6 }
   0x5   :  { %v36_v10 = vadd.f32 %v54_v2, %v25_v3  ;;  %v37_v11 = vadd.f32 %v54_v2, %v26_v7  ;;  %v38_v12 = vadd.f32 %v54_v2, %v27_v8  ;;  %v39_v13 = vadd.f32 %v54_v2, %v28_v9 }
   0x7   :  { %v40_v14 = vmax.f32 %v36_v10, 0.0  ;;  %v41_v15 = vmax.f32 %v37_v11, 0.0  ;;  %v42_v16 = vmax.f32 %v38_v12, 0.0  ;;  %v43_v17 = vmax.f32 %v39_v13, 0.0 }
   0x9   :  { %45 = vst.msk [vmem:[%s108_s3] sm:$0xff] %vm44_vm0, %v40_v14  ;;  %46 = vst.msk [vmem:[%s108_s3 + $0x8] sm:$0xff] %vm44_vm0, %v41_v15 }
   0xa   :  { %47 = vst.msk [vmem:[%s108_s3 + $0x10] sm:$0xff] %vm44_vm0, %v42_v16  ;;  %48 = vst.msk [vmem:[%s108_s3 + $0x18] sm:$0xff] %vm44_vm0, %v43_v17 }

// kernel: decoder_block_forward.3
= control target key start
LH: loop header
LB: loop body
LE: loop exit
PB: predicated region body
PF: predicated region fallthrough
CT: control target
= control target key end

     0   :  { %s758_s15 = smov 0   ;;  %s760_s16 = smov 0   ;;  %s854_s0 = inlined_call_operand.vmem [shape: f32[2,8,8,8], index: 0, kind: input, shape index: {}]   ;;  %s855_s1 = inlined_call_operand.vmem [shape: f32[8,8], index: 1, kind: input, shape index: {}]   ;;  %s856_s2 = inlined_call_operand.vmem [shape: f32[8,8], index: 2, kind: input, shape index: {}]   ;;  %s857_s3 = inlined_call_operand.vmem [shape: f32[1,8], index: 3, kind: input, shape index: {}]   ;;  %s858_s4 = inlined_call_operand.vmem [shape: f32[2,8,2,8,8], index: 4, kind: output, shape index: {}]  }
   0x1   :  { %s762_s17 = smov 0  }
   0x2 LB: > { %s26_s18 = sadd.s32 1, %s727_s16  ;;  %p605_p0 = scmp.ge.s32.totalorder %s731_s17, 1  ;;  %s731_s17 = sphi %s762_s17, %s14_s17   ;;  %s727_s16 = sphi %s760_s16, %s860_s16   ;;  %s723_s15 = sphi %s758_s15, %s859_s15  }
   0x3   : > { %p28_p1 = scmp.ge.s32.totalorder %s26_s18, 2  ;;  %p183_p2 = scmp.lt.s32.totalorder %s731_s17, 3 }
   0x5   : > { %s862_s18 = smov (%p28_p1, %s26_s18), 0  ;;  %p184_p3 = pnand %p605_p0, %p183_p2 }
   0x6   : > { %p219_p4 = scmp.lt.s32.totalorder (!%p184_p3), %s723_s15, 1 }
   0x7   : > { %187 = sbr.rel (%p184_p3) target bundleno = 227 (0xe3), region = 36 }
   0xc   : > { %v247_v0 = vld [vmem:[%s855_s1] sm:$0xff]  ;;  %s864_s15 = smov (!%p219_p4, %s723_s15), 1  ;;  %vm255_vm0 = vcmask 64512  }
   0xd   : > { %v385_v1 = vld [vmem:[%s856_s2] sm:$0xff]  ;;  %657 = vmatprep.subr.mxu0 %v247_v0  ;;  %s637_s23 = sshll.u32 %s864_s15, 6  ;;  %s638_s27 = sshll.u32 %s864_s15, 7 }
   0xe   : > { %671 = vmatprep.subr.mxu1 %v385_v1  ;;  %658 = vmatpush3.msra.mxu0 %v247_v0  ;;  %s226_s26 = scalar_lea.vmem %s854_s0, %s637_s23  ;;  %v610_v10 = vld [vmem:[%s857_s3] ss:$0 sm:$0xff]  ;;  %s811_s6 = scalar_lea.vmem %s858_s4, %s638_s27 }
   0xf   : > { %672 = vmatpush3.msra.mxu1 %v385_v1  ;;  %v239_v2 = vld [vmem:[%s226_s26] sm:$0xff]  ;;  %v240_v3 = vld [vmem:[%s226_s26 + $0x8] sm:$0xff]  ;;  %v241_v4 = vld [vmem:[%s226_s26 + $0x10] sm:$0xff] }
  0x10   : > { %659 = vmatprep.mubr.msk.f32.mxu0 %vm255_vm0, %v239_v2  ;;  %673 = vmatprep.mubr.msk.f32.mxu1 %vm255_vm0, %v239_v2  ;;  %v242_v5 = vld [vmem:[%s226_s26 + $0x18] sm:$0xff]  ;;  %v243_v6 = vld [vmem:[%s226_s26 + $0x20] sm:$0xff]  ;;  %v244_v7 = vld [vmem:[%s226_s26 + $0x28] sm:$0xff] }
  0x11   : > { %660 = vmatmul.mubr.msk.f32.vlgmr.msra.gmra.mxu0 %vm255_vm0, %v240_v3  ;;  %674 = vmatmul.mubr.msk.f32.vlgmr.msra.gmra.mxu1 %vm255_vm0, %v240_v3  ;;  %v245_v8 = vld [vmem:[%s226_s26 + $0x30] sm:$0xff]  ;;  %v246_v9 = vld [vmem:[%s226_s26 + $0x38] sm:$0xff] }
  0x12   : > { %662 = vmatprep.mubr.msk.f32.mxu0 %vm255_vm0, %v241_v4  ;;  %676 = vmatprep.mubr.msk.f32.mxu1 %vm255_vm0, %v241_v4 }
  0x15   : > { %663 = vmatmul.mubr.msk.f32.gmra.mxu0 %vm255_vm0, %v242_v5  ;;  %677 = vmatmul.mubr.msk.f32.gmra.mxu1 %vm255_vm0, %v242_v5 }
  0x16   : > { %665 = vmatprep.mubr.msk.f32.mxu0 %vm255_vm0, %v243_v6  ;;  %679 = vmatprep.mubr.msk.f32.mxu1 %vm255_vm0, %v243_v6 }
  0x19   : > { %666 = vmatmul.mubr.msk.f32.gmra.mxu0 %vm255_vm0, %v244_v7  ;;  %680 = vmatmul.mubr.msk.f32.gmra.mxu1 %vm255_vm0, %v244_v7 }
  0x1a   : > { %668 = vmatprep.mubr.msk.f32.mxu0 %vm255_vm0, %v245_v8  ;;  %682 = vmatprep.mubr.msk.f32.mxu1 %vm255_vm0, %v245_v8 }
  0x1d   : > { %669 = vmatmul.mubr.msk.f32.gmra.mxu0 %vm255_vm0, %v246_v9  ;;  %683 = vmatmul.mubr.msk.f32.gmra.mxu1 %vm255_vm0, %v246_v9 }
  0xd1   : > { %v661_v11 = vpop.f32.mrf.mxu0  ;;  %v675_v12 = vpop.f32.mrf.mxu1 }
  0xd2   : > { %v352_v13 = vadd.f32 %v661_v11, %v610_v10  ;;  %v458_v14 = vadd.f32 %v675_v12, %v610_v10 }
  0xd3   : > { %v346_v15 = vpop.f32.mrf.mxu0  ;;  %v452_v16 = vpop.f32.mrf.mxu1 }
  0xd4   : > { %492 = vst.msk [vmem:[%s811_s6 + $0x10] sm:$0xff] %vm255_vm0, %v352_v13  ;;  %628 = vst.msk [vmem:[%s811_s6 + $0x18] sm:$0xff] %vm255_vm0, %v458_v14  ;;  %v347_v17 = vadd.f32 %v610_v10, %v346_v15  ;;  %v453_v18 = vadd.f32 %v610_v10, %v452_v16 }
  0xd5   : > { %v664_v19 = vpop.f32.mrf.mxu0  ;;  %v678_v20 = vpop.f32.mrf.mxu1 }
  0xd6   : > { %491 = vst.msk [vmem:[%s811_s6] sm:$0xff] %vm255_vm0, %v347_v17  ;;  %627 = vst.msk [vmem:[%s811_s6 + $0x8] sm:$0xff] %vm255_vm0, %v453_v18  ;;  %v362_v21 = vadd.f32 %v664_v19, %v610_v10  ;;  %v468_v22 = vadd.f32 %v678_v20, %v610_v10 }
  0xd7   : > { %v356_v23 = vpop.f32.mrf.mxu0  ;;  %v462_v24 = vpop.f32.mrf.mxu1 }
  0xd8   : > { %494 = vst.msk [vmem:[%s811_s6 + $0x30] sm:$0xff] %vm255_vm0, %v362_v21  ;;  %630 = vst.msk [vmem:[%s811_s6 + $0x38] sm:$0xff] %vm255_vm0, %v468_v22  ;;  %v357_v25 = vadd.f32 %v610_v10, %v356_v23  ;;  %v463_v26 = vadd.f32 %v610_v10, %v462_v24 }
  0xd9   : > { %v667_v27 = vpop.f32.mrf.mxu0  ;;  %v681_v28 = vpop.f32.mrf.mxu1 }
  0xda   : > { %493 = vst.msk [vmem:[%s811_s6 + $0x20] sm:$0xff] %vm255_vm0, %v357_v25  ;;  %629 = vst.msk [vmem:[%s811_s6 + $0x28] sm:$0xff] %vm255_vm0, %v463_v26  ;;  %v372_v29 = vadd.f32 %v667_v27, %v610_v10  ;;  %v478_v30 = vadd.f32 %v681_v28, %v610_v10 }
  0xdb   : > { %v366_v31 = vpop.f32.mrf.mxu0  ;;  %v472_v32 = vpop.f32.mrf.mxu1 }
  0xdc   : > { %496 = vst.msk [vmem:[%s811_s6 + $0x50] sm:$0xff] %vm255_vm0, %v372_v29  ;;  %632 = vst.msk [vmem:[%s811_s6 + $0x58] sm:$0xff] %vm255_vm0, %v478_v30  ;;  %v367_v33 = vadd.f32 %v610_v10, %v366_v31  ;;  %v473_v34 = vadd.f32 %v610_v10, %v472_v32 }
  0xdd   : > { %v670_v35 = vpop.f32.mrf.mxu0  ;;  %v684_v36 = vpop.f32.mrf.mxu1 }
  0xde   : > { %495 = vst.msk [vmem:[%s811_s6 + $0x40] sm:$0xff] %vm255_vm0, %v367_v33  ;;  %631 = vst.msk [vmem:[%s811_s6 + $0x48] sm:$0xff] %vm255_vm0, %v473_v34  ;;  %v382_v37 = vadd.f32 %v670_v35, %v610_v10  ;;  %v488_v38 = vadd.f32 %v684_v36, %v610_v10 }
  0xdf   : > { %v376_v39 = vpop.f32.mrf.mxu0  ;;  %v482_v40 = vpop.f32.mrf.mxu1 }
  0xe0   : > { %498 = vst.msk [vmem:[%s811_s6 + $0x70] sm:$0xff] %vm255_vm0, %v382_v37  ;;  %634 = vst.msk [vmem:[%s811_s6 + $0x78] sm:$0xff] %vm255_vm0, %v488_v38  ;;  %v377_v41 = vadd.f32 %v610_v10, %v376_v39  ;;  %v483_v42 = vadd.f32 %v610_v10, %v482_v40 }
  0xe2   : > { %497 = vst.msk [vmem:[%s811_s6 + $0x60] sm:$0xff] %vm255_vm0, %v377_v41  ;;  %633 = vst.msk [vmem:[%s811_s6 + $0x68] sm:$0xff] %vm255_vm0, %v483_v42 }
  0xe3 PF: > { %s14_s17 = sadd.s32 1, %s731_s17   ;;  %s859_s15 = smov %s727_s16 }
  0xe4   : > { %p11_p5 = scmp.ge.s32.totalorder %s14_s17, 4   ;;  %s860_s16 = smov %s862_s18 }
  0xe6   :  { %13 = sbr.rel (!%p11_p5) target bundleno = 2 (0x2), region = 67 }

// kernel: decoder_block_forward.4
= control target key start
LH: loop header
LB: loop body
LE: loop exit
PB: predicated region body
PF: predicated region fallthrough
CT: control target
= control target key end

     0   :  { %s8430_s24 = smov 0   ;;  %s11054_s0 = inlined_call_operand.vmem [shape: f32[2,16,16,4], index: 0, kind: input, shape index: {}]   ;;  %s11055_s1 = inlined_call_operand.vmem [shape: f32[2,16,16,4], index: 1, kind: input, shape index: {}]   ;;  %s11056_s2 = inlined_call_operand.vmem [shape: f32[3,3,4,4], index: 2, kind: input, shape index: {}]   ;;  %s11057_s3 = inlined_call_operand.vmem [shape: f32[3,3,4,4], index: 3, kind: input, shape index: {}]   ;;  %s11058_s4 = inlined_call_operand.vmem [shape: f32[1,4], index: 4, kind: input, shape index: {}]   ;;  %s11059_s5 = inlined_call_operand.vmem [shape: f32[2,16,16,4], index: 5, kind: output, shape index: {0}]   ;;  %s11060_s6 = inlined_call_operand.vmem [shape: f32[2,1,4], index: 6, kind: output, shape index: {1}]   ;;  %s11061_s7 = inlined_call_operand.vmem [shape: f32[2,1,4], index: 7, kind: output, shape index: {2}]  }
   0x1 LB: > { %s6059_s25 = sadd.s32 4294967295, %s8387_s24   ;;  %p6063_p0 = scmp.ge.s32.totalorder %s8387_s24, 1  ;;  %s8387_s24 = sphi %s8430_s24, %s18_s24  }
   0x2   : > { %p252_p1 = scmp.lt.s32.totalorder %s8387_s24, 3 }
   0x4   : > { %p253_p2 = pnand %p6063_p0, %p252_p1 }
   0x6   : > { %256 = sbr.rel (%p253_p2) target bundleno = 903 (0x387), region = 40 }
   0xb   : > { %v437_v0 = vld [vmem:[%s11057_s3] sm:$0xf]  ;;  %vm534_vm0 = vcmask 1043456   ;;  %p295_p3 = scmp.lt.s32.totalorder %s6059_s25, 1  ;;  %v6137_v2 = vld [vmem:[%s11057_s3 + $0x4] sm:$0xf] }
   0xc   : > { %v436_v1 = vld [vmem:[%s11056_s2] sm:$0xf]  ;;  %7280 = vmatprep.subr.msk.mxu0 %vm534_vm0, %v437_v0  ;;  %v6136_v3 = vld [vmem:[%s11056_s2 + $0x4] sm:$0xf]  ;;  %vm380_vm1 = vcmask 31744   ;;  %vm383_vm2 = vcmask 25600  }
   0xd   : > { %7330 = vmatprep.subr.msk.mxu1 %vm534_vm0, %v436_v1  ;;  %7281 = vmatpush3.msk.msra.mxu0 %vm534_vm0, %v437_v0  ;;  %s11209_s25 = smov (!%p295_p3, %s6059_s25), 1  ;;  %v8500_v10 = vld [vmem:[%s11057_s3 + $0x8] sm:$0xf]  ;;  %vm5939_vm3 = vcmask 24576  }
   0xe   : > { %7331 = vmatpush3.msk.msra.mxu1 %vm534_vm0, %v436_v1  ;;  %7380 = vmatprep.subr.msk.mxu0 %vm534_vm0, %v6137_v2  ;;  %s8459_s11 = sshll.u32 %s11209_s25, 8  ;;  %v8511_v12 = vld [vmem:[%s11056_s2 + $0x8] sm:$0xf]  ;;  %s312_s15 = scalar_lea.vmem %s11060_s6, %s11209_s25 }
   0xf   : > { %7430 = vmatprep.subr.msk.mxu1 %vm534_vm0, %v6136_v3  ;;  %s8465_s14 = scalar_lea.vmem %s11055_s1, %s8459_s11  ;;  %s8474_s17 = scalar_lea.vmem %s11054_s0, %s8459_s11 }
  0x10   : > { %v8468_v4 = vld [vmem:[%s8465_s14] sm:$0xff]  ;;  %v8477_v5 = vld [vmem:[%s8465_s14 + $0x8] sm:$0xff]  ;;  %v8488_v8 = vld [vmem:[%s8465_s14 + $0x10] sm:$0xff]  ;;  %s10586_s9 = scalar_lea.vmem %s11059_s5, %s8459_s11  ;;  %s315_s19 = scalar_lea.vmem %s11061_s7, %s11209_s25 }
  0x11   : > { %11116 = vst [vmem:[#allocation3_spill] sm:$0xff] %v8468_v4  ;;  %7282 = vmatprep.mubr.msk.f32.mxu0 %vm380_vm1, %v8468_v4  ;;  %v8482_v6 = vld [vmem:[%s8474_s17] sm:$0xff]  ;;  %v8485_v7 = vld [vmem:[%s8474_s17 + $0x8] sm:$0xff]  ;;  %v8495_v9 = vld [vmem:[%s8474_s17 + $0x10] sm:$0xff] }
  0x12   : > { %7332 = vmatprep.mubr.msk.f32.mxu1 %vm380_vm1, %v8482_v6  ;;  %7283 = vmatmul.mubr.msk.f32.vlgmr.msra.gmra.mxu0 %vm380_vm1, %v8477_v5  ;;  %v8506_v11 = vld [vmem:[%s8465_s14 + $0x18] sm:$0xff]  ;;  %v8520_v14 = vld [vmem:[%s8465_s14 + $0x20] sm:$0xff]  ;;  %v8538_v16 = vld [vmem:[%s8465_s14 + $0x28] sm:$0xff] }
  0x13   : > { %7333 = vmatmul.mubr.msk.f32.vlgmr.msra.gmra.mxu1 %vm380_vm1, %v8485_v7  ;;  %7381 = vmatpush3.msk.msra.mxu0 %vm534_vm0, %v6137_v2  ;;  %v8517_v13 = vld [vmem:[%s8474_s17 + $0x18] sm:$0xff]  ;;  %v8525_v15 = vld [vmem:[%s8474_s17 + $0x20] sm:$0xff]  ;;  %v8543_v17 = vld [vmem:[%s8474_s17 + $0x28] sm:$0xff] }
  0x14   : > { %7431 = vmatpush3.msk.msra.mxu1 %vm534_vm0, %v6136_v3  ;;  %7285 = vmatprep.mubr.msk.f32.mxu0 %vm380_vm1, %v8488_v8  ;;  %v8546_v18 = vld [vmem:[%s8465_s14 + $0x30] sm:$0xff]  ;;  %v8558_v20 = vld [vmem:[%s8465_s14 + $0x38] sm:$0xff]  ;;  %v8566_v22 = vld [vmem:[%s8465_s14 + $0x40] sm:$0xff] }
  0x15   : > { %7335 = vmatprep.mubr.msk.f32.mxu1 %vm380_vm1, %v8495_v9  ;;  %7480 = vmatprep.subr.msk.mxu0 %vm534_vm0, %v8500_v10  ;;  %v8549_v19 = vld [vmem:[%s8474_s17 + $0x30] sm:$0xff]  ;;  %v8563_v21 = vld [vmem:[%s8474_s17 + $0x38] sm:$0xff]  ;;  %v8569_v23 = vld [vmem:[%s8474_s17 + $0x40] sm:$0xff] }
  0x16   : > { %7286 = vmatmul.mubr.msk.f32.gmra.mxu0 %vm380_vm1, %v8506_v11  ;;  %7530 = vmatprep.subr.msk.mxu1 %vm534_vm0, %v8511_v12  ;;  %v8578_v24 = vld [vmem:[%s8465_s14 + $0x48] sm:$0xff]  ;;  %v8586_v26 = vld [vmem:[%s8465_s14 + $0x50] sm:$0xff]  ;;  %v8598_v28 = vld [vmem:[%s8465_s14 + $0x58] sm:$0xff] }
  0x17   : > { %7336 = vmatmul.mubr.msk.f32.gmra.mxu1 %vm380_vm1, %v8517_v13  ;;  %7288 = vmatprep.mubr.msk.f32.mxu0 %vm380_vm1, %v8520_v14  ;;  %v8583_v25 = vld [vmem:[%s8474_s17 + $0x48] sm:$0xff]  ;;  %v8589_v27 = vld [vmem:[%s8474_s17 + $0x50] sm:$0xff]  ;;  %v8603_v29 = vld [vmem:[%s8474_s17 + $0x58] sm:$0xff] }
  0x18   : > { %7338 = vmatprep.mubr.msk.f32.mxu1 %vm380_vm1, %v8525_v15  ;;  %v8606_v30 = vld [vmem:[%s8465_s14 + $0x60] sm:$0xff]  ;;  %v8618_v32 = vld [vmem:[%s8465_s14 + $0x68] sm:$0xff]  ;;  %v8626_v34 = vld [vmem:[%s8465_s14 + $0x70] sm:$0xff] }
  0x19   : > { %v8609_v31 = vld [vmem:[%s8474_s17 + $0x60] sm:$0xff]  ;;  %v8623_v33 = vld [vmem:[%s8474_s17 + $0x68] sm:$0xff]  ;;  %v8629_v35 = vld [vmem:[%s8474_s17 + $0x70] sm:$0xff] }
  0x1a   : > { %7289 = vmatmul.mubr.msk.f32.gmra.mxu0 %vm380_vm1, %v8538_v16  ;;  %v8638_v36 = vld [vmem:[%s8465_s14 + $0x78] sm:$0xff]  ;;  %v8646_v38 = vld [vmem:[%s8465_s14 + $0x80] sm:$0xff]  ;;  %v8658_v40 = vld [vmem:[%s8465_s14 + $0x88] sm:$0xff] }
  0x1b   : > { %7339 = vmatmul.mubr.msk.f32.gmra.mxu1 %vm380_vm1, %v8543_v17  ;;  %7291 = vmatprep.mubr.msk.f32.mxu0 %vm380_vm1, %v8546_v18  ;;  %v8643_v37 = vld [vmem:[%s8474_s17 + $0x78] sm:$0xff]  ;;  %v8649_v39 = vld [vmem:[%s8474_s17 + $0x80] sm:$0xff]  ;;  %v8663_v41 = vld [vmem:[%s8474_s17 + $0x88] sm:$0xff] }
  0x1c   : > { %7341 = vmatprep.mubr.msk.f32.mxu1 %vm380_vm1, %v8549_v19  ;;  %v8666_v42 = vld [vmem:[%s8465_s14 + $0x90] sm:$0xff]  ;;  %v8678_v44 = vld [vmem:[%s8465_s14 + $0x98] sm:$0xff]  ;;  %v8686_v46 = vld [vmem:[%s8465_s14 + $0xa0] sm:$0xff] }
  0x1d   : > { %v8669_v43 = vld [vmem:[%s8474_s17 + $0x90] sm:$0xff]  ;;  %v8683_v45 = vld [vmem:[%s8474_s17 + $0x98] sm:$0xff]  ;;  %v8689_v47 = vld [vmem:[%s8474_s17 + $0xa0] sm:$0xff] }
  0x1e   : > { %7292 = vmatmul.mubr.msk.f32.gmra.mxu0 %vm380_vm1, %v8558_v20  ;;  %v8698_v48 = vld [vmem:[%s8465_s14 + $0xa8] sm:$0xff]  ;;  %v8706_v50 = vld [vmem:[%s8465_s14 + $0xb0] sm:$0xff]  ;;  %v8718_v52 = vld [vmem:[%s8465_s14 + $0xb8] sm:$0xff] }
  0x1f   : > { %7342 = vmatmul.mubr.msk.f32.gmra.mxu1 %vm380_vm1, %v8563_v21  ;;  %7294 = vmatprep.mubr.msk.f32.mxu0 %vm380_vm1, %v8566_v22  ;;  %v8703_v49 = vld [vmem:[%s8474_s17 + $0xa8] sm:$0xff]  ;;  %v8709_v51 = vld [vmem:[%s8474_s17 + $0xb0] sm:$0xff]  ;;  %v8723_v53 = vld [vmem:[%s8474_s17 + $0xb8] sm:$0xff] }
  0x20   : > { %7344 = vmatprep.mubr.msk.f32.mxu1 %vm380_vm1, %v8569_v23  ;;  %v8726_v54 = vld [vmem:[%s8465_s14 + $0xc0] sm:$0xff]  ;;  %v8738_v56 = vld [vmem:[%s8465_s14 + $0xc8] sm:$0xff]  ;;  %v8746_v58 = vld [vmem:[%s8465_s14 + $0xd0] sm:$0xff] }
  0x21   : > { %v8729_v55 = vld [vmem:[%s8474_s17 + $0xc0] sm:$0xff]  ;;  %v8743_v57 = vld [vmem:[%s8474_s17 + $0xc8] sm:$0xff]  ;;  %11118 = vst [vmem:[#allocation5_spill] sm:$0xff] %v8746_v58  ;;  %v8749_v59 = vld [vmem:[%s8474_s17 + $0xd0] sm:$0xff] }
  0x22   : > { %7295 = vmatmul.mubr.msk.f32.gmra.mxu0 %vm380_vm1, %v8578_v24  ;;  %11117 = vst [vmem:[#allocation4_spill] sm:$0xff] %v8729_v55  ;;  %v8758_v60 = vld [vmem:[%s8465_s14 + $0xd8] sm:$0xff]  ;;  %v8766_v62 = vld [vmem:[%s8465_s14 + $0xe0] sm:$0xff]  ;;  %v8778_v0 = vld [vmem:[%s8465_s14 + $0xe8] sm:$0xff] }
  0x23   : > { %7345 = vmatmul.mubr.msk.f32.gmra.mxu1 %vm380_vm1, %v8583_v25  ;;  %7297 = vmatprep.mubr.msk.f32.mxu0 %vm380_vm1, %v8586_v26  ;;  %11119 = vst [vmem:[#allocation6_spill] sm:$0xff] %v8758_v60  ;;  %v8763_v61 = vld [vmem:[%s8474_s17 + $0xd8] sm:$0xff]  ;;  %11121 = vst [vmem:[#allocation8_spill] sm:$0xff] %v8766_v62  ;;  %v8769_v63 = vld [vmem:[%s8474_s17 + $0xe0] sm:$0xff] }
  0x24   : > { %7347 = vmatprep.mubr.msk.f32.mxu1 %vm380_vm1, %v8589_v27  ;;  %11120 = vst [vmem:[#allocation7_spill] sm:$0xff] %v8763_v61  ;;  %11122 = vst [vmem:[#allocation9_spill] sm:$0xff] %v8769_v63  ;;  %v8783_v1 = vld [vmem:[%s8474_s17 + $0xe8] sm:$0xff]  ;;  %v8786_v2 = vld [vmem:[%s8465_s14 + $0xf0] sm:$0xff] }
  0x25   : > { %11123 = vst [vmem:[#allocation10_spill] sm:$0xff] %v8778_v0  ;;  %11124 = vst [vmem:[#allocation11_spill] sm:$0xff] %v8783_v1  ;;  %v8789_v3 = vld [vmem:[%s8474_s17 + $0xf0] sm:$0xff] }
  0x26   : > { %7298 = vmatmul.mubr.msk.f32.gmra.mxu0 %vm380_vm1, %v8598_v28  ;;  %11125 = vst [vmem:[#allocation12_spill] sm:$0xff] %v8786_v2  ;;  %11126 = vst [vmem:[#allocation13_spill] sm:$0xff] %v8789_v3 }
  0x27   : > { %7348 = vmatmul.mubr.msk.f32.gmra.mxu1 %vm380_vm1, %v8603_v29  ;;  %7300 = vmatprep.mubr.msk.f32.mxu0 %vm380_vm1, %v8606_v30 }
  0x28   : > { %7350 = vmatprep.mubr.msk.f32.mxu1 %vm380_vm1, %v8609_v31 }
  0x2a   : > { %7301 = vmatmul.mubr.msk.f32.gmra.mxu0 %vm380_vm1, %v8618_v32 }
  0x2b   : > { %7351 = vmatmul.mubr.msk.f32.gmra.mxu1 %vm380_vm1, %v8623_v33  ;;  %7303 = vmatprep.mubr.msk.f32.mxu0 %vm380_vm1, %v8626_v34 }
  0x2c   : > { %7353 = vmatprep.mubr.msk.f32.mxu1 %vm380_vm1, %v8629_v35 }
  0x2e   : > { %7304 = vmatmul.mubr.msk.f32.gmra.mxu0 %vm380_vm1, %v8638_v36 }
  0x2f   : > { %7354 = vmatmul.mubr.msk.f32.gmra.mxu1 %vm380_vm1, %v8643_v37  ;;  %7306 = vmatprep.mubr.msk.f32.mxu0 %vm380_vm1, %v8646_v38 }
  0x30   : > { %7356 = vmatprep.mubr.msk.f32.mxu1 %vm380_vm1, %v8649_v39 }
  0x32   : > { %7307 = vmatmul.mubr.msk.f32.gmra.mxu0 %vm380_vm1, %v8658_v40 }
  0x33   : > { %7357 = vmatmul.mubr.msk.f32.gmra.mxu1 %vm380_vm1, %v8663_v41  ;;  %7309 = vmatprep.mubr.msk.f32.mxu0 %vm380_vm1, %v8666_v42 }
  0x34   : > { %7359 = vmatprep.mubr.msk.f32.mxu1 %vm380_vm1, %v8669_v43 }
  0x36   : > { %7310 = vmatmul.mubr.msk.f32.gmra.mxu0 %vm380_vm1, %v8678_v44 }
  0x37   : > { %7360 = vmatmul.mubr.msk.f32.gmra.mxu1 %vm380_vm1, %v8683_v45  ;;  %7312 = vmatprep.mubr.msk.f32.mxu0 %vm380_vm1, %v8686_v46 }
  0x38   : > { %7362 = vmatprep.mubr.msk.f32.mxu1 %vm380_vm1, %v8689_v47 }
  0x3a   : > { %7313 = vmatmul.mubr.msk.f32.gmra.mxu0 %vm380_vm1, %v8698_v48 }
  0x3b   : > { %7363 = vmatmul.mubr.msk.f32.gmra.mxu1 %vm380_vm1, %v8703_v49  ;;  %7315 = vmatprep.mubr.msk.f32.mxu0 %vm380_vm1, %v8706_v50 }
  0x3c   : > { %7365 = vmatprep.mubr.msk.f32.mxu1 %vm380_vm1, %v8709_v51 }
  0x3e   : > { %7316 = vmatmul.mubr.msk.f32.gmra.mxu0 %vm380_vm1, %v8718_v52 }
  0x3f   : > { %7366 = vmatmul.mubr.msk.f32.gmra.mxu1 %vm380_vm1, %v8723_v53  ;;  %7318 = vmatprep.mubr.msk.f32.mxu0 %vm380_vm1, %v8726_v54 }
  0x40   : > { %7368 = vmatprep.mubr.msk.f32.mxu1 %vm380_vm1, %v8729_v55 }
  0x42   : > { %7319 = vmatmul.mubr.msk.f32.gmra.mxu0 %vm380_vm1, %v8738_v56 }
  0x43   : > { %7369 = vmatmul.mubr.msk.f32.gmra.mxu1 %vm380_vm1, %v8743_v57  ;;  %7321 = vmatprep.mubr.msk.f32.mxu0 %vm380_vm1, %v8746_v58 }
  0x44   : > { %7371 = vmatprep.mubr.msk.f32.mxu1 %vm380_vm1, %v8749_v59 }
  0x46   : > { %7322 = vmatmul.mubr.msk.f32.gmra.mxu0 %vm380_vm1, %v8758_v60 }
  0x47   : > { %7372 = vmatmul.mubr.msk.f32.gmra.mxu1 %vm380_vm1, %v8763_v61  ;;  %7324 = vmatprep.mubr.msk.f32.mxu0 %vm380_vm1, %v8766_v62  ;;  %v8798_v62 = vld [vmem:[%s8465_s14 + $0xf8] sm:$0xff]  ;;  %v8389_v61 = vmov 0.0  }
  0x48   : > { %7374 = vmatprep.mubr.msk.f32.mxu1 %vm380_vm1, %v8769_v63  ;;  %11127 = vst [vmem:[#allocation14_spill] sm:$0xff] %v8798_v62  ;;  %v8803_v63 = vld [vmem:[%s8474_s17 + $0xf8] sm:$0xff]  ;;  %389 = vst.msk [vmem:[#allocation2 + $0x38] sm:$0xff] %vm380_vm1, %v8389_v61 }
  0x49   : > { %11128 = vst [vmem:[#allocation15_spill] sm:$0xff] %v8803_v63  ;;  %390 = vst.msk [vmem:[#allocation2 + $0x40] sm:$0x3] %vm383_vm2, %v8389_v61 }
  0x4a   : > { %7325 = vmatmul.mubr.msk.f32.gmra.mxu0 %vm380_vm1, %v8778_v0  ;;  %381 = vst.msk [vmem:[#allocation2] sm:$0xff] %vm380_vm1, %v8389_v61  ;;  %382 = vst.msk [vmem:[#allocation2 + $0x8] sm:$0xff] %vm380_vm1, %v8389_v61 }
  0x4b   : > { %7375 = vmatmul.mubr.msk.f32.gmra.mxu1 %vm380_vm1, %v8783_v1  ;;  %7327 = vmatprep.mubr.msk.f32.mxu0 %vm380_vm1, %v8786_v2  ;;  %384 = vst.msk [vmem:[#allocation2 + $0x10] sm:$0x3] %vm383_vm2, %v8389_v61  ;;  %387 = vst.msk [vmem:[#allocation2 + $0x28] sm:$0x3] %vm383_vm2, %v8389_v61 }
  0x4c   : > { %7377 = vmatprep.mubr.msk.f32.mxu1 %vm380_vm1, %v8789_v3  ;;  %385 = vst.msk [vmem:[#allocation2 + $0x18] sm:$0xff] %vm380_vm1, %v8389_v61  ;;  %386 = vst.msk [vmem:[#allocation2 + $0x20] sm:$0xff] %vm380_vm1, %v8389_v61 }
  0x4d   : > { %388 = vst.msk [vmem:[#allocation2 + $0x30] sm:$0xff] %vm380_vm1, %v8389_v61  ;;  %391 = vst.msk [vmem:[#allocation2 + $0x48] sm:$0xff] %vm380_vm1, %v8389_v61 }
  0x4e   : > { %7328 = vmatmul.mubr.msk.f32.gmra.mxu0 %vm380_vm1, %v8798_v62  ;;  %392 = vst.msk [vmem:[#allocation2 + $0x50] sm:$0xff] %vm380_vm1, %v8389_v61  ;;  %394 = vst.msk [vmem:[#allocation2 + $0x60] sm:$0xff] %vm380_vm1, %v8389_v61  ;;  %v8872_v62 = vld [vmem:[%s11057_s3 + $0xc] sm:$0xf] }
  0x4f   : > { %393 = vst.msk [vmem:[#allocation2 + $0x58] sm:$0x3] %vm383_vm2, %v8389_v61  ;;  %396 = vst.msk [vmem:[#allocation2 + $0x70] sm:$0x3] %vm383_vm2, %v8389_v61  ;;  %7378 = vmatmul.mubr.msk.f32.gmra.mxu1 %vm380_vm1, %v8803_v63  ;;  %7382 = vmatprep.mubr.msk.f32.mxu0 %vm380_vm1, %v8468_v4 }
  0x50   : > { %395 = vst.msk [vmem:[#allocation2 + $0x68] sm:$0xff] %vm380_vm1, %v8389_v61  ;;  %397 = vst.msk [vmem:[#allocation2 + $0x78] sm:$0xff] %vm380_vm1, %v8389_v61  ;;  %7432 = vmatprep.mubr.msk.f32.mxu1 %vm380_vm1, %v8482_v6 }
  0x51   : > { %398 = vst.msk [vmem:[#allocation2 + $0x80] sm:$0xff] %vm380_vm1, %v8389_v61  ;;  %400 = vst.msk [vmem:[#allocation2 + $0x90] sm:$0xff] %vm380_vm1, %v8389_v61 }
  0x52   : > { %399 = vst.msk [vmem:[#allocation2 + $0x88] sm:$0x3] %vm383_vm2, %v8389_v61  ;;  %402 = vst.msk [vmem:[#allocation2 + $0xa0] sm:$0x3] %vm383_vm2, %v8389_v61  ;;  %7383 = vmatmul.mubr.msk.f32.vlgmr.msra.gmra.mxu0 %vm380_vm1, %v8477_v5 }
  0x53   : > { %401 = vst.msk [vmem:[#allocation2 + $0x98] sm:$0xff] %vm380_vm1, %v8389_v61  ;;  %403 = vst.msk [vmem:[#allocation2 + $0xa8] sm:$0xff] %vm380_vm1, %v8389_v61  ;;  %7433 = vmatmul.mubr.msk.f32.vlgmr.msra.gmra.mxu1 %vm380_vm1, %v8485_v7  ;;  %7481 = vmatpush3.msk.msra.mxu0 %vm534_vm0, %v8500_v10  ;;  %v11129_v10 = vld [vmem:[#allocation7_spill] sm:$0xff] }
  0x54   : > { %404 = vst.msk [vmem:[#allocation2 + $0xb0] sm:$0xff] %vm380_vm1, %v8389_v61  ;;  %406 = vst.msk [vmem:[#allocation2 + $0xc0] sm:$0xff] %vm380_vm1, %v8389_v61  ;;  %7531 = vmatpush3.msk.msra.mxu1 %vm534_vm0, %v8511_v12  ;;  %7385 = vmatprep.mubr.msk.f32.mxu0 %vm380_vm1, %v8488_v8  ;;  %v11130_v12 = vld [vmem:[#allocation8_spill] sm:$0xff] }
  0x55   : > { %405 = vst.msk [vmem:[#allocation2 + $0xb8] sm:$0x3] %vm383_vm2, %v8389_v61  ;;  %408 = vst.msk [vmem:[#allocation2 + $0xd0] sm:$0x3] %vm383_vm2, %v8389_v61  ;;  %7435 = vmatprep.mubr.msk.f32.mxu1 %vm380_vm1, %v8495_v9  ;;  %7580 = vmatprep.subr.msk.mxu0 %vm534_vm0, %v8872_v62 }
  0x56   : > { %407 = vst.msk [vmem:[#allocation2 + $0xc8] sm:$0xff] %vm380_vm1, %v8389_v61  ;;  %409 = vst.msk [vmem:[#allocation2 + $0xd8] sm:$0xff] %vm380_vm1, %v8389_v61  ;;  %7386 = vmatmul.mubr.msk.f32.gmra.mxu0 %vm380_vm1, %v8506_v11 }
  0x57   : > { %410 = vst.msk [vmem:[#allocation2 + $0xe0] sm:$0xff] %vm380_vm1, %v8389_v61  ;;  %412 = vst.msk [vmem:[#allocation2 + $0xf0] sm:$0xff] %vm380_vm1, %v8389_v61  ;;  %7436 = vmatmul.mubr.msk.f32.gmra.mxu1 %vm380_vm1, %v8517_v13  ;;  %7388 = vmatprep.mubr.msk.f32.mxu0 %vm380_vm1, %v8520_v14 }
  0x58   : > { %411 = vst.msk [vmem:[#allocation2 + $0xe8] sm:$0x3] %vm383_vm2, %v8389_v61  ;;  %414 = vst.msk [vmem:[#allocation2 + $0x100] sm:$0x3] %vm383_vm2, %v8389_v61  ;;  %7438 = vmatprep.mubr.msk.f32.mxu1 %vm380_vm1, %v8525_v15 }
  0x59   : > { %413 = vst.msk [vmem:[#allocation2 + $0xf8] sm:$0xff] %vm380_vm1, %v8389_v61  ;;  %415 = vst.msk [vmem:[#allocation2 + $0x108] sm:$0xff] %vm380_vm1, %v8389_v61 }
  0x5a   : > { %416 = vst.msk [vmem:[#allocation2 + $0x110] sm:$0xff] %vm380_vm1, %v8389_v61  ;;  %418 = vst.msk [vmem:[#allocation2 + $0x120] sm:$0xff] %vm380_vm1, %v8389_v61  ;;  %7389 = vmatmul.mubr.msk.f32.gmra.mxu0 %vm380_vm1, %v8538_v16 }
  0x5b   : > { %417 = vst.msk [vmem:[#allocation2 + $0x118] sm:$0x3] %vm383_vm2, %v8389_v61  ;;  %420 = vst.msk [vmem:[#allocation2 + $0x130] sm:$0x3] %vm383_vm2, %v8389_v61  ;;  %7439 = vmatmul.mubr.msk.f32.gmra.mxu1 %vm380_vm1, %v8543_v17  ;;  %7391 = vmatprep.mubr.msk.f32.mxu0 %vm380_vm1, %v8546_v18 }
  0x5c   : > { %419 = vst.msk [vmem:[#allocation2 + $0x128] sm:$0xff] %vm380_vm1, %v8389_v61  ;;  %421 = vst.msk [vmem:[#allocation2 + $0x138] sm:$0xff] %vm380_vm1, %v8389_v61  ;;  %7441 = vmatprep.mubr.msk.f32.mxu1 %vm380_vm1, %v8549_v19 }
  0x5d   : > { %422 = vst.msk [vmem:[#allocation2 + $0x140] sm:$0xff] %vm380_vm1, %v8389_v61  ;;  %424 = vst.msk [vmem:[#allocation2 + $0x150] sm:$0xff] %vm380_vm1, %v8389_v61 }
  0x5e   : > { %423 = vst.msk [vmem:[#allocation2 + $0x148] sm:$0x3] %vm383_vm2, %v8389_v61  ;;  %426 = vst.msk [vmem:[#allocation2 + $0x160] sm:$0x3] %vm383_vm2, %v8389_v61  ;;  %7392 = vmatmul.mubr.msk.f32.gmra.mxu0 %vm380_vm1, %v8558_v20 }
  0x5f   : > { %425 = vst.msk [vmem:[#allocation2 + $0x158] sm:$0xff] %vm380_vm1, %v8389_v61  ;;  %427 = vst.msk [vmem:[#allocation2 + $0x168] sm:$0xff] %vm380_vm1, %v8389_v61  ;;  %7442 = vmatmul.mubr.msk.f32.gmra.mxu1 %vm380_vm1, %v8563_v21  ;;  %7394 = vmatprep.mubr.msk.f32.mxu0 %vm380_vm1, %v8566_v22 }
  0x60   : > { %428 = vst.msk [vmem:[#allocation2 + $0x170] sm:$0xff] %vm380_vm1, %v8389_v61  ;;  %430 = vst.msk [vmem:[#allocation2 + $0x180] sm:$0xff] %vm380_vm1, %v8389_v61  ;;  %7444 = vmatprep.mubr.msk.f32.mxu1 %vm380_vm1, %v8569_v23 }
  0x61   : > { %429 = vst.msk [vmem:[#allocation2 + $0x178] sm:$0x3] %vm383_vm2, %v8389_v61  ;;  %432 = vst.msk [vmem:[#allocation2 + $0x190] sm:$0x3] %vm383_vm2, %v8389_v61 }
  0x62   : > { %431 = vst.msk [vmem:[#allocation2 + $0x188] sm:$0xff] %vm380_vm1, %v8389_v61  ;;  %433 = vst.msk [vmem:[#allocation2 + $0x198] sm:$0xff] %vm380_vm1, %v8389_v61  ;;  %7395 = vmatmul.mubr.msk.f32.gmra.mxu0 %vm380_vm1, %v8578_v24 }
  0x63   : > { %434 = vst.msk [vmem:[#allocation2 + $0x1a0] sm:$0xff] %vm380_vm1, %v8389_v61  ;;  %7445 = vmatmul.mubr.msk.f32.gmra.mxu1 %vm380_vm1, %v8583_v25  ;;  %7397 = vmatprep.mubr.msk.f32.mxu0 %vm380_vm1, %v8586_v26 }
  0x64   : > { %435 = vst.msk [vmem:[#allocation2 + $0x1a8] sm:$0x3] %vm383_vm2, %v8389_v61  ;;  %v8881_v61 = vld [vmem:[%s11056_s2 + $0xc] sm:$0xf]  ;;  %7447 = vmatprep.mubr.msk.f32.mxu1 %vm380_vm1, %v8589_v27 }
  0x65   : > { %7630 = vmatprep.subr.msk.mxu1 %vm534_vm0, %v8881_v61 }
  0x66   : > { %7398 = vmatmul.mubr.msk.f32.gmra.mxu0 %vm380_vm1, %v8598_v28 }
  0x67   : > { %7448 = vmatmul.mubr.msk.f32.gmra.mxu1 %vm380_vm1, %v8603_v29  ;;  %7400 = vmatprep.mubr.msk.f32.mxu0 %vm380_vm1, %v8606_v30 }
  0x68   : > { %7450 = vmatprep.mubr.msk.f32.mxu1 %vm380_vm1, %v8609_v31 }
  0x6a   : > { %7401 = vmatmul.mubr.msk.f32.gmra.mxu0 %vm380_vm1, %v8618_v32 }
  0x6b   : > { %7451 = vmatmul.mubr.msk.f32.gmra.mxu1 %vm380_vm1, %v8623_v33  ;;  %7403 = vmatprep.mubr.msk.f32.mxu0 %vm380_vm1, %v8626_v34 }
  0x6c   : > { %7453 = vmatprep.mubr.msk.f32.mxu1 %vm380_vm1, %v8629_v35 }
  0x6e   : > { %7404 = vmatmul.mubr.msk.f32.gmra.mxu0 %vm380_vm1, %v8638_v36 }
  0x6f   : > { %7454 = vmatmul.mubr.msk.f32.gmra.mxu1 %vm380_vm1, %v8643_v37  ;;  %7406 = vmatprep.mubr.msk.f32.mxu0 %vm380_vm1, %v8646_v38 }
  0x70   : > { %7456 = vmatprep.mubr.msk.f32.mxu1 %vm380_vm1, %v8649_v39 }
  0x72   : > { %7407 = vmatmul.mubr.msk.f32.gmra.mxu0 %vm380_vm1, %v8658_v40 }
  0x73   : > { %7457 = vmatmul.mubr.msk.f32.gmra.mxu1 %vm380_vm1, %v8663_v41  ;;  %7409 = vmatprep.mubr.msk.f32.mxu0 %vm380_vm1, %v8666_v42 }
  0x74   : > { %7459 = vmatprep.mubr.msk.f32.mxu1 %vm380_vm1, %v8669_v43 }
  0x76   : > { %7410 = vmatmul.mubr.msk.f32.gmra.mxu0 %vm380_vm1, %v8678_v44 }
  0x77   : > { %7460 = vmatmul.mubr.msk.f32.gmra.mxu1 %vm380_vm1, %v8683_v45  ;;  %7412 = vmatprep.mubr.msk.f32.mxu0 %vm380_vm1, %v8686_v46 }
  0x78   : > { %7462 = vmatprep.mubr.msk.f32.mxu1 %vm380_vm1, %v8689_v47 }
  0x7a   : > { %7413 = vmatmul.mubr.msk.f32.gmra.mxu0 %vm380_vm1, %v8698_v48 }
  0x7b   : > { %7463 = vmatmul.mubr.msk.f32.gmra.mxu1 %vm380_vm1, %v8703_v49  ;;  %7415 = vmatprep.mubr.msk.f32.mxu0 %vm380_vm1, %v8706_v50 }
  0x7c   : > { %7465 = vmatprep.mubr.msk.f32.mxu1 %vm380_vm1, %v8709_v51 }
  0x7e   : > { %7416 = vmatmul.mubr.msk.f32.gmra.mxu0 %vm380_vm1, %v8718_v52 }
  0x7f   : > { %7466 = vmatmul.mubr.msk.f32.gmra.mxu1 %vm380_vm1, %v8723_v53  ;;  %7418 = vmatprep.mubr.msk.f32.mxu0 %vm380_vm1, %v8726_v54 }
  0x80   : > { %7468 = vmatprep.mubr.msk.f32.mxu1 %vm380_vm1, %v8729_v55  ;;  %v11131_v55 = vld [vmem:[#allocation9_spill] sm:$0xff] }
  0x82   : > { %7419 = vmatmul.mubr.msk.f32.gmra.mxu0 %vm380_vm1, %v8738_v56 }
  0x83   : > { %7469 = vmatmul.mubr.msk.f32.gmra.mxu1 %vm380_vm1, %v8743_v57  ;;  %7421 = vmatprep.mubr.msk.f32.mxu0 %vm380_vm1, %v8746_v58 }
  0x84   : > { %7471 = vmatprep.mubr.msk.f32.mxu1 %vm380_vm1, %v8749_v59 }
  0x86   : > { %7422 = vmatmul.mubr.msk.f32.gmra.mxu0 %vm380_vm1, %v8758_v60  ;;  %v11132_v60 = vld [vmem:[#allocation14_spill] sm:$0xff] }
  0x87   : > { %7472 = vmatmul.mubr.msk.f32.gmra.mxu1 %vm380_vm1, %v11129_v10  ;;  %7424 = vmatprep.mubr.msk.f32.mxu0 %vm380_vm1, %v11130_v12 }
  0x88   : > { %7474 = vmatprep.mubr.msk.f32.mxu1 %vm380_vm1, %v11131_v55 }
  0x8a   : > { %7425 = vmatmul.mubr.msk.f32.gmra.mxu0 %vm380_vm1, %v8778_v0 }
  0x8b   : > { %7475 = vmatmul.mubr.msk.f32.gmra.mxu1 %vm380_vm1, %v8783_v1  ;;  %7427 = vmatprep.mubr.msk.f32.mxu0 %vm380_vm1, %v8786_v2  ;;  %v9018_v2 = vld [vmem:[%s11057_s3 + $0x10] sm:$0xf] }
  0x8c   : > { %7477 = vmatprep.mubr.msk.f32.mxu1 %vm380_vm1, %v8789_v3 }
  0x8e   : > { %7428 = vmatmul.mubr.msk.f32.gmra.mxu0 %vm380_vm1, %v11132_v60 }
  0x8f   : > { %7478 = vmatmul.mubr.msk.f32.gmra.mxu1 %vm380_vm1, %v8803_v63  ;;  %7482 = vmatprep.mubr.msk.f32.mxu0 %vm380_vm1, %v8468_v4  ;;  %v9027_v4 = vld [vmem:[%s11056_s2 + $0x10] sm:$0xf] }
  0x90   : > { %7532 = vmatprep.mubr.msk.f32.mxu1 %vm380_vm1, %v8482_v6 }
  0x92   : > { %7483 = vmatmul.mubr.msk.f32.vlgmr.msra.gmra.mxu0 %vm380_vm1, %v8477_v5 }
  0x93   : > { %7533 = vmatmul.mubr.msk.f32.vlgmr.msra.gmra.mxu1 %vm380_vm1, %v8485_v7  ;;  %7581 = vmatpush3.msk.msra.mxu0 %vm534_vm0, %v8872_v62  ;;  %v11133_v62 = vld [vmem:[#allocation4_spill] sm:$0xff] }
  0x94   : > { %7631 = vmatpush3.msk.msra.mxu1 %vm534_vm0, %v8881_v61  ;;  %7485 = vmatprep.mubr.msk.f32.mxu0 %vm380_vm1, %v8488_v8  ;;  %v11134_v61 = vld [vmem:[#allocation6_spill] sm:$0xff] }
  0x95   : > { %7535 = vmatprep.mubr.msk.f32.mxu1 %vm380_vm1, %v8495_v9  ;;  %7680 = vmatprep.subr.msk.mxu0 %vm534_vm0, %v9018_v2 }
  0x96   : > { %7486 = vmatmul.mubr.msk.f32.gmra.mxu0 %vm380_vm1, %v8506_v11  ;;  %7730 = vmatprep.subr.msk.mxu1 %vm534_vm0, %v9027_v4 }
  0x97   : > { %7536 = vmatmul.mubr.msk.f32.gmra.mxu1 %vm380_vm1, %v8517_v13  ;;  %7488 = vmatprep.mubr.msk.f32.mxu0 %vm380_vm1, %v8520_v14 }
  0x98   : > { %7538 = vmatprep.mubr.msk.f32.mxu1 %vm380_vm1, %v8525_v15 }
  0x9a   : > { %7489 = vmatmul.mubr.msk.f32.gmra.mxu0 %vm380_vm1, %v8538_v16 }
  0x9b   : > { %7539 = vmatmul.mubr.msk.f32.gmra.mxu1 %vm380_vm1, %v8543_v17  ;;  %7491 = vmatprep.mubr.msk.f32.mxu0 %vm380_vm1, %v8546_v18 }
  0x9c   : > { %7541 = vmatprep.mubr.msk.f32.mxu1 %vm380_vm1, %v8549_v19 }
  0x9e   : > { %7492 = vmatmul.mubr.msk.f32.gmra.mxu0 %vm380_vm1, %v8558_v20 }
  0x9f   : > { %7542 = vmatmul.mubr.msk.f32.gmra.mxu1 %vm380_vm1, %v8563_v21  ;;  %7494 = vmatprep.mubr.msk.f32.mxu0 %vm380_vm1, %v8566_v22 }
  0xa0   : > { %7544 = vmatprep.mubr.msk.f32.mxu1 %vm380_vm1, %v8569_v23 }
  0xa2   : > { %7495 = vmatmul.mubr.msk.f32.gmra.mxu0 %vm380_vm1, %v8578_v24 }
  0xa3   : > { %7545 = vmatmul.mubr.msk.f32.gmra.mxu1 %vm380_vm1, %v8583_v25  ;;  %7497 = vmatprep.mubr.msk.f32.mxu0 %vm380_vm1, %v8586_v26 }
  0xa4   : > { %7547 = vmatprep.mubr.msk.f32.mxu1 %vm380_vm1, %v8589_v27 }
  0xa6   : > { %7498 = vmatmul.mubr.msk.f32.gmra.mxu0 %vm380_vm1, %v8598_v28 }
  0xa7   : > { %7548 = vmatmul.mubr.msk.f32.gmra.mxu1 %vm380_vm1, %v8603_v29  ;;  %7500 = vmatprep.mubr.msk.f32.mxu0 %vm380_vm1, %v8606_v30 }
  0xa8   : > { %7550 = vmatprep.mubr.msk.f32.mxu1 %vm380_vm1, %v8609_v31 }
  0xaa   : > { %7501 = vmatmul.mubr.msk.f32.gmra.mxu0 %vm380_vm1, %v8618_v32 }
  0xab   : > { %7551 = vmatmul.mubr.msk.f32.gmra.mxu1 %vm380_vm1, %v8623_v33  ;;  %7503 = vmatprep.mubr.msk.f32.mxu0 %vm380_vm1, %v8626_v34 }
  0xac   : > { %7553 = vmatprep.mubr.msk.f32.mxu1 %vm380_vm1, %v8629_v35 }
  0xae   : > { %7504 = vmatmul.mubr.msk.f32.gmra.mxu0 %vm380_vm1, %v8638_v36 }
  0xaf   : > { %7554 = vmatmul.mubr.msk.f32.gmra.mxu1 %vm380_vm1, %v8643_v37  ;;  %7506 = vmatprep.mubr.msk.f32.mxu0 %vm380_vm1, %v8646_v38 }
  0xb0   : > { %7556 = vmatprep.mubr.msk.f32.mxu1 %vm380_vm1, %v8649_v39 }
  0xb2   : > { %7507 = vmatmul.mubr.msk.f32.gmra.mxu0 %vm380_vm1, %v8658_v40 }
  0xb3   : > { %7557 = vmatmul.mubr.msk.f32.gmra.mxu1 %vm380_vm1, %v8663_v41  ;;  %7509 = vmatprep.mubr.msk.f32.mxu0 %vm380_vm1, %v8666_v42 }
  0xb4   : > { %7559 = vmatprep.mubr.msk.f32.mxu1 %vm380_vm1, %v8669_v43 }
  0xb6   : > { %7510 = vmatmul.mubr.msk.f32.gmra.mxu0 %vm380_vm1, %v8678_v44 }
  0xb7   : > { %7560 = vmatmul.mubr.msk.f32.gmra.mxu1 %vm380_vm1, %v8683_v45  ;;  %7512 = vmatprep.mubr.msk.f32.mxu0 %vm380_vm1, %v8686_v46 }
  0xb8   : > { %7562 = vmatprep.mubr.msk.f32.mxu1 %vm380_vm1, %v8689_v47 }
  0xba   : > { %7513 = vmatmul.mubr.msk.f32.gmra.mxu0 %vm380_vm1, %v8698_v48 }
  0xbb   : > { %7563 = vmatmul.mubr.msk.f32.gmra.mxu1 %vm380_vm1, %v8703_v49  ;;  %7515 = vmatprep.mubr.msk.f32.mxu0 %vm380_vm1, %v8706_v50 }
  0xbc   : > { %7565 = vmatprep.mubr.msk.f32.mxu1 %vm380_vm1, %v8709_v51 }
  0xbe   : > { %7516 = vmatmul.mubr.msk.f32.gmra.mxu0 %vm380_vm1, %v8718_v52 }
  0xbf   : > { %7566 = vmatmul.mubr.msk.f32.gmra.mxu1 %vm380_vm1, %v8723_v53  ;;  %7518 = vmatprep.mubr.msk.f32.mxu0 %vm380_vm1, %v8726_v54 }
  0xc0   : > { %7568 = vmatprep.mubr.msk.f32.mxu1 %vm380_vm1, %v11133_v62 }
  0xc2   : > { %7519 = vmatmul.mubr.msk.f32.gmra.mxu0 %vm380_vm1, %v8738_v56 }
  0xc3   : > { %7569 = vmatmul.mubr.msk.f32.gmra.mxu1 %vm380_vm1, %v8743_v57  ;;  %7521 = vmatprep.mubr.msk.f32.mxu0 %vm380_vm1, %v8746_v58  ;;  %v11135_v58 = vld [vmem:[#allocation12_spill] sm:$0xff] }
  0xc4   : > { %7571 = vmatprep.mubr.msk.f32.mxu1 %vm380_vm1, %v8749_v59 }
  0xc6   : > { %7522 = vmatmul.mubr.msk.f32.gmra.mxu0 %vm380_vm1, %v11134_v61 }
  0xc7   : > { %7572 = vmatmul.mubr.msk.f32.gmra.mxu1 %vm380_vm1, %v11129_v10  ;;  %7524 = vmatprep.mubr.msk.f32.mxu0 %vm380_vm1, %v11130_v12  ;;  %v11136_v12 = vld [vmem:[#allocation3_spill] sm:$0xff] }
  0xc8   : > { %7574 = vmatprep.mubr.msk.f32.mxu1 %vm380_vm1, %v11131_v55 }
  0xca   : > { %7525 = vmatmul.mubr.msk.f32.gmra.mxu0 %vm380_vm1, %v8778_v0 }
  0xcb   : > { %7575 = vmatmul.mubr.msk.f32.gmra.mxu1 %vm380_vm1, %v8783_v1  ;;  %7527 = vmatprep.mubr.msk.f32.mxu0 %vm380_vm1, %v11135_v58  ;;  %v1088_v1 = vld [vmem:[#allocation2 + $0x32] sm:$0xff] }
  0xcc   : > { %7577 = vmatprep.mubr.msk.f32.mxu1 %vm380_vm1, %v8789_v3  ;;  %v9164_v3 = vld [vmem:[%s11057_s3 + $0x14] sm:$0xf] }
  0xce   : > { %7528 = vmatmul.mubr.msk.f32.gmra.mxu0 %vm380_vm1, %v11132_v60  ;;  %v1089_v60 = vld [vmem:[#allocation2 + $0x3a] sm:$0xff] }
  0xcf   : > { %7578 = vmatmul.mubr.msk.f32.gmra.mxu1 %vm380_vm1, %v8803_v63  ;;  %7582 = vmatprep.mubr.msk.f32.mxu0 %vm380_vm1, %v11136_v12 }
  0xd0   : > { %7632 = vmatprep.mubr.msk.f32.mxu1 %vm380_vm1, %v8482_v6  ;;  %v9173_v6 = vld [vmem:[%s11056_s2 + $0x14] sm:$0xf] }
  0xd2   : > { %v7284_v0 = vpop.f32.mrf.mxu0  ;;  %7583 = vmatmul.mubr.msk.f32.vlgmr.msra.gmra.mxu0 %vm380_vm1, %v8477_v5 }
  0xd3   : > { %v7334_v58 = vpop.f32.mrf.mxu1  ;;  %7633 = vmatmul.mubr.msk.f32.vlgmr.msra.gmra.mxu1 %vm380_vm1, %v8485_v7  ;;  %7681 = vmatpush3.msk.msra.mxu0 %vm534_vm0, %v9018_v2 }
  0xd4   : > { %v934_v12 = vadd.f32 %v7334_v58, %v7284_v0  ;;  %7731 = vmatpush3.msk.msra.mxu1 %vm534_vm0, %v9027_v4  ;;  %v604_v5 = vpop.f32.mrf.mxu0  ;;  %7585 = vmatprep.mubr.msk.f32.mxu0 %vm380_vm1, %v8488_v8  ;;  %v1091_v58 = vld [vmem:[#allocation2 + $0x52] sm:$0xff] }
  0xd5   : > { %v928_v63 = vpop.f32.mrf.mxu1  ;;  %7635 = vmatprep.mubr.msk.f32.mxu1 %vm380_vm1, %v8495_v9  ;;  %7780 = vmatprep.subr.msk.mxu0 %vm534_vm0, %v9164_v3 }
  0xd6   : > { %v1121_v7 = vadd.f32 %v1089_v60, %v934_v12  ;;  %v929_v2 = vadd.f32 %v928_v63, %v604_v5  ;;  %v7287_v55 = vpop.f32.mrf.mxu0  ;;  %7586 = vmatmul.mubr.msk.f32.gmra.mxu0 %vm380_vm1, %v8506_v11  ;;  %7830 = vmatprep.subr.msk.mxu1 %vm534_vm0, %v9173_v6  ;;  %v1090_v63 = vld [vmem:[#allocation2 + $0x4a] sm:$0xff] }
  0xd7   : > { %v7337_v4 = vpop.f32.mrf.mxu1  ;;  %7636 = vmatmul.mubr.msk.f32.gmra.mxu1 %vm380_vm1, %v8517_v13  ;;  %7588 = vmatprep.mubr.msk.f32.mxu0 %vm380_vm1, %v8520_v14  ;;  %v1093_v14 = vld [vmem:[#allocation2 + $0x6a] sm:$0xff] }
  0xd8   : > { %1153 = vst.msk [vmem:[#allocation2 + $0x3a] sm:$0xff] %vm380_vm1, %v1121_v7  ;;  %v1120_v8 = vadd.f32 %v1088_v1, %v929_v2  ;;  %v944_v9 = vadd.f32 %v7337_v4, %v7287_v55  ;;  %v614_v60 = vpop.f32.mrf.mxu0  ;;  %7638 = vmatprep.mubr.msk.f32.mxu1 %vm380_vm1, %v8525_v15  ;;  %v1092_v2 = vld [vmem:[#allocation2 + $0x62] sm:$0xff] }
  0xd9   : > { %v938_v11 = vpop.f32.mrf.mxu1 }
  0xda   : > { %1152 = vst.msk [vmem:[#allocation2 + $0x32] sm:$0xff] %vm380_vm1, %v1120_v8  ;;  %v1123_v0 = vadd.f32 %v1091_v58, %v944_v9  ;;  %v939_v12 = vadd.f32 %v938_v11, %v614_v60  ;;  %v7290_v5 = vpop.f32.mrf.mxu0  ;;  %7589 = vmatmul.mubr.msk.f32.gmra.mxu0 %vm380_vm1, %v8538_v16  ;;  %v1094_v11 = vld [vmem:[#allocation2 + $0x7a] sm:$0xff] }
  0xdb   : > { %v7340_v13 = vpop.f32.mrf.mxu1  ;;  %7639 = vmatmul.mubr.msk.f32.gmra.mxu1 %vm380_vm1, %v8543_v17  ;;  %7591 = vmatprep.mubr.msk.f32.mxu0 %vm380_vm1, %v8546_v18  ;;  %v1095_v18 = vld [vmem:[#allocation2 + $0x82] sm:$0xff] }
  0xdc   : > { %1155 = vst.msk [vmem:[#allocation2 + $0x52] sm:$0xff] %vm380_vm1, %v1123_v0  ;;  %v1122_v15 = vadd.f32 %v1090_v63, %v939_v12  ;;  %v954_v55 = vadd.f32 %v7340_v13, %v7290_v5  ;;  %v624_v1 = vpop.f32.mrf.mxu0  ;;  %7641 = vmatprep.mubr.msk.f32.mxu1 %vm380_vm1, %v8549_v19 }
  0xdd   : > { %v948_v7 = vpop.f32.mrf.mxu1 }
  0xde   : > { %1154 = vst.msk [vmem:[#allocation2 + $0x4a] sm:$0xff] %vm380_vm1, %v1122_v15  ;;  %v1125_v16 = vadd.f32 %v1093_v14, %v954_v55  ;;  %v949_v4 = vadd.f32 %v948_v7, %v624_v1  ;;  %v7293_v58 = vpop.f32.mrf.mxu0  ;;  %7592 = vmatmul.mubr.msk.f32.gmra.mxu0 %vm380_vm1, %v8558_v20  ;;  %v1096_v14 = vld [vmem:[#allocation2 + $0x92] sm:$0xff] }
  0xdf   : > { %v7343_v17 = vpop.f32.mrf.mxu1  ;;  %7642 = vmatmul.mubr.msk.f32.gmra.mxu1 %vm380_vm1, %v8563_v21  ;;  %7594 = vmatprep.mubr.msk.f32.mxu0 %vm380_vm1, %v8566_v22  ;;  %v1097_v22 = vld [vmem:[#allocation2 + $0x9a] sm:$0xff] }
  0xe0   : > { %1157 = vst.msk [vmem:[#allocation2 + $0x6a] sm:$0xff] %vm380_vm1, %v1125_v16  ;;  %v1124_v19 = vadd.f32 %v1092_v2, %v949_v4  ;;  %v964_v8 = vadd.f32 %v7343_v17, %v7293_v58  ;;  %v634_v9 = vpop.f32.mrf.mxu0  ;;  %7644 = vmatprep.mubr.msk.f32.mxu1 %vm380_vm1, %v8569_v23  ;;  %v1098_v16 = vld [vmem:[#allocation2 + $0xaa] sm:$0xff] }
  0xe1   : > { %v958_v60 = vpop.f32.mrf.mxu1 }
  0xe2   : > { %1156 = vst.msk [vmem:[#allocation2 + $0x62] sm:$0xff] %vm380_vm1, %v1124_v19  ;;  %v1127_v20 = vadd.f32 %v1095_v18, %v964_v8  ;;  %v959_v63 = vadd.f32 %v958_v60, %v634_v9  ;;  %v7296_v0 = vpop.f32.mrf.mxu0  ;;  %7595 = vmatmul.mubr.msk.f32.gmra.mxu0 %vm380_vm1, %v8578_v24  ;;  %v1100_v8 = vld [vmem:[#allocation2 + $0xc2] sm:$0xff] }
  0xe3   : > { %v7346_v21 = vpop.f32.mrf.mxu1  ;;  %7645 = vmatmul.mubr.msk.f32.gmra.mxu1 %vm380_vm1, %v8583_v25  ;;  %7597 = vmatprep.mubr.msk.f32.mxu0 %vm380_vm1, %v8586_v26  ;;  %v1099_v26 = vld [vmem:[#allocation2 + $0xb2] sm:$0xff] }
  0xe4   : > { %1159 = vst.msk [vmem:[#allocation2 + $0x82] sm:$0xff] %vm380_vm1, %v1127_v20  ;;  %v1126_v23 = vadd.f32 %v1094_v11, %v959_v63  ;;  %v974_v12 = vadd.f32 %v7346_v21, %v7296_v0  ;;  %v644_v5 = vpop.f32.mrf.mxu0  ;;  %7647 = vmatprep.mubr.msk.f32.mxu1 %vm380_vm1, %v8589_v27  ;;  %v1102_v0 = vld [vmem:[#allocation2 + $0xda] sm:$0xff] }
  0xe5   : > { %v968_v13 = vpop.f32.mrf.mxu1 }
  0xe6   : > { %1158 = vst.msk [vmem:[#allocation2 + $0x7a] sm:$0xff] %vm380_vm1, %v1126_v23  ;;  %v1129_v24 = vadd.f32 %v1097_v22, %v974_v12  ;;  %v969_v15 = vadd.f32 %v968_v13, %v644_v5  ;;  %v7299_v55 = vpop.f32.mrf.mxu0  ;;  %7598 = vmatmul.mubr.msk.f32.gmra.mxu0 %vm380_vm1, %v8598_v28  ;;  %v1104_v13 = vld [vmem:[#allocation2 + $0xf2] sm:$0xff] }
  0xe7   : > { %v7349_v25 = vpop.f32.mrf.mxu1  ;;  %7648 = vmatmul.mubr.msk.f32.gmra.mxu1 %vm380_vm1, %v8603_v29  ;;  %7600 = vmatprep.mubr.msk.f32.mxu0 %vm380_vm1, %v8606_v30  ;;  %v1101_v30 = vld [vmem:[#allocation2 + $0xca] sm:$0xff] }
  0xe8   : > { %1161 = vst.msk [vmem:[#allocation2 + $0x9a] sm:$0xff] %vm380_vm1, %v1129_v24  ;;  %v1128_v27 = vadd.f32 %v1096_v14, %v969_v15  ;;  %v984_v1 = vadd.f32 %v7349_v25, %v7299_v55  ;;  %v654_v7 = vpop.f32.mrf.mxu0  ;;  %7650 = vmatprep.mubr.msk.f32.mxu1 %vm380_vm1, %v8609_v31 }
  0xe9   : > { %v978_v2 = vpop.f32.mrf.mxu1 }
  0xea   : > { %1160 = vst.msk [vmem:[#allocation2 + $0x92] sm:$0xff] %vm380_vm1, %v1128_v27  ;;  %v1131_v28 = vadd.f32 %v1099_v26, %v984_v1  ;;  %v979_v4 = vadd.f32 %v978_v2, %v654_v7  ;;  %v7302_v58 = vpop.f32.mrf.mxu0  ;;  %7601 = vmatmul.mubr.msk.f32.gmra.mxu0 %vm380_vm1, %v8618_v32  ;;  %v1106_v26 = vld [vmem:[#allocation2 + $0x10a] sm:$0xff] }
  0xeb   : > { %v7352_v29 = vpop.f32.mrf.mxu1  ;;  %7651 = vmatmul.mubr.msk.f32.gmra.mxu1 %vm380_vm1, %v8623_v33  ;;  %7603 = vmatprep.mubr.msk.f32.mxu0 %vm380_vm1, %v8626_v34  ;;  %v1103_v34 = vld [vmem:[#allocation2 + $0xe2] sm:$0xff] }
  0xec   : > { %1163 = vst.msk [vmem:[#allocation2 + $0xb2] sm:$0xff] %vm380_vm1, %v1131_v28  ;;  %v1130_v31 = vadd.f32 %v1098_v16, %v979_v4  ;;  %v994_v17 = vadd.f32 %v7352_v29, %v7302_v58  ;;  %v664_v18 = vpop.f32.mrf.mxu0  ;;  %7653 = vmatprep.mubr.msk.f32.mxu1 %vm380_vm1, %v8629_v35  ;;  %v1108_v28 = vld [vmem:[#allocation2 + $0x122] sm:$0xff] }
  0xed   : > { %v988_v19 = vpop.f32.mrf.mxu1 }
  0xee   : > { %1162 = vst.msk [vmem:[#allocation2 + $0xaa] sm:$0xff] %vm380_vm1, %v1130_v31  ;;  %v1133_v32 = vadd.f32 %v1101_v30, %v994_v17  ;;  %v989_v9 = vadd.f32 %v988_v19, %v664_v18  ;;  %v7305_v60 = vpop.f32.mrf.mxu0  ;;  %7604 = vmatmul.mubr.msk.f32.gmra.mxu0 %vm380_vm1, %v8638_v36  ;;  %v1110_v17 = vld [vmem:[#allocation2 + $0x13a] sm:$0xff] }
  0xef   : > { %v7355_v33 = vpop.f32.mrf.mxu1  ;;  %7654 = vmatmul.mubr.msk.f32.gmra.mxu1 %vm380_vm1, %v8643_v37  ;;  %7606 = vmatprep.mubr.msk.f32.mxu0 %vm380_vm1, %v8646_v38  ;;  %v1105_v38 = vld [vmem:[#allocation2 + $0xfa] sm:$0xff] }
  0xf0   : > { %1165 = vst.msk [vmem:[#allocation2 + $0xca] sm:$0xff] %vm380_vm1, %v1133_v32  ;;  %v1132_v35 = vadd.f32 %v1100_v8, %v989_v9  ;;  %v1004_v11 = vadd.f32 %v7355_v33, %v7305_v60  ;;  %v674_v20 = vpop.f32.mrf.mxu0  ;;  %7656 = vmatprep.mubr.msk.f32.mxu1 %vm380_vm1, %v8649_v39  ;;  %v11137_v8 = vld [vmem:[#allocation5_spill] sm:$0xff]  ;;  %v1112_v33 = vld [vmem:[#allocation2 + $0x152] sm:$0xff] }
  0xf1   : > { %v998_v63 = vpop.f32.mrf.mxu1 }
  0xf2   : > { %1164 = vst.msk [vmem:[#allocation2 + $0xc2] sm:$0xff] %vm380_vm1, %v1132_v35  ;;  %v1135_v36 = vadd.f32 %v1103_v34, %v1004_v11  ;;  %v999_v21 = vadd.f32 %v998_v63, %v674_v20  ;;  %v7308_v22 = vpop.f32.mrf.mxu0  ;;  %7607 = vmatmul.mubr.msk.f32.gmra.mxu0 %vm380_vm1, %v8658_v40  ;;  %v1115_v11 = vld [vmem:[#allocation2 + $0x172] sm:$0xff] }
  0xf3   : > { %v7358_v37 = vpop.f32.mrf.mxu1  ;;  %7657 = vmatmul.mubr.msk.f32.gmra.mxu1 %vm380_vm1, %v8663_v41  ;;  %7609 = vmatprep.mubr.msk.f32.mxu0 %vm380_vm1, %v8666_v42  ;;  %v1107_v42 = vld [vmem:[#allocation2 + $0x112] sm:$0xff] }
  0xf4   : > { %1167 = vst.msk [vmem:[#allocation2 + $0xe2] sm:$0xff] %vm380_vm1, %v1135_v36  ;;  %v1134_v39 = vadd.f32 %v1102_v0, %v999_v21  ;;  %v1014_v23 = vadd.f32 %v7358_v37, %v7308_v22  ;;  %v684_v12 = vpop.f32.mrf.mxu0  ;;  %7659 = vmatprep.mubr.msk.f32.mxu1 %vm380_vm1, %v8669_v43  ;;  %v11138_v20 = vld [vmem:[#allocation8_spill] sm:$0xff]  ;;  %v11139_v36 = vld [vmem:[#allocation9_spill] sm:$0xff]  ;;  %v1114_v22 = vld [vmem:[#allocation2 + $0x16a] sm:$0xff] }
  0xf5   : > { %v1008_v5 = vpop.f32.mrf.mxu1 }
  0xf6   : > { %1166 = vst.msk [vmem:[#allocation2 + $0xda] sm:$0xff] %vm380_vm1, %v1134_v39  ;;  %v1137_v40 = vadd.f32 %v1105_v38, %v1014_v23  ;;  %v1009_v14 = vadd.f32 %v1008_v5, %v684_v12  ;;  %v7311_v24 = vpop.f32.mrf.mxu0  ;;  %7610 = vmatmul.mubr.msk.f32.gmra.mxu0 %vm380_vm1, %v8678_v44  ;;  %v11140_v39 = vld [vmem:[#allocation10_spill] sm:$0xff]  ;;  %v11141_v12 = vld [vmem:[#allocation11_spill] sm:$0xff]  ;;  %v11142_v5 = vld [vmem:[#allocation12_spill] sm:$0xff] }
  0xf7   : > { %v7361_v41 = vpop.f32.mrf.mxu1  ;;  %7660 = vmatmul.mubr.msk.f32.gmra.mxu1 %vm380_vm1, %v8683_v45  ;;  %7612 = vmatprep.mubr.msk.f32.mxu0 %vm380_vm1, %v8686_v46  ;;  %v1109_v46 = vld [vmem:[#allocation2 + $0x12a] sm:$0xff] }
  0xf8   : > { %1169 = vst.msk [vmem:[#allocation2 + $0xfa] sm:$0xff] %vm380_vm1, %v1137_v40  ;;  %v1136_v43 = vadd.f32 %v1104_v13, %v1009_v14  ;;  %v1024_v15 = vadd.f32 %v7361_v41, %v7311_v24  ;;  %v694_v55 = vpop.f32.mrf.mxu0  ;;  %7662 = vmatprep.mubr.msk.f32.mxu1 %vm380_vm1, %v8689_v47  ;;  %v1117_v23 = vld [vmem:[#allocation2 + $0x18a] sm:$0xff]  ;;  %v11143_v24 = vld [vmem:[#allocation13_spill] sm:$0xff] }
  0xf9   : > { %v1018_v25 = vpop.f32.mrf.mxu1 }
  0xfa   : > { %1168 = vst.msk [vmem:[#allocation2 + $0xf2] sm:$0xff] %vm380_vm1, %v1136_v43  ;;  %v1139_v44 = vadd.f32 %v1107_v42, %v1024_v15  ;;  %v1019_v27 = vadd.f32 %v1018_v25, %v694_v55  ;;  %v7314_v1 = vpop.f32.mrf.mxu0  ;;  %7613 = vmatmul.mubr.msk.f32.gmra.mxu0 %vm380_vm1, %v8698_v48  ;;  %v1116_v42 = vld [vmem:[#allocation2 + $0x182] sm:$0xff] }
  0xfb   : > { %v7364_v45 = vpop.f32.mrf.mxu1  ;;  %7663 = vmatmul.mubr.msk.f32.gmra.mxu1 %vm380_vm1, %v8703_v49  ;;  %7615 = vmatprep.mubr.msk.f32.mxu0 %vm380_vm1, %v8706_v50  ;;  %v1111_v50 = vld [vmem:[#allocation2 + $0x142] sm:$0xff] }
  0xfc   : > { %1171 = vst.msk [vmem:[#allocation2 + $0x112] sm:$0xff] %vm380_vm1, %v1139_v44  ;;  %v1138_v47 = vadd.f32 %v1106_v26, %v1019_v27  ;;  %v1034_v7 = vadd.f32 %v7364_v45, %v7314_v1  ;;  %v704_v2 = vpop.f32.mrf.mxu0  ;;  %7665 = vmatprep.mubr.msk.f32.mxu1 %vm380_vm1, %v8709_v51  ;;  %v11144_v25 = vld [vmem:[#allocation14_spill] sm:$0xff]  ;;  %v11145_v27 = vld [vmem:[#allocation15_spill] sm:$0xff]  ;;  %v9330_v1 = vld [vmem:[%s8465_s14] sm:$0xff] }
  0xfd   : > { %v1028_v16 = vpop.f32.mrf.mxu1  ;;  %v1119_v44 = vld [vmem:[#allocation2 + $0x1a2] sm:$0xff] }
  0xfe   : > { %1170 = vst.msk [vmem:[#allocation2 + $0x10a] sm:$0xff] %vm380_vm1, %v1138_v47  ;;  %v1141_v48 = vadd.f32 %v1109_v46, %v1034_v7  ;;  %v1029_v4 = vadd.f32 %v1028_v16, %v704_v2  ;;  %v7317_v58 = vpop.f32.mrf.mxu0  ;;  %7616 = vmatmul.mubr.msk.f32.gmra.mxu0 %vm380_vm1, %v8718_v52  ;;  %v9336_v7 = vld [vmem:[%s8474_s17] sm:$0xff] }
  0xff   : > { %v7367_v49 = vpop.f32.mrf.mxu1  ;;  %7666 = vmatmul.mubr.msk.f32.gmra.mxu1 %vm380_vm1, %v8723_v53  ;;  %7618 = vmatprep.mubr.msk.f32.mxu0 %vm380_vm1, %v8726_v54  ;;  %v1113_v54 = vld [vmem:[#allocation2 + $0x15a] sm:$0xff] }
 0x100   : > { %1173 = vst.msk [vmem:[#allocation2 + $0x12a] sm:$0xff] %vm380_vm1, %v1141_v48  ;;  %v1140_v51 = vadd.f32 %v1108_v28, %v1029_v4  ;;  %v1044_v29 = vadd.f32 %v7367_v49, %v7317_v58  ;;  %v714_v30 = vpop.f32.mrf.mxu0  ;;  %7668 = vmatprep.mubr.msk.f32.mxu1 %vm380_vm1, %v11133_v62  ;;  %v1118_v16 = vld [vmem:[#allocation2 + $0x19a] sm:$0xff]  ;;  %v9342_v58 = vld [vmem:[%s8465_s14 + $0x8] sm:$0xff] }
 0x101   : > { %v1038_v31 = vpop.f32.mrf.mxu1  ;;  %v9349_v49 = vld [vmem:[%s11057_s3 + $0x18] sm:$0xf] }
 0x102   : > { %1172 = vst.msk [vmem:[#allocation2 + $0x122] sm:$0xff] %vm380_vm1, %v1140_v51  ;;  %v1143_v52 = vadd.f32 %v1111_v50, %v1044_v29  ;;  %v1039_v18 = vadd.f32 %v1038_v31, %v714_v30  ;;  %v7320_v19 = vpop.f32.mrf.mxu0  ;;  %7619 = vmatmul.mubr.msk.f32.gmra.mxu0 %vm380_vm1, %v8738_v56  ;;  %v9352_v51 = vld [vmem:[%s8474_s17 + $0x8] sm:$0xff]  ;;  %v9361_v29 = vld [vmem:[%s11056_s2 + $0x18] sm:$0xf] }
 0x103   : > { %v7370_v53 = vpop.f32.mrf.mxu1  ;;  %7669 = vmatmul.mubr.msk.f32.gmra.mxu1 %vm380_vm1, %v8743_v57  ;;  %7621 = vmatprep.mubr.msk.f32.mxu0 %vm380_vm1, %v11137_v8  ;;  %v9380_v8 = vld [vmem:[%s8465_s14 + $0x18] sm:$0xff] }
 0x104   : > { %1175 = vst.msk [vmem:[#allocation2 + $0x142] sm:$0xff] %vm380_vm1, %v1143_v52  ;;  %v1142_v62 = vadd.f32 %v1110_v17, %v1039_v18  ;;  %v1054_v32 = vadd.f32 %v7370_v53, %v7320_v19  ;;  %v724_v9 = vpop.f32.mrf.mxu0  ;;  %7671 = vmatprep.mubr.msk.f32.mxu1 %vm380_vm1, %v8749_v59  ;;  %v9367_v52 = vld [vmem:[%s8465_s14 + $0x10] sm:$0xff] }
 0x105   : > { %v1048_v60 = vpop.f32.mrf.mxu1  ;;  %v9372_v19 = vld [vmem:[%s8474_s17 + $0x10] sm:$0xff] }
 0x106   : > { %1174 = vst.msk [vmem:[#allocation2 + $0x13a] sm:$0xff] %vm380_vm1, %v1142_v62  ;;  %v1145_v56 = vadd.f32 %v1113_v54, %v1054_v32  ;;  %v1049_v34 = vadd.f32 %v1048_v60, %v724_v9  ;;  %v7323_v35 = vpop.f32.mrf.mxu0  ;;  %7622 = vmatmul.mubr.msk.f32.gmra.mxu0 %vm380_vm1, %v11134_v61  ;;  %v1644_v62 = vld [vmem:[#allocation2 + $0x31] sm:$0xff]  ;;  %v9392_v60 = vld [vmem:[%s8465_s14 + $0x20] sm:$0xff] }
 0x107   : > { %v7373_v57 = vpop.f32.mrf.mxu1  ;;  %7672 = vmatmul.mubr.msk.f32.gmra.mxu1 %vm380_vm1, %v11129_v10  ;;  %7624 = vmatprep.mubr.msk.f32.mxu0 %vm380_vm1, %v11138_v20  ;;  %v9387_v9 = vld [vmem:[%s8474_s17 + $0x18] sm:$0xff] }
 0x108   : > { %1177 = vst.msk [vmem:[#allocation2 + $0x15a] sm:$0xff] %vm380_vm1, %v1145_v56  ;;  %v1144_v59 = vadd.f32 %v1112_v33, %v1049_v34  ;;  %v1064_v63 = vadd.f32 %v7373_v57, %v7323_v35  ;;  %v734_v0 = vpop.f32.mrf.mxu0  ;;  %7674 = vmatprep.mubr.msk.f32.mxu1 %vm380_vm1, %v11139_v36  ;;  %v9398_v35 = vld [vmem:[%s8474_s17 + $0x20] sm:$0xff]  ;;  %v1647_v57 = vld [vmem:[#allocation2 + $0x51] sm:$0xff]  ;;  %v1646_v36 = vld [vmem:[#allocation2 + $0x49] sm:$0xff] }
 0x109   : > { %v1058_v21 = vpop.f32.mrf.mxu1 }
 0x10a   : > { %1176 = vst.msk [vmem:[#allocation2 + $0x152] sm:$0xff] %vm380_vm1, %v1144_v59  ;;  %v1147_v61 = vadd.f32 %v1115_v11, %v1064_v63  ;;  %v1059_v37 = vadd.f32 %v1058_v21, %v734_v0  ;;  %v7326_v38 = vpop.f32.mrf.mxu0  ;;  %7625 = vmatmul.mubr.msk.f32.gmra.mxu0 %vm380_vm1, %v11140_v39  ;;  %v9404_v0 = vld [vmem:[%s8465_s14 + $0x28] sm:$0xff] }
 0x10b   : > { %v7376_v10 = vpop.f32.mrf.mxu1  ;;  %7675 = vmatmul.mubr.msk.f32.gmra.mxu1 %vm380_vm1, %v11141_v12  ;;  %7627 = vmatprep.mubr.msk.f32.mxu0 %vm380_vm1, %v11142_v5 }
 0x10c   : > { %1179 = vst.msk [vmem:[#allocation2 + $0x172] sm:$0xff] %vm380_vm1, %v1147_v61  ;;  %v1146_v13 = vadd.f32 %v1114_v22, %v1059_v37  ;;  %v1074_v40 = vadd.f32 %v7376_v10, %v7326_v38  ;;  %v744_v14 = vpop.f32.mrf.mxu0  ;;  %7677 = vmatprep.mubr.msk.f32.mxu1 %vm380_vm1, %v11143_v24  ;;  %v9409_v22 = vld [vmem:[%s8474_s17 + $0x28] sm:$0xff]  ;;  %v9414_v61 = vld [vmem:[%s8465_s14 + $0x30] sm:$0xff] }
 0x10d   : > { %v1068_v41 = vpop.f32.mrf.mxu1  ;;  %v9420_v10 = vld [vmem:[%s8474_s17 + $0x30] sm:$0xff]  ;;  %v1648_v24 = vld [vmem:[#allocation2 + $0x61] sm:$0xff] }
 0x10e   : > { %1178 = vst.msk [vmem:[#allocation2 + $0x16a] sm:$0xff] %vm380_vm1, %v1146_v13  ;;  %v1149_v43 = vadd.f32 %v1117_v23, %v1074_v40  ;;  %v1069_v15 = vadd.f32 %v1068_v41, %v744_v14  ;;  %v7329_v55 = vpop.f32.mrf.mxu0  ;;  %7628 = vmatmul.mubr.msk.f32.gmra.mxu0 %vm380_vm1, %v11144_v25  ;;  %v1649_v23 = vld [vmem:[#allocation2 + $0x69] sm:$0xff]  ;;  %v9426_v14 = vld [vmem:[%s8465_s14 + $0x38] sm:$0xff] }
 0x10f   : > { %v7379_v26 = vpop.f32.mrf.mxu1  ;;  %7678 = vmatmul.mubr.msk.f32.gmra.mxu1 %vm380_vm1, %v11145_v27  ;;  %7682 = vmatprep.mubr.msk.f32.mxu0 %vm380_vm1, %v9330_v1 }
 0x110   : > { %1181 = vst.msk [vmem:[#allocation2 + $0x18a] sm:$0xff] %vm380_vm1, %v1149_v43  ;;  %v1148_v45 = vadd.f32 %v1116_v42, %v1069_v15  ;;  %v1084_v46 = vadd.f32 %v7379_v26, %v7329_v55  ;;  %v754_v47 = vpop.f32.mrf.mxu0  ;;  %7732 = vmatprep.mubr.msk.f32.mxu1 %vm380_vm1, %v9336_v7  ;;  %v9431_v42 = vld [vmem:[%s8474_s17 + $0x38] sm:$0xff]  ;;  %v9436_v43 = vld [vmem:[%s8465_s14 + $0x40] sm:$0xff] }
 0x111   : > { %v1078_v2 = vpop.f32.mrf.mxu1  ;;  %v9442_v26 = vld [vmem:[%s8474_s17 + $0x40] sm:$0xff] }
 0x112   : > { %1180 = vst.msk [vmem:[#allocation2 + $0x182] sm:$0xff] %vm380_vm1, %v1148_v45  ;;  %v1151_v28 = vadd.f32 %v1119_v44, %v1084_v46  ;;  %v1079_v48 = vadd.f32 %v1078_v2, %v754_v47  ;;  %v7384_v4 = vpop.f32.mrf.mxu0  ;;  %7683 = vmatmul.mubr.msk.f32.vlgmr.msra.gmra.mxu0 %vm380_vm1, %v9342_v58  ;;  %v1651_v44 = vld [vmem:[#allocation2 + $0x81] sm:$0xff] }
 0x113   : > { %v7434_v50 = vpop.f32.mrf.mxu1  ;;  %7733 = vmatmul.mubr.msk.f32.vlgmr.msra.gmra.mxu1 %vm380_vm1, %v9352_v51  ;;  %7781 = vmatpush3.msk.msra.mxu0 %vm534_vm0, %v9164_v3  ;;  %v1645_v3 = vld [vmem:[#allocation2 + $0x39] sm:$0xff]  ;;  %v9448_v2 = vld [vmem:[%s8465_s14 + $0x48] sm:$0xff] }
 0x114   : > { %1183 = vst.msk [vmem:[#allocation2 + $0x1a2] sm:$0xff] %vm380_vm1, %v1151_v28  ;;  %v1150_v30 = vadd.f32 %v1118_v16, %v1079_v48  ;;  %v1491_v31 = vadd.f32 %v7434_v50, %v7384_v4  ;;  %7831 = vmatpush3.msk.msra.mxu1 %vm534_vm0, %v9173_v6  ;;  %v1257_v17 = vpop.f32.mrf.mxu0  ;;  %7685 = vmatprep.mubr.msk.f32.mxu0 %vm380_vm1, %v9367_v52  ;;  %v1650_v16 = vld [vmem:[#allocation2 + $0x79] sm:$0xff]  ;;  %v9453_v48 = vld [vmem:[%s8474_s17 + $0x48] sm:$0xff]  ;;  %v9458_v4 = vld [vmem:[%s8465_s14 + $0x50] sm:$0xff] }
 0x115   : > { %v1485_v18 = vpop.f32.mrf.mxu1  ;;  %7735 = vmatprep.mubr.msk.f32.mxu1 %vm380_vm1, %v9372_v19  ;;  %7880 = vmatprep.subr.msk.mxu0 %vm534_vm0, %v9349_v49 }
 0x116   : > { %1182 = vst.msk [vmem:[#allocation2 + $0x19a] sm:$0xff] %vm380_vm1, %v1150_v30  ;;  %v1677_v6 = vadd.f32 %v1645_v3, %v1491_v31  ;;  %v1486_v53 = vadd.f32 %v1485_v18, %v1257_v17  ;;  %v7387_v54 = vpop.f32.mrf.mxu0  ;;  %7686 = vmatmul.mubr.msk.f32.gmra.mxu0 %vm380_vm1, %v9380_v8  ;;  %7930 = vmatprep.subr.msk.mxu1 %vm534_vm0, %v9361_v29  ;;  %v9464_v17 = vld [vmem:[%s8474_s17 + $0x50] sm:$0xff]  ;;  %v1653_v3 = vld [vmem:[#allocation2 + $0x99] sm:$0xff] }
 0x117   : > { %v7437_v32 = vpop.f32.mrf.mxu1  ;;  %7736 = vmatmul.mubr.msk.f32.gmra.mxu1 %vm380_vm1, %v9387_v9  ;;  %7688 = vmatprep.mubr.msk.f32.mxu0 %vm380_vm1, %v9392_v60 }
 0x118   : > { %1709 = vst.msk [vmem:[#allocation2 + $0x39] sm:$0xff] %vm380_vm1, %v1677_v6  ;;  %v1676_v33 = vadd.f32 %v1644_v62, %v1486_v53  ;;  %v1501_v56 = vadd.f32 %v7437_v32, %v7387_v54  ;;  %v1267_v34 = vpop.f32.mrf.mxu0  ;;  %7738 = vmatprep.mubr.msk.f32.mxu1 %vm380_vm1, %v9398_v35  ;;  %v9470_v62 = vld [vmem:[%s8465_s14 + $0x58] sm:$0xff] }
 0x119   : > { %v1495_v11 = vpop.f32.mrf.mxu1  ;;  %v1652_v32 = vld [vmem:[#allocation2 + $0x91] sm:$0xff] }
 0x11a   : > { %1708 = vst.msk [vmem:[#allocation2 + $0x31] sm:$0xff] %vm380_vm1, %v1676_v33  ;;  %v1679_v20 = vadd.f32 %v1647_v57, %v1501_v56  ;;  %v1496_v59 = vadd.f32 %v1495_v11, %v1267_v34  ;;  %v7390_v63 = vpop.f32.mrf.mxu0  ;;  %7689 = vmatmul.mubr.msk.f32.gmra.mxu0 %vm380_vm1, %v9404_v0  ;;  %v9475_v56 = vld [vmem:[%s8474_s17 + $0x58] sm:$0xff]  ;;  %v9480_v34 = vld [vmem:[%s8465_s14 + $0x60] sm:$0xff] }
 0x11b   : > { %v7440_v21 = vpop.f32.mrf.mxu1  ;;  %7739 = vmatmul.mubr.msk.f32.gmra.mxu1 %vm380_vm1, %v9409_v22  ;;  %7691 = vmatprep.mubr.msk.f32.mxu0 %vm380_vm1, %v9414_v61 }
 0x11c   : > { %1711 = vst.msk [vmem:[#allocation2 + $0x51] sm:$0xff] %vm380_vm1, %v1679_v20  ;;  %v1678_v37 = vadd.f32 %v1646_v36, %v1496_v59  ;;  %v1511_v38 = vadd.f32 %v7440_v21, %v7390_v63  ;;  %v1277_v39 = vpop.f32.mrf.mxu0  ;;  %7741 = vmatprep.mubr.msk.f32.mxu1 %vm380_vm1, %v9420_v10  ;;  %v9486_v59 = vld [vmem:[%s8474_s17 + $0x60] sm:$0xff]  ;;  %v1655_v63 = vld [vmem:[#allocation2 + $0xb1] sm:$0xff] }
 0x11d   : > { %v1505_v12 = vpop.f32.mrf.mxu1 }
 0x11e   : > { %1710 = vst.msk [vmem:[#allocation2 + $0x49] sm:$0xff] %vm380_vm1, %v1678_v37  ;;  %v1681_v5 = vadd.f32 %v1649_v23, %v1511_v38  ;;  %v1506_v13 = vadd.f32 %v1505_v12, %v1277_v39  ;;  %v7393_v40 = vpop.f32.mrf.mxu0  ;;  %7692 = vmatmul.mubr.msk.f32.gmra.mxu0 %vm380_vm1, %v9426_v14  ;;  %v9492_v39 = vld [vmem:[%s8465_s14 + $0x68] sm:$0xff] }
 0x11f   : > { %v7443_v41 = vpop.f32.mrf.mxu1  ;;  %7742 = vmatmul.mubr.msk.f32.gmra.mxu1 %vm380_vm1, %v9431_v42  ;;  %7694 = vmatprep.mubr.msk.f32.mxu0 %vm380_vm1, %v9436_v43  ;;  %v1654_v23 = vld [vmem:[#allocation2 + $0xa9] sm:$0xff] }
 0x120   : > { %1713 = vst.msk [vmem:[#allocation2 + $0x69] sm:$0xff] %vm380_vm1, %v1681_v5  ;;  %v1680_v15 = vadd.f32 %v1648_v24, %v1506_v13  ;;  %v1521_v55 = vadd.f32 %v7443_v41, %v7393_v40  ;;  %v1287_v25 = vpop.f32.mrf.mxu0  ;;  %7744 = vmatprep.mubr.msk.f32.mxu1 %vm380_vm1, %v9442_v26  ;;  %v9497_v5 = vld [vmem:[%s8474_s17 + $0x68] sm:$0xff]  ;;  %v9502_v13 = vld [vmem:[%s8465_s14 + $0x70] sm:$0xff] }
 0x121   : > { %v1515_v27 = vpop.f32.mrf.mxu1 }
 0x122   : > { %1712 = vst.msk [vmem:[#allocation2 + $0x61] sm:$0xff] %vm380_vm1, %v1680_v15  ;;  %v1683_v45 = vadd.f32 %v1651_v44, %v1521_v55  ;;  %v1516_v46 = vadd.f32 %v1515_v27, %v1287_v25  ;;  %v7396_v47 = vpop.f32.mrf.mxu0  ;;  %7695 = vmatmul.mubr.msk.f32.gmra.mxu0 %vm380_vm1, %v9448_v2  ;;  %v9508_v15 = vld [vmem:[%s8474_s17 + $0x70] sm:$0xff] }
 0x123   : > { %v7446_v28 = vpop.f32.mrf.mxu1  ;;  %7745 = vmatmul.mubr.msk.f32.gmra.mxu1 %vm380_vm1, %v9453_v48  ;;  %7697 = vmatprep.mubr.msk.f32.mxu0 %vm380_vm1, %v9458_v4  ;;  %v1657_v55 = vld [vmem:[#allocation2 + $0xc9] sm:$0xff] }
 0x124   : > { %1715 = vst.msk [vmem:[#allocation2 + $0x81] sm:$0xff] %vm380_vm1, %v1683_v45  ;;  %v1682_v50 = vadd.f32 %v1650_v16, %v1516_v46  ;;  %v1531_v30 = vadd.f32 %v7446_v28, %v7396_v47  ;;  %v1297_v31 = vpop.f32.mrf.mxu0  ;;  %7747 = vmatprep.mubr.msk.f32.mxu1 %vm380_vm1, %v9464_v17  ;;  %v9514_v46 = vld [vmem:[%s8465_s14 + $0x78] sm:$0xff]  ;;  %v1656_v47 = vld [vmem:[#allocation2 + $0xc1] sm:$0xff] }
 0x125   : > { %v1525_v18 = vpop.f32.mrf.mxu1  ;;  %v9519_v28 = vld [vmem:[%s8474_s17 + $0x78] sm:$0xff] }
 0x126   : > { %1714 = vst.msk [vmem:[#allocation2 + $0x79] sm:$0xff] %vm380_vm1, %v1682_v50  ;;  %v1685_v6 = vadd.f32 %v1653_v3, %v1531_v30  ;;  %v1526_v53 = vadd.f32 %v1525_v18, %v1297_v31  ;;  %v7399_v54 = vpop.f32.mrf.mxu0  ;;  %7698 = vmatmul.mubr.msk.f32.gmra.mxu0 %vm380_vm1, %v9470_v62  ;;  %v9524_v50 = vld [vmem:[%s8465_s14 + $0x80] sm:$0xff] }
 0x127   : > { %v7449_v33 = vpop.f32.mrf.mxu1  ;;  %7748 = vmatmul.mubr.msk.f32.gmra.mxu1 %vm380_vm1, %v9475_v56  ;;  %7700 = vmatprep.mubr.msk.f32.mxu0 %vm380_vm1, %v9480_v34  ;;  %v9530_v18 = vld [vmem:[%s8474_s17 + $0x80] sm:$0xff] }
 0x128   : > { %1717 = vst.msk [vmem:[#allocation2 + $0x99] sm:$0xff] %vm380_vm1, %v1685_v6  ;;  %v1684_v57 = vadd.f32 %v1652_v32, %v1526_v53  ;;  %v1541_v11 = vadd.f32 %v7449_v33, %v7399_v54  ;;  %v1307_v20 = vpop.f32.mrf.mxu0  ;;  %7750 = vmatprep.mubr.msk.f32.mxu1 %vm380_vm1, %v9486_v59  ;;  %v1659_v6 = vld [vmem:[#allocation2 + $0xe1] sm:$0xff] }
 0x129   : > { %v1535_v36 = vpop.f32.mrf.mxu1 }
 0x12a   : > { %1716 = vst.msk [vmem:[#allocation2 + $0x91] sm:$0xff] %vm380_vm1, %v1684_v57  ;;  %v1687_v21 = vadd.f32 %v1655_v63, %v1541_v11  ;;  %v1536_v37 = vadd.f32 %v1535_v36, %v1307_v20  ;;  %v7402_v38 = vpop.f32.mrf.mxu0  ;;  %7701 = vmatmul.mubr.msk.f32.gmra.mxu0 %vm380_vm1, %v9492_v39  ;;  %v9536_v57 = vld [vmem:[%s8465_s14 + $0x88] sm:$0xff]  ;;  %v1658_v11 = vld [vmem:[#allocation2 + $0xd9] sm:$0xff]  ;;  %v9546_v36 = vld [vmem:[%s8465_s14 + $0x90] sm:$0xff] }
 0x12b   : > { %v7452_v12 = vpop.f32.mrf.mxu1  ;;  %7751 = vmatmul.mubr.msk.f32.gmra.mxu1 %vm380_vm1, %v9497_v5  ;;  %7703 = vmatprep.mubr.msk.f32.mxu0 %vm380_vm1, %v9502_v13  ;;  %v9541_v63 = vld [vmem:[%s8474_s17 + $0x88] sm:$0xff] }
 0x12c   : > { %1719 = vst.msk [vmem:[#allocation2 + $0xb1] sm:$0xff] %vm380_vm1, %v1687_v21  ;;  %v1686_v40 = vadd.f32 %v1654_v23, %v1536_v37  ;;  %v1551_v24 = vadd.f32 %v7452_v12, %v7402_v38  ;;  %v1317_v41 = vpop.f32.mrf.mxu0  ;;  %7753 = vmatprep.mubr.msk.f32.mxu1 %vm380_vm1, %v9508_v15  ;;  %v9552_v23 = vld [vmem:[%s8474_s17 + $0x90] sm:$0xff]  ;;  %v1661_v12 = vld [vmem:[#allocation2 + $0xf9] sm:$0xff] }
 0x12d   : > { %v1545_v25 = vpop.f32.mrf.mxu1 }
 0x12e   : > { %1718 = vst.msk [vmem:[#allocation2 + $0xa9] sm:$0xff] %vm380_vm1, %v1686_v40  ;;  %v1689_v44 = vadd.f32 %v1657_v55, %v1551_v24  ;;  %v1546_v27 = vadd.f32 %v1545_v25, %v1317_v41  ;;  %v7405_v45 = vpop.f32.mrf.mxu0  ;;  %7704 = vmatmul.mubr.msk.f32.gmra.mxu0 %vm380_vm1, %v9514_v46  ;;  %v9558_v25 = vld [vmem:[%s8465_s14 + $0x98] sm:$0xff] }
 0x12f   : > { %v7455_v16 = vpop.f32.mrf.mxu1  ;;  %7754 = vmatmul.mubr.msk.f32.gmra.mxu1 %vm380_vm1, %v9519_v28  ;;  %7706 = vmatprep.mubr.msk.f32.mxu0 %vm380_vm1, %v9524_v50 }
 0x130   : > { %1721 = vst.msk [vmem:[#allocation2 + $0xc9] sm:$0xff] %vm380_vm1, %v1689_v44  ;;  %v1688_v30 = vadd.f32 %v1656_v47, %v1546_v27  ;;  %v1561_v31 = vadd.f32 %v7455_v16, %v7405_v45  ;;  %v1327_v3 = vpop.f32.mrf.mxu0  ;;  %7756 = vmatprep.mubr.msk.f32.mxu1 %vm380_vm1, %v9530_v18  ;;  %v1660_v44 = vld [vmem:[#allocation2 + $0xf1] sm:$0xff]  ;;  %v9568_v47 = vld [vmem:[%s8465_s14 + $0xa0] sm:$0xff] }
 0x131   : > { %v1555_v53 = vpop.f32.mrf.mxu1  ;;  %v9563_v45 = vld [vmem:[%s8474_s17 + $0x98] sm:$0xff] }
 0x132   : > { %1720 = vst.msk [vmem:[#allocation2 + $0xc1] sm:$0xff] %vm380_vm1, %v1688_v30  ;;  %v1691_v54 = vadd.f32 %v1659_v6, %v1561_v31  ;;  %v1556_v32 = vadd.f32 %v1555_v53, %v1327_v3  ;;  %v7408_v33 = vpop.f32.mrf.mxu0  ;;  %7707 = vmatmul.mubr.msk.f32.gmra.mxu0 %vm380_vm1, %v9536_v57  ;;  %v9574_v3 = vld [vmem:[%s8474_s17 + $0xa0] sm:$0xff]  ;;  %v1663_v6 = vld [vmem:[#allocation2 + $0x111] sm:$0xff] }
 0x133   : > { %v7458_v20 = vpop.f32.mrf.mxu1  ;;  %7757 = vmatmul.mubr.msk.f32.gmra.mxu1 %vm380_vm1, %v9541_v63  ;;  %7709 = vmatprep.mubr.msk.f32.mxu0 %vm380_vm1, %v9546_v36 }
 0x134   : > { %1723 = vst.msk [vmem:[#allocation2 + $0xe1] sm:$0xff] %vm380_vm1, %v1691_v54  ;;  %v1690_v21 = vadd.f32 %v1658_v11, %v1556_v32  ;;  %v1571_v37 = vadd.f32 %v7458_v20, %v7408_v33  ;;  %v1337_v38 = vpop.f32.mrf.mxu0  ;;  %7759 = vmatprep.mubr.msk.f32.mxu1 %vm380_vm1, %v9552_v23  ;;  %v9580_v11 = vld [vmem:[%s8465_s14 + $0xa8] sm:$0xff] }
 0x135   : > { %v1565_v40 = vpop.f32.mrf.mxu1  ;;  %v1662_v20 = vld [vmem:[#allocation2 + $0x109] sm:$0xff] }
 0x136   : > { %1722 = vst.msk [vmem:[#allocation2 + $0xd9] sm:$0xff] %vm380_vm1, %v1690_v21  ;;  %v1693_v24 = vadd.f32 %v1661_v12, %v1571_v37  ;;  %v1566_v41 = vadd.f32 %v1565_v40, %v1337_v38  ;;  %v7411_v55 = vpop.f32.mrf.mxu0  ;;  %7710 = vmatmul.mubr.msk.f32.gmra.mxu0 %vm380_vm1, %v9558_v25  ;;  %v9585_v37 = vld [vmem:[%s8474_s17 + $0xa8] sm:$0xff]  ;;  %v9590_v38 = vld [vmem:[%s8465_s14 + $0xb0] sm:$0xff] }
 0x137   : > { %v7461_v27 = vpop.f32.mrf.mxu1  ;;  %7760 = vmatmul.mubr.msk.f32.gmra.mxu1 %vm380_vm1, %v9563_v45  ;;  %7712 = vmatprep.mubr.msk.f32.mxu0 %vm380_vm1, %v9568_v47 }
 0x138   : > { %1725 = vst.msk [vmem:[#allocation2 + $0xf9] sm:$0xff] %vm380_vm1, %v1693_v24  ;;  %v1692_v16 = vadd.f32 %v1660_v44, %v1566_v41  ;;  %v1581_v30 = vadd.f32 %v7461_v27, %v7411_v55  ;;  %v1347_v31 = vpop.f32.mrf.mxu0  ;;  %7762 = vmatprep.mubr.msk.f32.mxu1 %vm380_vm1, %v9574_v3  ;;  %v9596_v41 = vld [vmem:[%s8474_s17 + $0xb0] sm:$0xff] }
 0x139   : > { %v1575_v53 = vpop.f32.mrf.mxu1  ;;  %v1665_v55 = vld [vmem:[#allocation2 + $0x129] sm:$0xff] }
 0x13a   : > { %1724 = vst.msk [vmem:[#allocation2 + $0xf1] sm:$0xff] %vm380_vm1, %v1692_v16  ;;  %v1695_v54 = vadd.f32 %v1663_v6, %v1581_v30  ;;  %v1576_v32 = vadd.f32 %v1575_v53, %v1347_v31  ;;  %v7414_v33 = vpop.f32.mrf.mxu0  ;;  %7713 = vmatmul.mubr.msk.f32.gmra.mxu0 %vm380_vm1, %v9580_v11  ;;  %v9602_v31 = vld [vmem:[%s8465_s14 + $0xb8] sm:$0xff]  ;;  %v1664_v6 = vld [vmem:[#allocation2 + $0x121] sm:$0xff] }
 0x13b   : > { %v7464_v21 = vpop.f32.mrf.mxu1  ;;  %7763 = vmatmul.mubr.msk.f32.gmra.mxu1 %vm380_vm1, %v9585_v37  ;;  %7715 = vmatprep.mubr.msk.f32.mxu0 %vm380_vm1, %v9590_v38  ;;  %11146 = vst [vmem:[#allocation7_spill] sm:$0xff] %v9602_v31 }
 0x13c   : > { %1727 = vst.msk [vmem:[#allocation2 + $0x111] sm:$0xff] %vm380_vm1, %v1695_v54  ;;  %v1694_v12 = vadd.f32 %v1662_v20, %v1576_v32  ;;  %v1591_v40 = vadd.f32 %v7464_v21, %v7414_v33  ;;  %v1357_v24 = vpop.f32.mrf.mxu0  ;;  %7765 = vmatprep.mubr.msk.f32.mxu1 %vm380_vm1, %v9596_v41  ;;  %v9607_v54 = vld [vmem:[%s8474_s17 + $0xb8] sm:$0xff]  ;;  %v9612_v32 = vld [vmem:[%s8465_s14 + $0xc0] sm:$0xff] }
 0x13d   : > { %v1585_v44 = vpop.f32.mrf.mxu1  ;;  %11147 = vst [vmem:[#allocation4_spill] sm:$0xff] %v9607_v54  ;;  %11148 = vst [vmem:[#allocation6_spill] sm:$0xff] %v9612_v32 }
 0x13e   : > { %1726 = vst.msk [vmem:[#allocation2 + $0x109] sm:$0xff] %vm380_vm1, %v1694_v12  ;;  %v1697_v27 = vadd.f32 %v1665_v55, %v1591_v40  ;;  %v1586_v16 = vadd.f32 %v1585_v44, %v1357_v24  ;;  %v7417_v30 = vpop.f32.mrf.mxu0  ;;  %7716 = vmatmul.mubr.msk.f32.gmra.mxu0 %vm380_vm1, %v9602_v31  ;;  %v9618_v12 = vld [vmem:[%s8474_s17 + $0xc0] sm:$0xff]  ;;  %v9690_v31 = vld [vmem:[%s8465_s14 + $0xf8] sm:$0xff] }
 0x13f   : > { %v7467_v53 = vpop.f32.mrf.mxu1  ;;  %7766 = vmatmul.mubr.msk.f32.gmra.mxu1 %vm380_vm1, %v9607_v54  ;;  %7718 = vmatprep.mubr.msk.f32.mxu0 %vm380_vm1, %v9612_v32  ;;  %11149 = vst [vmem:[#allocation3_spill] sm:$0xff] %v9618_v12  ;;  %v1667_v40 = vld [vmem:[#allocation2 + $0x141] sm:$0xff]  ;;  %11160 = vst [vmem:[#allocation17_spill] sm:$0xff] %v9690_v31 }
 0x140   : > { %1729 = vst.msk [vmem:[#allocation2 + $0x129] sm:$0xff] %vm380_vm1, %v1697_v27  ;;  %v1696_v33 = vadd.f32 %v1664_v6, %v1586_v16  ;;  %v1601_v20 = vadd.f32 %v7467_v53, %v7417_v30  ;;  %v1367_v21 = vpop.f32.mrf.mxu0  ;;  %7768 = vmatprep.mubr.msk.f32.mxu1 %vm380_vm1, %v9618_v12  ;;  %v9624_v54 = vld [vmem:[%s8465_s14 + $0xc8] sm:$0xff]  ;;  %v1666_v27 = vld [vmem:[#allocation2 + $0x139] sm:$0xff]  ;;  %v9634_v6 = vld [vmem:[%s8465_s14 + $0xd0] sm:$0xff] }
 0x141   : > { %v1595_v24 = vpop.f32.mrf.mxu1  ;;  %11150 = vst [vmem:[#allocation5_spill] sm:$0xff] %v9624_v54  ;;  %v9629_v30 = vld [vmem:[%s8474_s17 + $0xc8] sm:$0xff]  ;;  %11152 = vst [vmem:[#allocation9_spill] sm:$0xff] %v9634_v6  ;;  %v9646_v12 = vld [vmem:[%s8465_s14 + $0xd8] sm:$0xff] }
 0x142   : > { %1728 = vst.msk [vmem:[#allocation2 + $0x121] sm:$0xff] %vm380_vm1, %v1696_v33  ;;  %v1699_v55 = vadd.f32 %v1667_v40, %v1601_v20  ;;  %v1596_v44 = vadd.f32 %v1595_v24, %v1367_v21  ;;  %v7420_v32 = vpop.f32.mrf.mxu0  ;;  %7719 = vmatmul.mubr.msk.f32.gmra.mxu0 %vm380_vm1, %v9624_v54  ;;  %11151 = vst [vmem:[#allocation8_spill] sm:$0xff] %v9629_v30  ;;  %v9640_v21 = vld [vmem:[%s8474_s17 + $0xd0] sm:$0xff]  ;;  %v1669_v40 = vld [vmem:[#allocation2 + $0x159] sm:$0xff] }
 0x143   : > { %v7470_v16 = vpop.f32.mrf.mxu1  ;;  %7769 = vmatmul.mubr.msk.f32.gmra.mxu1 %vm380_vm1, %v9629_v30  ;;  %7721 = vmatprep.mubr.msk.f32.mxu0 %vm380_vm1, %v9634_v6  ;;  %11153 = vst [vmem:[#allocation10_spill] sm:$0xff] %v9640_v21  ;;  %11154 = vst [vmem:[#allocation11_spill] sm:$0xff] %v9646_v12 }
 0x144   : > { %1731 = vst.msk [vmem:[#allocation2 + $0x141] sm:$0xff] %vm380_vm1, %v1699_v55  ;;  %v1698_v53 = vadd.f32 %v1666_v27, %v1596_v44  ;;  %v1611_v33 = vadd.f32 %v7470_v16, %v7420_v32  ;;  %v1377_v20 = vpop.f32.mrf.mxu0  ;;  %7771 = vmatprep.mubr.msk.f32.mxu1 %vm380_vm1, %v9640_v21  ;;  %v1668_v32 = vld [vmem:[#allocation2 + $0x151] sm:$0xff]  ;;  %v9656_v27 = vld [vmem:[%s8465_s14 + $0xe0] sm:$0xff]  ;;  %v9668_v21 = vld [vmem:[%s8465_s14 + $0xe8] sm:$0xff] }
 0x145   : > { %v1605_v24 = vpop.f32.mrf.mxu1  ;;  %v9651_v44 = vld [vmem:[%s8474_s17 + $0xd8] sm:$0xff]  ;;  %11156 = vst [vmem:[#allocation13_spill] sm:$0xff] %v9656_v27  ;;  %11158 = vst [vmem:[#allocation15_spill] sm:$0xff] %v9668_v21 }
 0x146   : > { %1730 = vst.msk [vmem:[#allocation2 + $0x139] sm:$0xff] %vm380_vm1, %v1698_v53  ;;  %v1701_v30 = vadd.f32 %v1669_v40, %v1611_v33  ;;  %v1606_v54 = vadd.f32 %v1605_v24, %v1377_v20  ;;  %v7423_v6 = vpop.f32.mrf.mxu0  ;;  %7722 = vmatmul.mubr.msk.f32.gmra.mxu0 %vm380_vm1, %v9646_v12  ;;  %11155 = vst [vmem:[#allocation12_spill] sm:$0xff] %v9651_v44  ;;  %v9662_v20 = vld [vmem:[%s8474_s17 + $0xe0] sm:$0xff]  ;;  %v1671_v40 = vld [vmem:[#allocation2 + $0x171] sm:$0xff] }
 0x147   : > { %v7473_v55 = vpop.f32.mrf.mxu1  ;;  %7772 = vmatmul.mubr.msk.f32.gmra.mxu1 %vm380_vm1, %v9651_v44  ;;  %7724 = vmatprep.mubr.msk.f32.mxu0 %vm380_vm1, %v9656_v27  ;;  %11157 = vst [vmem:[#allocation14_spill] sm:$0xff] %v9662_v20 }
 0x148   : > { %1733 = vst.msk [vmem:[#allocation2 + $0x159] sm:$0xff] %vm380_vm1, %v1701_v30  ;;  %v1700_v16 = vadd.f32 %v1668_v32, %v1606_v54  ;;  %v1621_v53 = vadd.f32 %v7473_v55, %v7423_v6  ;;  %v1387_v33 = vpop.f32.mrf.mxu0  ;;  %7774 = vmatprep.mubr.msk.f32.mxu1 %vm380_vm1, %v9662_v20  ;;  %v1670_v54 = vld [vmem:[#allocation2 + $0x169] sm:$0xff] }
 0x149   : > { %v1615_v24 = vpop.f32.mrf.mxu1  ;;  %v9673_v6 = vld [vmem:[%s8474_s17 + $0xe8] sm:$0xff]  ;;  %v9678_v32 = vld [vmem:[%s8465_s14 + $0xf0] sm:$0xff] }
 0x14a   : > { %1732 = vst.msk [vmem:[#allocation2 + $0x151] sm:$0xff] %vm380_vm1, %v1700_v16  ;;  %v1703_v44 = vadd.f32 %v1671_v40, %v1621_v53  ;;  %v1616_v12 = vadd.f32 %v1615_v24, %v1387_v33  ;;  %v7426_v27 = vpop.f32.mrf.mxu0  ;;  %7725 = vmatmul.mubr.msk.f32.gmra.mxu0 %vm380_vm1, %v9668_v21  ;;  %11159 = vst [vmem:[#allocation16_spill] sm:$0xff] %v9673_v6  ;;  %v9684_v33 = vld [vmem:[%s8474_s17 + $0xf0] sm:$0xff] }
 0x14b   : > { %v7476_v30 = vpop.f32.mrf.mxu1  ;;  %7775 = vmatmul.mubr.msk.f32.gmra.mxu1 %vm380_vm1, %v9673_v6  ;;  %7727 = vmatprep.mubr.msk.f32.mxu0 %vm380_vm1, %v9678_v32  ;;  %v1673_v40 = vld [vmem:[#allocation2 + $0x189] sm:$0xff] }
 0x14c   : > { %1735 = vst.msk [vmem:[#allocation2 + $0x171] sm:$0xff] %vm380_vm1, %v1703_v44  ;;  %v1702_v55 = vadd.f32 %v1670_v54, %v1616_v12  ;;  %v1631_v16 = vadd.f32 %v7476_v30, %v7426_v27  ;;  %v1397_v53 = vpop.f32.mrf.mxu0  ;;  %7777 = vmatprep.mubr.msk.f32.mxu1 %vm380_vm1, %v9684_v33  ;;  %v1672_v12 = vld [vmem:[#allocation2 + $0x181] sm:$0xff]  ;;  %v9695_v27 = vld [vmem:[%s8474_s17 + $0xf8] sm:$0xff] }
 0x14d   : > { %v1625_v24 = vpop.f32.mrf.mxu1 }
 0x14e   : > { %1734 = vst.msk [vmem:[#allocation2 + $0x169] sm:$0xff] %vm380_vm1, %v1702_v55  ;;  %v1705_v6 = vadd.f32 %v1673_v40, %v1631_v16  ;;  %v1626_v21 = vadd.f32 %v1625_v24, %v1397_v53  ;;  %v7429_v20 = vpop.f32.mrf.mxu0  ;;  %7728 = vmatmul.mubr.msk.f32.gmra.mxu0 %vm380_vm1, %v9690_v31  ;;  %v1675_v16 = vld [vmem:[#allocation2 + $0x1a1] sm:$0xff] }
 0x14f   : > { %v7479_v44 = vpop.f32.mrf.mxu1  ;;  %7778 = vmatmul.mubr.msk.f32.gmra.mxu1 %vm380_vm1, %v9695_v27  ;;  %7782 = vmatprep.mubr.msk.f32.mxu0 %vm380_vm1, %v9330_v1  ;;  %v9710_v1 = vld [vmem:[%s11057_s3 + $0x1c] sm:$0xf] }
 0x150   : > { %1737 = vst.msk [vmem:[#allocation2 + $0x189] sm:$0xff] %vm380_vm1, %v1705_v6  ;;  %v1704_v54 = vadd.f32 %v1672_v12, %v1626_v21  ;;  %v1641_v30 = vadd.f32 %v7479_v44, %v7429_v20  ;;  %v1407_v55 = vpop.f32.mrf.mxu0  ;;  %7832 = vmatprep.mubr.msk.f32.mxu1 %vm380_vm1, %v9336_v7  ;;  %v1674_v21 = vld [vmem:[#allocation2 + $0x199] sm:$0xff] }
 0x151   : > { %v1635_v53 = vpop.f32.mrf.mxu1  ;;  %v9719_v7 = vld [vmem:[%s11056_s2 + $0x1c] sm:$0xf] }
 0x152   : > { %1736 = vst.msk [vmem:[#allocation2 + $0x181] sm:$0xff] %vm380_vm1, %v1704_v54  ;;  %v1707_v40 = vadd.f32 %v1675_v16, %v1641_v30  ;;  %v1636_v24 = vadd.f32 %v1635_v53, %v1407_v55  ;;  %v7484_v31 = vpop.f32.mrf.mxu0  ;;  %7783 = vmatmul.mubr.msk.f32.vlgmr.msra.gmra.mxu0 %vm380_vm1, %v9342_v58 }
 0x153   : > { %v7534_v20 = vpop.f32.mrf.mxu1  ;;  %7833 = vmatmul.mubr.msk.f32.vlgmr.msra.gmra.mxu1 %vm380_vm1, %v9352_v51  ;;  %7881 = vmatpush3.msk.msra.mxu0 %vm534_vm0, %v9349_v49  ;;  %v2201_v51 = vld [vmem:[#allocation2 + $0x38] sm:$0xff] }
 0x154   : > { %1739 = vst.msk [vmem:[#allocation2 + $0x1a1] sm:$0xff] %vm380_vm1, %v1707_v40  ;;  %v1706_v58 = vadd.f32 %v1674_v21, %v1636_v24  ;;  %v2047_v6 = vadd.f32 %v7534_v20, %v7484_v31  ;;  %7931 = vmatpush3.msk.msra.mxu1 %vm534_vm0, %v9361_v29  ;;  %v1813_v12 = vpop.f32.mrf.mxu0  ;;  %7785 = vmatprep.mubr.msk.f32.mxu0 %vm380_vm1, %v9367_v52  ;;  %v2200_v29 = vld [vmem:[#allocation2 + $0x30] sm:$0xff] }
 0x155   : > { %v2041_v44 = vpop.f32.mrf.mxu1  ;;  %7835 = vmatprep.mubr.msk.f32.mxu1 %vm380_vm1, %v9372_v19  ;;  %7980 = vmatprep.subr.msk.mxu0 %vm534_vm0, %v9710_v1 }
 0x156   : > { %1738 = vst.msk [vmem:[#allocation2 + $0x199] sm:$0xff] %vm380_vm1, %v1706_v58  ;;  %v2233_v49 = vadd.f32 %v2201_v51, %v2047_v6  ;;  %v2042_v54 = vadd.f32 %v2041_v44, %v1813_v12  ;;  %v7487_v31 = vpop.f32.mrf.mxu0  ;;  %7786 = vmatmul.mubr.msk.f32.gmra.mxu0 %vm380_vm1, %v9380_v8  ;;  %8030 = vmatprep.subr.msk.mxu1 %vm534_vm0, %v9719_v7  ;;  %v2203_v8 = vld [vmem:[#allocation2 + $0x50] sm:$0xff]  ;;  %v2205_v58 = vld [vmem:[#allocation2 + $0x68] sm:$0xff] }
 0x157   : > { %v7537_v52 = vpop.f32.mrf.mxu1  ;;  %7836 = vmatmul.mubr.msk.f32.gmra.mxu1 %vm380_vm1, %v9387_v9  ;;  %7788 = vmatprep.mubr.msk.f32.mxu0 %vm380_vm1, %v9392_v60  ;;  %v2202_v9 = vld [vmem:[#allocation2 + $0x48] sm:$0xff] }
 0x158   : > { %2265 = vst.msk [vmem:[#allocation2 + $0x38] sm:$0xff] %vm380_vm1, %v2233_v49  ;;  %v2232_v19 = vadd.f32 %v2200_v29, %v2042_v54  ;;  %v2057_v30 = vadd.f32 %v7537_v52, %v7487_v31  ;;  %v1823_v55 = vpop.f32.mrf.mxu0  ;;  %7838 = vmatprep.mubr.msk.f32.mxu1 %vm380_vm1, %v9398_v35  ;;  %v2207_v54 = vld [vmem:[#allocation2 + $0x80] sm:$0xff] }
 0x159   : > { %v2051_v16 = vpop.f32.mrf.mxu1 }
 0x15a   : > { %2264 = vst.msk [vmem:[#allocation2 + $0x30] sm:$0xff] %vm380_vm1, %v2232_v19  ;;  %v2235_v53 = vadd.f32 %v2203_v8, %v2057_v30  ;;  %v2052_v40 = vadd.f32 %v2051_v16, %v1823_v55  ;;  %v7490_v24 = vpop.f32.mrf.mxu0  ;;  %7789 = vmatmul.mubr.msk.f32.gmra.mxu0 %vm380_vm1, %v9404_v0  ;;  %v2209_v55 = vld [vmem:[#allocation2 + $0x98] sm:$0xff] }
 0x15b   : > { %v7540_v60 = vpop.f32.mrf.mxu1  ;;  %7839 = vmatmul.mubr.msk.f32.gmra.mxu1 %vm380_vm1, %v9409_v22  ;;  %7791 = vmatprep.mubr.msk.f32.mxu0 %vm380_vm1, %v9414_v61  ;;  %v2204_v22 = vld [vmem:[#allocation2 + $0x60] sm:$0xff] }
 0x15c   : > { %2267 = vst.msk [vmem:[#allocation2 + $0x50] sm:$0xff] %vm380_vm1, %v2235_v53  ;;  %v2234_v35 = vadd.f32 %v2202_v9, %v2052_v40  ;;  %v2067_v21 = vadd.f32 %v7540_v60, %v7490_v24  ;;  %v1833_v20 = vpop.f32.mrf.mxu0  ;;  %7841 = vmatprep.mubr.msk.f32.mxu1 %vm380_vm1, %v9420_v10  ;;  %v2211_v9 = vld [vmem:[#allocation2 + $0xb0] sm:$0xff] }
 0x15d   : > { %v2061_v6 = vpop.f32.mrf.mxu1 }
 0x15e   : > { %2266 = vst.msk [vmem:[#allocation2 + $0x48] sm:$0xff] %vm380_vm1, %v2234_v35  ;;  %v2237_v0 = vadd.f32 %v2205_v58, %v2067_v21  ;;  %v2062_v12 = vadd.f32 %v2061_v6, %v1833_v20  ;;  %v7493_v51 = vpop.f32.mrf.mxu0  ;;  %7792 = vmatmul.mubr.msk.f32.gmra.mxu0 %vm380_vm1, %v9426_v14  ;;  %v2213_v6 = vld [vmem:[#allocation2 + $0xc8] sm:$0xff] }
 0x15f   : > { %v7543_v61 = vpop.f32.mrf.mxu1  ;;  %7842 = vmatmul.mubr.msk.f32.gmra.mxu1 %vm380_vm1, %v9431_v42  ;;  %7794 = vmatprep.mubr.msk.f32.mxu0 %vm380_vm1, %v9436_v43  ;;  %v2206_v42 = vld [vmem:[#allocation2 + $0x78] sm:$0xff] }
 0x160   : > { %2269 = vst.msk [vmem:[#allocation2 + $0x68] sm:$0xff] %vm380_vm1, %v2237_v0  ;;  %v2236_v10 = vadd.f32 %v2204_v22, %v2062_v12  ;;  %v2077_v44 = vadd.f32 %v7543_v61, %v7493_v51  ;;  %v1843_v49 = vpop.f32.mrf.mxu0  ;;  %7844 = vmatprep.mubr.msk.f32.mxu1 %vm380_vm1, %v9442_v26 }
 0x161   : > { %v2071_v31 = vpop.f32.mrf.mxu1 }
 0x162   : > { %2268 = vst.msk [vmem:[#allocation2 + $0x60] sm:$0xff] %vm380_vm1, %v2236_v10  ;;  %v2239_v14 = vadd.f32 %v2207_v54, %v2077_v44  ;;  %v2072_v29 = vadd.f32 %v2071_v31, %v1843_v49  ;;  %v7496_v52 = vpop.f32.mrf.mxu0  ;;  %7795 = vmatmul.mubr.msk.f32.gmra.mxu0 %vm380_vm1, %v9448_v2  ;;  %v2215_v10 = vld [vmem:[#allocation2 + $0xe0] sm:$0xff] }
 0x163   : > { %v7546_v43 = vpop.f32.mrf.mxu1  ;;  %7845 = vmatmul.mubr.msk.f32.gmra.mxu1 %vm380_vm1, %v9453_v48  ;;  %7797 = vmatprep.mubr.msk.f32.mxu0 %vm380_vm1, %v9458_v4  ;;  %v2208_v48 = vld [vmem:[#allocation2 + $0x90] sm:$0xff] }
 0x164   : > { %2271 = vst.msk [vmem:[#allocation2 + $0x80] sm:$0xff] %vm380_vm1, %v2239_v14  ;;  %v2238_v26 = vadd.f32 %v2206_v42, %v2072_v29  ;;  %v2087_v19 = vadd.f32 %v7546_v43, %v7496_v52  ;;  %v1853_v30 = vpop.f32.mrf.mxu0  ;;  %7847 = vmatprep.mubr.msk.f32.mxu1 %vm380_vm1, %v9464_v17  ;;  %v2217_v29 = vld [vmem:[#allocation2 + $0xf8] sm:$0xff] }
 0x165   : > { %v2081_v8 = vpop.f32.mrf.mxu1 }
 0x166   : > { %2270 = vst.msk [vmem:[#allocation2 + $0x78] sm:$0xff] %vm380_vm1, %v2238_v26  ;;  %v2241_v2 = vadd.f32 %v2209_v55, %v2087_v19  ;;  %v2082_v16 = vadd.f32 %v2081_v8, %v1853_v30  ;;  %v7499_v53 = vpop.f32.mrf.mxu0  ;;  %7798 = vmatmul.mubr.msk.f32.gmra.mxu0 %vm380_vm1, %v9470_v62  ;;  %v2219_v30 = vld [vmem:[#allocation2 + $0x110] sm:$0xff] }
 0x167   : > { %v7549_v4 = vpop.f32.mrf.mxu1  ;;  %7848 = vmatmul.mubr.msk.f32.gmra.mxu1 %vm380_vm1, %v9475_v56  ;;  %7800 = vmatprep.mubr.msk.f32.mxu0 %vm380_vm1, %v9480_v34  ;;  %v2210_v56 = vld [vmem:[#allocation2 + $0xa8] sm:$0xff] }
 0x168   : > { %2273 = vst.msk [vmem:[#allocation2 + $0x98] sm:$0xff] %vm380_vm1, %v2241_v2  ;;  %v2240_v17 = vadd.f32 %v2208_v48, %v2082_v16  ;;  %v2097_v40 = vadd.f32 %v7549_v4, %v7499_v53  ;;  %v1863_v24 = vpop.f32.mrf.mxu0  ;;  %7850 = vmatprep.mubr.msk.f32.mxu1 %vm380_vm1, %v9486_v59  ;;  %v2221_v48 = vld [vmem:[#allocation2 + $0x128] sm:$0xff] }
 0x169   : > { %v2091_v60 = vpop.f32.mrf.mxu1 }
 0x16a   : > { %2272 = vst.msk [vmem:[#allocation2 + $0x90] sm:$0xff] %vm380_vm1, %v2240_v17  ;;  %v2243_v62 = vadd.f32 %v2211_v9, %v2097_v40  ;;  %v2092_v35 = vadd.f32 %v2091_v60, %v1863_v24  ;;  %v7502_v21 = vpop.f32.mrf.mxu0  ;;  %7801 = vmatmul.mubr.msk.f32.gmra.mxu0 %vm380_vm1, %v9492_v39  ;;  %v11161_v24 = vld [vmem:[#allocation7_spill] sm:$0xff]  ;;  %v11162_v9 = vld [vmem:[#allocation4_spill] sm:$0xff]  ;;  %v11163_v60 = vld [vmem:[#allocation6_spill] sm:$0xff] }
 0x16b   : > { %v7552_v34 = vpop.f32.mrf.mxu1  ;;  %7851 = vmatmul.mubr.msk.f32.gmra.mxu1 %vm380_vm1, %v9497_v5  ;;  %7803 = vmatprep.mubr.msk.f32.mxu0 %vm380_vm1, %v9502_v13  ;;  %v2212_v5 = vld [vmem:[#allocation2 + $0xc0] sm:$0xff] }
 0x16c   : > { %2275 = vst.msk [vmem:[#allocation2 + $0xb0] sm:$0xff] %vm380_vm1, %v2243_v62  ;;  %v2242_v59 = vadd.f32 %v2210_v56, %v2092_v35  ;;  %v2107_v20 = vadd.f32 %v7552_v34, %v7502_v21  ;;  %v1873_v58 = vpop.f32.mrf.mxu0  ;;  %7853 = vmatprep.mubr.msk.f32.mxu1 %vm380_vm1, %v9508_v15  ;;  %v11164_v21 = vld [vmem:[#allocation3_spill] sm:$0xff]  ;;  %v2223_v56 = vld [vmem:[#allocation2 + $0x140] sm:$0xff] }
 0x16d   : > { %v2101_v0 = vpop.f32.mrf.mxu1 }
 0x16e   : > { %2274 = vst.msk [vmem:[#allocation2 + $0xa8] sm:$0xff] %vm380_vm1, %v2242_v59  ;;  %v2245_v39 = vadd.f32 %v2213_v6, %v2107_v20  ;;  %v2102_v12 = vadd.f32 %v2101_v0, %v1873_v58  ;;  %v7505_v51 = vpop.f32.mrf.mxu0  ;;  %7804 = vmatmul.mubr.msk.f32.gmra.mxu0 %vm380_vm1, %v9514_v46  ;;  %v11165_v6 = vld [vmem:[#allocation5_spill] sm:$0xff]  ;;  %v2222_v0 = vld [vmem:[#allocation2 + $0x138] sm:$0xff] }
 0x16f   : > { %v7555_v13 = vpop.f32.mrf.mxu1  ;;  %7854 = vmatmul.mubr.msk.f32.gmra.mxu1 %vm380_vm1, %v9519_v28  ;;  %7806 = vmatprep.mubr.msk.f32.mxu0 %vm380_vm1, %v9524_v50  ;;  %v2214_v28 = vld [vmem:[#allocation2 + $0xd8] sm:$0xff] }
 0x170   : > { %2277 = vst.msk [vmem:[#allocation2 + $0xc8] sm:$0xff] %vm380_vm1, %v2245_v39  ;;  %v2244_v15 = vadd.f32 %v2212_v5, %v2102_v12  ;;  %v2117_v22 = vadd.f32 %v7555_v13, %v7505_v51  ;;  %v1883_v61 = vpop.f32.mrf.mxu0  ;;  %7856 = vmatprep.mubr.msk.f32.mxu1 %vm380_vm1, %v9530_v18  ;;  %v11166_v12 = vld [vmem:[#allocation8_spill] sm:$0xff]  ;;  %v11167_v51 = vld [vmem:[#allocation9_spill] sm:$0xff] }
 0x171   : > { %v2111_v44 = vpop.f32.mrf.mxu1 }
 0x172   : > { %2276 = vst.msk [vmem:[#allocation2 + $0xc0] sm:$0xff] %vm380_vm1, %v2244_v15  ;;  %v2247_v46 = vadd.f32 %v2215_v10, %v2117_v22  ;;  %v2112_v49 = vadd.f32 %v2111_v44, %v1883_v61  ;;  %v7508_v54 = vpop.f32.mrf.mxu0  ;;  %7807 = vmatmul.mubr.msk.f32.gmra.mxu0 %vm380_vm1, %v9536_v57  ;;  %v11168_v22 = vld [vmem:[#allocation10_spill] sm:$0xff]  ;;  %v2225_v61 = vld [vmem:[#allocation2 + $0x158] sm:$0xff] }
 0x173   : > { %v7558_v50 = vpop.f32.mrf.mxu1  ;;  %7857 = vmatmul.mubr.msk.f32.gmra.mxu1 %vm380_vm1, %v9541_v63  ;;  %7809 = vmatprep.mubr.msk.f32.mxu0 %vm380_vm1, %v9546_v36  ;;  %v2216_v63 = vld [vmem:[#allocation2 + $0xf0] sm:$0xff] }
 0x174   : > { %2279 = vst.msk [vmem:[#allocation2 + $0xe0] sm:$0xff] %vm380_vm1, %v2247_v46  ;;  %v2246_v18 = vadd.f32 %v2214_v28, %v2112_v49  ;;  %v2127_v31 = vadd.f32 %v7558_v50, %v7508_v54  ;;  %v1893_v14 = vpop.f32.mrf.mxu0  ;;  %7859 = vmatprep.mubr.msk.f32.mxu1 %vm380_vm1, %v9552_v23  ;;  %v11169_v54 = vld [vmem:[#allocation11_spill] sm:$0xff] }
 0x175   : > { %v2121_v52 = vpop.f32.mrf.mxu1  ;;  %v2224_v28 = vld [vmem:[#allocation2 + $0x150] sm:$0xff] }
 0x176   : > { %2278 = vst.msk [vmem:[#allocation2 + $0xd8] sm:$0xff] %vm380_vm1, %v2246_v18  ;;  %v2249_v57 = vadd.f32 %v2217_v29, %v2127_v31  ;;  %v2122_v42 = vadd.f32 %v2121_v52, %v1893_v14  ;;  %v7511_v43 = vpop.f32.mrf.mxu0  ;;  %7810 = vmatmul.mubr.msk.f32.gmra.mxu0 %vm380_vm1, %v9558_v25  ;;  %v11170_v18 = vld [vmem:[#allocation12_spill] sm:$0xff]  ;;  %v11171_v31 = vld [vmem:[#allocation13_spill] sm:$0xff] }
 0x177   : > { %v7561_v36 = vpop.f32.mrf.mxu1  ;;  %7860 = vmatmul.mubr.msk.f32.gmra.mxu1 %vm380_vm1, %v9563_v45  ;;  %7812 = vmatprep.mubr.msk.f32.mxu0 %vm380_vm1, %v9568_v47  ;;  %v2218_v45 = vld [vmem:[#allocation2 + $0x108] sm:$0xff] }
 0x178   : > { %2281 = vst.msk [vmem:[#allocation2 + $0xf8] sm:$0xff] %vm380_vm1, %v2249_v57  ;;  %v2248_v23 = vadd.f32 %v2216_v63, %v2122_v42  ;;  %v2137_v26 = vadd.f32 %v7561_v36, %v7511_v43  ;;  %v1903_v19 = vpop.f32.mrf.mxu0  ;;  %7862 = vmatprep.mubr.msk.f32.mxu1 %vm380_vm1, %v9574_v3  ;;  %v11172_v57 = vld [vmem:[#allocation14_spill] sm:$0xff]  ;;  %v2227_v42 = vld [vmem:[#allocation2 + $0x170] sm:$0xff] }
 0x179   : > { %v2131_v55 = vpop.f32.mrf.mxu1 }
 0x17a   : > { %2280 = vst.msk [vmem:[#allocation2 + $0xf0] sm:$0xff] %vm380_vm1, %v2248_v23  ;;  %v2251_v25 = vadd.f32 %v2219_v30, %v2137_v26  ;;  %v2132_v8 = vadd.f32 %v2131_v55, %v1903_v19  ;;  %v7514_v2 = vpop.f32.mrf.mxu0  ;;  %7813 = vmatmul.mubr.msk.f32.gmra.mxu0 %vm380_vm1, %v9580_v11  ;;  %v11173_v26 = vld [vmem:[#allocation15_spill] sm:$0xff]  ;;  %v2226_v19 = vld [vmem:[#allocation2 + $0x168] sm:$0xff]  ;;  %v11174_v55 = vld [vmem:[#allocation16_spill] sm:$0xff] }
 0x17b   : > { %v7564_v47 = vpop.f32.mrf.mxu1  ;;  %7863 = vmatmul.mubr.msk.f32.gmra.mxu1 %vm380_vm1, %v9585_v37  ;;  %7815 = vmatprep.mubr.msk.f32.mxu0 %vm380_vm1, %v9590_v38  ;;  %v2220_v37 = vld [vmem:[#allocation2 + $0x120] sm:$0xff] }
 0x17c   : > { %2283 = vst.msk [vmem:[#allocation2 + $0x110] sm:$0xff] %vm380_vm1, %v2251_v25  ;;  %v2250_v3 = vadd.f32 %v2218_v45, %v2132_v8  ;;  %v2147_v16 = vadd.f32 %v7564_v47, %v7514_v2  ;;  %v1913_v53 = vpop.f32.mrf.mxu0  ;;  %7865 = vmatprep.mubr.msk.f32.mxu1 %vm380_vm1, %v9596_v41  ;;  %v2229_v45 = vld [vmem:[#allocation2 + $0x188] sm:$0xff] }
 0x17d   : > { %v2141_v4 = vpop.f32.mrf.mxu1 }
 0x17e   : > { %2282 = vst.msk [vmem:[#allocation2 + $0x108] sm:$0xff] %vm380_vm1, %v2250_v3  ;;  %v2253_v11 = vadd.f32 %v2221_v48, %v2147_v16  ;;  %v2142_v17 = vadd.f32 %v2141_v4, %v1913_v53  ;;  %v7517_v40 = vpop.f32.mrf.mxu0  ;;  %7816 = vmatmul.mubr.msk.f32.gmra.mxu0 %vm380_vm1, %v11161_v24  ;;  %v11175_v48 = vld [vmem:[#allocation17_spill] sm:$0xff] }
 0x17f   : > { %v7567_v38 = vpop.f32.mrf.mxu1  ;;  %7866 = vmatmul.mubr.msk.f32.gmra.mxu1 %vm380_vm1, %v11162_v9  ;;  %7818 = vmatprep.mubr.msk.f32.mxu0 %vm380_vm1, %v11163_v60  ;;  %v9884_v24 = vld [vmem:[%s8474_s17] sm:$0xff] }
 0x180   : > { %2285 = vst.msk [vmem:[#allocation2 + $0x128] sm:$0xff] %vm380_vm1, %v2253_v11  ;;  %v2252_v41 = vadd.f32 %v2220_v37, %v2142_v17  ;;  %v2157_v62 = vadd.f32 %v7567_v38, %v7517_v40  ;;  %v1923_v35 = vpop.f32.mrf.mxu0  ;;  %7868 = vmatprep.mubr.msk.f32.mxu1 %vm380_vm1, %v11164_v21  ;;  %v9878_v11 = vld [vmem:[%s8465_s14] sm:$0xff] }
 0x181   : > { %v2151_v34 = vpop.f32.mrf.mxu1  ;;  %v2231_v37 = vld [vmem:[#allocation2 + $0x1a0] sm:$0xff] }
 0x182   : > { %2284 = vst.msk [vmem:[#allocation2 + $0x120] sm:$0xff] %vm380_vm1, %v2252_v41  ;;  %v2255_v59 = vadd.f32 %v2223_v56, %v2157_v62  ;;  %v2152_v20 = vadd.f32 %v2151_v34, %v1923_v35  ;;  %v7520_v58 = vpop.f32.mrf.mxu0  ;;  %7819 = vmatmul.mubr.msk.f32.gmra.mxu0 %vm380_vm1, %v11165_v6  ;;  %v9890_v41 = vld [vmem:[%s8465_s14 + $0x8] sm:$0xff]  ;;  %v9897_v62 = vld [vmem:[%s11057_s3 + $0x20] sm:$0xf]  ;;  %v2230_v35 = vld [vmem:[#allocation2 + $0x198] sm:$0xff] }
 0x183   : > { %v7570_v39 = vpop.f32.mrf.mxu1  ;;  %7869 = vmatmul.mubr.msk.f32.gmra.mxu1 %vm380_vm1, %v11166_v12  ;;  %7821 = vmatprep.mubr.msk.f32.mxu0 %vm380_vm1, %v11167_v51  ;;  %v2758_v56 = vld [vmem:[#allocation2 + $0x22] sm:$0xff]  ;;  %v9920_v12 = vld [vmem:[%s8474_s17 + $0x10] sm:$0xff] }
 0x184   : > { %2287 = vst.msk [vmem:[#allocation2 + $0x140] sm:$0xff] %vm380_vm1, %v2255_v59  ;;  %v2254_v5 = vadd.f32 %v2222_v0, %v2152_v20  ;;  %v2167_v13 = vadd.f32 %v7570_v39, %v7520_v58  ;;  %v1933_v15 = vpop.f32.mrf.mxu0  ;;  %7871 = vmatprep.mubr.msk.f32.mxu1 %vm380_vm1, %v11168_v22  ;;  %v9900_v34 = vld [vmem:[%s8474_s17 + $0x8] sm:$0xff]  ;;  %v9909_v59 = vld [vmem:[%s11056_s2 + $0x20] sm:$0xf]  ;;  %v9915_v0 = vld [vmem:[%s8465_s14 + $0x10] sm:$0xff] }
 0x185   : > { %v2161_v10 = vpop.f32.mrf.mxu1  ;;  %v2757_v39 = vld [vmem:[#allocation2 + $0x1a] sm:$0xff] }
 0x186   : > { %2286 = vst.msk [vmem:[#allocation2 + $0x138] sm:$0xff] %vm380_vm1, %v2254_v5  ;;  %v2257_v44 = vadd.f32 %v2225_v61, %v2167_v13  ;;  %v2162_v46 = vadd.f32 %v2161_v10, %v1933_v15  ;;  %v7523_v49 = vpop.f32.mrf.mxu0  ;;  %7822 = vmatmul.mubr.msk.f32.gmra.mxu0 %vm380_vm1, %v11169_v54  ;;  %v9928_v13 = vld [vmem:[%s8465_s14 + $0x18] sm:$0xff]  ;;  %v9940_v61 = vld [vmem:[%s8465_s14 + $0x20] sm:$0xff] }
 0x187   : > { %v7573_v50 = vpop.f32.mrf.mxu1  ;;  %7872 = vmatmul.mubr.msk.f32.gmra.mxu1 %vm380_vm1, %v11170_v18  ;;  %7824 = vmatprep.mubr.msk.f32.mxu0 %vm380_vm1, %v11171_v31  ;;  %v9935_v22 = vld [vmem:[%s8474_s17 + $0x18] sm:$0xff] }
 0x188   : > { %2289 = vst.msk [vmem:[#allocation2 + $0x158] sm:$0xff] %vm380_vm1, %v2257_v44  ;;  %v2256_v14 = vadd.f32 %v2224_v28, %v2162_v46  ;;  %v2177_v29 = vadd.f32 %v7573_v50, %v7523_v49  ;;  %v1943_v52 = vpop.f32.mrf.mxu0  ;;  %7874 = vmatprep.mubr.msk.f32.mxu1 %vm380_vm1, %v11172_v57  ;;  %v9946_v49 = vld [vmem:[%s8474_s17 + $0x20] sm:$0xff]  ;;  %v9957_v57 = vld [vmem:[%s8474_s17 + $0x28] sm:$0xff] }
 0x189   : > { %v2171_v43 = vpop.f32.mrf.mxu1  ;;  %v2760_v54 = vld [vmem:[#allocation2 + $0x3a] sm:$0xff] }
 0x18a   : > { %2288 = vst.msk [vmem:[#allocation2 + $0x150] sm:$0xff] %vm380_vm1, %v2256_v14  ;;  %v2259_v63 = vadd.f32 %v2227_v42, %v2177_v29  ;;  %v2172_v36 = vadd.f32 %v2171_v43, %v1943_v52  ;;  %v7526_v23 = vpop.f32.mrf.mxu0  ;;  %7825 = vmatmul.mubr.msk.f32.gmra.mxu0 %vm380_vm1, %v11173_v26  ;;  %v9952_v14 = vld [vmem:[%s8465_s14 + $0x28] sm:$0xff]  ;;  %v2759_v29 = vld [vmem:[#allocation2 + $0x32] sm:$0xff] }
 0x18b   : > { %v7576_v30 = vpop.f32.mrf.mxu1  ;;  %7875 = vmatmul.mubr.msk.f32.gmra.mxu1 %vm380_vm1, %v11174_v55  ;;  %7827 = vmatprep.mubr.msk.f32.mxu0 %vm380_vm1, %v9678_v32  ;;  %v2228_v32 = vld [vmem:[#allocation2 + $0x180] sm:$0xff]  ;;  %v9962_v42 = vld [vmem:[%s8465_s14 + $0x30] sm:$0xff] }
 0x18c   : > { %2291 = vst.msk [vmem:[#allocation2 + $0x170] sm:$0xff] %vm380_vm1, %v2259_v63  ;;  %v2258_v25 = vadd.f32 %v2226_v19, %v2172_v36  ;;  %v2187_v8 = vadd.f32 %v7576_v30, %v7526_v23  ;;  %v1953_v2 = vpop.f32.mrf.mxu0  ;;  %7877 = vmatprep.mubr.msk.f32.mxu1 %vm380_vm1, %v9684_v33  ;;  %v9968_v23 = vld [vmem:[%s8474_s17 + $0x30] sm:$0xff] }
 0x18d   : > { %v2181_v47 = vpop.f32.mrf.mxu1  ;;  %v2762_v26 = vld [vmem:[#allocation2 + $0x52] sm:$0xff] }
 0x18e   : > { %2290 = vst.msk [vmem:[#allocation2 + $0x168] sm:$0xff] %vm380_vm1, %v2258_v25  ;;  %v2261_v3 = vadd.f32 %v2229_v45, %v2187_v8  ;;  %v2182_v16 = vadd.f32 %v2181_v47, %v1953_v2  ;;  %v7529_v53 = vpop.f32.mrf.mxu0  ;;  %7828 = vmatmul.mubr.msk.f32.gmra.mxu0 %vm380_vm1, %v11175_v48  ;;  %v9974_v8 = vld [vmem:[%s8465_s14 + $0x38] sm:$0xff]  ;;  %v2761_v2 = vld [vmem:[#allocation2 + $0x4a] sm:$0xff] }
 0x18f   : > { %v7579_v4 = vpop.f32.mrf.mxu1  ;;  %7878 = vmatmul.mubr.msk.f32.gmra.mxu1 %vm380_vm1, %v9695_v27  ;;  %7882 = vmatprep.mubr.msk.f32.mxu0 %vm380_vm1, %v9878_v11  ;;  %v9979_v47 = vld [vmem:[%s8474_s17 + $0x38] sm:$0xff] }
 0x190   : > { %2293 = vst.msk [vmem:[#allocation2 + $0x188] sm:$0xff] %vm380_vm1, %v2261_v3  ;;  %v2260_v33 = vadd.f32 %v2228_v32, %v2182_v16  ;;  %v2197_v17 = vadd.f32 %v7579_v4, %v7529_v53  ;;  %v1963_v40 = vpop.f32.mrf.mxu0  ;;  %7932 = vmatprep.mubr.msk.f32.mxu1 %vm380_vm1, %v9884_v24  ;;  %v9984_v3 = vld [vmem:[%s8465_s14 + $0x40] sm:$0xff]  ;;  %v2764_v4 = vld [vmem:[#allocation2 + $0x6a] sm:$0xff] }
 0x191   : > { %v2191_v38 = vpop.f32.mrf.mxu1  ;;  %v9990_v32 = vld [vmem:[%s8474_s17 + $0x40] sm:$0xff] }
 0x192   : > { %2292 = vst.msk [vmem:[#allocation2 + $0x180] sm:$0xff] %vm380_vm1, %v2260_v33  ;;  %v2263_v27 = vadd.f32 %v2231_v37, %v2197_v17  ;;  %v2192_v9 = vadd.f32 %v2191_v38, %v1963_v40  ;;  %v7584_v60 = vpop.f32.mrf.mxu0  ;;  %7883 = vmatmul.mubr.msk.f32.vlgmr.msra.gmra.mxu0 %vm380_vm1, %v9890_v41  ;;  %v9996_v38 = vld [vmem:[%s8465_s14 + $0x48] sm:$0xff] }
 0x193   : > { %v7634_v21 = vpop.f32.mrf.mxu1  ;;  %7933 = vmatmul.mubr.msk.f32.vlgmr.msra.gmra.mxu1 %vm380_vm1, %v9900_v34  ;;  %7981 = vmatpush3.msk.msra.mxu0 %vm534_vm0, %v9710_v1 }
 0x194   : > { %2295 = vst.msk [vmem:[#allocation2 + $0x1a0] sm:$0xff] %vm380_vm1, %v2263_v27  ;;  %v2262_v20 = vadd.f32 %v2230_v35, %v2192_v9  ;;  %v2603_v58 = vadd.f32 %v7634_v21, %v7584_v60  ;;  %8031 = vmatpush3.msk.msra.mxu1 %vm534_vm0, %v9719_v7  ;;  %v2369_v6 = vpop.f32.mrf.mxu0  ;;  %7885 = vmatprep.mubr.msk.f32.mxu0 %vm380_vm1, %v9915_v0  ;;  %v2763_v27 = vld [vmem:[#allocation2 + $0x62] sm:$0xff]  ;;  %v10006_v35 = vld [vmem:[%s8465_s14 + $0x50] sm:$0xff] }
 0x195   : > { %v2597_v1 = vpop.f32.mrf.mxu1  ;;  %7935 = vmatprep.mubr.msk.f32.mxu1 %vm380_vm1, %v9920_v12  ;;  %8080 = vmatprep.subr.msk.mxu0 %vm534_vm0, %v9897_v62  ;;  %v10001_v60 = vld [vmem:[%s8474_s17 + $0x48] sm:$0xff] }
 0x196   : > { %2294 = vst.msk [vmem:[#allocation2 + $0x198] sm:$0xff] %vm380_vm1, %v2262_v20  ;;  %v2790_v7 = vadd.f32 %v2758_v56, %v2603_v58  ;;  %v2598_v51 = vadd.f32 %v2597_v1, %v2369_v6  ;;  %v7587_v5 = vpop.f32.mrf.mxu0  ;;  %7886 = vmatmul.mubr.msk.f32.gmra.mxu0 %vm380_vm1, %v9928_v13  ;;  %8130 = vmatprep.subr.msk.mxu1 %vm534_vm0, %v9909_v59  ;;  %v10012_v58 = vld [vmem:[%s8474_s17 + $0x50] sm:$0xff]  ;;  %v2766_v6 = vld [vmem:[#allocation2 + $0x82] sm:$0xff] }
 0x197   : > { %v7637_v15 = vpop.f32.mrf.mxu1  ;;  %7936 = vmatmul.mubr.msk.f32.gmra.mxu1 %vm380_vm1, %v9935_v22  ;;  %7888 = vmatprep.mubr.msk.f32.mxu0 %vm380_vm1, %v9940_v61 }
 0x198   : > { %2822 = vst.msk [vmem:[#allocation2 + $0x22] sm:$0xff] %vm380_vm1, %v2790_v7  ;;  %v2789_v10 = vadd.f32 %v2757_v39, %v2598_v51  ;;  %v2613_v44 = vadd.f32 %v7637_v15, %v7587_v5  ;;  %v2379_v46 = vpop.f32.mrf.mxu0  ;;  %7938 = vmatprep.mubr.msk.f32.mxu1 %vm380_vm1, %v9946_v49  ;;  %v10018_v5 = vld [vmem:[%s8465_s14 + $0x58] sm:$0xff] }
 0x199   : > { %v2607_v28 = vpop.f32.mrf.mxu1  ;;  %v2765_v15 = vld [vmem:[#allocation2 + $0x7a] sm:$0xff] }
 0x19a   : > { %2821 = vst.msk [vmem:[#allocation2 + $0x1a] sm:$0xff] %vm380_vm1, %v2789_v10  ;;  %v2792_v50 = vadd.f32 %v2760_v54, %v2613_v44  ;;  %v2608_v18 = vadd.f32 %v2607_v28, %v2379_v46  ;;  %v7590_v31 = vpop.f32.mrf.mxu0  ;;  %7889 = vmatmul.mubr.msk.f32.gmra.mxu0 %vm380_vm1, %v9952_v14  ;;  %v10023_v44 = vld [vmem:[%s8474_s17 + $0x58] sm:$0xff]  ;;  %v10028_v46 = vld [vmem:[%s8465_s14 + $0x60] sm:$0xff] }
 0x19b   : > { %v7640_v52 = vpop.f32.mrf.mxu1  ;;  %7939 = vmatmul.mubr.msk.f32.gmra.mxu1 %vm380_vm1, %v9957_v57  ;;  %7891 = vmatprep.mubr.msk.f32.mxu0 %vm380_vm1, %v9962_v42 }
 0x19c   : > { %2824 = vst.msk [vmem:[#allocation2 + $0x3a] sm:$0xff] %vm380_vm1, %v2792_v50  ;;  %v2791_v43 = vadd.f32 %v2759_v29, %v2608_v18  ;;  %v2623_v63 = vadd.f32 %v7640_v52, %v7590_v31  ;;  %v2389_v36 = vpop.f32.mrf.mxu0  ;;  %7941 = vmatprep.mubr.msk.f32.mxu1 %vm380_vm1, %v9968_v23  ;;  %v10034_v18 = vld [vmem:[%s8474_s17 + $0x60] sm:$0xff] }
 0x19d   : > { %v2617_v19 = vpop.f32.mrf.mxu1  ;;  %v2768_v31 = vld [vmem:[#allocation2 + $0x9a] sm:$0xff] }
 0x19e   : > { %2823 = vst.msk [vmem:[#allocation2 + $0x32] sm:$0xff] %vm380_vm1, %v2791_v43  ;;  %v2794_v30 = vadd.f32 %v2762_v26, %v2623_v63  ;;  %v2618_v55 = vadd.f32 %v2617_v19, %v2389_v36  ;;  %v7593_v25 = vpop.f32.mrf.mxu0  ;;  %7892 = vmatmul.mubr.msk.f32.gmra.mxu0 %vm380_vm1, %v9974_v8  ;;  %v10040_v36 = vld [vmem:[%s8465_s14 + $0x68] sm:$0xff]  ;;  %v2767_v26 = vld [vmem:[#allocation2 + $0x92] sm:$0xff] }
 0x19f   : > { %v7643_v45 = vpop.f32.mrf.mxu1  ;;  %7942 = vmatmul.mubr.msk.f32.gmra.mxu1 %vm380_vm1, %v9979_v47  ;;  %7894 = vmatprep.mubr.msk.f32.mxu0 %vm380_vm1, %v9984_v3 }
 0x1a0   : > { %2826 = vst.msk [vmem:[#allocation2 + $0x52] sm:$0xff] %vm380_vm1, %v2794_v30  ;;  %v2793_v16 = vadd.f32 %v2761_v2, %v2618_v55  ;;  %v2633_v53 = vadd.f32 %v7643_v45, %v7593_v25  ;;  %v2399_v48 = vpop.f32.mrf.mxu0  ;;  %7944 = vmatprep.mubr.msk.f32.mxu1 %vm380_vm1, %v9990_v32  ;;  %v10045_v30 = vld [vmem:[%s8474_s17 + $0x68] sm:$0xff]  ;;  %v10050_v55 = vld [vmem:[%s8465_s14 + $0x70] sm:$0xff] }
 0x1a1   : > { %v2627_v33 = vpop.f32.mrf.mxu1 }
 0x1a2   : > { %2825 = vst.msk [vmem:[#allocation2 + $0x4a] sm:$0xff] %vm380_vm1, %v2793_v16  ;;  %v2796_v17 = vadd.f32 %v2764_v4, %v2633_v53  ;;  %v2628_v40 = vadd.f32 %v2627_v33, %v2399_v48  ;;  %v7596_v37 = vpop.f32.mrf.mxu0  ;;  %7895 = vmatmul.mubr.msk.f32.gmra.mxu0 %vm380_vm1, %v9996_v38  ;;  %v10056_v16 = vld [vmem:[%s8474_s17 + $0x70] sm:$0xff] }
 0x1a3   : > { %v7646_v9 = vpop.f32.mrf.mxu1  ;;  %7945 = vmatmul.mubr.msk.f32.gmra.mxu1 %vm380_vm1, %v10001_v60  ;;  %7897 = vmatprep.mubr.msk.f32.mxu0 %vm380_vm1, %v10006_v35  ;;  %v2770_v53 = vld [vmem:[#allocation2 + $0xb2] sm:$0xff] }
 0x1a4   : > { %2828 = vst.msk [vmem:[#allocation2 + $0x6a] sm:$0xff] %vm380_vm1, %v2796_v17  ;;  %v2795_v21 = vadd.f32 %v2763_v27, %v2628_v40  ;;  %v2643_v56 = vadd.f32 %v7646_v9, %v7596_v37  ;;  %v2409_v20 = vpop.f32.mrf.mxu0  ;;  %7947 = vmatprep.mubr.msk.f32.mxu1 %vm380_vm1, %v10012_v58  ;;  %v10062_v40 = vld [vmem:[%s8465_s14 + $0x78] sm:$0xff]  ;;  %v2769_v37 = vld [vmem:[#allocation2 + $0xaa] sm:$0xff] }
 0x1a5   : > { %v2637_v1 = vpop.f32.mrf.mxu1  ;;  %v10067_v9 = vld [vmem:[%s8474_s17 + $0x78] sm:$0xff] }
 0x1a6   : > { %2827 = vst.msk [vmem:[#allocation2 + $0x62] sm:$0xff] %vm380_vm1, %v2795_v21  ;;  %v2798_v39 = vadd.f32 %v2766_v6, %v2643_v56  ;;  %v2638_v7 = vadd.f32 %v2637_v1, %v2409_v20  ;;  %v7599_v51 = vpop.f32.mrf.mxu0  ;;  %7898 = vmatmul.mubr.msk.f32.gmra.mxu0 %vm380_vm1, %v10018_v5  ;;  %v10072_v21 = vld [vmem:[%s8465_s14 + $0x80] sm:$0xff] }
 0x1a7   : > { %v7649_v10 = vpop.f32.mrf.mxu1  ;;  %7948 = vmatmul.mubr.msk.f32.gmra.mxu1 %vm380_vm1, %v10023_v44  ;;  %7900 = vmatprep.mubr.msk.f32.mxu0 %vm380_vm1, %v10028_v46  ;;  %v10078_v1 = vld [vmem:[%s8474_s17 + $0x80] sm:$0xff] }
 0x1a8   : > { %2830 = vst.msk [vmem:[#allocation2 + $0x82] sm:$0xff] %vm380_vm1, %v2798_v39  ;;  %v2797_v54 = vadd.f32 %v2765_v15, %v2638_v7  ;;  %v2653_v28 = vadd.f32 %v7649_v10, %v7599_v51  ;;  %v2419_v50 = vpop.f32.mrf.mxu0  ;;  %7950 = vmatprep.mubr.msk.f32.mxu1 %vm380_vm1, %v10034_v18  ;;  %v2772_v39 = vld [vmem:[#allocation2 + $0xca] sm:$0xff] }
 0x1a9   : > { %v2647_v29 = vpop.f32.mrf.mxu1 }
 0x1aa   : > { %2829 = vst.msk [vmem:[#allocation2 + $0x7a] sm:$0xff] %vm380_vm1, %v2797_v54  ;;  %v2800_v52 = vadd.f32 %v2768_v31, %v2653_v28  ;;  %v2648_v43 = vadd.f32 %v2647_v29, %v2419_v50  ;;  %v7602_v63 = vpop.f32.mrf.mxu0  ;;  %7901 = vmatmul.mubr.msk.f32.gmra.mxu0 %vm380_vm1, %v10040_v36  ;;  %v10084_v54 = vld [vmem:[%s8465_s14 + $0x88] sm:$0xff]  ;;  %v10094_v29 = vld [vmem:[%s8465_s14 + $0x90] sm:$0xff] }
 0x1ab   : > { %v7652_v19 = vpop.f32.mrf.mxu1  ;;  %7951 = vmatmul.mubr.msk.f32.gmra.mxu1 %vm380_vm1, %v10045_v30  ;;  %7903 = vmatprep.mubr.msk.f32.mxu0 %vm380_vm1, %v10050_v55  ;;  %v2771_v28 = vld [vmem:[#allocation2 + $0xc2] sm:$0xff] }
 0x1ac   : > { %2832 = vst.msk [vmem:[#allocation2 + $0x9a] sm:$0xff] %vm380_vm1, %v2800_v52  ;;  %v2799_v25 = vadd.f32 %v2767_v26, %v2648_v43  ;;  %v2663_v2 = vadd.f32 %v7652_v19, %v7602_v63  ;;  %v2429_v45 = vpop.f32.mrf.mxu0  ;;  %7953 = vmatprep.mubr.msk.f32.mxu1 %vm380_vm1, %v10056_v16  ;;  %v10089_v31 = vld [vmem:[%s8474_s17 + $0x88] sm:$0xff]  ;;  %v10100_v26 = vld [vmem:[%s8474_s17 + $0x90] sm:$0xff] }
 0x1ad   : > { %v2657_v48 = vpop.f32.mrf.mxu1  ;;  %v2774_v19 = vld [vmem:[#allocation2 + $0xe2] sm:$0xff] }
 0x1ae   : > { %2831 = vst.msk [vmem:[#allocation2 + $0x92] sm:$0xff] %vm380_vm1, %v2799_v25  ;;  %v2802_v4 = vadd.f32 %v2770_v53, %v2663_v2  ;;  %v2658_v33 = vadd.f32 %v2657_v48, %v2429_v45  ;;  %v7605_v17 = vpop.f32.mrf.mxu0  ;;  %7904 = vmatmul.mubr.msk.f32.gmra.mxu0 %vm380_vm1, %v10062_v40  ;;  %v10106_v48 = vld [vmem:[%s8465_s14 + $0x98] sm:$0xff] }
 0x1af   : > { %v7655_v27 = vpop.f32.mrf.mxu1  ;;  %7954 = vmatmul.mubr.msk.f32.gmra.mxu1 %vm380_vm1, %v10067_v9  ;;  %7906 = vmatprep.mubr.msk.f32.mxu0 %vm380_vm1, %v10072_v21 }
 0x1b0   : > { %2834 = vst.msk [vmem:[#allocation2 + $0xb2] sm:$0xff] %vm380_vm1, %v2802_v4  ;;  %v2801_v56 = vadd.f32 %v2769_v37, %v2658_v33  ;;  %v2673_v20 = vadd.f32 %v7655_v27, %v7605_v17  ;;  %v2439_v6 = vpop.f32.mrf.mxu0  ;;  %7956 = vmatprep.mubr.msk.f32.mxu1 %vm380_vm1, %v10078_v1  ;;  %v2773_v4 = vld [vmem:[#allocation2 + $0xda] sm:$0xff] }
 0x1b1   : > { %v2667_v7 = vpop.f32.mrf.mxu1  ;;  %v10111_v17 = vld [vmem:[%s8474_s17 + $0x98] sm:$0xff]  ;;  %v10116_v37 = vld [vmem:[%s8465_s14 + $0xa0] sm:$0xff] }
 0x1b2   : > { %2833 = vst.msk [vmem:[#allocation2 + $0xaa] sm:$0xff] %vm380_vm1, %v2801_v56  ;;  %v2804_v51 = vadd.f32 %v2772_v39, %v2673_v20  ;;  %v2668_v15 = vadd.f32 %v2667_v7, %v2439_v6  ;;  %v7608_v10 = vpop.f32.mrf.mxu0  ;;  %7907 = vmatmul.mubr.msk.f32.gmra.mxu0 %vm380_vm1, %v10084_v54  ;;  %v10122_v6 = vld [vmem:[%s8474_s17 + $0xa0] sm:$0xff] }
 0x1b3   : > { %v7658_v50 = vpop.f32.mrf.mxu1  ;;  %7957 = vmatmul.mubr.msk.f32.gmra.mxu1 %vm380_vm1, %v10089_v31  ;;  %7909 = vmatprep.mubr.msk.f32.mxu0 %vm380_vm1, %v10094_v29  ;;  %v2776_v39 = vld [vmem:[#allocation2 + $0xfa] sm:$0xff] }
 0x1b4   : > { %2836 = vst.msk [vmem:[#allocation2 + $0xca] sm:$0xff] %vm380_vm1, %v2804_v51  ;;  %v2803_v52 = vadd.f32 %v2771_v28, %v2668_v15  ;;  %v2683_v43 = vadd.f32 %v7658_v50, %v7608_v10  ;;  %v2449_v63 = vpop.f32.mrf.mxu0  ;;  %7959 = vmatprep.mubr.msk.f32.mxu1 %vm380_vm1, %v10100_v26  ;;  %v10128_v28 = vld [vmem:[%s8465_s14 + $0xa8] sm:$0xff]  ;;  %v2775_v50 = vld [vmem:[#allocation2 + $0xf2] sm:$0xff] }
 0x1b5   : > { %v2677_v25 = vpop.f32.mrf.mxu1 }
 0x1b6   : > { %2835 = vst.msk [vmem:[#allocation2 + $0xc2] sm:$0xff] %vm380_vm1, %v2803_v52  ;;  %v2806_v2 = vadd.f32 %v2774_v19, %v2683_v43  ;;  %v2678_v45 = vadd.f32 %v2677_v25, %v2449_v63  ;;  %v7611_v53 = vpop.f32.mrf.mxu0  ;;  %7910 = vmatmul.mubr.msk.f32.gmra.mxu0 %vm380_vm1, %v10106_v48  ;;  %v10133_v43 = vld [vmem:[%s8474_s17 + $0xa8] sm:$0xff]  ;;  %v10138_v63 = vld [vmem:[%s8465_s14 + $0xb0] sm:$0xff] }
 0x1b7   : > { %v7661_v33 = vpop.f32.mrf.mxu1  ;;  %7960 = vmatmul.mubr.msk.f32.gmra.mxu1 %vm380_vm1, %v10111_v17  ;;  %7912 = vmatprep.mubr.msk.f32.mxu0 %vm380_vm1, %v10116_v37 }
 0x1b8   : > { %2838 = vst.msk [vmem:[#allocation2 + $0xe2] sm:$0xff] %vm380_vm1, %v2806_v2  ;;  %v2805_v27 = vadd.f32 %v2773_v4, %v2678_v45  ;;  %v2693_v56 = vadd.f32 %v7661_v33, %v7611_v53  ;;  %v2459_v20 = vpop.f32.mrf.mxu0  ;;  %7962 = vmatprep.mubr.msk.f32.mxu1 %vm380_vm1, %v10122_v6  ;;  %v10144_v45 = vld [vmem:[%s8474_s17 + $0xb0] sm:$0xff] }
 0x1b9   : > { %v2687_v7 = vpop.f32.mrf.mxu1  ;;  %v2778_v53 = vld [vmem:[#allocation2 + $0x112] sm:$0xff] }
 0x1ba   : > { %2837 = vst.msk [vmem:[#allocation2 + $0xda] sm:$0xff] %vm380_vm1, %v2805_v27  ;;  %v2808_v51 = vadd.f32 %v2776_v39, %v2693_v56  ;;  %v2688_v15 = vadd.f32 %v2687_v7, %v2459_v20  ;;  %v7614_v10 = vpop.f32.mrf.mxu0  ;;  %7913 = vmatmul.mubr.msk.f32.gmra.mxu0 %vm380_vm1, %v10128_v28  ;;  %v10150_v20 = vld [vmem:[%s8465_s14 + $0xb8] sm:$0xff]  ;;  %v2777_v39 = vld [vmem:[#allocation2 + $0x10a] sm:$0xff] }
 0x1bb   : > { %v7664_v52 = vpop.f32.mrf.mxu1  ;;  %7963 = vmatmul.mubr.msk.f32.gmra.mxu1 %vm380_vm1, %v10133_v43  ;;  %7915 = vmatprep.mubr.msk.f32.mxu0 %vm380_vm1, %v10138_v63  ;;  %11176 = vst [vmem:[#allocation7_spill] sm:$0xff] %v10150_v20 }
 0x1bc   : > { %2840 = vst.msk [vmem:[#allocation2 + $0xfa] sm:$0xff] %vm380_vm1, %v2808_v51  ;;  %v2807_v19 = vadd.f32 %v2775_v50, %v2688_v15  ;;  %v2703_v25 = vadd.f32 %v7664_v52, %v7614_v10  ;;  %v2469_v2 = vpop.f32.mrf.mxu0  ;;  %7965 = vmatprep.mubr.msk.f32.mxu1 %vm380_vm1, %v10144_v45  ;;  %v10155_v51 = vld [vmem:[%s8474_s17 + $0xb8] sm:$0xff]  ;;  %v10160_v15 = vld [vmem:[%s8465_s14 + $0xc0] sm:$0xff] }
 0x1bd   : > { %v2697_v4 = vpop.f32.mrf.mxu1  ;;  %11177 = vst [vmem:[#allocation4_spill] sm:$0xff] %v10155_v51  ;;  %11178 = vst [vmem:[#allocation6_spill] sm:$0xff] %v10160_v15 }
 0x1be   : > { %2839 = vst.msk [vmem:[#allocation2 + $0xf2] sm:$0xff] %vm380_vm1, %v2807_v19  ;;  %v2810_v33 = vadd.f32 %v2778_v53, %v2703_v25  ;;  %v2698_v27 = vadd.f32 %v2697_v4, %v2469_v2  ;;  %v7617_v56 = vpop.f32.mrf.mxu0  ;;  %7916 = vmatmul.mubr.msk.f32.gmra.mxu0 %vm380_vm1, %v10150_v20  ;;  %v10166_v19 = vld [vmem:[%s8474_s17 + $0xc0] sm:$0xff]  ;;  %v2780_v25 = vld [vmem:[#allocation2 + $0x12a] sm:$0xff]  ;;  %v10238_v20 = vld [vmem:[%s8465_s14 + $0xf8] sm:$0xff] }
 0x1bf   : > { %v7667_v7 = vpop.f32.mrf.mxu1  ;;  %7966 = vmatmul.mubr.msk.f32.gmra.mxu1 %vm380_vm1, %v10155_v51  ;;  %7918 = vmatprep.mubr.msk.f32.mxu0 %vm380_vm1, %v10160_v15  ;;  %11179 = vst [vmem:[#allocation3_spill] sm:$0xff] %v10166_v19  ;;  %v10172_v51 = vld [vmem:[%s8465_s14 + $0xc8] sm:$0xff]  ;;  %11190 = vst [vmem:[#allocation17_spill] sm:$0xff] %v10238_v20 }
 0x1c0   : > { %2842 = vst.msk [vmem:[#allocation2 + $0x112] sm:$0xff] %vm380_vm1, %v2810_v33  ;;  %v2809_v10 = vadd.f32 %v2777_v39, %v2698_v27  ;;  %v2713_v50 = vadd.f32 %v7667_v7, %v7617_v56  ;;  %v2479_v52 = vpop.f32.mrf.mxu0  ;;  %7968 = vmatprep.mubr.msk.f32.mxu1 %vm380_vm1, %v10166_v19  ;;  %11180 = vst [vmem:[#allocation5_spill] sm:$0xff] %v10172_v51  ;;  %v2779_v33 = vld [vmem:[#allocation2 + $0x122] sm:$0xff]  ;;  %v10182_v39 = vld [vmem:[%s8465_s14 + $0xd0] sm:$0xff] }
 0x1c1   : > { %v2707_v2 = vpop.f32.mrf.mxu1  ;;  %v10177_v56 = vld [vmem:[%s8474_s17 + $0xc8] sm:$0xff]  ;;  %11182 = vst [vmem:[#allocation9_spill] sm:$0xff] %v10182_v39  ;;  %v10194_v19 = vld [vmem:[%s8465_s14 + $0xd8] sm:$0xff] }
 0x1c2   : > { %2841 = vst.msk [vmem:[#allocation2 + $0x10a] sm:$0xff] %vm380_vm1, %v2809_v10  ;;  %v2812_v53 = vadd.f32 %v2780_v25, %v2713_v50  ;;  %v2708_v4 = vadd.f32 %v2707_v2, %v2479_v52  ;;  %v7620_v15 = vpop.f32.mrf.mxu0  ;;  %7919 = vmatmul.mubr.msk.f32.gmra.mxu0 %vm380_vm1, %v10172_v51  ;;  %11181 = vst [vmem:[#allocation8_spill] sm:$0xff] %v10177_v56  ;;  %v10188_v52 = vld [vmem:[%s8474_s17 + $0xd0] sm:$0xff]  ;;  %v2782_v25 = vld [vmem:[#allocation2 + $0x142] sm:$0xff] }
 0x1c3   : > { %v7670_v27 = vpop.f32.mrf.mxu1  ;;  %7969 = vmatmul.mubr.msk.f32.gmra.mxu1 %vm380_vm1, %v10177_v56  ;;  %7921 = vmatprep.mubr.msk.f32.mxu0 %vm380_vm1, %v10182_v39  ;;  %11183 = vst [vmem:[#allocation10_spill] sm:$0xff] %v10188_v52  ;;  %11184 = vst [vmem:[#allocation11_spill] sm:$0xff] %v10194_v19 }
 0x1c4   : > { %2844 = vst.msk [vmem:[#allocation2 + $0x12a] sm:$0xff] %vm380_vm1, %v2812_v53  ;;  %v2811_v7 = vadd.f32 %v2779_v33, %v2708_v4  ;;  %v2723_v10 = vadd.f32 %v7670_v27, %v7620_v15  ;;  %v2489_v50 = vpop.f32.mrf.mxu0  ;;  %7971 = vmatprep.mubr.msk.f32.mxu1 %vm380_vm1, %v10188_v52  ;;  %v2781_v15 = vld [vmem:[#allocation2 + $0x13a] sm:$0xff]  ;;  %v10216_v52 = vld [vmem:[%s8465_s14 + $0xe8] sm:$0xff] }
 0x1c5   : > { %v2717_v2 = vpop.f32.mrf.mxu1  ;;  %v10199_v4 = vld [vmem:[%s8474_s17 + $0xd8] sm:$0xff]  ;;  %v10204_v33 = vld [vmem:[%s8465_s14 + $0xe0] sm:$0xff]  ;;  %11188 = vst [vmem:[#allocation15_spill] sm:$0xff] %v10216_v52 }
 0x1c6   : > { %2843 = vst.msk [vmem:[#allocation2 + $0x122] sm:$0xff] %vm380_vm1, %v2811_v7  ;;  %v2814_v56 = vadd.f32 %v2782_v25, %v2723_v10  ;;  %v2718_v51 = vadd.f32 %v2717_v2, %v2489_v50  ;;  %v7623_v39 = vpop.f32.mrf.mxu0  ;;  %7922 = vmatmul.mubr.msk.f32.gmra.mxu0 %vm380_vm1, %v10194_v19  ;;  %11185 = vst [vmem:[#allocation12_spill] sm:$0xff] %v10199_v4  ;;  %v10210_v50 = vld [vmem:[%s8474_s17 + $0xe0] sm:$0xff] }
 0x1c7   : > { %v7673_v53 = vpop.f32.mrf.mxu1  ;;  %7972 = vmatmul.mubr.msk.f32.gmra.mxu1 %vm380_vm1, %v10199_v4  ;;  %11186 = vst [vmem:[#allocation13_spill] sm:$0xff] %v10204_v33  ;;  %7924 = vmatprep.mubr.msk.f32.mxu0 %vm380_vm1, %v10204_v33  ;;  %11187 = vst [vmem:[#allocation14_spill] sm:$0xff] %v10210_v50  ;;  %v2784_v25 = vld [vmem:[#allocation2 + $0x15a] sm:$0xff] }
 0x1c8   : > { %2846 = vst.msk [vmem:[#allocation2 + $0x142] sm:$0xff] %vm380_vm1, %v2814_v56  ;;  %v2813_v27 = vadd.f32 %v2781_v15, %v2718_v51  ;;  %v2733_v7 = vadd.f32 %v7673_v53, %v7623_v39  ;;  %v2499_v10 = vpop.f32.mrf.mxu0  ;;  %7974 = vmatprep.mubr.msk.f32.mxu1 %vm380_vm1, %v10210_v50  ;;  %v2783_v51 = vld [vmem:[#allocation2 + $0x152] sm:$0xff]  ;;  %v10221_v39 = vld [vmem:[%s8474_s17 + $0xe8] sm:$0xff] }
 0x1c9   : > { %v2727_v2 = vpop.f32.mrf.mxu1  ;;  %11189 = vst [vmem:[#allocation16_spill] sm:$0xff] %v10221_v39  ;;  %v10226_v15 = vld [vmem:[%s8465_s14 + $0xf0] sm:$0xff] }
 0x1ca   : > { %2845 = vst.msk [vmem:[#allocation2 + $0x13a] sm:$0xff] %vm380_vm1, %v2813_v27  ;;  %v2816_v4 = vadd.f32 %v2784_v25, %v2733_v7  ;;  %v2728_v19 = vadd.f32 %v2727_v2, %v2499_v10  ;;  %v7626_v33 = vpop.f32.mrf.mxu0  ;;  %7925 = vmatmul.mubr.msk.f32.gmra.mxu0 %vm380_vm1, %v10216_v52  ;;  %v10232_v10 = vld [vmem:[%s8474_s17 + $0xf0] sm:$0xff] }
 0x1cb   : > { %v7676_v56 = vpop.f32.mrf.mxu1  ;;  %7975 = vmatmul.mubr.msk.f32.gmra.mxu1 %vm380_vm1, %v10221_v39  ;;  %7927 = vmatprep.mubr.msk.f32.mxu0 %vm380_vm1, %v10226_v15  ;;  %v2786_v25 = vld [vmem:[#allocation2 + $0x172] sm:$0xff] }
 0x1cc   : > { %2848 = vst.msk [vmem:[#allocation2 + $0x15a] sm:$0xff] %vm380_vm1, %v2816_v4  ;;  %v2815_v53 = vadd.f32 %v2783_v51, %v2728_v19  ;;  %v2743_v27 = vadd.f32 %v7676_v56, %v7626_v33  ;;  %v2509_v7 = vpop.f32.mrf.mxu0  ;;  %7977 = vmatprep.mubr.msk.f32.mxu1 %vm380_vm1, %v10232_v10  ;;  %v2785_v19 = vld [vmem:[#allocation2 + $0x16a] sm:$0xff]  ;;  %v10243_v33 = vld [vmem:[%s8474_s17 + $0xf8] sm:$0xff] }
 0x1cd   : > { %v2737_v2 = vpop.f32.mrf.mxu1  ;;  %11191 = vst [vmem:[#allocation18_spill] sm:$0xff] %v10243_v33 }
 0x1ce   : > { %2847 = vst.msk [vmem:[#allocation2 + $0x152] sm:$0xff] %vm380_vm1, %v2815_v53  ;;  %v2818_v39 = vadd.f32 %v2786_v25, %v2743_v27  ;;  %v2738_v52 = vadd.f32 %v2737_v2, %v2509_v7  ;;  %v7629_v50 = vpop.f32.mrf.mxu0  ;;  %7928 = vmatmul.mubr.msk.f32.gmra.mxu0 %vm380_vm1, %v10238_v20  ;;  %v2788_v27 = vld [vmem:[#allocation2 + $0x18a] sm:$0xff] }
 0x1cf   : > { %v7679_v4 = vpop.f32.mrf.mxu1  ;;  %7978 = vmatmul.mubr.msk.f32.gmra.mxu1 %vm380_vm1, %v10243_v33  ;;  %7982 = vmatprep.mubr.msk.f32.mxu0 %vm380_vm1, %v9878_v11  ;;  %v2787_v33 = vld [vmem:[#allocation2 + $0x182] sm:$0xff] }
 0x1d0   : > { %2850 = vst.msk [vmem:[#allocation2 + $0x172] sm:$0xff] %vm380_vm1, %v2818_v39  ;;  %v2817_v51 = vadd.f32 %v2785_v19, %v2738_v52  ;;  %v2753_v56 = vadd.f32 %v7679_v4, %v7629_v50  ;;  %v2519_v53 = vpop.f32.mrf.mxu0  ;;  %8032 = vmatprep.mubr.msk.f32.mxu1 %vm380_vm1, %v9884_v24 }
 0x1d1   : > { %v2747_v7 = vpop.f32.mrf.mxu1 }
 0x1d2   : > { %2849 = vst.msk [vmem:[#allocation2 + $0x16a] sm:$0xff] %vm380_vm1, %v2817_v51  ;;  %v2820_v25 = vadd.f32 %v2788_v27, %v2753_v56  ;;  %v2748_v2 = vadd.f32 %v2747_v7, %v2519_v53  ;;  %v7684_v20 = vpop.f32.mrf.mxu0  ;;  %7983 = vmatmul.mubr.msk.f32.vlgmr.msra.gmra.mxu0 %vm380_vm1, %v9890_v41  ;;  %v3314_v41 = vld [vmem:[#allocation2 + $0x21] sm:$0xff]  ;;  %v3316_v51 = vld [vmem:[#allocation2 + $0x39] sm:$0xff] }
 0x1d3   : > { %v7734_v11 = vpop.f32.mrf.mxu1  ;;  %8033 = vmatmul.mubr.msk.f32.vlgmr.msra.gmra.mxu1 %vm380_vm1, %v9900_v34  ;;  %8081 = vmatpush3.msk.msra.mxu0 %vm534_vm0, %v9897_v62 }
 0x1d4   : > { %2852 = vst.msk [vmem:[#allocation2 + $0x18a] sm:$0xff] %vm380_vm1, %v2820_v25  ;;  %v2819_v24 = vadd.f32 %v2787_v33, %v2748_v2  ;;  %v3160_v52 = vadd.f32 %v7734_v11, %v7684_v20  ;;  %8131 = vmatpush3.msk.msra.mxu1 %vm534_vm0, %v9909_v59  ;;  %v2926_v50 = vpop.f32.mrf.mxu0  ;;  %7985 = vmatprep.mubr.msk.f32.mxu0 %vm380_vm1, %v9915_v0  ;;  %v3313_v20 = vld [vmem:[#allocation2 + $0x19] sm:$0xff]  ;;  %v3318_v2 = vld [vmem:[#allocation2 + $0x51] sm:$0xff] }
 0x1d5   : > { %v3154_v39 = vpop.f32.mrf.mxu1  ;;  %8035 = vmatprep.mubr.msk.f32.mxu1 %vm380_vm1, %v9920_v12 }
 0x1d6   : > { %2851 = vst.msk [vmem:[#allocation2 + $0x182] sm:$0xff] %vm380_vm1, %v2819_v24  ;;  %v3346_v34 = vadd.f32 %v3314_v41, %v3160_v52  ;;  %v3155_v62 = vadd.f32 %v3154_v39, %v2926_v50  ;;  %v7687_v19 = vpop.f32.mrf.mxu0  ;;  %7986 = vmatmul.mubr.msk.f32.gmra.mxu0 %vm380_vm1, %v9928_v13  ;;  %v3320_v39 = vld [vmem:[#allocation2 + $0x69] sm:$0xff] }
 0x1d7   : > { %v7737_v4 = vpop.f32.mrf.mxu1  ;;  %8036 = vmatmul.mubr.msk.f32.gmra.mxu1 %vm380_vm1, %v9935_v22  ;;  %7988 = vmatprep.mubr.msk.f32.mxu0 %vm380_vm1, %v9940_v61  ;;  %v3315_v22 = vld [vmem:[#allocation2 + $0x31] sm:$0xff] }
 0x1d8   : > { %3378 = vst.msk [vmem:[#allocation2 + $0x21] sm:$0xff] %vm380_vm1, %v3346_v34  ;;  %v3345_v59 = vadd.f32 %v3313_v20, %v3155_v62  ;;  %v3170_v12 = vadd.f32 %v7737_v4, %v7687_v19  ;;  %v2936_v33 = vpop.f32.mrf.mxu0  ;;  %8038 = vmatprep.mubr.msk.f32.mxu1 %vm380_vm1, %v9946_v49 }
 0x1d9   : > { %v3164_v56 = vpop.f32.mrf.mxu1 }
 0x1da   : > { %3377 = vst.msk [vmem:[#allocation2 + $0x19] sm:$0xff] %vm380_vm1, %v3345_v59  ;;  %v3348_v13 = vadd.f32 %v3316_v51, %v3170_v12  ;;  %v3165_v53 = vadd.f32 %v3164_v56, %v2936_v33  ;;  %v7690_v27 = vpop.f32.mrf.mxu0  ;;  %7989 = vmatmul.mubr.msk.f32.gmra.mxu0 %vm380_vm1, %v9952_v14  ;;  %v3322_v59 = vld [vmem:[#allocation2 + $0x81] sm:$0xff] }
 0x1db   : > { %v7740_v61 = vpop.f32.mrf.mxu1  ;;  %8039 = vmatmul.mubr.msk.f32.gmra.mxu1 %vm380_vm1, %v9957_v57  ;;  %7991 = vmatprep.mubr.msk.f32.mxu0 %vm380_vm1, %v9962_v42  ;;  %v3317_v57 = vld [vmem:[#allocation2 + $0x49] sm:$0xff] }
 0x1dc   : > { %3380 = vst.msk [vmem:[#allocation2 + $0x39] sm:$0xff] %vm380_vm1, %v3348_v13  ;;  %v3347_v49 = vadd.f32 %v3315_v22, %v3165_v53  ;;  %v3180_v7 = vadd.f32 %v7740_v61, %v7690_v27  ;;  %v2946_v25 = vpop.f32.mrf.mxu0  ;;  %8041 = vmatprep.mubr.msk.f32.mxu1 %vm380_vm1, %v9968_v23  ;;  %v3324_v53 = vld [vmem:[#allocation2 + $0x99] sm:$0xff] }
 0x1dd   : > { %v3174_v11 = vpop.f32.mrf.mxu1 }
 0x1de   : > { %3379 = vst.msk [vmem:[#allocation2 + $0x31] sm:$0xff] %vm380_vm1, %v3347_v49  ;;  %v3350_v14 = vadd.f32 %v3318_v2, %v3180_v7  ;;  %v3175_v24 = vadd.f32 %v3174_v11, %v2946_v25  ;;  %v7693_v52 = vpop.f32.mrf.mxu0  ;;  %7992 = vmatmul.mubr.msk.f32.gmra.mxu0 %vm380_vm1, %v9974_v8  ;;  %v3326_v25 = vld [vmem:[#allocation2 + $0xb1] sm:$0xff] }
 0x1df   : > { %v7743_v42 = vpop.f32.mrf.mxu1  ;;  %8042 = vmatmul.mubr.msk.f32.gmra.mxu1 %vm380_vm1, %v9979_v47  ;;  %7994 = vmatprep.mubr.msk.f32.mxu0 %vm380_vm1, %v9984_v3  ;;  %v3319_v47 = vld [vmem:[#allocation2 + $0x61] sm:$0xff] }
 0x1e0   : > { %3382 = vst.msk [vmem:[#allocation2 + $0x51] sm:$0xff] %vm380_vm1, %v3350_v14  ;;  %v3349_v23 = vadd.f32 %v3317_v57, %v3175_v24  ;;  %v3190_v50 = vadd.f32 %v7743_v42, %v7693_v52  ;;  %v2956_v41 = vpop.f32.mrf.mxu0  ;;  %8044 = vmatprep.mubr.msk.f32.mxu1 %vm380_vm1, %v9990_v32  ;;  %v3328_v57 = vld [vmem:[#allocation2 + $0xc9] sm:$0xff] }
 0x1e1   : > { %v3184_v34 = vpop.f32.mrf.mxu1 }
 0x1e2   : > { %3381 = vst.msk [vmem:[#allocation2 + $0x49] sm:$0xff] %vm380_vm1, %v3349_v23  ;;  %v3352_v8 = vadd.f32 %v3320_v39, %v3190_v50  ;;  %v3185_v62 = vadd.f32 %v3184_v34, %v2956_v41  ;;  %v7696_v19 = vpop.f32.mrf.mxu0  ;;  %7995 = vmatmul.mubr.msk.f32.gmra.mxu0 %vm380_vm1, %v9996_v38  ;;  %v3330_v34 = vld [vmem:[#allocation2 + $0xe1] sm:$0xff] }
 0x1e3   : > { %v7746_v3 = vpop.f32.mrf.mxu1  ;;  %8045 = vmatmul.mubr.msk.f32.gmra.mxu1 %vm380_vm1, %v10001_v60  ;;  %7997 = vmatprep.mubr.msk.f32.mxu0 %vm380_vm1, %v10006_v35  ;;  %v3321_v60 = vld [vmem:[#allocation2 + $0x79] sm:$0xff] }
 0x1e4   : > { %3384 = vst.msk [vmem:[#allocation2 + $0x69] sm:$0xff] %vm380_vm1, %v3352_v8  ;;  %v3351_v32 = vadd.f32 %v3319_v47, %v3185_v62  ;;  %v3200_v20 = vadd.f32 %v7746_v3, %v7696_v19  ;;  %v2966_v4 = vpop.f32.mrf.mxu0  ;;  %8047 = vmatprep.mubr.msk.f32.mxu1 %vm380_vm1, %v10012_v58 }
 0x1e5   : > { %v3194_v12 = vpop.f32.mrf.mxu1 }
 0x1e6   : > { %3383 = vst.msk [vmem:[#allocation2 + $0x61] sm:$0xff] %vm380_vm1, %v3351_v32  ;;  %v3354_v38 = vadd.f32 %v3322_v59, %v3200_v20  ;;  %v3195_v33 = vadd.f32 %v3194_v12, %v2966_v4  ;;  %v7699_v51 = vpop.f32.mrf.mxu0  ;;  %7998 = vmatmul.mubr.msk.f32.gmra.mxu0 %vm380_vm1, %v10018_v5  ;;  %v3332_v32 = vld [vmem:[#allocation2 + $0xf9] sm:$0xff] }
 0x1e7   : > { %v7749_v35 = vpop.f32.mrf.mxu1  ;;  %8048 = vmatmul.mubr.msk.f32.gmra.mxu1 %vm380_vm1, %v10023_v44  ;;  %8000 = vmatprep.mubr.msk.f32.mxu0 %vm380_vm1, %v10028_v46  ;;  %v3323_v44 = vld [vmem:[#allocation2 + $0x91] sm:$0xff] }
 0x1e8   : > { %3386 = vst.msk [vmem:[#allocation2 + $0x81] sm:$0xff] %vm380_vm1, %v3354_v38  ;;  %v3353_v58 = vadd.f32 %v3321_v60, %v3195_v33  ;;  %v3210_v56 = vadd.f32 %v7749_v35, %v7699_v51  ;;  %v2976_v13 = vpop.f32.mrf.mxu0  ;;  %8050 = vmatprep.mubr.msk.f32.mxu1 %vm380_vm1, %v10034_v18  ;;  %v3334_v33 = vld [vmem:[#allocation2 + $0x111] sm:$0xff] }
 0x1e9   : > { %v3204_v27 = vpop.f32.mrf.mxu1 }
 0x1ea   : > { %3385 = vst.msk [vmem:[#allocation2 + $0x79] sm:$0xff] %vm380_vm1, %v3353_v58  ;;  %v3356_v5 = vadd.f32 %v3324_v53, %v3210_v56  ;;  %v3205_v22 = vadd.f32 %v3204_v27, %v2976_v13  ;;  %v7702_v61 = vpop.f32.mrf.mxu0  ;;  %8001 = vmatmul.mubr.msk.f32.gmra.mxu0 %vm380_vm1, %v10040_v36  ;;  %v11192_v58 = vld [vmem:[#allocation7_spill] sm:$0xff]  ;;  %v11193_v56 = vld [vmem:[#allocation4_spill] sm:$0xff]  ;;  %v11194_v13 = vld [vmem:[#allocation6_spill] sm:$0xff] }
 0x1eb   : > { %v7752_v46 = vpop.f32.mrf.mxu1  ;;  %8051 = vmatmul.mubr.msk.f32.gmra.mxu1 %vm380_vm1, %v10045_v30  ;;  %8003 = vmatprep.mubr.msk.f32.mxu0 %vm380_vm1, %v10050_v55  ;;  %v3325_v30 = vld [vmem:[#allocation2 + $0xa9] sm:$0xff] }
 0x1ec   : > { %3388 = vst.msk [vmem:[#allocation2 + $0x99] sm:$0xff] %vm380_vm1, %v3356_v5  ;;  %v3355_v18 = vadd.f32 %v3323_v44, %v3205_v22  ;;  %v3220_v49 = vadd.f32 %v7752_v46, %v7702_v61  ;;  %v2986_v7 = vpop.f32.mrf.mxu0  ;;  %8053 = vmatprep.mubr.msk.f32.mxu1 %vm380_vm1, %v10056_v16  ;;  %v11195_v5 = vld [vmem:[#allocation3_spill] sm:$0xff] }
 0x1ed   : > { %v3214_v2 = vpop.f32.mrf.mxu1  ;;  %v3336_v22 = vld [vmem:[#allocation2 + $0x129] sm:$0xff] }
 0x1ee   : > { %3387 = vst.msk [vmem:[#allocation2 + $0x91] sm:$0xff] %vm380_vm1, %v3355_v18  ;;  %v3358_v36 = vadd.f32 %v3326_v25, %v3220_v49  ;;  %v3215_v11 = vadd.f32 %v3214_v2, %v2986_v7  ;;  %v7705_v14 = vpop.f32.mrf.mxu0  ;;  %8004 = vmatmul.mubr.msk.f32.gmra.mxu0 %vm380_vm1, %v10062_v40  ;;  %v11196_v49 = vld [vmem:[#allocation5_spill] sm:$0xff]  ;;  %v11197_v2 = vld [vmem:[#allocation8_spill] sm:$0xff] }
 0x1ef   : > { %v7755_v55 = vpop.f32.mrf.mxu1  ;;  %8054 = vmatmul.mubr.msk.f32.gmra.mxu1 %vm380_vm1, %v10067_v9  ;;  %8006 = vmatprep.mubr.msk.f32.mxu0 %vm380_vm1, %v10072_v21  ;;  %v3327_v9 = vld [vmem:[#allocation2 + $0xc1] sm:$0xff] }
 0x1f0   : > { %3390 = vst.msk [vmem:[#allocation2 + $0xb1] sm:$0xff] %vm380_vm1, %v3358_v36  ;;  %v3357_v16 = vadd.f32 %v3325_v30, %v3215_v11  ;;  %v3230_v24 = vadd.f32 %v7755_v55, %v7705_v14  ;;  %v2996_v52 = vpop.f32.mrf.mxu0  ;;  %8056 = vmatprep.mubr.msk.f32.mxu1 %vm380_vm1, %v10078_v1  ;;  %v3335_v7 = vld [vmem:[#allocation2 + $0x121] sm:$0xff] }
 0x1f1   : > { %v3224_v42 = vpop.f32.mrf.mxu1  ;;  %v11198_v36 = vld [vmem:[#allocation9_spill] sm:$0xff]  ;;  %v11199_v55 = vld [vmem:[#allocation10_spill] sm:$0xff] }
 0x1f2   : > { %3389 = vst.msk [vmem:[#allocation2 + $0xa9] sm:$0xff] %vm380_vm1, %v3357_v16  ;;  %v3360_v40 = vadd.f32 %v3328_v57, %v3230_v24  ;;  %v3225_v23 = vadd.f32 %v3224_v42, %v2996_v52  ;;  %v7708_v50 = vpop.f32.mrf.mxu0  ;;  %8007 = vmatmul.mubr.msk.f32.gmra.mxu0 %vm380_vm1, %v10084_v54  ;;  %v3338_v16 = vld [vmem:[#allocation2 + $0x141] sm:$0xff] }
 0x1f3   : > { %v7758_v21 = vpop.f32.mrf.mxu1  ;;  %8057 = vmatmul.mubr.msk.f32.gmra.mxu1 %vm380_vm1, %v10089_v31  ;;  %8009 = vmatprep.mubr.msk.f32.mxu0 %vm380_vm1, %v10094_v29  ;;  %v3329_v31 = vld [vmem:[#allocation2 + $0xd9] sm:$0xff] }
 0x1f4   : > { %3392 = vst.msk [vmem:[#allocation2 + $0xc9] sm:$0xff] %vm380_vm1, %v3360_v40  ;;  %v3359_v1 = vadd.f32 %v3327_v9, %v3225_v23  ;;  %v3240_v41 = vadd.f32 %v7758_v21, %v7708_v50  ;;  %v3006_v39 = vpop.f32.mrf.mxu0  ;;  %8059 = vmatprep.mubr.msk.f32.mxu1 %vm380_vm1, %v10100_v26  ;;  %v11200_v40 = vld [vmem:[#allocation11_spill] sm:$0xff]  ;;  %v3337_v23 = vld [vmem:[#allocation2 + $0x139] sm:$0xff] }
 0x1f5   : > { %v3234_v8 = vpop.f32.mrf.mxu1  ;;  %v11201_v9 = vld [vmem:[#allocation12_spill] sm:$0xff]  ;;  %v11202_v21 = vld [vmem:[#allocation13_spill] sm:$0xff] }
 0x1f6   : > { %3391 = vst.msk [vmem:[#allocation2 + $0xc1] sm:$0xff] %vm380_vm1, %v3359_v1  ;;  %v3362_v54 = vadd.f32 %v3330_v34, %v3240_v41  ;;  %v3235_v62 = vadd.f32 %v3234_v8, %v3006_v39  ;;  %v7711_v19 = vpop.f32.mrf.mxu0  ;;  %8010 = vmatmul.mubr.msk.f32.gmra.mxu0 %vm380_vm1, %v10106_v48  ;;  %v11203_v34 = vld [vmem:[#allocation14_spill] sm:$0xff]  ;;  %v3340_v8 = vld [vmem:[#allocation2 + $0x159] sm:$0xff] }
 0x1f7   : > { %v7761_v29 = vpop.f32.mrf.mxu1  ;;  %8060 = vmatmul.mubr.msk.f32.gmra.mxu1 %vm380_vm1, %v10111_v17  ;;  %8012 = vmatprep.mubr.msk.f32.mxu0 %vm380_vm1, %v10116_v37  ;;  %v3331_v17 = vld [vmem:[#allocation2 + $0xf1] sm:$0xff] }
 0x1f8   : > { %3394 = vst.msk [vmem:[#allocation2 + $0xe1] sm:$0xff] %vm380_vm1, %v3362_v54  ;;  %v3361_v26 = vadd.f32 %v3329_v31, %v3235_v62  ;;  %v3250_v47 = vadd.f32 %v7761_v29, %v7711_v19  ;;  %v3016_v3 = vpop.f32.mrf.mxu0  ;;  %8062 = vmatprep.mubr.msk.f32.mxu1 %vm380_vm1, %v10122_v6  ;;  %v11204_v29 = vld [vmem:[#allocation15_spill] sm:$0xff] }
 0x1f9   : > { %v3244_v20 = vpop.f32.mrf.mxu1 }
 0x1fa   : > { %3393 = vst.msk [vmem:[#allocation2 + $0xd9] sm:$0xff] %vm380_vm1, %v3361_v26  ;;  %v3364_v48 = vadd.f32 %v3332_v32, %v3250_v47  ;;  %v3245_v4 = vadd.f32 %v3244_v20, %v3016_v3  ;;  %v7714_v59 = vpop.f32.mrf.mxu0  ;;  %8013 = vmatmul.mubr.msk.f32.gmra.mxu0 %vm380_vm1, %v10128_v28  ;;  %v3339_v26 = vld [vmem:[#allocation2 + $0x151] sm:$0xff] }
 0x1fb   : > { %v7764_v37 = vpop.f32.mrf.mxu1  ;;  %8063 = vmatmul.mubr.msk.f32.gmra.mxu1 %vm380_vm1, %v10133_v43  ;;  %8015 = vmatprep.mubr.msk.f32.mxu0 %vm380_vm1, %v10138_v63  ;;  %v3333_v43 = vld [vmem:[#allocation2 + $0x109] sm:$0xff]  ;;  %v11205_v3 = vld [vmem:[#allocation16_spill] sm:$0xff] }
 0x1fc   : > { %3396 = vst.msk [vmem:[#allocation2 + $0xf9] sm:$0xff] %vm380_vm1, %v3364_v48  ;;  %v3363_v6 = vadd.f32 %v3331_v17, %v3245_v4  ;;  %v3260_v12 = vadd.f32 %v7764_v37, %v7714_v59  ;;  %v3026_v38 = vpop.f32.mrf.mxu0  ;;  %8065 = vmatprep.mubr.msk.f32.mxu1 %vm380_vm1, %v10144_v45  ;;  %v3342_v4 = vld [vmem:[#allocation2 + $0x171] sm:$0xff] }
 0x1fd   : > { %v3254_v51 = vpop.f32.mrf.mxu1 }
 0x1fe   : > { %3395 = vst.msk [vmem:[#allocation2 + $0xf1] sm:$0xff] %vm380_vm1, %v3363_v6  ;;  %v3366_v28 = vadd.f32 %v3334_v33, %v3260_v12  ;;  %v3255_v60 = vadd.f32 %v3254_v51, %v3026_v38  ;;  %v7717_v35 = vpop.f32.mrf.mxu0  ;;  %8016 = vmatmul.mubr.msk.f32.gmra.mxu0 %vm380_vm1, %v11192_v58  ;;  %v11206_v12 = vld [vmem:[#allocation17_spill] sm:$0xff]  ;;  %v11207_v33 = vld [vmem:[#allocation18_spill] sm:$0xff] }
 0x1ff   : > { %v7767_v63 = vpop.f32.mrf.mxu1  ;;  %8066 = vmatmul.mubr.msk.f32.gmra.mxu1 %vm380_vm1, %v11193_v56  ;;  %8018 = vmatprep.mubr.msk.f32.mxu0 %vm380_vm1, %v11194_v13  ;;  %v8317_v51 = vld [vmem:[%s8465_s14] sm:$0xff]  ;;  %v3344_v58 = vld [vmem:[#allocation2 + $0x189] sm:$0xff] }
 0x200   : > { %3398 = vst.msk [vmem:[#allocation2 + $0x111] sm:$0xff] %vm380_vm1, %v3366_v28  ;;  %v3365_v45 = vadd.f32 %v3333_v43, %v3255_v60  ;;  %v3270_v53 = vadd.f32 %v7767_v63, %v7717_v35  ;;  %v3036_v27 = vpop.f32.mrf.mxu0  ;;  %8068 = vmatprep.mubr.msk.f32.mxu1 %vm380_vm1, %v11195_v5  ;;  %v8318_v35 = vld [vmem:[%s8474_s17] sm:$0xff]  ;;  %v8320_v5 = vld [vmem:[%s8474_s17 + $0x8] sm:$0xff] }
 0x201   : > { %v3264_v61 = vpop.f32.mrf.mxu1 }
 0x202   : > { %3397 = vst.msk [vmem:[#allocation2 + $0x109] sm:$0xff] %vm380_vm1, %v3365_v45  ;;  %v3368_v44 = vadd.f32 %v3336_v22, %v3270_v53  ;;  %v3265_v46 = vadd.f32 %v3264_v61, %v3036_v27  ;;  %v7720_v18 = vpop.f32.mrf.mxu0  ;;  %8019 = vmatmul.mubr.msk.f32.gmra.mxu0 %vm380_vm1, %v11196_v49  ;;  %v8319_v45 = vld [vmem:[%s8465_s14 + $0x8] sm:$0xff] }
 0x203   : > { %v7770_v25 = vpop.f32.mrf.mxu1  ;;  %8069 = vmatmul.mubr.msk.f32.gmra.mxu1 %vm380_vm1, %v11197_v2  ;;  %8021 = vmatprep.mubr.msk.f32.mxu0 %vm380_vm1, %v11198_v36  ;;  %v3343_v53 = vld [vmem:[#allocation2 + $0x181] sm:$0xff]  ;;  %v8322_v36 = vld [vmem:[%s8465_s14 + $0x18] sm:$0xff] }
 0x204   : > { %3400 = vst.msk [vmem:[#allocation2 + $0x129] sm:$0xff] %vm380_vm1, %v3368_v44  ;;  %v3367_v11 = vadd.f32 %v3335_v7, %v3265_v46  ;;  %v3280_v14 = vadd.f32 %v7770_v25, %v7720_v18  ;;  %v3046_v30 = vpop.f32.mrf.mxu0  ;;  %8071 = vmatprep.mubr.msk.f32.mxu1 %vm380_vm1, %v11199_v55  ;;  %v8321_v46 = vld [vmem:[%s8474_s17 + $0x10] sm:$0xff]  ;;  %v3870_v18 = vld [vmem:[#allocation2 + $0x20] sm:$0xff] }
 0x205   : > { %v3274_v24 = vpop.f32.mrf.mxu1 }
 0x206   : > { %3399 = vst.msk [vmem:[#allocation2 + $0x121] sm:$0xff] %vm380_vm1, %v3367_v11  ;;  %v3370_v52 = vadd.f32 %v3338_v16, %v3280_v14  ;;  %v3275_v57 = vadd.f32 %v3274_v24, %v3046_v30  ;;  %v7723_v42 = vpop.f32.mrf.mxu0  ;;  %8022 = vmatmul.mubr.msk.f32.gmra.mxu0 %vm380_vm1, %v11200_v40  ;;  %v8323_v14 = vld [vmem:[%s8474_s17 + $0x18] sm:$0xff]  ;;  %v8324_v30 = vld [vmem:[%s8465_s14 + $0x20] sm:$0xff] }
 0x207   : > { %v7773_v50 = vpop.f32.mrf.mxu1  ;;  %8072 = vmatmul.mubr.msk.f32.gmra.mxu1 %vm380_vm1, %v11201_v9  ;;  %8024 = vmatprep.mubr.msk.f32.mxu0 %vm380_vm1, %v11202_v21  ;;  %v8326_v9 = vld [vmem:[%s8465_s14 + $0x28] sm:$0xff]  ;;  %v3871_v21 = vld [vmem:[#allocation2 + $0x30] sm:$0xff] }
 0x208   : > { %3402 = vst.msk [vmem:[#allocation2 + $0x141] sm:$0xff] %vm380_vm1, %v3370_v52  ;;  %v3369_v1 = vadd.f32 %v3337_v23, %v3275_v57  ;;  %v3290_v41 = vadd.f32 %v7773_v50, %v7723_v42  ;;  %v3056_v39 = vpop.f32.mrf.mxu0  ;;  %8074 = vmatprep.mubr.msk.f32.mxu1 %vm380_vm1, %v11203_v34  ;;  %v8325_v52 = vld [vmem:[%s8474_s17 + $0x20] sm:$0xff]  ;;  %v3872_v57 = vld [vmem:[#allocation2 + $0x38] sm:$0xff] }
 0x209   : > { %v3284_v54 = vpop.f32.mrf.mxu1 }
 0x20a   : > { %3401 = vst.msk [vmem:[#allocation2 + $0x139] sm:$0xff] %vm380_vm1, %v3369_v1  ;;  %v3372_v62 = vadd.f32 %v3340_v8, %v3290_v41  ;;  %v3285_v19 = vadd.f32 %v3284_v54, %v3056_v39  ;;  %v7726_v31 = vpop.f32.mrf.mxu0  ;;  %8025 = vmatmul.mubr.msk.f32.gmra.mxu0 %vm380_vm1, %v11204_v29  ;;  %v8327_v41 = vld [vmem:[%s8474_s17 + $0x28] sm:$0xff]  ;;  %v8328_v39 = vld [vmem:[%s8465_s14 + $0x30] sm:$0xff] }
 0x20b   : > { %v7776_v47 = vpop.f32.mrf.mxu1  ;;  %8075 = vmatmul.mubr.msk.f32.gmra.mxu1 %vm380_vm1, %v11205_v3  ;;  %8027 = vmatprep.mubr.msk.f32.mxu0 %vm380_vm1, %v10226_v15  ;;  %v3341_v15 = vld [vmem:[#allocation2 + $0x169] sm:$0xff]  ;;  %v8330_v3 = vld [vmem:[%s8465_s14 + $0x38] sm:$0xff] }
 0x20c   : > { %3404 = vst.msk [vmem:[#allocation2 + $0x159] sm:$0xff] %vm380_vm1, %v3372_v62  ;;  %v3371_v32 = vadd.f32 %v3339_v26, %v3285_v19  ;;  %v3300_v20 = vadd.f32 %v7776_v47, %v7726_v31  ;;  %v3066_v48 = vpop.f32.mrf.mxu0  ;;  %8077 = vmatprep.mubr.msk.f32.mxu1 %vm380_vm1, %v10232_v10  ;;  %v8329_v62 = vld [vmem:[%s8474_s17 + $0x30] sm:$0xff] }
 0x20d   : > { %v3294_v59 = vpop.f32.mrf.mxu1  ;;  %v3874_v19 = vld [vmem:[#allocation2 + $0x50] sm:$0xff] }
 0x20e   : > { %3403 = vst.msk [vmem:[#allocation2 + $0x151] sm:$0xff] %vm380_vm1, %v3371_v32  ;;  %v3374_v17 = vadd.f32 %v3342_v4, %v3300_v20  ;;  %v3295_v37 = vadd.f32 %v3294_v59, %v3066_v48  ;;  %v7729_v6 = vpop.f32.mrf.mxu0  ;;  %8028 = vmatmul.mubr.msk.f32.gmra.mxu0 %vm380_vm1, %v11206_v12  ;;  %v3873_v32 = vld [vmem:[#allocation2 + $0x48] sm:$0xff]  ;;  %v8331_v48 = vld [vmem:[%s8474_s17 + $0x38] sm:$0xff]  ;;  %v8332_v4 = vld [vmem:[%s8465_s14 + $0x40] sm:$0xff] }
 0x20f   : > { %v7779_v38 = vpop.f32.mrf.mxu1  ;;  %8078 = vmatmul.mubr.msk.f32.gmra.mxu1 %vm380_vm1, %v11207_v33  ;;  %8082 = vmatprep.mubr.msk.f32.mxu0 %vm380_vm1, %v8317_v51  ;;  %v3876_v12 = vld [vmem:[#allocation2 + $0x68] sm:$0xff] }
 0x210   : > { %3406 = vst.msk [vmem:[#allocation2 + $0x171] sm:$0xff] %vm380_vm1, %v3374_v17  ;;  %v3373_v10 = vadd.f32 %v3341_v15, %v3295_v37  ;;  %v3310_v28 = vadd.f32 %v7779_v38, %v7729_v6  ;;  %v3076_v60 = vpop.f32.mrf.mxu0  ;;  %8132 = vmatprep.mubr.msk.f32.mxu1 %vm380_vm1, %v8318_v35  ;;  %v8333_v6 = vld [vmem:[%s8474_s17 + $0x40] sm:$0xff]  ;;  %v8335_v35 = vld [vmem:[%s8474_s17 + $0x48] sm:$0xff] }
 0x211   : > { %v3304_v43 = vpop.f32.mrf.mxu1 }
 0x212   : > { %3405 = vst.msk [vmem:[#allocation2 + $0x169] sm:$0xff] %vm380_vm1, %v3373_v10  ;;  %v3376_v63 = vadd.f32 %v3344_v58, %v3310_v28  ;;  %v3305_v56 = vadd.f32 %v3304_v43, %v3076_v60  ;;  %v7784_v13 = vpop.f32.mrf.mxu0  ;;  %8083 = vmatmul.mubr.msk.f32.vlgmr.msra.gmra.mxu0 %vm380_vm1, %v8319_v45  ;;  %v8334_v10 = vld [vmem:[%s8465_s14 + $0x48] sm:$0xff]  ;;  %v3875_v28 = vld [vmem:[#allocation2 + $0x60] sm:$0xff]  ;;  %v8336_v58 = vld [vmem:[%s8465_s14 + $0x50] sm:$0xff] }
 0x213   : > { %v7834_v27 = vpop.f32.mrf.mxu1  ;;  %8133 = vmatmul.mubr.msk.f32.vlgmr.msra.gmra.mxu1 %vm380_vm1, %v8320_v5  ;;  %8085 = vmatprep.mubr.msk.f32.mxu0 %vm380_vm1, %v9915_v0  ;;  %v3869_v0 = vld [vmem:[#allocation2 + $0x18] sm:$0xff]  ;;  %v3878_v45 = vld [vmem:[#allocation2 + $0x80] sm:$0xff] }
 0x214   : > { %3408 = vst.msk [vmem:[#allocation2 + $0x189] sm:$0xff] %vm380_vm1, %v3376_v63  ;;  %v3375_v22 = vadd.f32 %v3343_v53, %v3305_v56  ;;  %v3716_v61 = vadd.f32 %v7834_v27, %v7784_v13  ;;  %v3482_v44 = vpop.f32.mrf.mxu0  ;;  %8135 = vmatprep.mubr.msk.f32.mxu1 %vm380_vm1, %v8321_v46  ;;  %v8337_v13 = vld [vmem:[%s8474_s17 + $0x50] sm:$0xff] }
 0x215   : > { %v3710_v49 = vpop.f32.mrf.mxu1 }
 0x216   : > { %3407 = vst.msk [vmem:[#allocation2 + $0x181] sm:$0xff] %vm380_vm1, %v3375_v22  ;;  %v3902_v7 = vadd.f32 %v3870_v18, %v3716_v61  ;;  %v3711_v25 = vadd.f32 %v3710_v49, %v3482_v44  ;;  %v7787_v2 = vpop.f32.mrf.mxu0  ;;  %8086 = vmatmul.mubr.msk.f32.gmra.mxu0 %vm380_vm1, %v8322_v36  ;;  %v8338_v61 = vld [vmem:[%s8465_s14 + $0x58] sm:$0xff]  ;;  %v8340_v49 = vld [vmem:[%s8465_s14 + $0x60] sm:$0xff] }
 0x217   : > { %v7837_v11 = vpop.f32.mrf.mxu1  ;;  %8136 = vmatmul.mubr.msk.f32.gmra.mxu1 %vm380_vm1, %v8323_v14  ;;  %8088 = vmatprep.mubr.msk.f32.mxu0 %vm380_vm1, %v8324_v30  ;;  %v3877_v44 = vld [vmem:[#allocation2 + $0x78] sm:$0xff]  ;;  %v8341_v36 = vld [vmem:[%s8474_s17 + $0x60] sm:$0xff] }
 0x218   : > { %3934 = vst.msk [vmem:[#allocation2 + $0x20] sm:$0xff] %vm380_vm1, %v3902_v7  ;;  %v3901_v55 = vadd.f32 %v3869_v0, %v3711_v25  ;;  %v3726_v16 = vadd.f32 %v7837_v11, %v7787_v2  ;;  %v3492_v24 = vpop.f32.mrf.mxu0  ;;  %8138 = vmatprep.mubr.msk.f32.mxu1 %vm380_vm1, %v8325_v52  ;;  %v8339_v18 = vld [vmem:[%s8474_s17 + $0x58] sm:$0xff] }
 0x219   : > { %v3720_v42 = vpop.f32.mrf.mxu1  ;;  %v3880_v0 = vld [vmem:[#allocation2 + $0x98] sm:$0xff] }
 0x21a   : > { %3933 = vst.msk [vmem:[#allocation2 + $0x18] sm:$0xff] %vm380_vm1, %v3901_v55  ;;  %v3904_v40 = vadd.f32 %v3872_v57, %v3726_v16  ;;  %v3721_v23 = vadd.f32 %v3720_v42, %v3492_v24  ;;  %v7790_v50 = vpop.f32.mrf.mxu0  ;;  %8089 = vmatmul.mubr.msk.f32.gmra.mxu0 %vm380_vm1, %v8326_v9  ;;  %v8342_v16 = vld [vmem:[%s8465_s14 + $0x68] sm:$0xff]  ;;  %v3879_v24 = vld [vmem:[#allocation2 + $0x90] sm:$0xff] }
 0x21b   : > { %v7840_v1 = vpop.f32.mrf.mxu1  ;;  %8139 = vmatmul.mubr.msk.f32.gmra.mxu1 %vm380_vm1, %v8327_v41  ;;  %8091 = vmatprep.mubr.msk.f32.mxu0 %vm380_vm1, %v8328_v39  ;;  %v8343_v57 = vld [vmem:[%s8474_s17 + $0x68] sm:$0xff]  ;;  %v8344_v42 = vld [vmem:[%s8465_s14 + $0x70] sm:$0xff] }
 0x21c   : > { %3936 = vst.msk [vmem:[#allocation2 + $0x38] sm:$0xff] %vm380_vm1, %v3904_v40  ;;  %v3903_v34 = vadd.f32 %v3871_v21, %v3721_v23  ;;  %v3736_v8 = vadd.f32 %v7840_v1, %v7790_v50  ;;  %v3502_v54 = vpop.f32.mrf.mxu0  ;;  %8141 = vmatprep.mubr.msk.f32.mxu1 %vm380_vm1, %v8329_v62  ;;  %v8345_v9 = vld [vmem:[%s8474_s17 + $0x70] sm:$0xff] }
 0x21d   : > { %v3730_v31 = vpop.f32.mrf.mxu1  ;;  %v3882_v21 = vld [vmem:[#allocation2 + $0xb0] sm:$0xff] }
 0x21e   : > { %3935 = vst.msk [vmem:[#allocation2 + $0x30] sm:$0xff] %vm380_vm1, %v3903_v34  ;;  %v3906_v29 = vadd.f32 %v3874_v19, %v3736_v8  ;;  %v3731_v26 = vadd.f32 %v3730_v31, %v3502_v54  ;;  %v7793_v47 = vpop.f32.mrf.mxu0  ;;  %8092 = vmatmul.mubr.msk.f32.gmra.mxu0 %vm380_vm1, %v8330_v3  ;;  %v8346_v8 = vld [vmem:[%s8465_s14 + $0x78] sm:$0xff]  ;;  %v3881_v54 = vld [vmem:[#allocation2 + $0xa8] sm:$0xff]  ;;  %v8348_v31 = vld [vmem:[%s8465_s14 + $0x80] sm:$0xff] }
 0x21f   : > { %v7843_v20 = vpop.f32.mrf.mxu1  ;;  %8142 = vmatmul.mubr.msk.f32.gmra.mxu1 %vm380_vm1, %v8331_v48  ;;  %8094 = vmatprep.mubr.msk.f32.mxu0 %vm380_vm1, %v8332_v4  ;;  %v8347_v19 = vld [vmem:[%s8474_s17 + $0x78] sm:$0xff]  ;;  %v8349_v3 = vld [vmem:[%s8474_s17 + $0x80] sm:$0xff] }
 0x220   : > { %3938 = vst.msk [vmem:[#allocation2 + $0x50] sm:$0xff] %vm380_vm1, %v3906_v29  ;;  %v3905_v59 = vadd.f32 %v3873_v32, %v3731_v26  ;;  %v3746_v17 = vadd.f32 %v7843_v20, %v7793_v47  ;;  %v3512_v37 = vpop.f32.mrf.mxu0  ;;  %8144 = vmatprep.mubr.msk.f32.mxu1 %vm380_vm1, %v8333_v6  ;;  %v3884_v32 = vld [vmem:[#allocation2 + $0xc8] sm:$0xff] }
 0x221   : > { %v3740_v15 = vpop.f32.mrf.mxu1 }
 0x222   : > { %3937 = vst.msk [vmem:[#allocation2 + $0x48] sm:$0xff] %vm380_vm1, %v3905_v59  ;;  %v3908_v38 = vadd.f32 %v3876_v12, %v3746_v17  ;;  %v3741_v33 = vadd.f32 %v3740_v15, %v3512_v37  ;;  %v7796_v51 = vpop.f32.mrf.mxu0  ;;  %8095 = vmatmul.mubr.msk.f32.gmra.mxu0 %vm380_vm1, %v8334_v10  ;;  %v8350_v17 = vld [vmem:[%s8465_s14 + $0x88] sm:$0xff]  ;;  %v3883_v37 = vld [vmem:[#allocation2 + $0xc0] sm:$0xff]  ;;  %v8352_v15 = vld [vmem:[%s8465_s14 + $0x90] sm:$0xff] }
 0x223   : > { %v7846_v60 = vpop.f32.mrf.mxu1  ;;  %8145 = vmatmul.mubr.msk.f32.gmra.mxu1 %vm380_vm1, %v8335_v35  ;;  %8097 = vmatprep.mubr.msk.f32.mxu0 %vm380_vm1, %v8336_v58  ;;  %v8351_v12 = vld [vmem:[%s8474_s17 + $0x88] sm:$0xff]  ;;  %v8353_v10 = vld [vmem:[%s8474_s17 + $0x90] sm:$0xff] }
 0x224   : > { %3940 = vst.msk [vmem:[#allocation2 + $0x68] sm:$0xff] %vm380_vm1, %v3908_v38  ;;  %v3907_v43 = vadd.f32 %v3875_v28, %v3741_v33  ;;  %v3756_v63 = vadd.f32 %v7846_v60, %v7796_v51  ;;  %v3522_v56 = vpop.f32.mrf.mxu0  ;;  %8147 = vmatprep.mubr.msk.f32.mxu1 %vm380_vm1, %v8337_v13  ;;  %v3886_v28 = vld [vmem:[#allocation2 + $0xe0] sm:$0xff] }
 0x225   : > { %v3750_v53 = vpop.f32.mrf.mxu1 }
 0x226   : > { %3939 = vst.msk [vmem:[#allocation2 + $0x60] sm:$0xff] %vm380_vm1, %v3907_v43  ;;  %v3910_v27 = vadd.f32 %v3878_v45, %v3756_v63  ;;  %v3751_v5 = vadd.f32 %v3750_v53, %v3522_v56  ;;  %v7799_v22 = vpop.f32.mrf.mxu0  ;;  %8098 = vmatmul.mubr.msk.f32.gmra.mxu0 %vm380_vm1, %v8338_v61  ;;  %v8354_v63 = vld [vmem:[%s8465_s14 + $0x98] sm:$0xff]  ;;  %v8356_v53 = vld [vmem:[%s8465_s14 + $0xa0] sm:$0xff] }
 0x227   : > { %v7849_v46 = vpop.f32.mrf.mxu1  ;;  %8148 = vmatmul.mubr.msk.f32.gmra.mxu1 %vm380_vm1, %v8339_v18  ;;  %8100 = vmatprep.mubr.msk.f32.mxu0 %vm380_vm1, %v8340_v49  ;;  %v3885_v56 = vld [vmem:[#allocation2 + $0xd8] sm:$0xff]  ;;  %v8357_v61 = vld [vmem:[%s8474_s17 + $0xa0] sm:$0xff] }
 0x228   : > { %3942 = vst.msk [vmem:[#allocation2 + $0x80] sm:$0xff] %vm380_vm1, %v3910_v27  ;;  %v3909_v7 = vadd.f32 %v3877_v44, %v3751_v5  ;;  %v3766_v25 = vadd.f32 %v7849_v46, %v7799_v22  ;;  %v3532_v2 = vpop.f32.mrf.mxu0  ;;  %8150 = vmatprep.mubr.msk.f32.mxu1 %vm380_vm1, %v8341_v36  ;;  %v8355_v45 = vld [vmem:[%s8474_s17 + $0x98] sm:$0xff] }
 0x229   : > { %v3760_v11 = vpop.f32.mrf.mxu1  ;;  %v3888_v44 = vld [vmem:[#allocation2 + $0xf8] sm:$0xff] }
 0x22a   : > { %3941 = vst.msk [vmem:[#allocation2 + $0x78] sm:$0xff] %vm380_vm1, %v3909_v7  ;;  %v3912_v14 = vadd.f32 %v3880_v0, %v3766_v25  ;;  %v3761_v30 = vadd.f32 %v3760_v11, %v3532_v2  ;;  %v7802_v55 = vpop.f32.mrf.mxu0  ;;  %8101 = vmatmul.mubr.msk.f32.gmra.mxu0 %vm380_vm1, %v8342_v16  ;;  %v8358_v25 = vld [vmem:[%s8465_s14 + $0xa8] sm:$0xff]  ;;  %v3887_v2 = vld [vmem:[#allocation2 + $0xf0] sm:$0xff] }
 0x22b   : > { %v7852_v52 = vpop.f32.mrf.mxu1  ;;  %8151 = vmatmul.mubr.msk.f32.gmra.mxu1 %vm380_vm1, %v8343_v57  ;;  %8103 = vmatprep.mubr.msk.f32.mxu0 %vm380_vm1, %v8344_v42  ;;  %v8359_v0 = vld [vmem:[%s8474_s17 + $0xa8] sm:$0xff]  ;;  %v8360_v11 = vld [vmem:[%s8465_s14 + $0xb0] sm:$0xff] }
 0x22c   : > { %3944 = vst.msk [vmem:[#allocation2 + $0x98] sm:$0xff] %vm380_vm1, %v3912_v14  ;;  %v3911_v40 = vadd.f32 %v3879_v24, %v3761_v30  ;;  %v3776_v23 = vadd.f32 %v7852_v52, %v7802_v55  ;;  %v3542_v50 = vpop.f32.mrf.mxu0  ;;  %8153 = vmatprep.mubr.msk.f32.mxu1 %vm380_vm1, %v8345_v9  ;;  %v8361_v16 = vld [vmem:[%s8474_s17 + $0xb0] sm:$0xff] }
 0x22d   : > { %v3770_v1 = vpop.f32.mrf.mxu1  ;;  %v3890_v24 = vld [vmem:[#allocation2 + $0x110] sm:$0xff] }
 0x22e   : > { %3943 = vst.msk [vmem:[#allocation2 + $0x90] sm:$0xff] %vm380_vm1, %v3911_v40  ;;  %v3914_v41 = vadd.f32 %v3882_v21, %v3776_v23  ;;  %v3771_v39 = vadd.f32 %v3770_v1, %v3542_v50  ;;  %v7805_v34 = vpop.f32.mrf.mxu0  ;;  %8104 = vmatmul.mubr.msk.f32.gmra.mxu0 %vm380_vm1, %v8346_v8  ;;  %v8362_v23 = vld [vmem:[%s8465_s14 + $0xb8] sm:$0xff]  ;;  %v3889_v50 = vld [vmem:[#allocation2 + $0x108] sm:$0xff]  ;;  %v8364_v1 = vld [vmem:[%s8465_s14 + $0xc0] sm:$0xff] }
 0x22f   : > { %v7855_v62 = vpop.f32.mrf.mxu1  ;;  %8154 = vmatmul.mubr.msk.f32.gmra.mxu1 %vm380_vm1, %v8347_v19  ;;  %8106 = vmatprep.mubr.msk.f32.mxu0 %vm380_vm1, %v8348_v31  ;;  %v8363_v21 = vld [vmem:[%s8474_s17 + $0xb8] sm:$0xff]  ;;  %v8365_v8 = vld [vmem:[%s8474_s17 + $0xc0] sm:$0xff] }
 0x230   : > { %3946 = vst.msk [vmem:[#allocation2 + $0xb0] sm:$0xff] %vm380_vm1, %v3914_v41  ;;  %v3913_v29 = vadd.f32 %v3881_v54, %v3771_v39  ;;  %v3786_v26 = vadd.f32 %v7855_v62, %v7805_v34  ;;  %v3552_v47 = vpop.f32.mrf.mxu0  ;;  %8156 = vmatprep.mubr.msk.f32.mxu1 %vm380_vm1, %v8349_v3  ;;  %v3892_v54 = vld [vmem:[#allocation2 + $0x128] sm:$0xff] }
 0x231   : > { %v3780_v20 = vpop.f32.mrf.mxu1 }
 0x232   : > { %3945 = vst.msk [vmem:[#allocation2 + $0xa8] sm:$0xff] %vm380_vm1, %v3913_v29  ;;  %v3916_v48 = vadd.f32 %v3884_v32, %v3786_v26  ;;  %v3781_v4 = vadd.f32 %v3780_v20, %v3552_v47  ;;  %v7808_v59 = vpop.f32.mrf.mxu0  ;;  %8107 = vmatmul.mubr.msk.f32.gmra.mxu0 %vm380_vm1, %v8350_v17  ;;  %v8366_v26 = vld [vmem:[%s8465_s14 + $0xc8] sm:$0xff]  ;;  %v3891_v47 = vld [vmem:[#allocation2 + $0x120] sm:$0xff]  ;;  %v8368_v20 = vld [vmem:[%s8465_s14 + $0xd0] sm:$0xff] }
 0x233   : > { %v7858_v6 = vpop.f32.mrf.mxu1  ;;  %8157 = vmatmul.mubr.msk.f32.gmra.mxu1 %vm380_vm1, %v8351_v12  ;;  %8109 = vmatprep.mubr.msk.f32.mxu0 %vm380_vm1, %v8352_v15  ;;  %v8367_v32 = vld [vmem:[%s8474_s17 + $0xc8] sm:$0xff]  ;;  %v8369_v17 = vld [vmem:[%s8474_s17 + $0xd0] sm:$0xff] }
 0x234   : > { %3948 = vst.msk [vmem:[#allocation2 + $0xc8] sm:$0xff] %vm380_vm1, %v3916_v48  ;;  %v3915_v38 = vadd.f32 %v3883_v37, %v3781_v4  ;;  %v3796_v33 = vadd.f32 %v7858_v6, %v7808_v59  ;;  %v3562_v51 = vpop.f32.mrf.mxu0  ;;  %8159 = vmatprep.mubr.msk.f32.mxu1 %vm380_vm1, %v8353_v10  ;;  %v3894_v37 = vld [vmem:[#allocation2 + $0x140] sm:$0xff] }
 0x235   : > { %v3790_v60 = vpop.f32.mrf.mxu1 }
 0x236   : > { %3947 = vst.msk [vmem:[#allocation2 + $0xc0] sm:$0xff] %vm380_vm1, %v3915_v38  ;;  %v3918_v35 = vadd.f32 %v3886_v28, %v3796_v33  ;;  %v3791_v58 = vadd.f32 %v3790_v60, %v3562_v51  ;;  %v7811_v43 = vpop.f32.mrf.mxu0  ;;  %8110 = vmatmul.mubr.msk.f32.gmra.mxu0 %vm380_vm1, %v8354_v63  ;;  %v8370_v33 = vld [vmem:[%s8465_s14 + $0xd8] sm:$0xff]  ;;  %v8372_v60 = vld [vmem:[%s8465_s14 + $0xe0] sm:$0xff] }
 0x237   : > { %v7861_v13 = vpop.f32.mrf.mxu1  ;;  %8160 = vmatmul.mubr.msk.f32.gmra.mxu1 %vm380_vm1, %v8355_v45  ;;  %8112 = vmatprep.mubr.msk.f32.mxu0 %vm380_vm1, %v8356_v53  ;;  %v3893_v51 = vld [vmem:[#allocation2 + $0x138] sm:$0xff]  ;;  %v8373_v63 = vld [vmem:[%s8474_s17 + $0xe0] sm:$0xff] }
 0x238   : > { %3950 = vst.msk [vmem:[#allocation2 + $0xe0] sm:$0xff] %vm380_vm1, %v3918_v35  ;;  %v3917_v27 = vadd.f32 %v3885_v56, %v3791_v58  ;;  %v3806_v5 = vadd.f32 %v7861_v13, %v7811_v43  ;;  %v3572_v22 = vpop.f32.mrf.mxu0  ;;  %8162 = vmatprep.mubr.msk.f32.mxu1 %vm380_vm1, %v8357_v61  ;;  %v8371_v28 = vld [vmem:[%s8474_s17 + $0xd8] sm:$0xff] }
 0x239   : > { %v3800_v46 = vpop.f32.mrf.mxu1  ;;  %v3896_v56 = vld [vmem:[#allocation2 + $0x158] sm:$0xff] }
 0x23a   : > { %3949 = vst.msk [vmem:[#allocation2 + $0xd8] sm:$0xff] %vm380_vm1, %v3917_v27  ;;  %v3920_v18 = vadd.f32 %v3888_v44, %v3806_v5  ;;  %v3801_v49 = vadd.f32 %v3800_v46, %v3572_v22  ;;  %v7814_v7 = vpop.f32.mrf.mxu0  ;;  %8113 = vmatmul.mubr.msk.f32.gmra.mxu0 %vm380_vm1, %v8358_v25  ;;  %v8374_v5 = vld [vmem:[%s8465_s14 + $0xe8] sm:$0xff]  ;;  %v3895_v22 = vld [vmem:[#allocation2 + $0x150] sm:$0xff] }
 0x23b   : > { %v7864_v36 = vpop.f32.mrf.mxu1  ;;  %8163 = vmatmul.mubr.msk.f32.gmra.mxu1 %vm380_vm1, %v8359_v0  ;;  %8115 = vmatprep.mubr.msk.f32.mxu0 %vm380_vm1, %v8360_v11  ;;  %v8375_v44 = vld [vmem:[%s8474_s17 + $0xe8] sm:$0xff]  ;;  %v8376_v46 = vld [vmem:[%s8465_s14 + $0xf0] sm:$0xff] }
 0x23c   : > { %3952 = vst.msk [vmem:[#allocation2 + $0xf8] sm:$0xff] %vm380_vm1, %v3920_v18  ;;  %v3919_v14 = vadd.f32 %v3887_v2, %v3801_v49  ;;  %v3816_v30 = vadd.f32 %v7864_v36, %v7814_v7  ;;  %v3582_v55 = vpop.f32.mrf.mxu0  ;;  %8165 = vmatprep.mubr.msk.f32.mxu1 %vm380_vm1, %v8361_v16  ;;  %v8377_v25 = vld [vmem:[%s8474_s17 + $0xf0] sm:$0xff] }
 0x23d   : > { %v3810_v52 = vpop.f32.mrf.mxu1  ;;  %v3898_v2 = vld [vmem:[#allocation2 + $0x170] sm:$0xff] }
 0x23e   : > { %3951 = vst.msk [vmem:[#allocation2 + $0xf0] sm:$0xff] %vm380_vm1, %v3919_v14  ;;  %v3922_v57 = vadd.f32 %v3890_v24, %v3816_v30  ;;  %v3811_v42 = vadd.f32 %v3810_v52, %v3582_v55  ;;  %v7817_v40 = vpop.f32.mrf.mxu0  ;;  %8116 = vmatmul.mubr.msk.f32.gmra.mxu0 %vm380_vm1, %v8362_v23  ;;  %v8378_v30 = vld [vmem:[%s8465_s14 + $0xf8] sm:$0xff]  ;;  %v3897_v55 = vld [vmem:[#allocation2 + $0x168] sm:$0xff] }
 0x23f   : > { %v7867_v9 = vpop.f32.mrf.mxu1  ;;  %8166 = vmatmul.mubr.msk.f32.gmra.mxu1 %vm380_vm1, %v8363_v21  ;;  %8118 = vmatprep.mubr.msk.f32.mxu0 %vm380_vm1, %v8364_v1  ;;  %v8379_v24 = vld [vmem:[%s8474_s17 + $0xf8] sm:$0xff]  ;;  %v3899_v1 = vld [vmem:[#allocation2 + $0x180] sm:$0xff] }
 0x240   : > { %3954 = vst.msk [vmem:[#allocation2 + $0x110] sm:$0xff] %vm380_vm1, %v3922_v57  ;;  %v3921_v41 = vadd.f32 %v3889_v50, %v3811_v42  ;;  %v3826_v39 = vadd.f32 %v7867_v9, %v7817_v40  ;;  %v3592_v34 = vpop.f32.mrf.mxu0  ;;  %8168 = vmatprep.mubr.msk.f32.mxu1 %vm380_vm1, %v8365_v8  ;;  %v3900_v40 = vld [vmem:[#allocation2 + $0x188] sm:$0xff] }
 0x241   : > { %v3820_v62 = vpop.f32.mrf.mxu1 }
 0x242   : > { %3953 = vst.msk [vmem:[#allocation2 + $0x108] sm:$0xff] %vm380_vm1, %v3921_v41  ;;  %v3924_v19 = vadd.f32 %v3892_v54, %v3826_v39  ;;  %v3821_v31 = vadd.f32 %v3820_v62, %v3592_v34  ;;  %v7820_v29 = vpop.f32.mrf.mxu0  ;;  %8119 = vmatmul.mubr.msk.f32.gmra.mxu0 %vm380_vm1, %v8366_v26  ;;  %v4426_v39 = vld [vmem:[#allocation2 + $0xa] sm:$0xff] }
 0x243   : > { %v7870_v3 = vpop.f32.mrf.mxu1  ;;  %8169 = vmatmul.mubr.msk.f32.gmra.mxu1 %vm380_vm1, %v8367_v32  ;;  %8121 = vmatprep.mubr.msk.f32.mxu0 %vm380_vm1, %v8368_v20 }
 0x244   : > { %3956 = vst.msk [vmem:[#allocation2 + $0x128] sm:$0xff] %vm380_vm1, %v3924_v19  ;;  %v3923_v48 = vadd.f32 %v3891_v47, %v3821_v31  ;;  %v3836_v4 = vadd.f32 %v7870_v3, %v7820_v29  ;;  %v3602_v59 = vpop.f32.mrf.mxu0  ;;  %8171 = vmatprep.mubr.msk.f32.mxu1 %vm380_vm1, %v8369_v17  ;;  %v4425_v19 = vld [vmem:[#allocation2 + $0x2] sm:$0xff] }
 0x245   : > { %v3830_v6 = vpop.f32.mrf.mxu1 }
 0x246   : > { %3955 = vst.msk [vmem:[#allocation2 + $0x120] sm:$0xff] %vm380_vm1, %v3923_v48  ;;  %v3926_v12 = vadd.f32 %v3894_v37, %v3836_v4  ;;  %v3831_v15 = vadd.f32 %v3830_v6, %v3602_v59  ;;  %v7823_v38 = vpop.f32.mrf.mxu0  ;;  %8122 = vmatmul.mubr.msk.f32.gmra.mxu0 %vm380_vm1, %v8370_v33  ;;  %v10579_v48 = vld [vmem:[%s11058_s4] ss:$0 sm:$0xff]  ;;  %v4428_v4 = vld [vmem:[#allocation2 + $0x22] sm:$0xff] }
 0x247   : > { %v7873_v10 = vpop.f32.mrf.mxu1  ;;  %8172 = vmatmul.mubr.msk.f32.gmra.mxu1 %vm380_vm1, %v8371_v28  ;;  %8124 = vmatprep.mubr.msk.f32.mxu0 %vm380_vm1, %v8372_v60 }
 0x248   : > { %3958 = vst.msk [vmem:[#allocation2 + $0x140] sm:$0xff] %vm380_vm1, %v3926_v12  ;;  %v3925_v35 = vadd.f32 %v3893_v51, %v3831_v15  ;;  %v3846_v58 = vadd.f32 %v7873_v10, %v7823_v38  ;;  %v3612_v43 = vpop.f32.mrf.mxu0  ;;  %8174 = vmatprep.mubr.msk.f32.mxu1 %vm380_vm1, %v8373_v63  ;;  %v4427_v15 = vld [vmem:[#allocation2 + $0x1a] sm:$0xff] }
 0x249   : > { %v3840_v13 = vpop.f32.mrf.mxu1 }
 0x24a   : > { %3957 = vst.msk [vmem:[#allocation2 + $0x138] sm:$0xff] %vm380_vm1, %v3925_v35  ;;  %v3928_v45 = vadd.f32 %v3896_v56, %v3846_v58  ;;  %v3841_v53 = vadd.f32 %v3840_v13, %v3612_v43  ;;  %v7826_v27 = vpop.f32.mrf.mxu0  ;;  %8125 = vmatmul.mubr.msk.f32.gmra.mxu0 %vm380_vm1, %v8374_v5  ;;  %v4430_v35 = vld [vmem:[#allocation2 + $0x3a] sm:$0xff] }
 0x24b   : > { %v7876_v61 = vpop.f32.mrf.mxu1  ;;  %8175 = vmatmul.mubr.msk.f32.gmra.mxu1 %vm380_vm1, %v8375_v44  ;;  %8127 = vmatprep.mubr.msk.f32.mxu0 %vm380_vm1, %v8376_v46 }
 0x24c   : > { %3960 = vst.msk [vmem:[#allocation2 + $0x158] sm:$0xff] %vm380_vm1, %v3928_v45  ;;  %v3927_v18 = vadd.f32 %v3895_v22, %v3841_v53  ;;  %v3856_v49 = vadd.f32 %v7876_v61, %v7826_v27  ;;  %v3622_v7 = vpop.f32.mrf.mxu0  ;;  %8177 = vmatprep.mubr.msk.f32.mxu1 %vm380_vm1, %v8377_v25  ;;  %v4429_v45 = vld [vmem:[#allocation2 + $0x32] sm:$0xff] }
 0x24d   : > { %v3850_v36 = vpop.f32.mrf.mxu1  ;;  %v4432_v61 = vld [vmem:[#allocation2 + $0x52] sm:$0xff] }
 0x24e   : > { %3959 = vst.msk [vmem:[#allocation2 + $0x150] sm:$0xff] %vm380_vm1, %v3927_v18  ;;  %v3930_v0 = vadd.f32 %v3898_v2, %v3856_v49  ;;  %v3851_v11 = vadd.f32 %v3850_v36, %v3622_v7  ;;  %v7829_v14 = vpop.f32.mrf.mxu0  ;;  %8128 = vmatmul.mubr.msk.f32.gmra.mxu0 %vm380_vm1, %v8378_v30  ;;  %v4431_v7 = vld [vmem:[#allocation2 + $0x4a] sm:$0xff] }
 0x24f   : > { %v7879_v16 = vpop.f32.mrf.mxu1  ;;  %8178 = vmatmul.mubr.msk.f32.gmra.mxu1 %vm380_vm1, %v8379_v24  ;;  %v4433_v24 = vld [vmem:[#allocation2 + $0x62] sm:$0xff] }
 0x250   : > { %3962 = vst.msk [vmem:[#allocation2 + $0x170] sm:$0xff] %vm380_vm1, %v3930_v0  ;;  %v3929_v52 = vadd.f32 %v3897_v55, %v3851_v11  ;;  %v3866_v57 = vadd.f32 %v7879_v16, %v7829_v14  ;;  %v3632_v42 = vpop.f32.mrf.mxu0  ;;  %v4434_v11 = vld [vmem:[#allocation2 + $0x6a] sm:$0xff] }
 0x251   : > { %v3860_v23 = vpop.f32.mrf.mxu1 }
 0x252   : > { %3961 = vst.msk [vmem:[#allocation2 + $0x168] sm:$0xff] %vm380_vm1, %v3929_v52  ;;  %v3932_v50 = vadd.f32 %v3900_v40, %v3866_v57  ;;  %v3861_v9 = vadd.f32 %v3860_v23, %v3632_v42  ;;  %v7884_v21 = vpop.f32.mrf.mxu0  ;;  %v4436_v23 = vld [vmem:[#allocation2 + $0x82] sm:$0xff] }
 0x253   : > { %v7934_v41 = vpop.f32.mrf.mxu1 }
 0x254   : > { %3964 = vst.msk [vmem:[#allocation2 + $0x188] sm:$0xff] %vm380_vm1, %v3932_v50  ;;  %v3931_v34 = vadd.f32 %v3899_v1, %v3861_v9  ;;  %v4272_v8 = vadd.f32 %v7934_v41, %v7884_v21  ;;  %v4038_v54 = vpop.f32.mrf.mxu0  ;;  %v4435_v41 = vld [vmem:[#allocation2 + $0x7a] sm:$0xff] }
 0x255   : > { %v4266_v62 = vpop.f32.mrf.mxu1 }
 0x256   : > { %3963 = vst.msk [vmem:[#allocation2 + $0x180] sm:$0xff] %vm380_vm1, %v3931_v34  ;;  %v4458_v31 = vadd.f32 %v4426_v39, %v4272_v8  ;;  %v4267_v29 = vadd.f32 %v4266_v62, %v4038_v54  ;;  %v7887_v26 = vpop.f32.mrf.mxu0  ;;  %v4438_v62 = vld [vmem:[#allocation2 + $0x9a] sm:$0xff] }
 0x257   : > { %v7937_v47 = vpop.f32.mrf.mxu1 }
 0x258   : > { %4490 = vst.msk [vmem:[#allocation2 + $0xa] sm:$0xff] %vm380_vm1, %v4458_v31  ;;  %v4457_v3 = vadd.f32 %v4425_v19, %v4267_v29  ;;  %v4282_v32 = vadd.f32 %v7937_v47, %v7887_v26  ;;  %v4048_v20 = vpop.f32.mrf.mxu0  ;;  %v4437_v47 = vld [vmem:[#allocation2 + $0x92] sm:$0xff] }
 0x259   : > { %v4276_v59 = vpop.f32.mrf.mxu1 }
 0x25a   : > { %4489 = vst.msk [vmem:[#allocation2 + $0x2] sm:$0xff] %vm380_vm1, %v4457_v3  ;;  %v4460_v17 = vadd.f32 %v4428_v4, %v4282_v32  ;;  %v4277_v37 = vadd.f32 %v4276_v59, %v4048_v20  ;;  %v7890_v6 = vpop.f32.mrf.mxu0  ;;  %v4440_v59 = vld [vmem:[#allocation2 + $0xb2] sm:$0xff] }
 0x25b   : > { %v5664_v12 = vld [vmem:[#allocation2 + $0x189] sm:$0xff]  ;;  %v7940_v38 = vpop.f32.mrf.mxu1 }
 0x25c   : > { %v10589_v33 = vadd.f32 %v10579_v48, %v5664_v12  ;;  %4492 = vst.msk [vmem:[#allocation2 + $0x22] sm:$0xff] %vm380_vm1, %v4460_v17  ;;  %v4459_v51 = vadd.f32 %v4427_v15, %v4277_v37  ;;  %v4292_v10 = vadd.f32 %v7940_v38, %v7890_v6  ;;  %v4058_v28 = vpop.f32.mrf.mxu0  ;;  %v4439_v15 = vld [vmem:[#allocation2 + $0xaa] sm:$0xff] }
 0x25d   : > { %v5663_v60 = vld [vmem:[#allocation2 + $0x181] sm:$0xff]  ;;  %v4286_v58 = vpop.f32.mrf.mxu1 }
 0x25e   : > { %5735 = vst.msk [vmem:[%s10586_s9 + $0xf8] sm:$0xff] %vm380_vm1, %v10589_v33  ;;  %v10596_v43 = vadd.f32 %v10579_v48, %v5663_v60  ;;  %4491 = vst.msk [vmem:[#allocation2 + $0x1a] sm:$0xff] %vm380_vm1, %v4459_v51  ;;  %v4462_v63 = vadd.f32 %v4430_v35, %v4292_v10  ;;  %v4287_v56 = vadd.f32 %v4286_v58, %v4058_v28  ;;  %v7893_v13 = vpop.f32.mrf.mxu0  ;;  %v4442_v60 = vld [vmem:[#allocation2 + $0xca] sm:$0xff] }
 0x25f   : > { %v7943_v53 = vpop.f32.mrf.mxu1 }
 0x260   : > { %5734 = vst.msk [vmem:[%s10586_s9 + $0xf0] sm:$0xff] %vm380_vm1, %v10596_v43  ;;  %4494 = vst.msk [vmem:[#allocation2 + $0x3a] sm:$0xff] %vm380_vm1, %v4462_v63  ;;  %v4461_v27 = vadd.f32 %v4429_v45, %v4287_v56  ;;  %v4302_v5 = vadd.f32 %v7943_v53, %v7893_v13  ;;  %v4068_v22 = vpop.f32.mrf.mxu0  ;;  %v4441_v13 = vld [vmem:[#allocation2 + $0xc2] sm:$0xff] }
 0x261   : > { %v4296_v44 = vpop.f32.mrf.mxu1 }
 0x262   : > { %4493 = vst.msk [vmem:[#allocation2 + $0x32] sm:$0xff] %vm380_vm1, %v4461_v27  ;;  %v4464_v46 = vadd.f32 %v4432_v61, %v4302_v5  ;;  %v4297_v18 = vadd.f32 %v4296_v44, %v4068_v22  ;;  %v7896_v49 = vpop.f32.mrf.mxu0  ;;  %v4444_v22 = vld [vmem:[#allocation2 + $0xe2] sm:$0xff] }
 0x263   : > { %v7946_v25 = vpop.f32.mrf.mxu1 }
 0x264   : > { %4496 = vst.msk [vmem:[#allocation2 + $0x52] sm:$0xff] %vm380_vm1, %v4464_v46  ;;  %v4463_v2 = vadd.f32 %v4431_v7, %v4297_v18  ;;  %v4312_v36 = vadd.f32 %v7946_v25, %v7896_v49  ;;  %v4078_v0 = vpop.f32.mrf.mxu0  ;;  %v4443_v49 = vld [vmem:[#allocation2 + $0xda] sm:$0xff] }
 0x265   : > { %v4306_v14 = vpop.f32.mrf.mxu1 }
 0x266   : > { %4495 = vst.msk [vmem:[#allocation2 + $0x4a] sm:$0xff] %vm380_vm1, %v4463_v2  ;;  %v4466_v30 = vadd.f32 %v4434_v11, %v4312_v36  ;;  %v4307_v55 = vadd.f32 %v4306_v14, %v4078_v0  ;;  %v7899_v16 = vpop.f32.mrf.mxu0  ;;  %v4446_v0 = vld [vmem:[#allocation2 + $0xfa] sm:$0xff] }
 0x267   : > { %v7949_v52 = vpop.f32.mrf.mxu1 }
 0x268   : > { %4498 = vst.msk [vmem:[#allocation2 + $0x6a] sm:$0xff] %vm380_vm1, %v4466_v30  ;;  %v4465_v57 = vadd.f32 %v4433_v24, %v4307_v55  ;;  %v4322_v42 = vadd.f32 %v7949_v52, %v7899_v16  ;;  %v4088_v40 = vpop.f32.mrf.mxu0  ;;  %v4445_v16 = vld [vmem:[#allocation2 + $0xf2] sm:$0xff] }
 0x269   : > { %v4316_v50 = vpop.f32.mrf.mxu1 }
 0x26a   : > { %4497 = vst.msk [vmem:[#allocation2 + $0x62] sm:$0xff] %vm380_vm1, %v4465_v57  ;;  %v4468_v9 = vadd.f32 %v4436_v23, %v4322_v42  ;;  %v4317_v21 = vadd.f32 %v4316_v50, %v4088_v40  ;;  %v7902_v1 = vpop.f32.mrf.mxu0  ;;  %v4448_v40 = vld [vmem:[#allocation2 + $0x112] sm:$0xff] }
 0x26b   : > { %v7952_v39 = vpop.f32.mrf.mxu1 }
 0x26c   : > { %4500 = vst.msk [vmem:[#allocation2 + $0x82] sm:$0xff] %vm380_vm1, %v4468_v9  ;;  %v4467_v34 = vadd.f32 %v4435_v41, %v4317_v21  ;;  %v4332_v8 = vadd.f32 %v7952_v39, %v7902_v1  ;;  %v4098_v54 = vpop.f32.mrf.mxu0  ;;  %v4447_v1 = vld [vmem:[#allocation2 + $0x10a] sm:$0xff] }
 0x26d   : > { %v4326_v19 = vpop.f32.mrf.mxu1 }
 0x26e   : > { %4499 = vst.msk [vmem:[#allocation2 + $0x7a] sm:$0xff] %vm380_vm1, %v4467_v34  ;;  %v4470_v31 = vadd.f32 %v4438_v62, %v4332_v8  ;;  %v4327_v29 = vadd.f32 %v4326_v19, %v4098_v54  ;;  %v7905_v26 = vpop.f32.mrf.mxu0  ;;  %v4450_v54 = vld [vmem:[#allocation2 + $0x12a] sm:$0xff] }
 0x26f   : > { %v7955_v3 = vpop.f32.mrf.mxu1 }
 0x270   : > { %4502 = vst.msk [vmem:[#allocation2 + $0x9a] sm:$0xff] %vm380_vm1, %v4470_v31  ;;  %v4469_v32 = vadd.f32 %v4437_v47, %v4327_v29  ;;  %v4342_v20 = vadd.f32 %v7955_v3, %v7905_v26  ;;  %v4108_v4 = vpop.f32.mrf.mxu0  ;;  %v4449_v26 = vld [vmem:[#allocation2 + $0x122] sm:$0xff] }
 0x271   : > { %v4336_v17 = vpop.f32.mrf.mxu1 }
 0x272   : > { %4501 = vst.msk [vmem:[#allocation2 + $0x92] sm:$0xff] %vm380_vm1, %v4469_v32  ;;  %v4472_v37 = vadd.f32 %v4440_v59, %v4342_v20  ;;  %v4337_v6 = vadd.f32 %v4336_v17, %v4108_v4  ;;  %v7908_v12 = vpop.f32.mrf.mxu0  ;;  %v4452_v4 = vld [vmem:[#allocation2 + $0x142] sm:$0xff] }
 0x273   : > { %v7958_v38 = vpop.f32.mrf.mxu1 }
 0x274   : > { %4504 = vst.msk [vmem:[#allocation2 + $0xb2] sm:$0xff] %vm380_vm1, %v4472_v37  ;;  %v4471_v51 = vadd.f32 %v4439_v15, %v4337_v6  ;;  %v4352_v10 = vadd.f32 %v7958_v38, %v7908_v12  ;;  %v4118_v28 = vpop.f32.mrf.mxu0  ;;  %v4451_v12 = vld [vmem:[#allocation2 + $0x13a] sm:$0xff] }
 0x275   : > { %v4346_v35 = vpop.f32.mrf.mxu1 }
 0x276   : > { %4503 = vst.msk [vmem:[#allocation2 + $0xaa] sm:$0xff] %vm380_vm1, %v4471_v51  ;;  %v4474_v58 = vadd.f32 %v4442_v60, %v4352_v10  ;;  %v4347_v63 = vadd.f32 %v4346_v35, %v4118_v28  ;;  %v7911_v56 = vpop.f32.mrf.mxu0  ;;  %v4454_v28 = vld [vmem:[#allocation2 + $0x15a] sm:$0xff] }
 0x277   : > { %v7961_v45 = vpop.f32.mrf.mxu1 }
 0x278   : > { %4506 = vst.msk [vmem:[#allocation2 + $0xca] sm:$0xff] %vm380_vm1, %v4474_v58  ;;  %v4473_v53 = vadd.f32 %v4441_v13, %v4347_v63  ;;  %v4362_v27 = vadd.f32 %v7961_v45, %v7911_v56  ;;  %v4128_v5 = vpop.f32.mrf.mxu0  ;;  %v4453_v56 = vld [vmem:[#allocation2 + $0x152] sm:$0xff] }
 0x279   : > { %v4356_v61 = vpop.f32.mrf.mxu1 }
 0x27a   : > { %4505 = vst.msk [vmem:[#allocation2 + $0xc2] sm:$0xff] %vm380_vm1, %v4473_v53  ;;  %v4476_v44 = vadd.f32 %v4444_v22, %v4362_v27  ;;  %v4357_v46 = vadd.f32 %v4356_v61, %v4128_v5  ;;  %v7914_v18 = vpop.f32.mrf.mxu0  ;;  %v4456_v5 = vld [vmem:[#allocation2 + $0x172] sm:$0xff] }
 0x27b   : > { %v7964_v7 = vpop.f32.mrf.mxu1 }
 0x27c   : > { %4508 = vst.msk [vmem:[#allocation2 + $0xe2] sm:$0xff] %vm380_vm1, %v4476_v44  ;;  %v4475_v25 = vadd.f32 %v4443_v49, %v4357_v46  ;;  %v4372_v2 = vadd.f32 %v7964_v7, %v7914_v18  ;;  %v4138_v36 = vpop.f32.mrf.mxu0  ;;  %v4455_v18 = vld [vmem:[#allocation2 + $0x16a] sm:$0xff] }
 0x27d   : > { %v4366_v11 = vpop.f32.mrf.mxu1 }
 0x27e   : > { %4507 = vst.msk [vmem:[#allocation2 + $0xda] sm:$0xff] %vm380_vm1, %v4475_v25  ;;  %v4478_v14 = vadd.f32 %v4446_v0, %v4372_v2  ;;  %v4367_v30 = vadd.f32 %v4366_v11, %v4138_v36  ;;  %v7917_v55 = vpop.f32.mrf.mxu0  ;;  %v4982_v36 = vld [vmem:[#allocation2 + $0x9] sm:$0xff] }
 0x27f   : > { %v7967_v24 = vpop.f32.mrf.mxu1 }
 0x280   : > { %4510 = vst.msk [vmem:[#allocation2 + $0xfa] sm:$0xff] %vm380_vm1, %v4478_v14  ;;  %v4477_v52 = vadd.f32 %v4445_v16, %v4367_v30  ;;  %v4382_v57 = vadd.f32 %v7967_v24, %v7917_v55  ;;  %v4148_v42 = vpop.f32.mrf.mxu0  ;;  %v4981_v55 = vld [vmem:[#allocation2 + $0x1] sm:$0xff] }
 0x281   : > { %v4376_v23 = vpop.f32.mrf.mxu1 }
 0x282   : > { %4509 = vst.msk [vmem:[#allocation2 + $0xf2] sm:$0xff] %vm380_vm1, %v4477_v52  ;;  %v4480_v50 = vadd.f32 %v4448_v40, %v4382_v57  ;;  %v4377_v9 = vadd.f32 %v4376_v23, %v4148_v42  ;;  %v7920_v21 = vpop.f32.mrf.mxu0  ;;  %v4984_v42 = vld [vmem:[#allocation2 + $0x21] sm:$0xff] }
 0x283   : > { %v7970_v41 = vpop.f32.mrf.mxu1 }
 0x284   : > { %4512 = vst.msk [vmem:[#allocation2 + $0x112] sm:$0xff] %vm380_vm1, %v4480_v50  ;;  %v4479_v39 = vadd.f32 %v4447_v1, %v4377_v9  ;;  %v4392_v34 = vadd.f32 %v7970_v41, %v7920_v21  ;;  %v4158_v8 = vpop.f32.mrf.mxu0  ;;  %v4983_v21 = vld [vmem:[#allocation2 + $0x19] sm:$0xff] }
 0x285   : > { %v4386_v62 = vpop.f32.mrf.mxu1 }
 0x286   : > { %4511 = vst.msk [vmem:[#allocation2 + $0x10a] sm:$0xff] %vm380_vm1, %v4479_v39  ;;  %v4482_v19 = vadd.f32 %v4450_v54, %v4392_v34  ;;  %v4387_v31 = vadd.f32 %v4386_v62, %v4158_v8  ;;  %v7923_v29 = vpop.f32.mrf.mxu0  ;;  %v4986_v8 = vld [vmem:[#allocation2 + $0x39] sm:$0xff] }
 0x287   : > { %v7973_v47 = vpop.f32.mrf.mxu1 }
 0x288   : > { %4514 = vst.msk [vmem:[#allocation2 + $0x12a] sm:$0xff] %vm380_vm1, %v4482_v19  ;;  %v4481_v3 = vadd.f32 %v4449_v26, %v4387_v31  ;;  %v4402_v32 = vadd.f32 %v7973_v47, %v7923_v29  ;;  %v4168_v20 = vpop.f32.mrf.mxu0  ;;  %v4985_v29 = vld [vmem:[#allocation2 + $0x31] sm:$0xff] }
 0x289   : > { %v4396_v59 = vpop.f32.mrf.mxu1 }
 0x28a   : > { %4513 = vst.msk [vmem:[#allocation2 + $0x122] sm:$0xff] %vm380_vm1, %v4481_v3  ;;  %v4484_v17 = vadd.f32 %v4452_v4, %v4402_v32  ;;  %v4397_v37 = vadd.f32 %v4396_v59, %v4168_v20  ;;  %v7926_v6 = vpop.f32.mrf.mxu0  ;;  %v4988_v20 = vld [vmem:[#allocation2 + $0x51] sm:$0xff] }
 0x28b   : > { %v7976_v15 = vpop.f32.mrf.mxu1 }
 0x28c   : > { %4516 = vst.msk [vmem:[#allocation2 + $0x142] sm:$0xff] %vm380_vm1, %v4484_v17  ;;  %v4483_v38 = vadd.f32 %v4451_v12, %v4397_v37  ;;  %v4412_v51 = vadd.f32 %v7976_v15, %v7926_v6  ;;  %v4178_v10 = vpop.f32.mrf.mxu0  ;;  %v4987_v6 = vld [vmem:[#allocation2 + $0x49] sm:$0xff] }
 0x28d   : > { %v4406_v60 = vpop.f32.mrf.mxu1 }
 0x28e   : > { %4515 = vst.msk [vmem:[#allocation2 + $0x13a] sm:$0xff] %vm380_vm1, %v4483_v38  ;;  %v4486_v35 = vadd.f32 %v4454_v28, %v4412_v51  ;;  %v4407_v58 = vadd.f32 %v4406_v60, %v4178_v10  ;;  %v7929_v63 = vpop.f32.mrf.mxu0  ;;  %v4990_v10 = vld [vmem:[#allocation2 + $0x69] sm:$0xff] }
 0x28f   : > { %v7979_v13 = vpop.f32.mrf.mxu1 }
 0x290   : > { %4518 = vst.msk [vmem:[#allocation2 + $0x15a] sm:$0xff] %vm380_vm1, %v4486_v35  ;;  %v4485_v45 = vadd.f32 %v4453_v56, %v4407_v58  ;;  %v4422_v53 = vadd.f32 %v7979_v13, %v7929_v63  ;;  %v4188_v27 = vpop.f32.mrf.mxu0  ;;  %v4989_v63 = vld [vmem:[#allocation2 + $0x61] sm:$0xff] }
 0x291   : > { %v4416_v22 = vpop.f32.mrf.mxu1 }
 0x292   : > { %4517 = vst.msk [vmem:[#allocation2 + $0x152] sm:$0xff] %vm380_vm1, %v4485_v45  ;;  %v4488_v61 = vadd.f32 %v4456_v5, %v4422_v53  ;;  %v4417_v44 = vadd.f32 %v4416_v22, %v4188_v27  ;;  %v7984_v46 = vpop.f32.mrf.mxu0  ;;  %v4992_v27 = vld [vmem:[#allocation2 + $0x81] sm:$0xff] }
 0x293   : > { %v8034_v49 = vpop.f32.mrf.mxu1 }
 0x294   : > { %4520 = vst.msk [vmem:[#allocation2 + $0x172] sm:$0xff] %vm380_vm1, %v4488_v61  ;;  %v4487_v7 = vadd.f32 %v4455_v18, %v4417_v44  ;;  %v4828_v25 = vadd.f32 %v8034_v49, %v7984_v46  ;;  %v4594_v2 = vpop.f32.mrf.mxu0  ;;  %v4991_v46 = vld [vmem:[#allocation2 + $0x79] sm:$0xff] }
 0x295   : > { %v4822_v0 = vpop.f32.mrf.mxu1 }
 0x296   : > { %4519 = vst.msk [vmem:[#allocation2 + $0x16a] sm:$0xff] %vm380_vm1, %v4487_v7  ;;  %v5014_v11 = vadd.f32 %v4982_v36, %v4828_v25  ;;  %v4823_v14 = vadd.f32 %v4822_v0, %v4594_v2  ;;  %v7987_v30 = vpop.f32.mrf.mxu0  ;;  %v4994_v2 = vld [vmem:[#allocation2 + $0x99] sm:$0xff] }
 0x297   : > { %v8037_v16 = vpop.f32.mrf.mxu1 }
 0x298   : > { %5046 = vst.msk [vmem:[#allocation2 + $0x9] sm:$0xff] %vm380_vm1, %v5014_v11  ;;  %v5013_v24 = vadd.f32 %v4981_v55, %v4823_v14  ;;  %v4838_v52 = vadd.f32 %v8037_v16, %v7987_v30  ;;  %v4604_v57 = vpop.f32.mrf.mxu0  ;;  %v4993_v30 = vld [vmem:[#allocation2 + $0x91] sm:$0xff] }
 0x299   : > { %v4832_v40 = vpop.f32.mrf.mxu1 }
 0x29a   : > { %5045 = vst.msk [vmem:[#allocation2 + $0x1] sm:$0xff] %vm380_vm1, %v5013_v24  ;;  %v5016_v23 = vadd.f32 %v4984_v42, %v4838_v52  ;;  %v4833_v50 = vadd.f32 %v4832_v40, %v4604_v57  ;;  %v7990_v9 = vpop.f32.mrf.mxu0  ;;  %v4996_v57 = vld [vmem:[#allocation2 + $0xb1] sm:$0xff] }
 0x29b   : > { %v8040_v1 = vpop.f32.mrf.mxu1 }
 0x29c   : > { %5048 = vst.msk [vmem:[#allocation2 + $0x21] sm:$0xff] %vm380_vm1, %v5016_v23  ;;  %v5015_v41 = vadd.f32 %v4983_v21, %v4833_v50  ;;  %v4848_v39 = vadd.f32 %v8040_v1, %v7990_v9  ;;  %v4614_v34 = vpop.f32.mrf.mxu0  ;;  %v4995_v9 = vld [vmem:[#allocation2 + $0xa9] sm:$0xff] }
 0x29d   : > { %v4842_v54 = vpop.f32.mrf.mxu1 }
 0x29e   : > { %5047 = vst.msk [vmem:[#allocation2 + $0x19] sm:$0xff] %vm380_vm1, %v5015_v41  ;;  %v5018_v62 = vadd.f32 %v4986_v8, %v4848_v39  ;;  %v4843_v19 = vadd.f32 %v4842_v54, %v4614_v34  ;;  %v7993_v31 = vpop.f32.mrf.mxu0  ;;  %v4998_v34 = vld [vmem:[#allocation2 + $0xc9] sm:$0xff] }
 0x29f   : > { %v8043_v26 = vpop.f32.mrf.mxu1 }
 0x2a0   : > { %5050 = vst.msk [vmem:[#allocation2 + $0x39] sm:$0xff] %vm380_vm1, %v5018_v62  ;;  %v5017_v47 = vadd.f32 %v4985_v29, %v4843_v19  ;;  %v4858_v3 = vadd.f32 %v8043_v26, %v7993_v31  ;;  %v4624_v32 = vpop.f32.mrf.mxu0  ;;  %v4997_v31 = vld [vmem:[#allocation2 + $0xc1] sm:$0xff] }
 0x2a1   : > { %v4852_v4 = vpop.f32.mrf.mxu1 }
 0x2a2   : > { %5049 = vst.msk [vmem:[#allocation2 + $0x31] sm:$0xff] %vm380_vm1, %v5017_v47  ;;  %v5020_v59 = vadd.f32 %v4988_v20, %v4858_v3  ;;  %v4853_v17 = vadd.f32 %v4852_v4, %v4624_v32  ;;  %v7996_v37 = vpop.f32.mrf.mxu0  ;;  %v5000_v32 = vld [vmem:[#allocation2 + $0xe1] sm:$0xff] }
 0x2a3   : > { %v8046_v12 = vpop.f32.mrf.mxu1 }
 0x2a4   : > { %5052 = vst.msk [vmem:[#allocation2 + $0x51] sm:$0xff] %vm380_vm1, %v5020_v59  ;;  %v5019_v15 = vadd.f32 %v4987_v6, %v4853_v17  ;;  %v4868_v38 = vadd.f32 %v8046_v12, %v7996_v37  ;;  %v4634_v51 = vpop.f32.mrf.mxu0  ;;  %v4999_v37 = vld [vmem:[#allocation2 + $0xd9] sm:$0xff] }
 0x2a5   : > { %v4862_v28 = vpop.f32.mrf.mxu1 }
 0x2a6   : > { %5051 = vst.msk [vmem:[#allocation2 + $0x49] sm:$0xff] %vm380_vm1, %v5019_v15  ;;  %v5022_v60 = vadd.f32 %v4990_v10, %v4868_v38  ;;  %v4863_v35 = vadd.f32 %v4862_v28, %v4634_v51  ;;  %v7999_v58 = vpop.f32.mrf.mxu0  ;;  %v5002_v51 = vld [vmem:[#allocation2 + $0xf9] sm:$0xff] }
 0x2a7   : > { %v8049_v56 = vpop.f32.mrf.mxu1 }
 0x2a8   : > { %5054 = vst.msk [vmem:[#allocation2 + $0x69] sm:$0xff] %vm380_vm1, %v5022_v60  ;;  %v5021_v13 = vadd.f32 %v4989_v63, %v4863_v35  ;;  %v4878_v45 = vadd.f32 %v8049_v56, %v7999_v58  ;;  %v4644_v53 = vpop.f32.mrf.mxu0  ;;  %v5001_v58 = vld [vmem:[#allocation2 + $0xf1] sm:$0xff] }
 0x2a9   : > { %v4872_v5 = vpop.f32.mrf.mxu1 }
 0x2aa   : > { %5053 = vst.msk [vmem:[#allocation2 + $0x61] sm:$0xff] %vm380_vm1, %v5021_v13  ;;  %v5024_v22 = vadd.f32 %v4992_v27, %v4878_v45  ;;  %v4873_v61 = vadd.f32 %v4872_v5, %v4644_v53  ;;  %v8002_v44 = vpop.f32.mrf.mxu0  ;;  %v5004_v53 = vld [vmem:[#allocation2 + $0x111] sm:$0xff] }
 0x2ab   : > { %v8052_v18 = vpop.f32.mrf.mxu1 }
 0x2ac   : > { %5056 = vst.msk [vmem:[#allocation2 + $0x81] sm:$0xff] %vm380_vm1, %v5024_v22  ;;  %v5023_v49 = vadd.f32 %v4991_v46, %v4873_v61  ;;  %v4888_v7 = vadd.f32 %v8052_v18, %v8002_v44  ;;  %v4654_v25 = vpop.f32.mrf.mxu0  ;;  %v5003_v44 = vld [vmem:[#allocation2 + $0x109] sm:$0xff] }
 0x2ad   : > { %v4882_v36 = vpop.f32.mrf.mxu1 }
 0x2ae   : > { %5055 = vst.msk [vmem:[#allocation2 + $0x79] sm:$0xff] %vm380_vm1, %v5023_v49  ;;  %v5026_v0 = vadd.f32 %v4994_v2, %v4888_v7  ;;  %v4883_v11 = vadd.f32 %v4882_v36, %v4654_v25  ;;  %v8005_v14 = vpop.f32.mrf.mxu0  ;;  %v5006_v25 = vld [vmem:[#allocation2 + $0x129] sm:$0xff] }
 0x2af   : > { %v8055_v55 = vpop.f32.mrf.mxu1 }
 0x2b0   : > { %5058 = vst.msk [vmem:[#allocation2 + $0x99] sm:$0xff] %vm380_vm1, %v5026_v0  ;;  %v5025_v16 = vadd.f32 %v4993_v30, %v4883_v11  ;;  %v4898_v24 = vadd.f32 %v8055_v55, %v8005_v14  ;;  %v4664_v52 = vpop.f32.mrf.mxu0  ;;  %v5005_v14 = vld [vmem:[#allocation2 + $0x121] sm:$0xff] }
 0x2b1   : > { %v4892_v42 = vpop.f32.mrf.mxu1 }
 0x2b2   : > { %5057 = vst.msk [vmem:[#allocation2 + $0x91] sm:$0xff] %vm380_vm1, %v5025_v16  ;;  %v5028_v40 = vadd.f32 %v4996_v57, %v4898_v24  ;;  %v4893_v23 = vadd.f32 %v4892_v42, %v4664_v52  ;;  %v8008_v50 = vpop.f32.mrf.mxu0  ;;  %v5008_v52 = vld [vmem:[#allocation2 + $0x141] sm:$0xff] }
 0x2b3   : > { %v8058_v21 = vpop.f32.mrf.mxu1 }
 0x2b4   : > { %5060 = vst.msk [vmem:[#allocation2 + $0xb1] sm:$0xff] %vm380_vm1, %v5028_v40  ;;  %v5027_v1 = vadd.f32 %v4995_v9, %v4893_v23  ;;  %v4908_v41 = vadd.f32 %v8058_v21, %v8008_v50  ;;  %v4674_v39 = vpop.f32.mrf.mxu0  ;;  %v5007_v50 = vld [vmem:[#allocation2 + $0x139] sm:$0xff] }
 0x2b5   : > { %v4902_v8 = vpop.f32.mrf.mxu1 }
 0x2b6   : > { %5059 = vst.msk [vmem:[#allocation2 + $0xa9] sm:$0xff] %vm380_vm1, %v5027_v1  ;;  %v5030_v54 = vadd.f32 %v4998_v34, %v4908_v41  ;;  %v4903_v62 = vadd.f32 %v4902_v8, %v4674_v39  ;;  %v8011_v19 = vpop.f32.mrf.mxu0  ;;  %v5010_v39 = vld [vmem:[#allocation2 + $0x159] sm:$0xff] }
 0x2b7   : > { %v8061_v29 = vpop.f32.mrf.mxu1 }
 0x2b8   : > { %5062 = vst.msk [vmem:[#allocation2 + $0xc9] sm:$0xff] %vm380_vm1, %v5030_v54  ;;  %v5029_v26 = vadd.f32 %v4997_v31, %v4903_v62  ;;  %v4918_v47 = vadd.f32 %v8061_v29, %v8011_v19  ;;  %v4684_v3 = vpop.f32.mrf.mxu0  ;;  %v5009_v19 = vld [vmem:[#allocation2 + $0x151] sm:$0xff] }
 0x2b9   : > { %v4912_v20 = vpop.f32.mrf.mxu1 }
 0x2ba   : > { %5061 = vst.msk [vmem:[#allocation2 + $0xc1] sm:$0xff] %vm380_vm1, %v5029_v26  ;;  %v5032_v4 = vadd.f32 %v5000_v32, %v4918_v47  ;;  %v4913_v59 = vadd.f32 %v4912_v20, %v4684_v3  ;;  %v8014_v17 = vpop.f32.mrf.mxu0  ;;  %v5012_v3 = vld [vmem:[#allocation2 + $0x171] sm:$0xff] }
 0x2bb   : > { %v8064_v6 = vpop.f32.mrf.mxu1 }
 0x2bc   : > { %5064 = vst.msk [vmem:[#allocation2 + $0xe1] sm:$0xff] %vm380_vm1, %v5032_v4  ;;  %v5031_v12 = vadd.f32 %v4999_v37, %v4913_v59  ;;  %v4928_v15 = vadd.f32 %v8064_v6, %v8014_v17  ;;  %v4694_v38 = vpop.f32.mrf.mxu0  ;;  %v5011_v17 = vld [vmem:[#allocation2 + $0x169] sm:$0xff] }
 0x2bd   : > { %v4922_v10 = vpop.f32.mrf.mxu1 }
 0x2be   : > { %5063 = vst.msk [vmem:[#allocation2 + $0xd9] sm:$0xff] %vm380_vm1, %v5031_v12  ;;  %v5034_v28 = vadd.f32 %v5002_v51, %v4928_v15  ;;  %v4923_v60 = vadd.f32 %v4922_v10, %v4694_v38  ;;  %v8017_v35 = vpop.f32.mrf.mxu0  ;;  %v5538_v38 = vld [vmem:[#allocation2 + $0x8] sm:$0xff] }
 0x2bf   : > { %v8067_v63 = vpop.f32.mrf.mxu1 }
 0x2c0   : > { %5066 = vst.msk [vmem:[#allocation2 + $0xf9] sm:$0xff] %vm380_vm1, %v5034_v28  ;;  %v5033_v56 = vadd.f32 %v5001_v58, %v4923_v60  ;;  %v4938_v13 = vadd.f32 %v8067_v63, %v8017_v35  ;;  %v4704_v45 = vpop.f32.mrf.mxu0  ;;  %v5537_v35 = vld [vmem:[#allocation2] sm:$0xff] }
 0x2c1   : > { %v4932_v27 = vpop.f32.mrf.mxu1 }
 0x2c2   : > { %5065 = vst.msk [vmem:[#allocation2 + $0xf1] sm:$0xff] %vm380_vm1, %v5033_v56  ;;  %v5036_v5 = vadd.f32 %v5004_v53, %v4938_v13  ;;  %v4933_v22 = vadd.f32 %v4932_v27, %v4704_v45  ;;  %v8020_v61 = vpop.f32.mrf.mxu0  ;;  %v5540_v45 = vld [vmem:[#allocation2 + $0x20] sm:$0xff] }
 0x2c3   : > { %v8070_v46 = vpop.f32.mrf.mxu1 }
 0x2c4   : > { %5068 = vst.msk [vmem:[#allocation2 + $0x111] sm:$0xff] %vm380_vm1, %v5036_v5  ;;  %v5035_v18 = vadd.f32 %v5003_v44, %v4933_v22  ;;  %v4948_v49 = vadd.f32 %v8070_v46, %v8020_v61  ;;  %v4714_v7 = vpop.f32.mrf.mxu0  ;;  %v5539_v61 = vld [vmem:[#allocation2 + $0x18] sm:$0xff] }
 0x2c5   : > { %v4942_v2 = vpop.f32.mrf.mxu1 }
 0x2c6   : > { %5067 = vst.msk [vmem:[#allocation2 + $0x109] sm:$0xff] %vm380_vm1, %v5035_v18  ;;  %v5038_v36 = vadd.f32 %v5006_v25, %v4948_v49  ;;  %v4943_v0 = vadd.f32 %v4942_v2, %v4714_v7  ;;  %v8023_v11 = vpop.f32.mrf.mxu0  ;;  %v5542_v7 = vld [vmem:[#allocation2 + $0x38] sm:$0xff] }
 0x2c7   : > { %v8073_v30 = vpop.f32.mrf.mxu1 }
 0x2c8   : > { %5070 = vst.msk [vmem:[#allocation2 + $0x129] sm:$0xff] %vm380_vm1, %v5038_v36  ;;  %v5037_v55 = vadd.f32 %v5005_v14, %v4943_v0  ;;  %v4958_v16 = vadd.f32 %v8073_v30, %v8023_v11  ;;  %v4724_v24 = vpop.f32.mrf.mxu0  ;;  %v5541_v11 = vld [vmem:[#allocation2 + $0x30] sm:$0xff] }
 0x2c9   : > { %v4952_v57 = vpop.f32.mrf.mxu1 }
 0x2ca   : > { %5069 = vst.msk [vmem:[#allocation2 + $0x121] sm:$0xff] %vm380_vm1, %v5037_v55  ;;  %v5040_v42 = vadd.f32 %v5008_v52, %v4958_v16  ;;  %v4953_v40 = vadd.f32 %v4952_v57, %v4724_v24  ;;  %v8026_v23 = vpop.f32.mrf.mxu0  ;;  %v5544_v24 = vld [vmem:[#allocation2 + $0x50] sm:$0xff] }
 0x2cb   : > { %v8076_v9 = vpop.f32.mrf.mxu1 }
 0x2cc   : > { %5072 = vst.msk [vmem:[#allocation2 + $0x141] sm:$0xff] %vm380_vm1, %v5040_v42  ;;  %v5039_v21 = vadd.f32 %v5007_v50, %v4953_v40  ;;  %v4968_v1 = vadd.f32 %v8076_v9, %v8026_v23  ;;  %v4734_v41 = vpop.f32.mrf.mxu0  ;;  %v5543_v50 = vld [vmem:[#allocation2 + $0x48] sm:$0xff] }
 0x2cd   : > { %v4962_v34 = vpop.f32.mrf.mxu1 }
 0x2ce   : > { %5071 = vst.msk [vmem:[#allocation2 + $0x139] sm:$0xff] %vm380_vm1, %v5039_v21  ;;  %v5042_v8 = vadd.f32 %v5010_v39, %v4968_v1  ;;  %v4963_v54 = vadd.f32 %v4962_v34, %v4734_v41  ;;  %v8029_v62 = vpop.f32.mrf.mxu0 }
 0x2cf   : > { %v8079_v31 = vpop.f32.mrf.mxu1 }
 0x2d0   : > { %5074 = vst.msk [vmem:[#allocation2 + $0x159] sm:$0xff] %vm380_vm1, %v5042_v8  ;;  %v5041_v29 = vadd.f32 %v5009_v19, %v4963_v54  ;;  %v4978_v26 = vadd.f32 %v8079_v31, %v8029_v62  ;;  %v4744_v47 = vpop.f32.mrf.mxu0  ;;  %v5546_v8 = vld [vmem:[#allocation2 + $0x68] sm:$0xff] }
 0x2d1   : > { %v4972_v32 = vpop.f32.mrf.mxu1 }
 0x2d2   : > { %5073 = vst.msk [vmem:[#allocation2 + $0x151] sm:$0xff] %vm380_vm1, %v5041_v29  ;;  %v5044_v20 = vadd.f32 %v5012_v3, %v4978_v26  ;;  %v4973_v4 = vadd.f32 %v4972_v32, %v4744_v47  ;;  %v8084_v59 = vpop.f32.mrf.mxu0  ;;  %v5545_v47 = vld [vmem:[#allocation2 + $0x60] sm:$0xff] }
 0x2d3   : > { %v8134_v37 = vpop.f32.mrf.mxu1 }
 0x2d4   : > { %5076 = vst.msk [vmem:[#allocation2 + $0x171] sm:$0xff] %vm380_vm1, %v5044_v20  ;;  %v5043_v6 = vadd.f32 %v5011_v17, %v4973_v4  ;;  %v5384_v12 = vadd.f32 %v8134_v37, %v8084_v59  ;;  %v5150_v15 = vpop.f32.mrf.mxu0 }
 0x2d5   : > { %v5378_v51 = vpop.f32.mrf.mxu1 }
 0x2d6   : > { %5075 = vst.msk [vmem:[#allocation2 + $0x169] sm:$0xff] %vm380_vm1, %v5043_v6  ;;  %v5570_v10 = vadd.f32 %v5538_v38, %v5384_v12  ;;  %v5379_v28 = vadd.f32 %v5378_v51, %v5150_v15  ;;  %v8087_v60 = vpop.f32.mrf.mxu0  ;;  %v5548_v6 = vld [vmem:[#allocation2 + $0x80] sm:$0xff] }
 0x2d7   : > { %v8137_v58 = vpop.f32.mrf.mxu1 }
 0x2d8   : > { %5602 = vst.msk [vmem:[#allocation2 + $0x8] sm:$0xff] %vm380_vm1, %v5570_v10  ;;  %v5569_v63 = vadd.f32 %v5537_v35, %v5379_v28  ;;  %v5394_v56 = vadd.f32 %v8137_v58, %v8087_v60  ;;  %v5160_v13 = vpop.f32.mrf.mxu0  ;;  %v5547_v58 = vld [vmem:[#allocation2 + $0x78] sm:$0xff] }
 0x2d9   : > { %v5388_v53 = vpop.f32.mrf.mxu1 }
 0x2da   : > { %5601 = vst.msk [vmem:[#allocation2] sm:$0xff] %vm380_vm1, %v5569_v63  ;;  %v5572_v27 = vadd.f32 %v5540_v45, %v5394_v56  ;;  %v5389_v5 = vadd.f32 %v5388_v53, %v5160_v13  ;;  %v8090_v22 = vpop.f32.mrf.mxu0 }
 0x2db   : > { %v8140_v44 = vpop.f32.mrf.mxu1 }
 0x2dc   : > { %5604 = vst.msk [vmem:[#allocation2 + $0x20] sm:$0xff] %vm380_vm1, %v5572_v27  ;;  %v5571_v46 = vadd.f32 %v5539_v61, %v5389_v5  ;;  %v5404_v18 = vadd.f32 %v8140_v44, %v8090_v22  ;;  %v5170_v49 = vpop.f32.mrf.mxu0  ;;  %v5550_v61 = vld [vmem:[#allocation2 + $0x98] sm:$0xff] }
 0x2dd   : > { %v5398_v25 = vpop.f32.mrf.mxu1 }
 0x2de   : > { %5603 = vst.msk [vmem:[#allocation2 + $0x18] sm:$0xff] %vm380_vm1, %v5571_v46  ;;  %v5574_v2 = vadd.f32 %v5542_v7, %v5404_v18  ;;  %v5399_v36 = vadd.f32 %v5398_v25, %v5170_v49  ;;  %v8093_v0 = vpop.f32.mrf.mxu0 }
 0x2df   : > { %v8143_v14 = vpop.f32.mrf.mxu1 }
 0x2e0   : > { %5606 = vst.msk [vmem:[#allocation2 + $0x38] sm:$0xff] %vm380_vm1, %v5574_v2  ;;  %v5573_v30 = vadd.f32 %v5541_v11, %v5399_v36  ;;  %v5414_v55 = vadd.f32 %v8143_v14, %v8093_v0  ;;  %v5180_v16 = vpop.f32.mrf.mxu0  ;;  %v5549_v0 = vld [vmem:[#allocation2 + $0x90] sm:$0xff] }
 0x2e1   : > { %v5408_v52 = vpop.f32.mrf.mxu1 }
 0x2e2   : > { %5605 = vst.msk [vmem:[#allocation2 + $0x30] sm:$0xff] %vm380_vm1, %v5573_v30  ;;  %v5576_v57 = vadd.f32 %v5544_v24, %v5414_v55  ;;  %v5409_v42 = vadd.f32 %v5408_v52, %v5180_v16  ;;  %v8096_v40 = vpop.f32.mrf.mxu0 }
 0x2e3   : > { %v5634_v23 = vld [vmem:[#allocation2 + $0x21] sm:$0xff]  ;;  %v8146_v9 = vpop.f32.mrf.mxu1 }
 0x2e4   : > { %v10669_v21 = vadd.f32 %v10579_v48, %v5634_v23  ;;  %5608 = vst.msk [vmem:[#allocation2 + $0x50] sm:$0xff] %vm380_vm1, %v5576_v57  ;;  %v5575_v1 = vadd.f32 %v5543_v50, %v5409_v42  ;;  %v5424_v41 = vadd.f32 %v8146_v9, %v8096_v40  ;;  %v5190_v39 = vpop.f32.mrf.mxu0  ;;  %v5552_v42 = vld [vmem:[#allocation2 + $0xb0] sm:$0xff] }
 0x2e5   : > { %v5633_v34 = vld [vmem:[#allocation2 + $0x19] sm:$0xff]  ;;  %v5418_v54 = vpop.f32.mrf.mxu1 }
 0x2e6   : > { %5705 = vst.msk [vmem:[%s10586_s9 + $0x8] sm:$0xff] %vm380_vm1, %v10669_v21  ;;  %v10676_v62 = vadd.f32 %v10579_v48, %v5633_v34  ;;  %5607 = vst.msk [vmem:[#allocation2 + $0x48] sm:$0xff] %vm380_vm1, %v5575_v1  ;;  %v5578_v19 = vadd.f32 %v5546_v8, %v5424_v41  ;;  %v5419_v31 = vadd.f32 %v5418_v54, %v5190_v39  ;;  %v8099_v29 = vpop.f32.mrf.mxu0  ;;  %v5737_v15 = vsel %vm380_vm1, %v10669_v21, 0.0  ;;  %v5551_v8 = vld [vmem:[#allocation2 + $0xa8] sm:$0xff] }
 0x2e7   : > { %v5636_v26 = vld [vmem:[#allocation2 + $0x39] sm:$0xff]  ;;  %v8149_v3 = vpop.f32.mrf.mxu1 }
 0x2e8   : > { %5704 = vst.msk [vmem:[%s10586_s9] sm:$0xff] %vm380_vm1, %v10676_v62  ;;  %v5736_v32 = vsel %vm380_vm1, %v10676_v62, 0.0  ;;  %v10685_v20 = vadd.f32 %v10579_v48, %v5636_v26  ;;  %5610 = vst.msk [vmem:[#allocation2 + $0x68] sm:$0xff] %vm380_vm1, %v5578_v19  ;;  %v5577_v4 = vadd.f32 %v5545_v47, %v5419_v31  ;;  %v5434_v59 = vadd.f32 %v8149_v3, %v8099_v29  ;;  %v5200_v17 = vpop.f32.mrf.mxu0 }
 0x2e9   : > { %v5635_v37 = vld [vmem:[#allocation2 + $0x31] sm:$0xff]  ;;  %v5428_v12 = vpop.f32.mrf.mxu1  ;;  %v5738_v60 = vadd.f32 %v5737_v15, %v5736_v32 }
 0x2ea   : > { %5707 = vst.msk [vmem:[%s10586_s9 + $0x18] sm:$0xff] %vm380_vm1, %v10685_v20  ;;  %v10694_v38 = vadd.f32 %v10579_v48, %v5635_v37  ;;  %5609 = vst.msk [vmem:[#allocation2 + $0x60] sm:$0xff] %vm380_vm1, %v5577_v4  ;;  %v5580_v51 = vadd.f32 %v5548_v6, %v5434_v59  ;;  %v5429_v10 = vadd.f32 %v5428_v12, %v5200_v17  ;;  %v8102_v28 = vpop.f32.mrf.mxu0  ;;  %v5741_v46 = vsel %vm380_vm1, %v10685_v20, 0.0  ;;  %v5554_v4 = vld [vmem:[#allocation2 + $0xc8] sm:$0xff] }
 0x2eb   : > { %v5638_v35 = vld [vmem:[#allocation2 + $0x51] sm:$0xff]  ;;  %v8152_v63 = vpop.f32.mrf.mxu1 }
 0x2ec   : > { %5706 = vst.msk [vmem:[%s10586_s9 + $0x10] sm:$0xff] %vm380_vm1, %v10694_v38  ;;  %v5739_v56 = vsel %vm380_vm1, %v10694_v38, 0.0  ;;  %v10703_v13 = vadd.f32 %v10579_v48, %v5638_v35  ;;  %5612 = vst.msk [vmem:[#allocation2 + $0x80] sm:$0xff] %vm380_vm1, %v5580_v51  ;;  %v5579_v45 = vadd.f32 %v5547_v58, %v5429_v10  ;;  %v5444_v53 = vadd.f32 %v8152_v63, %v8102_v28  ;;  %v5210_v27 = vpop.f32.mrf.mxu0  ;;  %v5553_v28 = vld [vmem:[#allocation2 + $0xc0] sm:$0xff] }
 0x2ed   : > { %v5740_v5 = vadd.f32 %v5739_v56, %v5738_v60  ;;  %v5637_v22 = vld [vmem:[#allocation2 + $0x49] sm:$0xff]  ;;  %v5438_v44 = vpop.f32.mrf.mxu1 }
 0x2ee   : > { %5709 = vst.msk [vmem:[%s10586_s9 + $0x28] sm:$0xff] %vm380_vm1, %v10703_v13  ;;  %v10712_v18 = vadd.f32 %v10579_v48, %v5637_v22  ;;  %5611 = vst.msk [vmem:[#allocation2 + $0x78] sm:$0xff] %vm380_vm1, %v5579_v45  ;;  %v5582_v49 = vadd.f32 %v5550_v61, %v5444_v53  ;;  %v5439_v7 = vadd.f32 %v5438_v44, %v5210_v27  ;;  %v8105_v25 = vpop.f32.mrf.mxu0  ;;  %v5745_v23 = vsel %vm380_vm1, %v10703_v13, 0.0 }
 0x2ef   : > { %v5742_v2 = vadd.f32 %v5741_v46, %v5740_v5  ;;  %v5640_v36 = vld [vmem:[#allocation2 + $0x69] sm:$0xff]  ;;  %v8155_v11 = vpop.f32.mrf.mxu1  ;;  %v5556_v5 = vld [vmem:[#allocation2 + $0xe0] sm:$0xff] }
 0x2f0   : > { %5708 = vst.msk [vmem:[%s10586_s9 + $0x20] sm:$0xff] %vm380_vm1, %v10712_v18  ;;  %v5743_v14 = vsel %vm380_vm1, %v10712_v18, 0.0  ;;  %v10721_v30 = vadd.f32 %v10579_v48, %v5640_v36  ;;  %5614 = vst.msk [vmem:[#allocation2 + $0x98] sm:$0xff] %vm380_vm1, %v5582_v49  ;;  %v5581_v55 = vadd.f32 %v5549_v0, %v5439_v7  ;;  %v5454_v16 = vadd.f32 %v8155_v11, %v8105_v25  ;;  %v5220_v24 = vpop.f32.mrf.mxu0  ;;  %v5555_v36 = vld [vmem:[#allocation2 + $0xd8] sm:$0xff] }
 0x2f1   : > { %v5744_v52 = vadd.f32 %v5743_v14, %v5742_v2  ;;  %v5639_v57 = vld [vmem:[#allocation2 + $0x61] sm:$0xff]  ;;  %v5448_v40 = vpop.f32.mrf.mxu1 }
 0x2f2   : > { %5711 = vst.msk [vmem:[%s10586_s9 + $0x38] sm:$0xff] %vm380_vm1, %v10721_v30  ;;  %v10730_v50 = vadd.f32 %v10579_v48, %v5639_v57  ;;  %5613 = vst.msk [vmem:[#allocation2 + $0x90] sm:$0xff] %vm380_vm1, %v5581_v55  ;;  %v5584_v9 = vadd.f32 %v5552_v42, %v5454_v16  ;;  %v5449_v1 = vadd.f32 %v5448_v40, %v5220_v24  ;;  %v8108_v41 = vpop.f32.mrf.mxu0  ;;  %v5749_v17 = vsel %vm380_vm1, %v10721_v30, 0.0  ;;  %v5558_v42 = vld [vmem:[#allocation2 + $0xf8] sm:$0xff] }
 0x2f3   : > { %v5746_v39 = vadd.f32 %v5745_v23, %v5744_v52  ;;  %v5642_v34 = vld [vmem:[#allocation2 + $0x81] sm:$0xff]  ;;  %v8158_v54 = vpop.f32.mrf.mxu1 }
 0x2f4   : > { %5710 = vst.msk [vmem:[%s10586_s9 + $0x30] sm:$0xff] %vm380_vm1, %v10730_v50  ;;  %v5747_v19 = vsel %vm380_vm1, %v10730_v50, 0.0  ;;  %v10739_v31 = vadd.f32 %v10579_v48, %v5642_v34  ;;  %5616 = vst.msk [vmem:[#allocation2 + $0xb0] sm:$0xff] %vm380_vm1, %v5584_v9  ;;  %v5583_v29 = vadd.f32 %v5551_v8, %v5449_v1  ;;  %v5464_v26 = vadd.f32 %v8158_v54, %v8108_v41  ;;  %v5230_v47 = vpop.f32.mrf.mxu0  ;;  %v10750_v48 = vld [vmem:[%s11058_s4] ss:$0 sm:$0xff]  ;;  %v5557_v54 = vld [vmem:[#allocation2 + $0xf0] sm:$0xff] }
 0x2f5   : > { %v5748_v3 = vadd.f32 %v5747_v19, %v5746_v39  ;;  %v5641_v32 = vld [vmem:[#allocation2 + $0x79] sm:$0xff]  ;;  %v5458_v59 = vpop.f32.mrf.mxu1 }
 0x2f6   : > { %5713 = vst.msk [vmem:[%s10586_s9 + $0x48] sm:$0xff] %vm380_vm1, %v10739_v31  ;;  %v10753_v37 = vadd.f32 %v10750_v48, %v5641_v32  ;;  %5615 = vst.msk [vmem:[#allocation2 + $0xa8] sm:$0xff] %vm380_vm1, %v5583_v29  ;;  %v5586_v6 = vadd.f32 %v5554_v4, %v5464_v26  ;;  %v5459_v12 = vadd.f32 %v5458_v59, %v5230_v47  ;;  %v8111_v15 = vpop.f32.mrf.mxu0  ;;  %v5753_v61 = vsel %vm380_vm1, %v10739_v31, 0.0 }
 0x2f7   : > { %v5750_v51 = vadd.f32 %v5749_v17, %v5748_v3  ;;  %v5644_v10 = vld [vmem:[#allocation2 + $0x99] sm:$0xff]  ;;  %v8161_v60 = vpop.f32.mrf.mxu1  ;;  %v5560_v17 = vld [vmem:[#allocation2 + $0x110] sm:$0xff] }
 0x2f8   : > { %5712 = vst.msk [vmem:[%s10586_s9 + $0x40] sm:$0xff] %vm380_vm1, %v10753_v37  ;;  %v5751_v35 = vsel %vm380_vm1, %v10753_v37, 0.0  ;;  %v10762_v58 = vadd.f32 %v10750_v48, %v5644_v10  ;;  %5618 = vst.msk [vmem:[#allocation2 + $0xc8] sm:$0xff] %vm380_vm1, %v5586_v6  ;;  %v5585_v63 = vadd.f32 %v5553_v28, %v5459_v12  ;;  %v5474_v56 = vadd.f32 %v8161_v60, %v8111_v15  ;;  %v5240_v45 = vpop.f32.mrf.mxu0 }
 0x2f9   : > { %v5752_v53 = vadd.f32 %v5751_v35, %v5750_v51  ;;  %v5643_v27 = vld [vmem:[#allocation2 + $0x91] sm:$0xff]  ;;  %v5468_v22 = vpop.f32.mrf.mxu1 }
 0x2fa   : > { %5715 = vst.msk [vmem:[%s10586_s9 + $0x58] sm:$0xff] %vm380_vm1, %v10762_v58  ;;  %v10771_v44 = vadd.f32 %v10750_v48, %v5643_v27  ;;  %5617 = vst.msk [vmem:[#allocation2 + $0xc0] sm:$0xff] %vm380_vm1, %v5585_v63  ;;  %v5588_v46 = vadd.f32 %v5556_v5, %v5474_v56  ;;  %v5469_v49 = vadd.f32 %v5468_v22, %v5240_v45  ;;  %v8114_v7 = vpop.f32.mrf.mxu0  ;;  %v5757_v23 = vsel %vm380_vm1, %v10762_v58, 0.0  ;;  %v5559_v63 = vld [vmem:[#allocation2 + $0x108] sm:$0xff] }
 0x2fb   : > { %v5754_v25 = vadd.f32 %v5753_v61, %v5752_v53  ;;  %v5646_v2 = vld [vmem:[#allocation2 + $0xb1] sm:$0xff]  ;;  %v8164_v0 = vpop.f32.mrf.mxu1 }
 0x2fc   : > { %5714 = vst.msk [vmem:[%s10586_s9 + $0x50] sm:$0xff] %vm380_vm1, %v10771_v44  ;;  %v5755_v11 = vsel %vm380_vm1, %v10771_v44, 0.0  ;;  %v10780_v14 = vadd.f32 %v10750_v48, %v5646_v2  ;;  %5620 = vst.msk [vmem:[#allocation2 + $0xe0] sm:$0xff] %vm380_vm1, %v5588_v46  ;;  %v5587_v55 = vadd.f32 %v5555_v36, %v5469_v49  ;;  %v5484_v16 = vadd.f32 %v8164_v0, %v8114_v7  ;;  %v5250_v24 = vpop.f32.mrf.mxu0  ;;  %v5562_v49 = vld [vmem:[#allocation2 + $0x128] sm:$0xff] }
 0x2fd   : > { %v5756_v52 = vadd.f32 %v5755_v11, %v5754_v25  ;;  %v5645_v57 = vld [vmem:[#allocation2 + $0xa9] sm:$0xff]  ;;  %v5478_v40 = vpop.f32.mrf.mxu1 }
 0x2fe   : > { %5717 = vst.msk [vmem:[%s10586_s9 + $0x68] sm:$0xff] %vm380_vm1, %v10780_v14  ;;  %v10789_v9 = vadd.f32 %v10750_v48, %v5645_v57  ;;  %5619 = vst.msk [vmem:[#allocation2 + $0xd8] sm:$0xff] %vm380_vm1, %v5587_v55  ;;  %v5590_v1 = vadd.f32 %v5558_v42, %v5484_v16  ;;  %v5479_v41 = vadd.f32 %v5478_v40, %v5250_v24  ;;  %v8117_v39 = vpop.f32.mrf.mxu0  ;;  %v5761_v12 = vsel %vm380_vm1, %v10780_v14, 0.0  ;;  %v5561_v24 = vld [vmem:[#allocation2 + $0x120] sm:$0xff] }
 0x2ff   : > { %v5758_v34 = vadd.f32 %v5757_v23, %v5756_v52  ;;  %v5648_v8 = vld [vmem:[#allocation2 + $0xc9] sm:$0xff]  ;;  %v8167_v19 = vpop.f32.mrf.mxu1 }
 0x300   : > { %5716 = vst.msk [vmem:[%s10586_s9 + $0x60] sm:$0xff] %vm380_vm1, %v10789_v9  ;;  %v5759_v29 = vsel %vm380_vm1, %v10789_v9, 0.0  ;;  %v10798_v26 = vadd.f32 %v10750_v48, %v5648_v8  ;;  %5622 = vst.msk [vmem:[#allocation2 + $0xf8] sm:$0xff] %vm380_vm1, %v5590_v1  ;;  %v5589_v47 = vadd.f32 %v5557_v54, %v5479_v41  ;;  %v5494_v3 = vadd.f32 %v8167_v19, %v8117_v39  ;;  %v5260_v32 = vpop.f32.mrf.mxu0 }
 0x301   : > { %v5760_v4 = vadd.f32 %v5759_v29, %v5758_v34  ;;  %v5647_v59 = vld [vmem:[#allocation2 + $0xc1] sm:$0xff]  ;;  %v5488_v6 = vpop.f32.mrf.mxu1 }
 0x302   : > { %5719 = vst.msk [vmem:[%s10586_s9 + $0x78] sm:$0xff] %vm380_vm1, %v10798_v26  ;;  %v10807_v15 = vadd.f32 %v10750_v48, %v5647_v59  ;;  %5621 = vst.msk [vmem:[#allocation2 + $0xf0] sm:$0xff] %vm380_vm1, %v5589_v47  ;;  %v5592_v51 = vadd.f32 %v5560_v17, %v5494_v3  ;;  %v5489_v10 = vadd.f32 %v5488_v6, %v5260_v32  ;;  %v8120_v28 = vpop.f32.mrf.mxu0  ;;  %v5765_v25 = vsel %vm380_vm1, %v10798_v26, 0.0  ;;  %v5564_v34 = vld [vmem:[#allocation2 + $0x140] sm:$0xff]  ;;  %v5563_v59 = vld [vmem:[#allocation2 + $0x138] sm:$0xff] }
 0x303   : > { %v5762_v60 = vadd.f32 %v5761_v12, %v5760_v4  ;;  %v5650_v35 = vld [vmem:[#allocation2 + $0xe1] sm:$0xff]  ;;  %v8170_v56 = vpop.f32.mrf.mxu1 }
 0x304   : > { %5718 = vst.msk [vmem:[%s10586_s9 + $0x70] sm:$0xff] %vm380_vm1, %v10807_v15  ;;  %v5763_v45 = vsel %vm380_vm1, %v10807_v15, 0.0  ;;  %v10816_v53 = vadd.f32 %v10750_v48, %v5650_v35  ;;  %5624 = vst.msk [vmem:[#allocation2 + $0x110] sm:$0xff] %vm380_vm1, %v5592_v51  ;;  %v5591_v27 = vadd.f32 %v5559_v63, %v5489_v10  ;;  %v5504_v5 = vadd.f32 %v8170_v56, %v8120_v28  ;;  %v5270_v22 = vpop.f32.mrf.mxu0  ;;  %v5566_v63 = vld [vmem:[#allocation2 + $0x158] sm:$0xff] }
 0x305   : > { %v5764_v61 = vadd.f32 %v5763_v45, %v5762_v60  ;;  %v5649_v46 = vld [vmem:[#allocation2 + $0xd9] sm:$0xff]  ;;  %v5498_v7 = vpop.f32.mrf.mxu1 }
 0x306   : > { %5721 = vst.msk [vmem:[%s10586_s9 + $0x88] sm:$0xff] %vm380_vm1, %v10816_v53  ;;  %v10825_v2 = vadd.f32 %v10750_v48, %v5649_v46  ;;  %5623 = vst.msk [vmem:[#allocation2 + $0x108] sm:$0xff] %vm380_vm1, %v5591_v27  ;;  %v5594_v36 = vadd.f32 %v5562_v49, %v5504_v5  ;;  %v5499_v0 = vadd.f32 %v5498_v7, %v5270_v22  ;;  %v8123_v11 = vpop.f32.mrf.mxu0  ;;  %v5769_v54 = vsel %vm380_vm1, %v10816_v53, 0.0  ;;  %v5565_v7 = vld [vmem:[#allocation2 + $0x150] sm:$0xff] }
 0x307   : > { %v5766_v55 = vadd.f32 %v5765_v25, %v5764_v61  ;;  %v5652_v16 = vld [vmem:[#allocation2 + $0xf9] sm:$0xff]  ;;  %v8173_v52 = vpop.f32.mrf.mxu1 }
 0x308   : > { %5720 = vst.msk [vmem:[%s10586_s9 + $0x80] sm:$0xff] %vm380_vm1, %v10825_v2  ;;  %v5767_v57 = vsel %vm380_vm1, %v10825_v2, 0.0  ;;  %v10834_v42 = vadd.f32 %v10750_v48, %v5652_v16  ;;  %5626 = vst.msk [vmem:[#allocation2 + $0x128] sm:$0xff] %vm380_vm1, %v5594_v36  ;;  %v5593_v40 = vadd.f32 %v5561_v24, %v5499_v0  ;;  %v5514_v23 = vadd.f32 %v8173_v52, %v8123_v11  ;;  %v5280_v1 = vpop.f32.mrf.mxu0 }
 0x309   : > { %v5768_v41 = vadd.f32 %v5767_v57, %v5766_v55  ;;  %v5651_v39 = vld [vmem:[#allocation2 + $0xf1] sm:$0xff]  ;;  %v5508_v8 = vpop.f32.mrf.mxu1 }
 0x30a   : > { %5723 = vst.msk [vmem:[%s10586_s9 + $0x98] sm:$0xff] %vm380_vm1, %v10834_v42  ;;  %v10843_v19 = vadd.f32 %v10750_v48, %v5651_v39  ;;  %5625 = vst.msk [vmem:[#allocation2 + $0x120] sm:$0xff] %vm380_vm1, %v5593_v40  ;;  %v5596_v29 = vadd.f32 %v5564_v34, %v5514_v23  ;;  %v5509_v47 = vadd.f32 %v5508_v8, %v5280_v1  ;;  %v8126_v3 = vpop.f32.mrf.mxu0  ;;  %v5773_v45 = vsel %vm380_vm1, %v10834_v42, 0.0  ;;  %v5568_v57 = vld [vmem:[#allocation2 + $0x170] sm:$0xff] }
 0x30b   : > { %v5770_v32 = vadd.f32 %v5769_v54, %v5768_v41  ;;  %v5654_v4 = vld [vmem:[#allocation2 + $0x111] sm:$0xff]  ;;  %v8176_v17 = vpop.f32.mrf.mxu1  ;;  %v5567_v54 = vld [vmem:[#allocation2 + $0x168] sm:$0xff] }
 0x30c   : > { %5722 = vst.msk [vmem:[%s10586_s9 + $0x90] sm:$0xff] %vm380_vm1, %v10843_v19  ;;  %v5771_v6 = vsel %vm380_vm1, %v10843_v19, 0.0  ;;  %v10852_v12 = vadd.f32 %v10750_v48, %v5654_v4  ;;  %5628 = vst.msk [vmem:[#allocation2 + $0x140] sm:$0xff] %vm380_vm1, %v5596_v29  ;;  %v5595_v51 = vadd.f32 %v5563_v59, %v5509_v47  ;;  %v5524_v10 = vadd.f32 %v8176_v17, %v8126_v3  ;;  %v5290_v28 = vpop.f32.mrf.mxu0 }
 0x30d   : > { %v5772_v60 = vadd.f32 %v5771_v6, %v5770_v32  ;;  %v5653_v35 = vld [vmem:[#allocation2 + $0x109] sm:$0xff]  ;;  %v5518_v56 = vpop.f32.mrf.mxu1 }
 0x30e   : > { %5725 = vst.msk [vmem:[%s10586_s9 + $0xa8] sm:$0xff] %vm380_vm1, %v10852_v12  ;;  %v10861_v27 = vadd.f32 %v10750_v48, %v5653_v35  ;;  %5627 = vst.msk [vmem:[#allocation2 + $0x138] sm:$0xff] %vm380_vm1, %v5595_v51  ;;  %v5598_v5 = vadd.f32 %v5566_v63, %v5524_v10  ;;  %v5519_v22 = vadd.f32 %v5518_v56, %v5290_v28  ;;  %v8129_v61 = vpop.f32.mrf.mxu0  ;;  %v5777_v23 = vsel %vm380_vm1, %v10852_v12, 0.0 }
 0x30f   : > { %v5774_v46 = vadd.f32 %v5773_v45, %v5772_v60  ;;  %v5656_v49 = vld [vmem:[#allocation2 + $0x129] sm:$0xff]  ;;  %v8179_v25 = vpop.f32.mrf.mxu1 }
 0x310   : > { %5724 = vst.msk [vmem:[%s10586_s9 + $0xa0] sm:$0xff] %vm380_vm1, %v10861_v27  ;;  %v5775_v36 = vsel %vm380_vm1, %v10861_v27, 0.0  ;;  %v10870_v0 = vadd.f32 %v10750_v48, %v5656_v49  ;;  %5630 = vst.msk [vmem:[#allocation2 + $0x158] sm:$0xff] %vm380_vm1, %v5598_v5  ;;  %v5597_v11 = vadd.f32 %v5565_v7, %v5519_v22  ;;  %v5534_v55 = vadd.f32 %v8179_v25, %v8129_v61  ;;  %v5300_v16 = vpop.f32.mrf.mxu0 }
 0x311   : > { %v5776_v24 = vadd.f32 %v5775_v36, %v5774_v46  ;;  %v5655_v52 = vld [vmem:[#allocation2 + $0x121] sm:$0xff]  ;;  %v5528_v40 = vpop.f32.mrf.mxu1 }
 0x312   : > { %5727 = vst.msk [vmem:[%s10586_s9 + $0xb8] sm:$0xff] %vm380_vm1, %v10870_v0  ;;  %v10879_v1 = vadd.f32 %v10750_v48, %v5655_v52  ;;  %5629 = vst.msk [vmem:[#allocation2 + $0x150] sm:$0xff] %vm380_vm1, %v5597_v11  ;;  %v5600_v41 = vadd.f32 %v5568_v57, %v5534_v55  ;;  %v5529_v39 = vadd.f32 %v5528_v40, %v5300_v16  ;;  %v5781_v59 = vsel %vm380_vm1, %v10870_v0, 0.0 }
 0x313   : > { %v5778_v34 = vadd.f32 %v5777_v23, %v5776_v24  ;;  %v5658_v8 = vld [vmem:[#allocation2 + $0x141] sm:$0xff]  ;;  %v5795_v52 = vsel %vm380_vm1, %v10596_v43, 0.0 }
 0x314   : > { %5726 = vst.msk [vmem:[%s10586_s9 + $0xb0] sm:$0xff] %vm380_vm1, %v10879_v1  ;;  %v5779_v29 = vsel %vm380_vm1, %v10879_v1, 0.0  ;;  %v10888_v47 = vadd.f32 %v10750_v48, %v5658_v8  ;;  %5632 = vst.msk [vmem:[#allocation2 + $0x170] sm:$0xff] %vm380_vm1, %v5600_v41  ;;  %v5599_v3 = vadd.f32 %v5567_v54, %v5529_v39 }
 0x315   : > { %v5780_v32 = vadd.f32 %v5779_v29, %v5778_v34  ;;  %v5657_v4 = vld [vmem:[#allocation2 + $0x139] sm:$0xff] }
 0x316   : > { %5729 = vst.msk [vmem:[%s10586_s9 + $0xc8] sm:$0xff] %vm380_vm1, %v10888_v47  ;;  %v10897_v17 = vadd.f32 %v10750_v48, %v5657_v4  ;;  %5631 = vst.msk [vmem:[#allocation2 + $0x168] sm:$0xff] %vm380_vm1, %v5599_v3  ;;  %v5785_v63 = vsel %vm380_vm1, %v10888_v47, 0.0 }
 0x317   : > { %v5782_v6 = vadd.f32 %v5781_v59, %v5780_v32  ;;  %v5660_v51 = vld [vmem:[#allocation2 + $0x159] sm:$0xff] }
 0x318   : > { %5728 = vst.msk [vmem:[%s10586_s9 + $0xc0] sm:$0xff] %vm380_vm1, %v10897_v17  ;;  %v5783_v10 = vsel %vm380_vm1, %v10897_v17, 0.0  ;;  %v10906_v28 = vadd.f32 %v10750_v48, %v5660_v51 }
 0x319   : > { %v5784_v60 = vadd.f32 %v5783_v10, %v5782_v6  ;;  %v5659_v35 = vld [vmem:[#allocation2 + $0x151] sm:$0xff] }
 0x31a   : > { %5731 = vst.msk [vmem:[%s10586_s9 + $0xd8] sm:$0xff] %vm380_vm1, %v10906_v28  ;;  %v10914_v56 = vadd.f32 %v10750_v48, %v5659_v35  ;;  %v5789_v7 = vsel %vm380_vm1, %v10906_v28, 0.0 }
 0x31b   : > { %v5786_v45 = vadd.f32 %v5785_v63, %v5784_v60  ;;  %v5662_v5 = vld [vmem:[#allocation2 + $0x171] sm:$0xff] }
 0x31c   : > { %5730 = vst.msk [vmem:[%s10586_s9 + $0xd0] sm:$0xff] %vm380_vm1, %v10914_v56  ;;  %v5787_v22 = vsel %vm380_vm1, %v10914_v56, 0.0  ;;  %v10922_v61 = vadd.f32 %v10750_v48, %v5662_v5 }
 0x31d   : > { %v5788_v46 = vadd.f32 %v5787_v22, %v5786_v45  ;;  %v5661_v49 = vld [vmem:[#allocation2 + $0x169] sm:$0xff] }
 0x31e   : > { %5733 = vst.msk [vmem:[%s10586_s9 + $0xe8] sm:$0xff] %vm380_vm1, %v10922_v61  ;;  %v10930_v25 = vadd.f32 %v10750_v48, %v5661_v49  ;;  %v5793_v16 = vsel %vm380_vm1, %v10922_v61, 0.0  ;;  %v5797_v48 = vsel %vm380_vm1, %v10589_v33, 0.0 }
 0x31f   : > { %v5790_v36 = vadd.f32 %v5789_v7, %v5788_v46 }
 0x320   : > { %5732 = vst.msk [vmem:[%s10586_s9 + $0xe0] sm:$0xff] %vm380_vm1, %v10930_v25  ;;  %v5791_v11 = vsel %vm380_vm1, %v10930_v25, 0.0 }
 0x321   : > { %v5792_v55 = vadd.f32 %v5791_v11, %v5790_v36 }
 0x323   : > { %v5794_v24 = vadd.f32 %v5793_v16, %v5792_v55 }
 0x325   : > { %v5796_v57 = vadd.f32 %v5795_v52, %v5794_v24 }
 0x327   : > { %v5798_v40 = vadd.f32 %v5797_v48, %v5796_v57 }
 0x329   : > { %v5799_v23 = vrot.slane %v5798_v40, 4 }
 0x32b   : > { %v5800_v41 = vadd.f32 %v5799_v23, %v5798_v40 }
 0x32d   : > { %v5801_v39 = vrot.slane %v5800_v41, 2 }
 0x32f   : > { %v5802_v34 = vadd.f32 %v5801_v39, %v5800_v41 }
 0x331   : > { %v5803_v8 = vrot.slane %v5802_v34, 1 }
 0x333   : > { %v5804_v54 = vadd.f32 %v5803_v8, %v5802_v34 }
 0x335   : > { %5940 = vst.msk [vmem:[%s312_s15] sm:$0x1] %vm5939_vm3, %v5804_v54  ;;  %v10948_v29 = vmul.f32 0.00390625, %v5804_v54 }
 0x337   : > { %v5806_v3 = vsub.f32 %v10676_v62, %v10948_v29  ;;  %v5807_v32 = vsub.f32 %v10669_v21, %v10948_v29  ;;  %v5808_v4 = vsub.f32 %v10694_v38, %v10948_v29  ;;  %v5809_v59 = vsub.f32 %v10685_v20, %v10948_v29 }
 0x338   : > { %v5810_v10 = vsub.f32 %v10712_v18, %v10948_v29  ;;  %v5811_v35 = vsub.f32 %v10703_v13, %v10948_v29  ;;  %v5812_v38 = vsub.f32 %v10730_v50, %v10948_v29  ;;  %v5813_v18 = vsub.f32 %v10721_v30, %v10948_v29 }
 0x339   : > { %v5838_v6 = vmul.f32 %v5806_v3, %v5806_v3  ;;  %v5839_v51 = vmul.f32 %v5807_v32, %v5807_v32  ;;  %v5840_v60 = vmul.f32 %v5808_v4, %v5808_v4  ;;  %v5841_v63 = vmul.f32 %v5809_v59, %v5809_v59 }
 0x33a   : > { %v5842_v5 = vmul.f32 %v5810_v10, %v5810_v10  ;;  %v5843_v46 = vmul.f32 %v5811_v35, %v5811_v35  ;;  %v5814_v7 = vsub.f32 %v10753_v37, %v10948_v29  ;;  %v5844_v36 = vmul.f32 %v5812_v38, %v5812_v38 }
 0x33b   : > { %v5870_v62 = vsel %vm380_vm1, %v5838_v6, 0.0  ;;  %v5871_v21 = vsel %vm380_vm1, %v5839_v51, 0.0  ;;  %v5873_v20 = vsel %vm380_vm1, %v5840_v60, 0.0  ;;  %v5875_v49 = vsel %vm380_vm1, %v5841_v63, 0.0 }
 0x33c   : > { %v5872_v45 = vadd.f32 %v5871_v21, %v5870_v62  ;;  %v5877_v11 = vsel %vm380_vm1, %v5842_v5, 0.0  ;;  %v5815_v50 = vsub.f32 %v10739_v31, %v10948_v29  ;;  %v5845_v16 = vmul.f32 %v5813_v18, %v5813_v18 }
 0x33d   : > { %v5879_v24 = vsel %vm380_vm1, %v5843_v46, 0.0  ;;  %v5816_v30 = vsub.f32 %v10771_v44, %v10948_v29  ;;  %v5846_v57 = vmul.f32 %v5814_v7, %v5814_v7  ;;  %v5881_v48 = vsel %vm380_vm1, %v5844_v36, 0.0 }
 0x33e   : > { %v5874_v22 = vadd.f32 %v5873_v20, %v5872_v45  ;;  %v5817_v37 = vsub.f32 %v10762_v58, %v10948_v29  ;;  %v5847_v23 = vmul.f32 %v5815_v50, %v5815_v50  ;;  %v5883_v41 = vsel %vm380_vm1, %v5845_v16, 0.0 }
 0x33f   : > { %v5818_v31 = vsub.f32 %v10789_v9, %v10948_v29  ;;  %v5848_v34 = vmul.f32 %v5816_v30, %v5816_v30  ;;  %v5885_v8 = vsel %vm380_vm1, %v5846_v57, 0.0  ;;  %v5819_v44 = vsub.f32 %v10780_v14, %v10948_v29 }
 0x340   : > { %v5876_v13 = vadd.f32 %v5875_v49, %v5874_v22  ;;  %v5849_v3 = vmul.f32 %v5817_v37, %v5817_v37  ;;  %v5887_v32 = vsel %vm380_vm1, %v5847_v23, 0.0  ;;  %v5820_v58 = vsub.f32 %v10807_v15, %v10948_v29 }
 0x341   : > { %v5850_v59 = vmul.f32 %v5818_v31, %v5818_v31  ;;  %v5889_v6 = vsel %vm380_vm1, %v5848_v34, 0.0  ;;  %v5821_v9 = vsub.f32 %v10798_v26, %v10948_v29  ;;  %v5851_v10 = vmul.f32 %v5819_v44, %v5819_v44 }
 0x342   : > { %v5878_v55 = vadd.f32 %v5877_v11, %v5876_v13  ;;  %v5891_v60 = vsel %vm380_vm1, %v5849_v3, 0.0  ;;  %v5822_v14 = vsub.f32 %v10825_v2, %v10948_v29  ;;  %v5852_v63 = vmul.f32 %v5820_v58, %v5820_v58 }
 0x343   : > { %v5893_v62 = vsel %vm380_vm1, %v5850_v59, 0.0  ;;  %v5823_v15 = vsub.f32 %v10816_v53, %v10948_v29  ;;  %v5853_v45 = vmul.f32 %v5821_v9, %v5821_v9  ;;  %v5895_v38 = vsel %vm380_vm1, %v5851_v10, 0.0 }
 0x344   : > { %v5880_v52 = vadd.f32 %v5879_v24, %v5878_v55  ;;  %v5824_v26 = vsub.f32 %v10843_v19, %v10948_v29  ;;  %v5854_v20 = vmul.f32 %v5822_v14, %v5822_v14  ;;  %v5897_v22 = vsel %vm380_vm1, %v5852_v63, 0.0 }
 0x345   : > { %v5825_v2 = vsub.f32 %v10834_v42, %v10948_v29  ;;  %v5855_v46 = vmul.f32 %v5823_v15, %v5823_v15  ;;  %v5899_v49 = vsel %vm380_vm1, %v5853_v45, 0.0  ;;  %v5826_v53 = vsub.f32 %v10861_v27, %v10948_v29 }
 0x346   : > { %v5882_v40 = vadd.f32 %v5881_v48, %v5880_v52  ;;  %v5856_v7 = vmul.f32 %v5824_v26, %v5824_v26  ;;  %v5901_v36 = vsel %vm380_vm1, %v5854_v20, 0.0  ;;  %v5827_v19 = vsub.f32 %v10852_v12, %v10948_v29 }
 0x347   : > { %v5857_v55 = vmul.f32 %v5825_v2, %v5825_v2  ;;  %v5903_v50 = vsel %vm380_vm1, %v5855_v46, 0.0  ;;  %v5828_v42 = vsub.f32 %v10879_v1, %v10948_v29  ;;  %v5858_v24 = vmul.f32 %v5826_v53, %v5826_v53 }
 0x348   : > { %v5884_v39 = vadd.f32 %v5883_v41, %v5882_v40  ;;  %v5905_v52 = vsel %vm380_vm1, %v5856_v7, 0.0  ;;  %v5829_v27 = vsub.f32 %v10870_v0, %v10948_v29  ;;  %v5859_v57 = vmul.f32 %v5827_v19, %v5827_v19 }
 0x349   : > { %v5907_v48 = vsel %vm380_vm1, %v5857_v55, 0.0  ;;  %v5830_v12 = vsub.f32 %v10897_v17, %v10948_v29  ;;  %v5860_v37 = vmul.f32 %v5828_v42, %v5828_v42  ;;  %v5909_v23 = vsel %vm380_vm1, %v5858_v24, 0.0 }
 0x34a   : > { %v5886_v54 = vadd.f32 %v5885_v8, %v5884_v39  ;;  %v5831_v1 = vsub.f32 %v10888_v47, %v10948_v29  ;;  %v5861_v39 = vmul.f32 %v5829_v27, %v5829_v27  ;;  %v5911_v31 = vsel %vm380_vm1, %v5859_v57, 0.0 }
 0x34b   : > { %v5832_v0 = vsub.f32 %v10914_v56, %v10948_v29  ;;  %v5862_v8 = vmul.f32 %v5830_v12, %v5830_v12  ;;  %v5833_v17 = vsub.f32 %v10906_v28, %v10948_v29  ;;  %v5834_v47 = vsub.f32 %v10930_v25, %v10948_v29 }
 0x34c   : > { %v5888_v4 = vadd.f32 %v5887_v32, %v5886_v54  ;;  %v5913_v54 = vsel %vm380_vm1, %v5860_v37, 0.0  ;;  %v5863_v3 = vmul.f32 %v5831_v1, %v5831_v1  ;;  %v5915_v32 = vsel %vm380_vm1, %v5861_v39, 0.0 }
 0x34d   : > { %v5864_v58 = vmul.f32 %v5832_v0, %v5832_v0  ;;  %v5917_v59 = vsel %vm380_vm1, %v5862_v8, 0.0  ;;  %v5835_v56 = vsub.f32 %v10922_v61, %v10948_v29  ;;  %v5836_v28 = vsub.f32 %v10596_v43, %v10948_v29 }
 0x34e   : > { %v5890_v51 = vadd.f32 %v5889_v6, %v5888_v4  ;;  %v5919_v9 = vsel %vm380_vm1, %v5863_v3, 0.0  ;;  %v5837_v25 = vsub.f32 %v10589_v33, %v10948_v29 }
 0x34f   : > { %v5867_v63 = vmul.f32 %v5835_v56, %v5835_v56  ;;  %v5868_v61 = vmul.f32 %v5836_v28, %v5836_v28 }
 0x350   : > { %v5892_v35 = vadd.f32 %v5891_v60, %v5890_v51  ;;  %v5865_v51 = vmul.f32 %v5833_v17, %v5833_v17  ;;  %v5866_v60 = vmul.f32 %v5834_v47, %v5834_v47 }
 0x351   : > { %v5929_v26 = vsel %vm380_vm1, %v5868_v61, 0.0 }
 0x352   : > { %v5894_v21 = vadd.f32 %v5893_v62, %v5892_v35  ;;  %v5921_v35 = vsel %vm380_vm1, %v5864_v58, 0.0  ;;  %v5923_v62 = vsel %vm380_vm1, %v5865_v51, 0.0  ;;  %v5925_v15 = vsel %vm380_vm1, %v5866_v60, 0.0 }
 0x354   : > { %v5896_v5 = vadd.f32 %v5895_v38, %v5894_v21  ;;  %v5869_v38 = vmul.f32 %v5837_v25, %v5837_v25 }
 0x356   : > { %v5898_v18 = vadd.f32 %v5897_v22, %v5896_v5  ;;  %v5927_v5 = vsel %vm380_vm1, %v5867_v63, 0.0  ;;  %v5931_v22 = vsel %vm380_vm1, %v5869_v38, 0.0 }
 0x358   : > { %v5900_v13 = vadd.f32 %v5899_v49, %v5898_v18 }
 0x35a   : > { %v5902_v11 = vadd.f32 %v5901_v36, %v5900_v13 }
 0x35c   : > { %v5904_v16 = vadd.f32 %v5903_v50, %v5902_v11 }
 0x35e   : > { %v5906_v30 = vadd.f32 %v5905_v52, %v5904_v16 }
 0x360   : > { %v5908_v40 = vadd.f32 %v5907_v48, %v5906_v30 }
 0x362   : > { %v5910_v41 = vadd.f32 %v5909_v23, %v5908_v40 }
 0x364   : > { %v5912_v34 = vadd.f32 %v5911_v31, %v5910_v41 }
 0x366   : > { %v5914_v44 = vadd.f32 %v5913_v54, %v5912_v34 }
 0x368   : > { %v5916_v4 = vadd.f32 %v5915_v32, %v5914_v44 }
 0x36a   : > { %v5918_v6 = vadd.f32 %v5917_v59, %v5916_v4 }
 0x36c   : > { %v5920_v10 = vadd.f32 %v5919_v9, %v5918_v6 }
 0x36e   : > { %v5922_v14 = vadd.f32 %v5921_v35, %v5920_v10 }
 0x370   : > { %v5924_v21 = vadd.f32 %v5923_v62, %v5922_v14 }
 0x372   : > { %v5926_v45 = vadd.f32 %v5925_v15, %v5924_v21 }
 0x374   : > { %v5928_v43 = vadd.f32 %v5927_v5, %v5926_v45 }
 0x376   : > { %v5930_v20 = vadd.f32 %v5929_v26, %v5928_v43 }
 0x378   : > { %v5932_v18 = vadd.f32 %v5931_v22, %v5930_v20 }
 0x37a   : > { %v5933_v33 = vrot.slane %v5932_v18, 4 }
 0x37c   : > { %v5934_v29 = vadd.f32 %v5933_v33, %v5932_v18 }
 0x37e   : > { %v5935_v2 = vrot.slane %v5934_v29, 2 }
 0x380   : > { %v5936_v46 = vadd.f32 %v5935_v2, %v5934_v29 }
 0x382   : > { %v5937_v49 = vrot.slane %v5936_v46, 1 }
 0x384   : > { %v5938_v13 = vadd.f32 %v5937_v49, %v5936_v46 }
 0x386   : > { %5941 = vst.msk [vmem:[%s315_s19] sm:$0x1] %vm5939_vm3, %v5938_v13 }
 0x387 PF: > { %s18_s24 = sadd.s32 1, %s8387_s24  }
 0x388   : > { %p15_p4 = scmp.ge.s32.totalorder %s18_s24, 4  }
 0x38a   :  { %17 = sbr.rel (!%p15_p4) target bundleno = 1 (0x1), region = 115 }

</bundles_post_ra>
